<compile_context>
chip_gen: v5e
topology: v5e:2x2
jax: 0.10.0
libtpu: 0.0.40
codegen_flags: <defaults>
</compile_context>

<pallas_src>
import functools

import jax
import jax.numpy as jnp
from jax import lax
from jax.experimental import pallas as pl
from jax.experimental.pallas import tpu as pltpu

BN_EPS = 1e-5
NEG_SLOPE = 0.1


def _round_up(x, m):
    return (x + m - 1) // m * m


def _pick_tile_oh(oh, ow, max_sp):
    """Largest divisor of OH whose spatial tile (tile_oh * OW) stays <= max_sp."""
    t = max(1, min(oh, max(1, max_sp // max(ow, 1))))
    while oh % t:
        t -= 1
    return t


def _conv_tile(x_ref, w_ref, tile_idx, *, kh_sz, kw_sz, stride, tile_oh, ow,
               cin_p, cp):
    """(tile_oh*OW, Cp) f32 conv accumulator for one spatial tile.

    x_ref: (Hp, Wp, Cin_p) bf16 padded NHWC image, resident in VMEM per batch elem.
    w_ref: (KH*KW, Cin_p, Cp) bf16 conv weights, resident across the whole grid.
    Taps are built from in-VMEM shifted slices, so the KH*KW-times-duplicated
    im2col array never exists in HBM.
    """
    row0 = tile_idx * (tile_oh * stride)
    acc = jnp.zeros((tile_oh * ow, cp), jnp.float32)
    for kh in range(kh_sz):
        for kw in range(kw_sz):
            if stride == 1:
                tap = x_ref[pl.ds(row0 + kh, tile_oh), pl.ds(kw, ow), :]
            else:
                # stride > 1: strided window reads on the ref (not traced for the demo).
                tap = x_ref[pl.ds(row0 + kh, tile_oh, stride),
                            pl.ds(kw, ow, stride), :]
            tap2 = tap.reshape(tile_oh * ow, cin_p)
            acc = acc + jnp.dot(tap2, w_ref[kh * kw_sz + kw],
                                preferred_element_type=jnp.float32)
    return acc


def conv_stats_kernel(x_ref, w_ref, stats_ref, *, kh_sz, kw_sz, stride, tile_oh,
                      ow, cin_p, cp):
    # Pass 1: per-tile partial BN statistics only (no conv output written to HBM,
    # no resident accumulator -> fully parallel grid, pairwise-summed in JAX after).
    acc = _conv_tile(x_ref, w_ref, pl.program_id(1), kh_sz=kh_sz, kw_sz=kw_sz,
                     stride=stride, tile_oh=tile_oh, ow=ow, cin_p=cin_p, cp=cp)
    s1 = jnp.sum(acc, axis=0, keepdims=True)
    s2 = jnp.sum(acc * acc, axis=0, keepdims=True)
    stats_ref[...] = jnp.concatenate([s1, s2], axis=0)


def conv_bn_act_kernel(x_ref, w_ref, scale_ref, shift_ref, o_ref, *, kh_sz, kw_sz,
                       stride, tile_oh, ow, cin_p, cp, cout):
    # Pass 2: recompute the conv tile (cheaper than an f32 conv HBM roundtrip when
    # mem-bound), apply folded BN + LeakyReLU, and store the tile channel-major so
    # no separate NHWC -> NCHW transpose pass over the output is needed.
    acc = _conv_tile(x_ref, w_ref, pl.program_id(1), kh_sz=kh_sz, kw_sz=kw_sz,
                     stride=stride, tile_oh=tile_oh, ow=ow, cin_p=cin_p, cp=cp)
    acc_t = jnp.transpose(acc)                       # (Cp, tile_sp), XLU transpose
    y = acc_t[:cout, :] * scale_ref[...] + shift_ref[...]
    o_ref[...] = jnp.where(y > 0, y, NEG_SLOPE * y).astype(o_ref.dtype)


@functools.partial(jax.jit,
                   static_argnames=("kernel_size", "stride", "padding", "max_tile_sp"))
def conv_block(x_nchw, weight_oihw, gamma, beta, *,
               kernel_size, stride, padding, max_tile_sp=1024):
    """Fused Conv2d(no bias) + BatchNorm2d(training batch stats) + LeakyReLU(0.1).

    x_nchw:      (N, Cin, H, W)      float32
    weight_oihw: (Cout, Cin, KH, KW) float32 (PyTorch conv weight layout)
    gamma, beta: (Cout,)             float32
    returns      (N, Cout, OH, OW)   float32
    """
    N, Cin, H, W = x_nchw.shape
    Cout = weight_oihw.shape[0]
    KH = KW = kernel_size
    OH = (H + 2 * padding - KH) // stride + 1
    OW = (W + 2 * padding - KW) // stride + 1
    M = N * OH * OW

    Cin_p = _round_up(Cin, 16)       # bf16 packs 16 sublanes -> clean MXU K operands
    Cp = _round_up(Cout, 128)        # pad only the weight RHS lanes (VMEM, not HBM)
    tile_oh = _pick_tile_oh(OH, OW, max_tile_sp)   # divides OH -> exact stats, no masks
    tile_sp = tile_oh * OW
    num_t = OH // tile_oh
    Hp = H + 2 * padding
    Wp = W + 2 * padding

    # --- glue: NCHW -> padded bf16 NHWC (one 1x-input-size copy; no im2col) ---
    # TODO(synk): in a full network keep activations NHWC end-to-end to skip this
    # transpose, and pack W*Cin into the lane dim for small-Cin layers (lane util).
    x = jnp.transpose(x_nchw, (0, 2, 3, 1)).astype(jnp.bfloat16)
    x = jnp.pad(x, ((0, 0), (padding, padding), (padding, padding), (0, Cin_p - Cin)))

    # conv weight (Cout,Cin,KH,KW) -> (KH*KW, Cin_p, Cp) bf16 (tiny, VMEM-resident)
    w = jnp.transpose(weight_oihw, (2, 3, 1, 0))
    w = jnp.pad(w, ((0, 0), (0, 0), (0, Cin_p - Cin), (0, Cp - Cout)))
    w = w.astype(jnp.bfloat16).reshape(KH * KW, Cin_p, Cp)

    kargs = dict(kh_sz=KH, kw_sz=KW, stride=stride, tile_oh=tile_oh, ow=OW,
                 cin_p=Cin_p, cp=Cp)
    cparams = pltpu.CompilerParams(
        dimension_semantics=("parallel", "parallel"),   # megacore shards both axes
        vmem_limit_bytes=48 << 20)                      # safe on v7x (64 MiB VMEM)

    # --- pass 1: per-tile partial BN statistics (tiny output; fully parallel) ---
    stats = pl.pallas_call(
        functools.partial(conv_stats_kernel, **kargs),
        out_shape=jax.ShapeDtypeStruct((N * num_t, 2, Cp), jnp.float32),
        grid=(N, num_t),
        in_specs=[
            pl.BlockSpec((None, Hp, Wp, Cin_p), lambda n, t: (n, 0, 0, 0)),
            pl.BlockSpec((KH * KW, Cin_p, Cp), lambda n, t: (0, 0, 0)),
        ],
        out_specs=pl.BlockSpec((None, 2, Cp), lambda n, t: (n * num_t + t, 0, 0)),
        compiler_params=cparams,
    )(x, w)

    # --- tiny BN fold in JAX (pairwise tile reduction -> better numerics) ---
    s = jnp.sum(stats, axis=0)                     # (2, Cp)
    inv_m = 1.0 / jnp.float32(M)
    mean = s[0, :Cout] * inv_m
    var = jnp.maximum(s[1, :Cout] * inv_m - mean * mean, 0.0)
    scale = gamma.astype(jnp.float32) * lax.rsqrt(var + BN_EPS)
    shift = beta.astype(jnp.float32) - mean * scale
    # TODO(synk): optionally fold scale/shift computation into pass 2 under
    # pl.when(first step) to drop this tiny XLA op between the two pallas_calls.

    # --- pass 2: recompute conv, folded BN + LeakyReLU, channel-major stores ---
    out = pl.pallas_call(
        functools.partial(conv_bn_act_kernel, cout=Cout, **kargs),
        out_shape=jax.ShapeDtypeStruct((N, Cout, OH * OW), jnp.float32),
        grid=(N, num_t),
        in_specs=[
            pl.BlockSpec((None, Hp, Wp, Cin_p), lambda n, t: (n, 0, 0, 0)),
            pl.BlockSpec((KH * KW, Cin_p, Cp), lambda n, t: (0, 0, 0)),
            pl.BlockSpec((Cout, 1), lambda n, t: (0, 0)),
            pl.BlockSpec((Cout, 1), lambda n, t: (0, 0)),
        ],
        out_specs=pl.BlockSpec((None, Cout, tile_sp), lambda n, t: (n, 0, t)),
        compiler_params=cparams,
    )(x, w, scale.reshape(Cout, 1), shift.reshape(Cout, 1))

    # NCHW output with a free reshape (no full-array transpose in HBM).
    return out.reshape(N, Cout, OH, OW)


def _reference(x_nchw, weight_oihw, gamma, beta, *, stride, padding,
               matmul_dtype=jnp.float32):
    """Pure-JAX reference. matmul_dtype=bfloat16 mirrors the kernel's MXU operands."""
    conv = lax.conv_general_dilated(
        x_nchw.astype(matmul_dtype), weight_oihw.astype(matmul_dtype),
        window_strides=(stride, stride),
        padding=((padding, padding), (padding, padding)),
        dimension_numbers=("NCHW", "OIHW", "NCHW"),
        preferred_element_type=jnp.float32,
    )
    mean = jnp.mean(conv, axis=(0, 2, 3), keepdims=True)
    var = jnp.mean((conv - mean) ** 2, axis=(0, 2, 3), keepdims=True)
    xhat = (conv - mean) * lax.rsqrt(var + BN_EPS)
    y = xhat * gamma.reshape(1, -1, 1, 1) + beta.reshape(1, -1, 1, 1)
    return jnp.where(y > 0, y, NEG_SLOPE * y)


if __name__ == "__main__":
    # ConvBlock(in_channels=4, out_channels=16, kernel_size=3, stride=1, padding=1)
    N, Cin, H, W = 2, 4, 16, 16
    Cout, KSZ, STRIDE, PAD = 16, 3, 1, 1

    key = jax.random.PRNGKey(0)
    kx, kw = jax.random.split(key)
    x = jax.random.normal(kx, (N, Cin, H, W), dtype=jnp.float32)
    weight = 0.1 * jax.random.normal(kw, (Cout, Cin, KSZ, KSZ), dtype=jnp.float32)
    gamma = jnp.ones((Cout,), dtype=jnp.float32)   # torch BatchNorm2d defaults
    beta = jnp.zeros((Cout,), dtype=jnp.float32)

    out = conv_block(x, weight, gamma, beta,
                     kernel_size=KSZ, stride=STRIDE, padding=PAD)
    out = jax.block_until_ready(out)
    assert out.shape == (N, Cout, H, W), out.shape

    # Tight check vs. a reference fed the same bf16 operands (f32 accumulation).
    ref_bf16 = _reference(x, weight, gamma, beta, stride=STRIDE, padding=PAD,
                          matmul_dtype=jnp.bfloat16)
    err_bf16 = float(jnp.max(jnp.abs(out - ref_bf16)))
    assert jnp.allclose(out, ref_bf16, atol=2e-3, rtol=2e-3), err_bf16

    # Looser sanity check vs. the full-f32 reference (bf16 operand rounding only).
    ref_f32 = _reference(x, weight, gamma, beta, stride=STRIDE, padding=PAD)
    err_f32 = float(jnp.max(jnp.abs(out - ref_f32)))
    assert jnp.allclose(out, ref_f32, atol=5e-2, rtol=5e-2), err_f32

    print("KERNEL_OK")
</pallas_src>

<mosaic_0001>
module attributes {stable_mosaic.version = 11 : i64} {
  func.func @conv_stats_kernel(%arg0: i32, %arg1: i32, %arg2: memref<1x18x18x16xbf16, #tpu.memory_space<vmem>>, %arg3: memref<9x16x128xbf16, #tpu.memory_space<vmem>>, %arg4: memref<1x2x128xf32, #tpu.memory_space<vmem>>) attributes {dimension_semantics = [#tpu.dimension_semantics<parallel>, #tpu.dimension_semantics<parallel>], iteration_bounds = array<i64: 2, 1>, scalar_prefetch = 0 : i64, scratch_operands = 0 : i64, tpu.core_type = #tpu.core_type<tc>, window_params = [{transform_indices = @transform_0, window_bounds = array<i64: 1, 18, 18, 16>}, {pipeline_mode = #tpu.pipeline_mode<synchronous>, transform_indices = @transform_1, window_bounds = array<i64: 9, 16, 128>}, {transform_indices = @transform_2, window_bounds = array<i64: 1, 2, 128>}]} {
    %c16_i32 = arith.constant 16 : i32
    %0 = arith.muli %arg1, %c16_i32 : i32
    %cst = arith.constant 0.000000e+00 : f32
    %1 = vector.broadcast %cst : f32 to vector<256x128xf32>
    %c0_i32 = arith.constant 0 : i32
    %2 = arith.addi %0, %c0_i32 : i32
    %c0 = arith.constant 0 : index
    %3 = arith.index_cast %2 : i32 to index
    %c0_0 = arith.constant 0 : index
    %c0_1 = arith.constant 0 : index
    %4 = vector.load %arg2[%c0, %3, %c0_0, %c0_1] : memref<1x18x18x16xbf16, #tpu.memory_space<vmem>>, vector<1x16x16x16xbf16>
    %5 = vector.shape_cast %4 : vector<1x16x16x16xbf16> to vector<16x16x16xbf16>
    %6 = vector.shape_cast %5 : vector<16x16x16xbf16> to vector<256x16xbf16>
    %c0_2 = arith.constant 0 : index
    %c0_3 = arith.constant 0 : index
    %c0_4 = arith.constant 0 : index
    %7 = vector.load %arg3[%c0_2, %c0_3, %c0_4] : memref<9x16x128xbf16, #tpu.memory_space<vmem>>, vector<1x16x128xbf16>
    %8 = vector.shape_cast %7 : vector<1x16x128xbf16> to vector<16x128xbf16>
    %cst_5 = arith.constant dense<0.000000e+00> : vector<256x128xf32>
    %9 = tpu.matmul %6, %8, %cst_5 {dimension_numbers = #tpu.dot_dimension_numbers<[1], [0], [0], [1], [0, 0, 1, 1], [], []>} : vector<256x16xbf16>, vector<16x128xbf16>, vector<256x128xf32> -> vector<256x128xf32>
    %10 = arith.addf %1, %9 : vector<256x128xf32>
    %c0_i32_6 = arith.constant 0 : i32
    %11 = arith.addi %0, %c0_i32_6 : i32
    %c0_7 = arith.constant 0 : index
    %12 = arith.index_cast %11 : i32 to index
    %c1 = arith.constant 1 : index
    %c0_8 = arith.constant 0 : index
    %13 = vector.load %arg2[%c0_7, %12, %c1, %c0_8] : memref<1x18x18x16xbf16, #tpu.memory_space<vmem>>, vector<1x16x16x16xbf16>
    %14 = vector.shape_cast %13 : vector<1x16x16x16xbf16> to vector<16x16x16xbf16>
    %15 = vector.shape_cast %14 : vector<16x16x16xbf16> to vector<256x16xbf16>
    %c1_9 = arith.constant 1 : index
    %c0_10 = arith.constant 0 : index
    %c0_11 = arith.constant 0 : index
    %16 = vector.load %arg3[%c1_9, %c0_10, %c0_11] : memref<9x16x128xbf16, #tpu.memory_space<vmem>>, vector<1x16x128xbf16>
    %17 = vector.shape_cast %16 : vector<1x16x128xbf16> to vector<16x128xbf16>
    %cst_12 = arith.constant dense<0.000000e+00> : vector<256x128xf32>
    %18 = tpu.matmul %15, %17, %cst_12 {dimension_numbers = #tpu.dot_dimension_numbers<[1], [0], [0], [1], [0, 0, 1, 1], [], []>} : vector<256x16xbf16>, vector<16x128xbf16>, vector<256x128xf32> -> vector<256x128xf32>
    %19 = arith.addf %10, %18 : vector<256x128xf32>
    %c0_i32_13 = arith.constant 0 : i32
    %20 = arith.addi %0, %c0_i32_13 : i32
    %c0_14 = arith.constant 0 : index
    %21 = arith.index_cast %20 : i32 to index
    %c2 = arith.constant 2 : index
    %c0_15 = arith.constant 0 : index
    %22 = vector.load %arg2[%c0_14, %21, %c2, %c0_15] : memref<1x18x18x16xbf16, #tpu.memory_space<vmem>>, vector<1x16x16x16xbf16>
    %23 = vector.shape_cast %22 : vector<1x16x16x16xbf16> to vector<16x16x16xbf16>
    %24 = vector.shape_cast %23 : vector<16x16x16xbf16> to vector<256x16xbf16>
    %c2_16 = arith.constant 2 : index
    %c0_17 = arith.constant 0 : index
    %c0_18 = arith.constant 0 : index
    %25 = vector.load %arg3[%c2_16, %c0_17, %c0_18] : memref<9x16x128xbf16, #tpu.memory_space<vmem>>, vector<1x16x128xbf16>
    %26 = vector.shape_cast %25 : vector<1x16x128xbf16> to vector<16x128xbf16>
    %cst_19 = arith.constant dense<0.000000e+00> : vector<256x128xf32>
    %27 = tpu.matmul %24, %26, %cst_19 {dimension_numbers = #tpu.dot_dimension_numbers<[1], [0], [0], [1], [0, 0, 1, 1], [], []>} : vector<256x16xbf16>, vector<16x128xbf16>, vector<256x128xf32> -> vector<256x128xf32>
    %28 = arith.addf %19, %27 : vector<256x128xf32>
    %c1_i32 = arith.constant 1 : i32
    %29 = arith.addi %0, %c1_i32 : i32
    %c0_20 = arith.constant 0 : index
    %30 = arith.index_cast %29 : i32 to index
    %c0_21 = arith.constant 0 : index
    %c0_22 = arith.constant 0 : index
    %31 = vector.load %arg2[%c0_20, %30, %c0_21, %c0_22] : memref<1x18x18x16xbf16, #tpu.memory_space<vmem>>, vector<1x16x16x16xbf16>
    %32 = vector.shape_cast %31 : vector<1x16x16x16xbf16> to vector<16x16x16xbf16>
    %33 = vector.shape_cast %32 : vector<16x16x16xbf16> to vector<256x16xbf16>
    %c3 = arith.constant 3 : index
    %c0_23 = arith.constant 0 : index
    %c0_24 = arith.constant 0 : index
    %34 = vector.load %arg3[%c3, %c0_23, %c0_24] : memref<9x16x128xbf16, #tpu.memory_space<vmem>>, vector<1x16x128xbf16>
    %35 = vector.shape_cast %34 : vector<1x16x128xbf16> to vector<16x128xbf16>
    %cst_25 = arith.constant dense<0.000000e+00> : vector<256x128xf32>
    %36 = tpu.matmul %33, %35, %cst_25 {dimension_numbers = #tpu.dot_dimension_numbers<[1], [0], [0], [1], [0, 0, 1, 1], [], []>} : vector<256x16xbf16>, vector<16x128xbf16>, vector<256x128xf32> -> vector<256x128xf32>
    %37 = arith.addf %28, %36 : vector<256x128xf32>
    %c1_i32_26 = arith.constant 1 : i32
    %38 = arith.addi %0, %c1_i32_26 : i32
    %c0_27 = arith.constant 0 : index
    %39 = arith.index_cast %38 : i32 to index
    %c1_28 = arith.constant 1 : index
    %c0_29 = arith.constant 0 : index
    %40 = vector.load %arg2[%c0_27, %39, %c1_28, %c0_29] : memref<1x18x18x16xbf16, #tpu.memory_space<vmem>>, vector<1x16x16x16xbf16>
    %41 = vector.shape_cast %40 : vector<1x16x16x16xbf16> to vector<16x16x16xbf16>
    %42 = vector.shape_cast %41 : vector<16x16x16xbf16> to vector<256x16xbf16>
    %c4 = arith.constant 4 : index
    %c0_30 = arith.constant 0 : index
    %c0_31 = arith.constant 0 : index
    %43 = vector.load %arg3[%c4, %c0_30, %c0_31] : memref<9x16x128xbf16, #tpu.memory_space<vmem>>, vector<1x16x128xbf16>
    %44 = vector.shape_cast %43 : vector<1x16x128xbf16> to vector<16x128xbf16>
    %cst_32 = arith.constant dense<0.000000e+00> : vector<256x128xf32>
    %45 = tpu.matmul %42, %44, %cst_32 {dimension_numbers = #tpu.dot_dimension_numbers<[1], [0], [0], [1], [0, 0, 1, 1], [], []>} : vector<256x16xbf16>, vector<16x128xbf16>, vector<256x128xf32> -> vector<256x128xf32>
    %46 = arith.addf %37, %45 : vector<256x128xf32>
    %c1_i32_33 = arith.constant 1 : i32
    %47 = arith.addi %0, %c1_i32_33 : i32
    %c0_34 = arith.constant 0 : index
    %48 = arith.index_cast %47 : i32 to index
    %c2_35 = arith.constant 2 : index
    %c0_36 = arith.constant 0 : index
    %49 = vector.load %arg2[%c0_34, %48, %c2_35, %c0_36] : memref<1x18x18x16xbf16, #tpu.memory_space<vmem>>, vector<1x16x16x16xbf16>
    %50 = vector.shape_cast %49 : vector<1x16x16x16xbf16> to vector<16x16x16xbf16>
    %51 = vector.shape_cast %50 : vector<16x16x16xbf16> to vector<256x16xbf16>
    %c5 = arith.constant 5 : index
    %c0_37 = arith.constant 0 : index
    %c0_38 = arith.constant 0 : index
    %52 = vector.load %arg3[%c5, %c0_37, %c0_38] : memref<9x16x128xbf16, #tpu.memory_space<vmem>>, vector<1x16x128xbf16>
    %53 = vector.shape_cast %52 : vector<1x16x128xbf16> to vector<16x128xbf16>
    %cst_39 = arith.constant dense<0.000000e+00> : vector<256x128xf32>
    %54 = tpu.matmul %51, %53, %cst_39 {dimension_numbers = #tpu.dot_dimension_numbers<[1], [0], [0], [1], [0, 0, 1, 1], [], []>} : vector<256x16xbf16>, vector<16x128xbf16>, vector<256x128xf32> -> vector<256x128xf32>
    %55 = arith.addf %46, %54 : vector<256x128xf32>
    %c2_i32 = arith.constant 2 : i32
    %56 = arith.addi %0, %c2_i32 : i32
    %c0_40 = arith.constant 0 : index
    %57 = arith.index_cast %56 : i32 to index
    %c0_41 = arith.constant 0 : index
    %c0_42 = arith.constant 0 : index
    %58 = vector.load %arg2[%c0_40, %57, %c0_41, %c0_42] : memref<1x18x18x16xbf16, #tpu.memory_space<vmem>>, vector<1x16x16x16xbf16>
    %59 = vector.shape_cast %58 : vector<1x16x16x16xbf16> to vector<16x16x16xbf16>
    %60 = vector.shape_cast %59 : vector<16x16x16xbf16> to vector<256x16xbf16>
    %c6 = arith.constant 6 : index
    %c0_43 = arith.constant 0 : index
    %c0_44 = arith.constant 0 : index
    %61 = vector.load %arg3[%c6, %c0_43, %c0_44] : memref<9x16x128xbf16, #tpu.memory_space<vmem>>, vector<1x16x128xbf16>
    %62 = vector.shape_cast %61 : vector<1x16x128xbf16> to vector<16x128xbf16>
    %cst_45 = arith.constant dense<0.000000e+00> : vector<256x128xf32>
    %63 = tpu.matmul %60, %62, %cst_45 {dimension_numbers = #tpu.dot_dimension_numbers<[1], [0], [0], [1], [0, 0, 1, 1], [], []>} : vector<256x16xbf16>, vector<16x128xbf16>, vector<256x128xf32> -> vector<256x128xf32>
    %64 = arith.addf %55, %63 : vector<256x128xf32>
    %c2_i32_46 = arith.constant 2 : i32
    %65 = arith.addi %0, %c2_i32_46 : i32
    %c0_47 = arith.constant 0 : index
    %66 = arith.index_cast %65 : i32 to index
    %c1_48 = arith.constant 1 : index
    %c0_49 = arith.constant 0 : index
    %67 = vector.load %arg2[%c0_47, %66, %c1_48, %c0_49] : memref<1x18x18x16xbf16, #tpu.memory_space<vmem>>, vector<1x16x16x16xbf16>
    %68 = vector.shape_cast %67 : vector<1x16x16x16xbf16> to vector<16x16x16xbf16>
    %69 = vector.shape_cast %68 : vector<16x16x16xbf16> to vector<256x16xbf16>
    %c7 = arith.constant 7 : index
    %c0_50 = arith.constant 0 : index
    %c0_51 = arith.constant 0 : index
    %70 = vector.load %arg3[%c7, %c0_50, %c0_51] : memref<9x16x128xbf16, #tpu.memory_space<vmem>>, vector<1x16x128xbf16>
    %71 = vector.shape_cast %70 : vector<1x16x128xbf16> to vector<16x128xbf16>
    %cst_52 = arith.constant dense<0.000000e+00> : vector<256x128xf32>
    %72 = tpu.matmul %69, %71, %cst_52 {dimension_numbers = #tpu.dot_dimension_numbers<[1], [0], [0], [1], [0, 0, 1, 1], [], []>} : vector<256x16xbf16>, vector<16x128xbf16>, vector<256x128xf32> -> vector<256x128xf32>
    %73 = arith.addf %64, %72 : vector<256x128xf32>
    %c2_i32_53 = arith.constant 2 : i32
    %74 = arith.addi %0, %c2_i32_53 : i32
    %c0_54 = arith.constant 0 : index
    %75 = arith.index_cast %74 : i32 to index
    %c2_55 = arith.constant 2 : index
    %c0_56 = arith.constant 0 : index
    %76 = vector.load %arg2[%c0_54, %75, %c2_55, %c0_56] : memref<1x18x18x16xbf16, #tpu.memory_space<vmem>>, vector<1x16x16x16xbf16>
    %77 = vector.shape_cast %76 : vector<1x16x16x16xbf16> to vector<16x16x16xbf16>
    %78 = vector.shape_cast %77 : vector<16x16x16xbf16> to vector<256x16xbf16>
    %c8 = arith.constant 8 : index
    %c0_57 = arith.constant 0 : index
    %c0_58 = arith.constant 0 : index
    %79 = vector.load %arg3[%c8, %c0_57, %c0_58] : memref<9x16x128xbf16, #tpu.memory_space<vmem>>, vector<1x16x128xbf16>
    %80 = vector.shape_cast %79 : vector<1x16x128xbf16> to vector<16x128xbf16>
    %cst_59 = arith.constant dense<0.000000e+00> : vector<256x128xf32>
    %81 = tpu.matmul %78, %80, %cst_59 {dimension_numbers = #tpu.dot_dimension_numbers<[1], [0], [0], [1], [0, 0, 1, 1], [], []>} : vector<256x16xbf16>, vector<16x128xbf16>, vector<256x128xf32> -> vector<256x128xf32>
    %82 = arith.addf %73, %81 : vector<256x128xf32>
    %cst_60 = arith.constant dense<0.000000e+00> : vector<128xf32>
    %83 = vector.multi_reduction <add>, %82, %cst_60 [0] : vector<256x128xf32> to vector<128xf32>
    %84 = vector.shape_cast %83 : vector<128xf32> to vector<1x128xf32>
    %85 = arith.mulf %82, %82 : vector<256x128xf32>
    %cst_61 = arith.constant dense<0.000000e+00> : vector<128xf32>
    %86 = vector.multi_reduction <add>, %85, %cst_61 [0] : vector<256x128xf32> to vector<128xf32>
    %87 = vector.shape_cast %86 : vector<128xf32> to vector<1x128xf32>
    %88 = tpu.concatenate %84, %87 in 0 : vector<1x128xf32>, vector<1x128xf32> -> vector<2x128xf32>
    %c0_62 = arith.constant 0 : index
    %c0_63 = arith.constant 0 : index
    %c0_64 = arith.constant 0 : index
    %89 = vector.load %arg4[%c0_62, %c0_63, %c0_64] : memref<1x2x128xf32, #tpu.memory_space<vmem>>, vector<1x2x128xf32>
    %90 = vector.shape_cast %89 : vector<1x2x128xf32> to vector<2x128xf32>
    %91 = vector.shape_cast %88 : vector<2x128xf32> to vector<1x2x128xf32>
    tpu.vector_store %arg4[%c0_62, %c0_63, %c0_64], %91 {strides = array<i32>} : memref<1x2x128xf32, #tpu.memory_space<vmem>>, vector<1x2x128xf32>,
    return
  }
  func.func @transform_0(%arg0: i32, %arg1: i32) -> (i32, i32, i32, i32) {
    %c0_i32 = arith.constant 0 : i32
    %c0_i32_0 = arith.constant 0 : i32
    %c0_i32_1 = arith.constant 0 : i32
    %c0_i32_2 = arith.constant 0 : i32
    return %arg0, %c0_i32, %c0_i32_0, %c0_i32_1 : i32, i32, i32, i32
  }
  func.func @transform_1(%arg0: i32, %arg1: i32) -> (i32, i32, i32) {
    %c0_i32 = arith.constant 0 : i32
    %c0_i32_0 = arith.constant 0 : i32
    %c0_i32_1 = arith.constant 0 : i32
    %c0_i32_2 = arith.constant 0 : i32
    return %c0_i32, %c0_i32_0, %c0_i32_1 : i32, i32, i32
  }
  func.func @transform_2(%arg0: i32, %arg1: i32) -> (i32, i32, i32) {
    %c1_i32 = arith.constant 1 : i32
    %0 = arith.muli %arg0, %c1_i32 : i32
    %1 = arith.addi %0, %arg1 : i32
    %c0_i32 = arith.constant 0 : i32
    %c0_i32_0 = arith.constant 0 : i32
    %c0_i32_1 = arith.constant 0 : i32
    return %1, %c0_i32, %c0_i32_0 : i32, i32, i32
  }
}

module attributes {stable_mosaic.version = 11 : i64} {
  func.func @conv_bn_act_kernel(%arg0: i32, %arg1: i32, %arg2: memref<1x18x18x16xbf16, #tpu.memory_space<vmem>>, %arg3: memref<9x16x128xbf16, #tpu.memory_space<vmem>>, %arg4: memref<16x1xf32, #tpu.memory_space<vmem>>, %arg5: memref<16x1xf32, #tpu.memory_space<vmem>>, %arg6: memref<1x16x256xf32, #tpu.memory_space<vmem>>) attributes {dimension_semantics = [#tpu.dimension_semantics<parallel>, #tpu.dimension_semantics<parallel>], iteration_bounds = array<i64: 2, 1>, scalar_prefetch = 0 : i64, scratch_operands = 0 : i64, tpu.core_type = #tpu.core_type<tc>, window_params = [{transform_indices = @transform_0, window_bounds = array<i64: 1, 18, 18, 16>}, {pipeline_mode = #tpu.pipeline_mode<synchronous>, transform_indices = @transform_1, window_bounds = array<i64: 9, 16, 128>}, {pipeline_mode = #tpu.pipeline_mode<synchronous>, transform_indices = @transform_2, window_bounds = array<i64: 16, 1>}, {pipeline_mode = #tpu.pipeline_mode<synchronous>, transform_indices = @transform_3, window_bounds = array<i64: 16, 1>}, {transform_indices = @transform_4, window_bounds = array<i64: 1, 16, 256>}]} {
    %c16_i32 = arith.constant 16 : i32
    %0 = arith.muli %arg1, %c16_i32 : i32
    %cst = arith.constant 0.000000e+00 : f32
    %1 = vector.broadcast %cst : f32 to vector<256x128xf32>
    %c0_i32 = arith.constant 0 : i32
    %2 = arith.addi %0, %c0_i32 : i32
    %c0 = arith.constant 0 : index
    %3 = arith.index_cast %2 : i32 to index
    %c0_0 = arith.constant 0 : index
    %c0_1 = arith.constant 0 : index
    %4 = vector.load %arg2[%c0, %3, %c0_0, %c0_1] : memref<1x18x18x16xbf16, #tpu.memory_space<vmem>>, vector<1x16x16x16xbf16>
    %5 = vector.shape_cast %4 : vector<1x16x16x16xbf16> to vector<16x16x16xbf16>
    %6 = vector.shape_cast %5 : vector<16x16x16xbf16> to vector<256x16xbf16>
    %c0_2 = arith.constant 0 : index
    %c0_3 = arith.constant 0 : index
    %c0_4 = arith.constant 0 : index
    %7 = vector.load %arg3[%c0_2, %c0_3, %c0_4] : memref<9x16x128xbf16, #tpu.memory_space<vmem>>, vector<1x16x128xbf16>
    %8 = vector.shape_cast %7 : vector<1x16x128xbf16> to vector<16x128xbf16>
    %cst_5 = arith.constant dense<0.000000e+00> : vector<256x128xf32>
    %9 = tpu.matmul %6, %8, %cst_5 {dimension_numbers = #tpu.dot_dimension_numbers<[1], [0], [0], [1], [0, 0, 1, 1], [], []>} : vector<256x16xbf16>, vector<16x128xbf16>, vector<256x128xf32> -> vector<256x128xf32>
    %10 = arith.addf %1, %9 : vector<256x128xf32>
    %c0_i32_6 = arith.constant 0 : i32
    %11 = arith.addi %0, %c0_i32_6 : i32
    %c0_7 = arith.constant 0 : index
    %12 = arith.index_cast %11 : i32 to index
    %c1 = arith.constant 1 : index
    %c0_8 = arith.constant 0 : index
    %13 = vector.load %arg2[%c0_7, %12, %c1, %c0_8] : memref<1x18x18x16xbf16, #tpu.memory_space<vmem>>, vector<1x16x16x16xbf16>
    %14 = vector.shape_cast %13 : vector<1x16x16x16xbf16> to vector<16x16x16xbf16>
    %15 = vector.shape_cast %14 : vector<16x16x16xbf16> to vector<256x16xbf16>
    %c1_9 = arith.constant 1 : index
    %c0_10 = arith.constant 0 : index
    %c0_11 = arith.constant 0 : index
    %16 = vector.load %arg3[%c1_9, %c0_10, %c0_11] : memref<9x16x128xbf16, #tpu.memory_space<vmem>>, vector<1x16x128xbf16>
    %17 = vector.shape_cast %16 : vector<1x16x128xbf16> to vector<16x128xbf16>
    %cst_12 = arith.constant dense<0.000000e+00> : vector<256x128xf32>
    %18 = tpu.matmul %15, %17, %cst_12 {dimension_numbers = #tpu.dot_dimension_numbers<[1], [0], [0], [1], [0, 0, 1, 1], [], []>} : vector<256x16xbf16>, vector<16x128xbf16>, vector<256x128xf32> -> vector<256x128xf32>
    %19 = arith.addf %10, %18 : vector<256x128xf32>
    %c0_i32_13 = arith.constant 0 : i32
    %20 = arith.addi %0, %c0_i32_13 : i32
    %c0_14 = arith.constant 0 : index
    %21 = arith.index_cast %20 : i32 to index
    %c2 = arith.constant 2 : index
    %c0_15 = arith.constant 0 : index
    %22 = vector.load %arg2[%c0_14, %21, %c2, %c0_15] : memref<1x18x18x16xbf16, #tpu.memory_space<vmem>>, vector<1x16x16x16xbf16>
    %23 = vector.shape_cast %22 : vector<1x16x16x16xbf16> to vector<16x16x16xbf16>
    %24 = vector.shape_cast %23 : vector<16x16x16xbf16> to vector<256x16xbf16>
    %c2_16 = arith.constant 2 : index
    %c0_17 = arith.constant 0 : index
    %c0_18 = arith.constant 0 : index
    %25 = vector.load %arg3[%c2_16, %c0_17, %c0_18] : memref<9x16x128xbf16, #tpu.memory_space<vmem>>, vector<1x16x128xbf16>
    %26 = vector.shape_cast %25 : vector<1x16x128xbf16> to vector<16x128xbf16>
    %cst_19 = arith.constant dense<0.000000e+00> : vector<256x128xf32>
    %27 = tpu.matmul %24, %26, %cst_19 {dimension_numbers = #tpu.dot_dimension_numbers<[1], [0], [0], [1], [0, 0, 1, 1], [], []>} : vector<256x16xbf16>, vector<16x128xbf16>, vector<256x128xf32> -> vector<256x128xf32>
    %28 = arith.addf %19, %27 : vector<256x128xf32>
    %c1_i32 = arith.constant 1 : i32
    %29 = arith.addi %0, %c1_i32 : i32
    %c0_20 = arith.constant 0 : index
    %30 = arith.index_cast %29 : i32 to index
    %c0_21 = arith.constant 0 : index
    %c0_22 = arith.constant 0 : index
    %31 = vector.load %arg2[%c0_20, %30, %c0_21, %c0_22] : memref<1x18x18x16xbf16, #tpu.memory_space<vmem>>, vector<1x16x16x16xbf16>
    %32 = vector.shape_cast %31 : vector<1x16x16x16xbf16> to vector<16x16x16xbf16>
    %33 = vector.shape_cast %32 : vector<16x16x16xbf16> to vector<256x16xbf16>
    %c3 = arith.constant 3 : index
    %c0_23 = arith.constant 0 : index
    %c0_24 = arith.constant 0 : index
    %34 = vector.load %arg3[%c3, %c0_23, %c0_24] : memref<9x16x128xbf16, #tpu.memory_space<vmem>>, vector<1x16x128xbf16>
    %35 = vector.shape_cast %34 : vector<1x16x128xbf16> to vector<16x128xbf16>
    %cst_25 = arith.constant dense<0.000000e+00> : vector<256x128xf32>
    %36 = tpu.matmul %33, %35, %cst_25 {dimension_numbers = #tpu.dot_dimension_numbers<[1], [0], [0], [1], [0, 0, 1, 1], [], []>} : vector<256x16xbf16>, vector<16x128xbf16>, vector<256x128xf32> -> vector<256x128xf32>
    %37 = arith.addf %28, %36 : vector<256x128xf32>
    %c1_i32_26 = arith.constant 1 : i32
    %38 = arith.addi %0, %c1_i32_26 : i32
    %c0_27 = arith.constant 0 : index
    %39 = arith.index_cast %38 : i32 to index
    %c1_28 = arith.constant 1 : index
    %c0_29 = arith.constant 0 : index
    %40 = vector.load %arg2[%c0_27, %39, %c1_28, %c0_29] : memref<1x18x18x16xbf16, #tpu.memory_space<vmem>>, vector<1x16x16x16xbf16>
    %41 = vector.shape_cast %40 : vector<1x16x16x16xbf16> to vector<16x16x16xbf16>
    %42 = vector.shape_cast %41 : vector<16x16x16xbf16> to vector<256x16xbf16>
    %c4 = arith.constant 4 : index
    %c0_30 = arith.constant 0 : index
    %c0_31 = arith.constant 0 : index
    %43 = vector.load %arg3[%c4, %c0_30, %c0_31] : memref<9x16x128xbf16, #tpu.memory_space<vmem>>, vector<1x16x128xbf16>
    %44 = vector.shape_cast %43 : vector<1x16x128xbf16> to vector<16x128xbf16>
    %cst_32 = arith.constant dense<0.000000e+00> : vector<256x128xf32>
    %45 = tpu.matmul %42, %44, %cst_32 {dimension_numbers = #tpu.dot_dimension_numbers<[1], [0], [0], [1], [0, 0, 1, 1], [], []>} : vector<256x16xbf16>, vector<16x128xbf16>, vector<256x128xf32> -> vector<256x128xf32>
    %46 = arith.addf %37, %45 : vector<256x128xf32>
    %c1_i32_33 = arith.constant 1 : i32
    %47 = arith.addi %0, %c1_i32_33 : i32
    %c0_34 = arith.constant 0 : index
    %48 = arith.index_cast %47 : i32 to index
    %c2_35 = arith.constant 2 : index
    %c0_36 = arith.constant 0 : index
    %49 = vector.load %arg2[%c0_34, %48, %c2_35, %c0_36] : memref<1x18x18x16xbf16, #tpu.memory_space<vmem>>, vector<1x16x16x16xbf16>
    %50 = vector.shape_cast %49 : vector<1x16x16x16xbf16> to vector<16x16x16xbf16>
    %51 = vector.shape_cast %50 : vector<16x16x16xbf16> to vector<256x16xbf16>
    %c5 = arith.constant 5 : index
    %c0_37 = arith.constant 0 : index
    %c0_38 = arith.constant 0 : index
    %52 = vector.load %arg3[%c5, %c0_37, %c0_38] : memref<9x16x128xbf16, #tpu.memory_space<vmem>>, vector<1x16x128xbf16>
    %53 = vector.shape_cast %52 : vector<1x16x128xbf16> to vector<16x128xbf16>
    %cst_39 = arith.constant dense<0.000000e+00> : vector<256x128xf32>
    %54 = tpu.matmul %51, %53, %cst_39 {dimension_numbers = #tpu.dot_dimension_numbers<[1], [0], [0], [1], [0, 0, 1, 1], [], []>} : vector<256x16xbf16>, vector<16x128xbf16>, vector<256x128xf32> -> vector<256x128xf32>
    %55 = arith.addf %46, %54 : vector<256x128xf32>
    %c2_i32 = arith.constant 2 : i32
    %56 = arith.addi %0, %c2_i32 : i32
    %c0_40 = arith.constant 0 : index
    %57 = arith.index_cast %56 : i32 to index
    %c0_41 = arith.constant 0 : index
    %c0_42 = arith.constant 0 : index
    %58 = vector.load %arg2[%c0_40, %57, %c0_41, %c0_42] : memref<1x18x18x16xbf16, #tpu.memory_space<vmem>>, vector<1x16x16x16xbf16>
    %59 = vector.shape_cast %58 : vector<1x16x16x16xbf16> to vector<16x16x16xbf16>
    %60 = vector.shape_cast %59 : vector<16x16x16xbf16> to vector<256x16xbf16>
    %c6 = arith.constant 6 : index
    %c0_43 = arith.constant 0 : index
    %c0_44 = arith.constant 0 : index
    %61 = vector.load %arg3[%c6, %c0_43, %c0_44] : memref<9x16x128xbf16, #tpu.memory_space<vmem>>, vector<1x16x128xbf16>
    %62 = vector.shape_cast %61 : vector<1x16x128xbf16> to vector<16x128xbf16>
    %cst_45 = arith.constant dense<0.000000e+00> : vector<256x128xf32>
    %63 = tpu.matmul %60, %62, %cst_45 {dimension_numbers = #tpu.dot_dimension_numbers<[1], [0], [0], [1], [0, 0, 1, 1], [], []>} : vector<256x16xbf16>, vector<16x128xbf16>, vector<256x128xf32> -> vector<256x128xf32>
    %64 = arith.addf %55, %63 : vector<256x128xf32>
    %c2_i32_46 = arith.constant 2 : i32
    %65 = arith.addi %0, %c2_i32_46 : i32
    %c0_47 = arith.constant 0 : index
    %66 = arith.index_cast %65 : i32 to index
    %c1_48 = arith.constant 1 : index
    %c0_49 = arith.constant 0 : index
    %67 = vector.load %arg2[%c0_47, %66, %c1_48, %c0_49] : memref<1x18x18x16xbf16, #tpu.memory_space<vmem>>, vector<1x16x16x16xbf16>
    %68 = vector.shape_cast %67 : vector<1x16x16x16xbf16> to vector<16x16x16xbf16>
    %69 = vector.shape_cast %68 : vector<16x16x16xbf16> to vector<256x16xbf16>
    %c7 = arith.constant 7 : index
    %c0_50 = arith.constant 0 : index
    %c0_51 = arith.constant 0 : index
    %70 = vector.load %arg3[%c7, %c0_50, %c0_51] : memref<9x16x128xbf16, #tpu.memory_space<vmem>>, vector<1x16x128xbf16>
    %71 = vector.shape_cast %70 : vector<1x16x128xbf16> to vector<16x128xbf16>
    %cst_52 = arith.constant dense<0.000000e+00> : vector<256x128xf32>
    %72 = tpu.matmul %69, %71, %cst_52 {dimension_numbers = #tpu.dot_dimension_numbers<[1], [0], [0], [1], [0, 0, 1, 1], [], []>} : vector<256x16xbf16>, vector<16x128xbf16>, vector<256x128xf32> -> vector<256x128xf32>
    %73 = arith.addf %64, %72 : vector<256x128xf32>
    %c2_i32_53 = arith.constant 2 : i32
    %74 = arith.addi %0, %c2_i32_53 : i32
    %c0_54 = arith.constant 0 : index
    %75 = arith.index_cast %74 : i32 to index
    %c2_55 = arith.constant 2 : index
    %c0_56 = arith.constant 0 : index
    %76 = vector.load %arg2[%c0_54, %75, %c2_55, %c0_56] : memref<1x18x18x16xbf16, #tpu.memory_space<vmem>>, vector<1x16x16x16xbf16>
    %77 = vector.shape_cast %76 : vector<1x16x16x16xbf16> to vector<16x16x16xbf16>
    %78 = vector.shape_cast %77 : vector<16x16x16xbf16> to vector<256x16xbf16>
    %c8 = arith.constant 8 : index
    %c0_57 = arith.constant 0 : index
    %c0_58 = arith.constant 0 : index
    %79 = vector.load %arg3[%c8, %c0_57, %c0_58] : memref<9x16x128xbf16, #tpu.memory_space<vmem>>, vector<1x16x128xbf16>
    %80 = vector.shape_cast %79 : vector<1x16x128xbf16> to vector<16x128xbf16>
    %cst_59 = arith.constant dense<0.000000e+00> : vector<256x128xf32>
    %81 = tpu.matmul %78, %80, %cst_59 {dimension_numbers = #tpu.dot_dimension_numbers<[1], [0], [0], [1], [0, 0, 1, 1], [], []>} : vector<256x16xbf16>, vector<16x128xbf16>, vector<256x128xf32> -> vector<256x128xf32>
    %82 = arith.addf %73, %81 : vector<256x128xf32>
    %83 = tpu.transpose %82, [1, 0] : vector<256x128xf32> -> vector<128x256xf32>
    %84 = vector.extract_strided_slice %83 {offsets = [0, 0], sizes = [16, 256], strides = [1, 1]} : vector<128x256xf32> to vector<16x256xf32>
    %c0_60 = arith.constant 0 : index
    %c0_61 = arith.constant 0 : index
    %85 = vector.load %arg4[%c0_60, %c0_61] : memref<16x1xf32, #tpu.memory_space<vmem>>, vector<16x1xf32>
    %86 = vector.broadcast %85 : vector<16x1xf32> to vector<16x256xf32>
    %87 = arith.mulf %84, %86 : vector<16x256xf32>
    %c0_62 = arith.constant 0 : index
    %c0_63 = arith.constant 0 : index
    %88 = vector.load %arg5[%c0_62, %c0_63] : memref<16x1xf32, #tpu.memory_space<vmem>>, vector<16x1xf32>
    %89 = vector.broadcast %88 : vector<16x1xf32> to vector<16x256xf32>
    %90 = arith.addf %87, %89 : vector<16x256xf32>
    %cst_64 = arith.constant 0.000000e+00 : f32
    %91 = vector.broadcast %cst_64 : f32 to vector<16x256xf32>
    %92 = arith.cmpf ogt, %90, %91 : vector<16x256xf32>
    %cst_65 = arith.constant 1.000000e-01 : f32
    %93 = vector.broadcast %cst_65 : f32 to vector<16x256xf32>
    %94 = arith.mulf %93, %90 : vector<16x256xf32>
    %95 = arith.select %92, %90, %94 : vector<16x256xi1>, vector<16x256xf32>
    %c0_66 = arith.constant 0 : index
    %c0_67 = arith.constant 0 : index
    %c0_68 = arith.constant 0 : index
    %96 = vector.load %arg6[%c0_66, %c0_67, %c0_68] : memref<1x16x256xf32, #tpu.memory_space<vmem>>, vector<1x16x256xf32>
    %97 = vector.shape_cast %96 : vector<1x16x256xf32> to vector<16x256xf32>
    %98 = vector.shape_cast %95 : vector<16x256xf32> to vector<1x16x256xf32>
    tpu.vector_store %arg6[%c0_66, %c0_67, %c0_68], %98 {strides = array<i32>} : memref<1x16x256xf32, #tpu.memory_space<vmem>>, vector<1x16x256xf32>,
    return
  }
  func.func @transform_0(%arg0: i32, %arg1: i32) -> (i32, i32, i32, i32) {
    %c0_i32 = arith.constant 0 : i32
    %c0_i32_0 = arith.constant 0 : i32
    %c0_i32_1 = arith.constant 0 : i32
    %c0_i32_2 = arith.constant 0 : i32
    return %arg0, %c0_i32, %c0_i32_0, %c0_i32_1 : i32, i32, i32, i32
  }
  func.func @transform_1(%arg0: i32, %arg1: i32) -> (i32, i32, i32) {
    %c0_i32 = arith.constant 0 : i32
    %c0_i32_0 = arith.constant 0 : i32
    %c0_i32_1 = arith.constant 0 : i32
    %c0_i32_2 = arith.constant 0 : i32
    return %c0_i32, %c0_i32_0, %c0_i32_1 : i32, i32, i32
  }
  func.func @transform_2(%arg0: i32, %arg1: i32) -> (i32, i32) {
    %c0_i32 = arith.constant 0 : i32
    %c0_i32_0 = arith.constant 0 : i32
    %c0_i32_1 = arith.constant 0 : i32
    return %c0_i32, %c0_i32_0 : i32, i32
  }
  func.func @transform_3(%arg0: i32, %arg1: i32) -> (i32, i32) {
    %c0_i32 = arith.constant 0 : i32
    %c0_i32_0 = arith.constant 0 : i32
    %c0_i32_1 = arith.constant 0 : i32
    return %c0_i32, %c0_i32_0 : i32, i32
  }
  func.func @transform_4(%arg0: i32, %arg1: i32) -> (i32, i32, i32) {
    %c0_i32 = arith.constant 0 : i32
    %c0_i32_0 = arith.constant 0 : i32
    return %arg0, %c0_i32, %arg1 : i32, i32, i32
  }
}

</mosaic_0001>

<bundles_post_ra>
// kernel: conv_block.3
= control target key start
LH: loop header
LB: loop body
LE: loop exit
PB: predicated region body
PF: predicated region fallthrough
CT: control target
= control target key end

     0   :  { %s5208_s15 = smov 0   ;;  %s5210_s16 = smov 0   ;;  %s6560_s0 = inlined_call_operand.vmem [shape: bf16[2,18,18,16], index: 0, kind: input, shape index: {}]   ;;  %s6561_s1 = inlined_call_operand.vmem [shape: bf16[9,16,128], index: 1, kind: input, shape index: {}]   ;;  %s6562_s2 = inlined_call_operand.vmem [shape: f32[16,1], index: 2, kind: input, shape index: {}]   ;;  %s6563_s3 = inlined_call_operand.vmem [shape: f32[16,1], index: 3, kind: input, shape index: {}]   ;;  %s6564_s4 = inlined_call_operand.vmem [shape: f32[2,16,256], index: 4, kind: output, shape index: {}]  }
   0x1   :  { %s5212_s17 = smov 0  }
   0x2 LB: > { %s26_s18 = sadd.s32 1, %s5176_s16  ;;  %p4385_p0 = scmp.ge.s32.totalorder %s5180_s17, 1  ;;  %s5180_s17 = sphi %s5212_s17, %s14_s17   ;;  %s5176_s16 = sphi %s5210_s16, %s6576_s16   ;;  %s5172_s15 = sphi %s5208_s15, %s6575_s15  }
   0x3   : > { %p28_p1 = scmp.ge.s32.totalorder %s26_s18, 2  ;;  %p176_p2 = scmp.lt.s32.totalorder %s5180_s17, 3 }
   0x5   : > { %s6578_s18 = smov (%p28_p1, %s26_s18), 0  ;;  %p177_p3 = pnand %p4385_p0, %p176_p2 }
   0x7   : > { %180 = sbr.rel (%p177_p3) target bundleno = 815 (0x32f), region = 36 }
   0xc   : > { %v5037_v0 = vld [vmem:[%s6561_s1 + $0x8] sm:$0xff]  ;;  %p206_p4 = scmp.lt.s32.totalorder %s5172_s15, 1  ;;  %v5038_v1 = vld [vmem:[%s6561_s1 + $0x10] sm:$0xff]  ;;  %v5055_v2 = vld [vmem:[%s6561_s1 + $0x18] sm:$0xff]  ;;  %vm276_vm0 = vsmask.f32 3328 }
   0xd   : > { %5077 = vmatpush.bf16.msra.mxu1 %v5037_v0  ;;  %5078 = vmatpush.bf16.msra.mxu2 %v5037_v0  ;;  %v5036_v3 = vld [vmem:[%s6561_s1] sm:$0xff]  ;;  %vm277_vm1 = vsmask.f32 7440  ;;  %vm720_vm3 = vcmask 130048   ;;  %vm1129_vm4 = vcmask 1042432   ;;  %vm1130_vm5 = vcmask 1046532  }
   0xe   : > { %s6580_s15 = smov (!%p206_p4, %s5172_s15), 1  ;;  %5079 = vmatpush.bf16.msra.mxu3 %v5037_v0  ;;  %776 = vmatpush.bf16.msra.mxu0 %v5037_v0  ;;  %v5056_v4 = vld [vmem:[%s6561_s1 + $0x20] sm:$0xff]  ;;  %vm5259_vm2 = vmor %vm276_vm0, %vm277_vm1 }
   0xf   : > { %s5080_s29 = smul.u32 216, %s6580_s15  ;;  %vm5442_vm6 = vmor %vm1129_vm4, %vm1130_vm5  ;;  %s5019_s27 = sshll.u32 %s6580_s15, 5 }
  0x10   : > { %s219_s30 = scalar_lea.vmem %s6564_s4, %s5019_s27 }
  0x11   : > { %1356 = vmatpush.bf16.msrb.mxu2 %v5038_v1  ;;  %999 = vmatpush.bf16.msrb.mxu1 %v5036_v3  ;;  %s5247_s6 = scalar_lea.vmem %s6560_s0, %s5080_s29 }
  0x12   : > { %1650 = vmatpush.bf16.msrb.mxu3 %v5055_v2  ;;  %2308 = vmatpush.bf16.msrb.mxu0 %v5056_v4  ;;  %v234_v5 = vld [vmem:[%s5247_s6 + $0x30] sm:$0xf]  ;;  %v235_v6 = vld [vmem:[%s5247_s6 + $0x34] sm:$0xf]  ;;  %v264_v7 = vld [vmem:[%s5247_s6 + $0x38] sm:$0x1] }
  0x13   : > { %v376_v8 = vshrl.u32 %v234_v5, 16  ;;  %v379_v9 = vshll.u32 %v234_v5, 16  ;;  %v385_v10 = vshll.u32 %v235_v6, 16  ;;  %v389_v11 = vshrl.u32 %v235_v6, 16  ;;  %v242_v12 = vld [vmem:[%s5247_s6 + $0x60] sm:$0xf] }
  0x14   : > { %v395_v13 = vshll.u32 %v264_v7, 16  ;;  %v243_v14 = vld [vmem:[%s5247_s6 + $0x64] sm:$0xf]  ;;  %v268_v15 = vld [vmem:[%s5247_s6 + $0x68] sm:$0x1]  ;;  %v472_v16 = vshrl.u32 %v242_v12, 16 }
  0x15   : > { %v378_v17 = vrot.slane %v376_v8, 4  ;;  %v381_v18 = vrot.slane %v379_v9, 5  ;;  %v387_v19 = vrot.slane %v385_v10, 5  ;;  %v391_v20 = vrot.slane %v389_v11, 4  ;;  %v250_v21 = vld [vmem:[%s5247_s6 + $0x90] sm:$0xf] }
  0x16   : > { %v397_v22 = vrot.slane %v395_v13, 5  ;;  %v474_v23 = vrot.slane %v472_v16, 4  ;;  %v475_v24 = vshll.u32 %v242_v12, 16  ;;  %v481_v25 = vshll.u32 %v243_v14, 16  ;;  %v251_v30 = vld [vmem:[%s5247_s6 + $0x94] sm:$0xf] }
  0x17   : > { %v382_v26 = vor.u32 %v381_v18, %v378_v17  ;;  %v392_v27 = vor.u32 %v391_v20, %v387_v19  ;;  %v485_v28 = vshrl.u32 %v243_v14, 16  ;;  %v491_v29 = vshll.u32 %v268_v15, 16  ;;  %v272_v40 = vld [vmem:[%s5247_s6 + $0x98] sm:$0x1]  ;;  %v226_v56 = vld [vmem:[%s5247_s6] sm:$0xf] }
  0x18   : > { %v477_v32 = vrot.slane %v475_v24, 5  ;;  %v483_v33 = vrot.slane %v481_v25, 5  ;;  %v568_v34 = vshrl.u32 %v250_v21, 16  ;;  %v571_v42 = vshll.u32 %v250_v21, 16  ;;  %v5272_v60 = vld [vmem:[%s5247_s6 + $0x4] sm:$0xf] }
  0x19   : > { %v383_v35 = vrot.slane %v382_v26, 4  ;;  %v393_v36 = vrot.slane %v392_v27, 4  ;;  %v487_v37 = vrot.slane %v485_v28, 4  ;;  %v493_v38 = vrot.slane %v491_v29, 5  ;;  %v5275_v61 = vld [vmem:[%s5247_s6 + $0x8] sm:$0x1] }
  0x1a   : > { %v478_v39 = vor.u32 %v477_v32, %v474_v23  ;;  %v570_v41 = vrot.slane %v568_v34, 4  ;;  %v577_v43 = vshll.u32 %v251_v30, 16  ;;  %v581_v47 = vshrl.u32 %v251_v30, 16  ;;  %v236_v14 = vld [vmem:[%s5247_s6 + $0x3c] sm:$0xf] }
  0x1b   : > { %v388_v44 = vsel %vm5259_vm2, %v383_v35, %v387_v19  ;;  %v398_v45 = vsel %vm5259_vm2, %v393_v36, %v397_v22  ;;  %v488_v46 = vor.u32 %v487_v37, %v483_v33  ;;  %v573_v51 = vrot.slane %v571_v42, 5  ;;  %v5287_v15 = vld [vmem:[%s5247_s6 + $0x40] sm:$0xf]  ;;  %v5292_v20 = vld [vmem:[%s5247_s6 + $0x44] sm:$0x1] }
  0x1c   : > { %v674_v48 = vunpack.c.l.b16 %v388_v44  ;;  %v675_v49 = vunpack.c.l.b16 %v398_v45  ;;  %v479_v50 = vrot.slane %v478_v39, 4  ;;  %v579_v53 = vrot.slane %v577_v43, 5  ;;  %v244_v28 = vld [vmem:[%s5247_s6 + $0x6c] sm:$0xf]  ;;  %v269_v42 = vld [vmem:[%s5247_s6 + $0x74] sm:$0x1] }
  0x1d   : > { %v489_v52 = vrot.slane %v488_v46, 4  ;;  %v583_v54 = vrot.slane %v581_v47, 4  ;;  %v587_v55 = vshll.u32 %v272_v40, 16  ;;  %v574_v59 = vor.u32 %v573_v51, %v570_v41 }
  0x1e   : > { %v702_v57 = vpack.c.b16 %v675_v49, %v674_v48  ;;  %v484_v58 = vsel %vm5259_vm2, %v479_v50, %v483_v33  ;;  %v280_v4 = vshrl.u32 %v226_v56, 16  ;;  %v283_v5 = vshll.u32 %v226_v56, 16  ;;  %v252_v56 = vld [vmem:[%s5247_s6 + $0x9c] sm:$0xf] }
  0x1f   : > { %v494_v62 = vsel %vm5259_vm2, %v489_v52, %v493_v38  ;;  %v682_v63 = vunpack.c.l.b16 %v484_v58  ;;  %v584_v0 = vor.u32 %v583_v54, %v579_v53  ;;  %v589_v1 = vrot.slane %v587_v55, 5  ;;  %v245_v38 = vld [vmem:[%s5247_s6 + $0x70] sm:$0xf] }
  0x20   : > { %4399 = vmatmul.msk.bf16.vlgmr.msra.gmra.mxu1 %vm720_vm3, %v702_v57  ;;  %v683_v2 = vunpack.c.l.b16 %v494_v62  ;;  %v575_v3 = vrot.slane %v574_v59, 4  ;;  %v289_v7 = vshll.u32 %v5272_v60, 16  ;;  %v293_v8 = vshrl.u32 %v5272_v60, 16  ;;  %v253_v62 = vld [vmem:[%s5247_s6 + $0xa0] sm:$0xf] }
  0x21   : > { %v585_v6 = vrot.slane %v584_v0, 4  ;;  %v299_v9 = vshll.u32 %v5275_v61, 16  ;;  %v282_v12 = vrot.slane %v280_v4, 4  ;;  %v285_v13 = vrot.slane %v283_v5, 5 }
  0x22   : > { %v706_v10 = vpack.c.b16 %v683_v2, %v682_v63  ;;  %v580_v11 = vsel %vm5259_vm2, %v575_v3, %v579_v53  ;;  %v291_v18 = vrot.slane %v289_v7, 5  ;;  %v295_v19 = vrot.slane %v293_v8, 4  ;;  %v273_v3 = vld [vmem:[%s5247_s6 + $0xa4] sm:$0x1] }
  0x23   : > { %v590_v16 = vsel %vm5259_vm2, %v585_v6, %v589_v1  ;;  %v690_v17 = vunpack.c.l.b16 %v580_v11  ;;  %v286_v22 = vor.u32 %v285_v13, %v282_v12  ;;  %v301_v23 = vrot.slane %v299_v9, 5 }
  0x24   : > { %4403 = vmatmul.msk.bf16.vlgmr.msra.gmra.mxu2 %vm720_vm3, %v706_v10  ;;  %v691_v21 = vunpack.c.l.b16 %v590_v16  ;;  %v296_v24 = vor.u32 %v295_v19, %v291_v18  ;;  %v400_v25 = vshrl.u32 %v236_v14, 16  ;;  %v403_v26 = vshll.u32 %v236_v14, 16 }
  0x25   : > { %v409_v27 = vshll.u32 %v5287_v15, 16  ;;  %v287_v30 = vrot.slane %v286_v22, 4  ;;  %v413_v32 = vshrl.u32 %v5287_v15, 16  ;;  %v419_v33 = vshll.u32 %v5292_v20, 16 }
  0x26   : > { %v710_v29 = vpack.c.b16 %v691_v21, %v690_v17  ;;  %v297_v34 = vrot.slane %v296_v24, 4  ;;  %v402_v35 = vrot.slane %v400_v25, 4  ;;  %v405_v36 = vrot.slane %v403_v26, 5  ;;  %v228_v17 = vld [vmem:[%s5247_s6 + $0xc] sm:$0xf] }
  0x27   : > { %v411_v37 = vrot.slane %v409_v27, 5  ;;  %v292_v39 = vsel %vm5259_vm2, %v287_v30, %v291_v18  ;;  %v415_v40 = vrot.slane %v413_v32, 4  ;;  %v421_v41 = vrot.slane %v419_v33, 5  ;;  %v5321_v27 = vld [vmem:[%s5247_s6 + $0x14] sm:$0x1] }
  0x28   : > { %4407 = vmatmul.msk.bf16.vlgmr.msra.gmra.mxu3 %vm720_vm3, %v710_v29  ;;  %v496_v43 = vshrl.u32 %v244_v28, 16  ;;  %v302_v44 = vsel %vm5259_vm2, %v297_v34, %v301_v23  ;;  %v666_v45 = vunpack.c.l.b16 %v292_v39  ;;  %v406_v46 = vor.u32 %v405_v36, %v402_v35  ;;  %v5318_v23 = vld [vmem:[%s5247_s6 + $0x10] sm:$0xf] }
  0x29   : > { %v499_v47 = vshll.u32 %v244_v28, 16  ;;  %v667_v48 = vunpack.c.l.b16 %v302_v44  ;;  %v416_v49 = vor.u32 %v415_v40, %v411_v37  ;;  %v505_v51 = vshll.u32 %v245_v38, 16 }
  0x2a   : > { %v498_v50 = vrot.slane %v496_v43, 4  ;;  %v407_v52 = vrot.slane %v406_v46, 4  ;;  %v509_v54 = vshrl.u32 %v245_v38, 16  ;;  %v515_v55 = vshll.u32 %v269_v42, 16  ;;  %v5331_v42 = vld [vmem:[%s5247_s6 + $0x4c] sm:$0xf] }
  0x2b   : > { %v501_v53 = vrot.slane %v499_v47, 5  ;;  %v698_v57 = vpack.c.b16 %v667_v48, %v666_v45  ;;  %v417_v58 = vrot.slane %v416_v49, 4  ;;  %v507_v59 = vrot.slane %v505_v51, 5  ;;  %v5336_v51 = vld [vmem:[%s5247_s6 + $0x50] sm:$0x1] }
  0x2c   : > { %v412_v63 = vsel %vm5259_vm2, %v407_v52, %v411_v37  ;;  %v511_v1 = vrot.slane %v509_v54, 4  ;;  %v517_v2 = vrot.slane %v515_v55, 5  ;;  %v592_v6 = vshrl.u32 %v252_v56, 16  ;;  %v238_v37 = vld [vmem:[%s5247_s6 + $0x48] sm:$0xf] }
  0x2d   : > { %v502_v0 = vor.u32 %v501_v53, %v498_v50  ;;  %4395 = vmatmul.msk.bf16.vlgmr.msra.gmra.mxu0 %vm720_vm3, %v698_v57  ;;  %v422_v4 = vsel %vm5259_vm2, %v417_v58, %v421_v41  ;;  %v676_v5 = vunpack.c.l.b16 %v412_v63  ;;  %v595_v7 = vshll.u32 %v252_v56, 16 }
  0x2e   : > { %v677_v8 = vunpack.c.l.b16 %v422_v4  ;;  %v512_v10 = vor.u32 %v511_v1, %v507_v59  ;;  %v601_v11 = vshll.u32 %v253_v62, 16  ;;  %v594_v12 = vrot.slane %v592_v6, 4 }
  0x2f   : > { %v503_v9 = vrot.slane %v502_v0, 4  ;;  %v597_v13 = vrot.slane %v595_v7, 5  ;;  %v605_v14 = vshrl.u32 %v253_v62, 16  ;;  %v611_v16 = vshll.u32 %v273_v3, 16  ;;  %v246_v62 = vld [vmem:[%s5247_s6 + $0x78] sm:$0xf] }
  0x30   : > { %v703_v18 = vpack.c.b16 %v677_v8, %v676_v5  ;;  %v513_v21 = vrot.slane %v512_v10, 4  ;;  %v603_v22 = vrot.slane %v601_v11, 5  ;;  %v304_v30 = vshrl.u32 %v228_v17, 16  ;;  %v247_v3 = vld [vmem:[%s5247_s6 + $0x7c] sm:$0xf] }
  0x31   : > { %v508_v19 = vsel %vm5259_vm2, %v503_v9, %v507_v59  ;;  %v598_v25 = vor.u32 %v597_v13, %v594_v12  ;;  %v607_v26 = vrot.slane %v605_v14, 4  ;;  %v613_v29 = vrot.slane %v611_v16, 5  ;;  %v270_v11 = vld [vmem:[%s5247_s6 + $0x80] sm:$0x1] }
  0x32   : > { %v684_v24 = vunpack.c.l.b16 %v508_v19  ;;  %4400 = vmatmul.msk.bf16.gmra.mxu1 %vm720_vm3, %v703_v18  ;;  %v518_v28 = vsel %vm5259_vm2, %v513_v21, %v517_v2  ;;  %v307_v32 = vshll.u32 %v228_v17, 16  ;;  %v313_v36 = vshll.u32 %v5318_v23, 16 }
  0x33   : > { %v685_v33 = vunpack.c.l.b16 %v518_v28  ;;  %v599_v34 = vrot.slane %v598_v25, 4  ;;  %v608_v35 = vor.u32 %v607_v26, %v603_v22  ;;  %v306_v38 = vrot.slane %v304_v30, 4 }
  0x34   : > { %v309_v39 = vrot.slane %v307_v32, 5  ;;  %v317_v40 = vshrl.u32 %v5318_v23, 16  ;;  %v323_v41 = vshll.u32 %v5321_v27, 16  ;;  %v315_v46 = vrot.slane %v313_v36, 5 }
  0x35   : > { %v707_v43 = vpack.c.b16 %v685_v33, %v684_v24  ;;  %v604_v44 = vsel %vm5259_vm2, %v599_v34, %v603_v22  ;;  %v609_v45 = vrot.slane %v608_v35, 4  ;;  %v424_v53 = vshrl.u32 %v238_v37, 16  ;;  %v255_v34 = vld [vmem:[%s5247_s6 + $0xac] sm:$0xf]  ;;  %v274_v35 = vld [vmem:[%s5247_s6 + $0xb0] sm:$0x1] }
  0x36   : > { %v692_v47 = vunpack.c.l.b16 %v604_v44  ;;  %v310_v48 = vor.u32 %v309_v39, %v306_v38  ;;  %v319_v49 = vrot.slane %v317_v40, 4  ;;  %v325_v50 = vrot.slane %v323_v41, 5 }
  0x37   : > { %4404 = vmatmul.msk.bf16.gmra.mxu2 %vm720_vm3, %v707_v43  ;;  %v614_v52 = vsel %vm5259_vm2, %v609_v45, %v613_v29  ;;  %v427_v54 = vshll.u32 %v238_v37, 16  ;;  %v433_v55 = vshll.u32 %v5331_v42, 16  ;;  %v437_v59 = vshrl.u32 %v5331_v42, 16  ;;  %v254_v29 = vld [vmem:[%s5247_s6 + $0xa8] sm:$0xf] }
  0x38   : > { %v693_v56 = vunpack.c.l.b16 %v614_v52  ;;  %v311_v57 = vrot.slane %v310_v48, 4  ;;  %v320_v58 = vor.u32 %v319_v49, %v315_v46  ;;  %v426_v63 = vrot.slane %v424_v53, 4 }
  0x39   : > { %v429_v0 = vrot.slane %v427_v54, 5  ;;  %v435_v1 = vrot.slane %v433_v55, 5  ;;  %v443_v2 = vshll.u32 %v5336_v51, 16  ;;  %v439_v7 = vrot.slane %v437_v59, 4  ;;  %v230_v54 = vld [vmem:[%s5247_s6 + $0x18] sm:$0xf] }
  0x3a   : > { %v711_v4 = vpack.c.b16 %v693_v56, %v692_v47  ;;  %v316_v5 = vsel %vm5259_vm2, %v311_v57, %v315_v46  ;;  %v321_v6 = vrot.slane %v320_v58, 4  ;;  %v520_v12 = vshrl.u32 %v246_v62, 16  ;;  %v5364_v58 = vld [vmem:[%s5247_s6 + $0x1c] sm:$0xf]  ;;  %v5367_v59 = vld [vmem:[%s5247_s6 + $0x20] sm:$0x1] }
  0x3b   : > { %v668_v8 = vunpack.c.l.b16 %v316_v5  ;;  %v430_v9 = vor.u32 %v429_v0, %v426_v63  ;;  %v445_v10 = vrot.slane %v443_v2, 5  ;;  %v440_v14 = vor.u32 %v439_v7, %v435_v1 }
  0x3c   : > { %4408 = vmatmul.msk.bf16.gmra.mxu3 %vm720_vm3, %v711_v4  ;;  %v326_v13 = vsel %vm5259_vm2, %v321_v6, %v325_v50  ;;  %v523_v16 = vshll.u32 %v246_v62, 16  ;;  %v529_v17 = vshll.u32 %v247_v3, 16  ;;  %v522_v21 = vrot.slane %v520_v12, 4 }
  0x3d   : > { %v669_v18 = vunpack.c.l.b16 %v326_v13  ;;  %v431_v19 = vrot.slane %v430_v9, 4  ;;  %v533_v22 = vshrl.u32 %v247_v3, 16  ;;  %v441_v24 = vrot.slane %v440_v14, 4 }
  0x3e   : > { %v525_v25 = vrot.slane %v523_v16, 5  ;;  %v531_v26 = vrot.slane %v529_v17, 5  ;;  %v539_v28 = vshll.u32 %v270_v11, 16  ;;  %v616_v43 = vshrl.u32 %v254_v29, 16  ;;  %v5377_v16 = vld [vmem:[%s5247_s6 + $0x58] sm:$0xf] }
  0x3f   : > { %v699_v30 = vpack.c.b16 %v669_v18, %v668_v8  ;;  %v436_v32 = vsel %vm5259_vm2, %v431_v19, %v435_v1  ;;  %v535_v33 = vrot.slane %v533_v22, 4  ;;  %v446_v36 = vsel %vm5259_vm2, %v441_v24, %v445_v10  ;;  %v240_v10 = vld [vmem:[%s5247_s6 + $0x54] sm:$0xf]  ;;  %v5382_v22 = vld [vmem:[%s5247_s6 + $0x5c] sm:$0x1] }
  0x40   : > { %v678_v37 = vunpack.c.l.b16 %v436_v32  ;;  %v526_v38 = vor.u32 %v525_v25, %v522_v21  ;;  %v541_v39 = vrot.slane %v539_v28, 5  ;;  %v679_v40 = vunpack.c.l.b16 %v446_v36 }
  0x41   : > { %4396 = vmatmul.msk.bf16.gmra.mxu0 %vm720_vm3, %v699_v30  ;;  %v536_v41 = vor.u32 %v535_v33, %v531_v26  ;;  %v619_v44 = vshll.u32 %v254_v29, 16  ;;  %v625_v46 = vshll.u32 %v255_v34, 16  ;;  %v629_v47 = vshrl.u32 %v255_v34, 16  ;;  %v248_v34 = vld [vmem:[%s5247_s6 + $0x84] sm:$0xf] }
  0x42   : > { %v527_v45 = vrot.slane %v526_v38, 4  ;;  %v635_v48 = vshll.u32 %v274_v35, 16  ;;  %v704_v49 = vpack.c.b16 %v679_v40, %v678_v37  ;;  %v618_v52 = vrot.slane %v616_v43, 4 }
  0x43   : > { %v537_v50 = vrot.slane %v536_v41, 4  ;;  %v621_v53 = vrot.slane %v619_v44, 5  ;;  %v627_v56 = vrot.slane %v625_v46, 5  ;;  %v631_v57 = vrot.slane %v629_v47, 4  ;;  %v249_v44 = vld [vmem:[%s5247_s6 + $0x88] sm:$0xf] }
  0x44   : > { %v532_v55 = vsel %vm5259_vm2, %v527_v45, %v531_v26  ;;  %4401 = vmatmul.msk.bf16.gmra.mxu1 %vm720_vm3, %v704_v49  ;;  %v637_v1 = vrot.slane %v635_v48, 5  ;;  %v328_v4 = vshrl.u32 %v230_v54, 16  ;;  %v331_v5 = vshll.u32 %v230_v54, 16  ;;  %v271_v48 = vld [vmem:[%s5247_s6 + $0x8c] sm:$0x1] }
  0x45   : > { %v542_v62 = vsel %vm5259_vm2, %v537_v50, %v541_v39  ;;  %v686_v63 = vunpack.c.l.b16 %v532_v55  ;;  %v622_v0 = vor.u32 %v621_v53, %v618_v52  ;;  %v632_v3 = vor.u32 %v631_v57, %v627_v56 }
  0x46   : > { %v687_v2 = vunpack.c.l.b16 %v542_v62  ;;  %v337_v7 = vshll.u32 %v5364_v58, 16  ;;  %v341_v8 = vshrl.u32 %v5364_v58, 16  ;;  %v347_v9 = vshll.u32 %v5367_v59, 16 }
  0x47   : > { %v623_v6 = vrot.slane %v622_v0, 4  ;;  %v633_v12 = vrot.slane %v632_v3, 4  ;;  %v330_v13 = vrot.slane %v328_v4, 4  ;;  %v333_v14 = vrot.slane %v331_v5, 5  ;;  %v256_v3 = vld [vmem:[%s5247_s6 + $0xb4] sm:$0xf] }
  0x48   : > { %v708_v11 = vpack.c.b16 %v687_v2, %v686_v63  ;;  %v339_v18 = vrot.slane %v337_v7, 5  ;;  %v343_v19 = vrot.slane %v341_v8, 4  ;;  %v349_v21 = vrot.slane %v347_v9, 5  ;;  %v257_v7 = vld [vmem:[%s5247_s6 + $0xb8] sm:$0xf] }
  0x49   : > { %v628_v17 = vsel %vm5259_vm2, %v623_v6, %v627_v56  ;;  %v638_v24 = vsel %vm5259_vm2, %v633_v12, %v637_v1  ;;  %v334_v26 = vor.u32 %v333_v14, %v330_v13  ;;  %v448_v28 = vshrl.u32 %v240_v10, 16  ;;  %v275_v12 = vld [vmem:[%s5247_s6 + $0xbc] sm:$0x1]  ;;  %v5074_v13 = vld [vmem:[%s6561_s1 + $0x30] sm:$0xff] }
  0x4a   : > { %4405 = vmatmul.msk.bf16.gmra.mxu2 %vm720_vm3, %v708_v11  ;;  %v694_v25 = vunpack.c.l.b16 %v628_v17  ;;  %v695_v29 = vunpack.c.l.b16 %v638_v24  ;;  %v344_v30 = vor.u32 %v343_v19, %v339_v18  ;;  %v451_v32 = vshll.u32 %v240_v10, 16 }
  0x4b   : > { %v457_v33 = vshll.u32 %v5377_v16, 16  ;;  %v335_v35 = vrot.slane %v334_v26, 4  ;;  %v450_v36 = vrot.slane %v448_v28, 4  ;;  %v461_v37 = vshrl.u32 %v5377_v16, 16  ;;  %3004 = vmatpush.bf16.msra.mxu2 %v5074_v13 }
  0x4c   : > { %v467_v38 = vshll.u32 %v5382_v22, 16  ;;  %v712_v39 = vpack.c.b16 %v695_v29, %v694_v25  ;;  %v345_v40 = vrot.slane %v344_v30, 4  ;;  %v453_v41 = vrot.slane %v451_v32, 5 }
  0x4d   : > { %v459_v43 = vrot.slane %v457_v33, 5  ;;  %v340_v45 = vsel %vm5259_vm2, %v335_v35, %v339_v18  ;;  %v463_v46 = vrot.slane %v461_v37, 4  ;;  %v544_v49 = vshrl.u32 %v248_v34, 16  ;;  %v232_v33 = vld [vmem:[%s5247_s6 + $0x24] sm:$0xf] }
  0x4e   : > { %v469_v47 = vrot.slane %v467_v38, 5  ;;  %4409 = vmatmul.msk.bf16.gmra.mxu3 %vm720_vm3, %v712_v39  ;;  %v350_v50 = vsel %vm5259_vm2, %v345_v40, %v349_v21  ;;  %v670_v52 = vunpack.c.l.b16 %v340_v45  ;;  %v454_v53 = vor.u32 %v453_v41, %v450_v36  ;;  %v5413_v38 = vld [vmem:[%s5247_s6 + $0x28] sm:$0xf]  ;;  %v5416_v39 = vld [vmem:[%s5247_s6 + $0x2c] sm:$0x1]  ;;  %v5075_v45 = vld [vmem:[%s6561_s1 + $0x38] sm:$0xff] }
  0x4f   : > { %v547_v54 = vshll.u32 %v248_v34, 16  ;;  %v671_v55 = vunpack.c.l.b16 %v350_v50  ;;  %v464_v56 = vor.u32 %v463_v46, %v459_v43  ;;  %v546_v57 = vrot.slane %v544_v49, 4  ;;  %v5057_v46 = vld [vmem:[%s6561_s1 + $0x28] sm:$0xff]  ;;  %3662 = vmatpush.bf16.msra.mxu3 %v5075_v45 }
  0x50   : > { %v553_v62 = vshll.u32 %v249_v44, 16  ;;  %v455_v63 = vrot.slane %v454_v53, 4  ;;  %v557_v1 = vshrl.u32 %v249_v44, 16  ;;  %v563_v2 = vshll.u32 %v271_v48, 16  ;;  %2710 = vmatpush.bf16.msra.mxu1 %v5057_v46 }
  0x51   : > { %v549_v0 = vrot.slane %v547_v54, 5  ;;  %v700_v4 = vpack.c.b16 %v671_v55, %v670_v52  ;;  %v465_v5 = vrot.slane %v464_v56, 4  ;;  %v640_v18 = vshrl.u32 %v256_v3, 16 }
  0x52   : > { %v555_v6 = vrot.slane %v553_v62, 5  ;;  %v460_v8 = vsel %vm5259_vm2, %v455_v63, %v459_v43  ;;  %v559_v10 = vrot.slane %v557_v1, 4  ;;  %v565_v11 = vrot.slane %v563_v2, 5  ;;  %v1081_v1 = vld [vmem:[%s5247_s6] sm:$0xe] }
  0x53   : > { %v550_v9 = vor.u32 %v549_v0, %v546_v57  ;;  %4397 = vmatmul.msk.bf16.gmra.mxu0 %vm720_vm3, %v700_v4  ;;  %v470_v14 = vsel %vm5259_vm2, %v465_v5, %v469_v47  ;;  %v680_v17 = vunpack.c.l.b16 %v460_v8  ;;  %v643_v19 = vshll.u32 %v256_v3, 16  ;;  %v5076_v47 = vld [vmem:[%s6561_s1 + $0x40] sm:$0xff] }
  0x54   : > { %v681_v21 = vunpack.c.l.b16 %v470_v14  ;;  %v560_v25 = vor.u32 %v559_v10, %v555_v6  ;;  %v649_v26 = vshll.u32 %v257_v7, 16  ;;  %v642_v28 = vrot.slane %v640_v18, 4  ;;  %4064 = vmatpush.bf16.msra.mxu0 %v5076_v47  ;;  %v4651_v10 = vld [vmem:[%s5247_s6 + $0xc] sm:$0xf] }
  0x55   : > { %v551_v24 = vrot.slane %v550_v9, 4  ;;  %v645_v29 = vrot.slane %v643_v19, 5  ;;  %v653_v30 = vshrl.u32 %v257_v7, 16  ;;  %v659_v32 = vshll.u32 %v275_v12, 16 }
  0x56   : > { %v705_v34 = vpack.c.b16 %v681_v21, %v680_v17  ;;  %v561_v36 = vrot.slane %v560_v25, 4  ;;  %v651_v37 = vrot.slane %v649_v26, 5  ;;  %v1137_v40 = vrot.slane %v5275_v61, 5  ;;  %v4654_v61 = vld [vmem:[%s5247_s6 + $0x18] sm:$0xf] }
  0x57   : > { %v556_v35 = vsel %vm5259_vm2, %v551_v24, %v555_v6  ;;  %v646_v43 = vor.u32 %v645_v29, %v642_v28  ;;  %v655_v44 = vrot.slane %v653_v30, 4  ;;  %v661_v49 = vrot.slane %v659_v32, 5 }
  0x58   : > { %v688_v41 = vunpack.c.l.b16 %v556_v35  ;;  %4402 = vmatmul.msk.bf16.gmra.mxu1 %vm720_vm3, %v705_v34  ;;  %v566_v48 = vsel %vm5259_vm2, %v561_v36, %v565_v11  ;;  %v352_v50 = vshrl.u32 %v232_v33, 16  ;;  %v355_v52 = vshll.u32 %v232_v33, 16  ;;  %v4652_v11 = vld [vmem:[%s5247_s6 + $0x10] sm:$0xf] }
  0x59   : > { %v689_v53 = vunpack.c.l.b16 %v566_v48  ;;  %v647_v54 = vrot.slane %v646_v43, 4  ;;  %v656_v55 = vor.u32 %v655_v44, %v651_v37  ;;  %v361_v56 = vshll.u32 %v5413_v38, 16  ;;  %v5020_v48 = vld [vmem:[%s5247_s6] sm:$0xff] }
  0x5a   : > { %v354_v57 = vrot.slane %v352_v50, 4  ;;  %v357_v62 = vrot.slane %v355_v52, 5  ;;  %v365_v63 = vshrl.u32 %v5413_v38, 16  ;;  %v371_v0 = vshll.u32 %v5416_v39, 16 }
  0x5b   : > { %v709_v2 = vpack.c.b16 %v689_v53, %v688_v41  ;;  %v652_v3 = vsel %vm5259_vm2, %v647_v54, %v651_v37  ;;  %v657_v4 = vrot.slane %v656_v55, 4  ;;  %v363_v5 = vrot.slane %v361_v56, 5  ;;  %v4653_v37 = vld [vmem:[%s5247_s6 + $0x14] sm:$0x1] }
  0x5c   : > { %v696_v6 = vunpack.c.l.b16 %v652_v3  ;;  %v358_v7 = vor.u32 %v357_v62, %v354_v57  ;;  %v367_v8 = vrot.slane %v365_v63, 4  ;;  %v373_v9 = vrot.slane %v371_v0, 5  ;;  %v4655_v63 = vld [vmem:[%s5247_s6 + $0x1c] sm:$0xf]  ;;  %v1082_v0 = vld [vmem:[%s5247_s6 + $0xc] sm:$0xe] }
  0x5d   : > { %4406 = vmatmul.msk.bf16.gmra.mxu2 %vm720_vm3, %v709_v2  ;;  %v662_v12 = vsel %vm5259_vm2, %v657_v4, %v661_v49  ;;  %v4495_v13 = vrot.slane %v1081_v1, 9  ;;  %v1134_v21 = vrot.slane %v5272_v60, 5  ;;  %v1813_v24 = vshrl.u32 %v4651_v10, 16 }
  0x5e   : > { %v697_v14 = vunpack.c.l.b16 %v662_v12  ;;  %v359_v17 = vrot.slane %v358_v7, 4  ;;  %v368_v18 = vor.u32 %v367_v8, %v363_v5  ;;  %v1816_v25 = vshll.u32 %v4651_v10, 16  ;;  %v5039_v7 = vld [vmem:[%s5247_s6 + $0xc] sm:$0xff] }
  0x5f   : > { %v1822_v26 = vshll.u32 %v4652_v11, 16  ;;  %v1826_v28 = vshrl.u32 %v4652_v11, 16  ;;  %v1135_v33 = vsel %vm5442_vm6, %v4495_v13, %v1134_v21  ;;  %v1136_v35 = vrot.slane %v1134_v21, 4 }
  0x60   : > { %v713_v29 = vpack.c.b16 %v697_v14, %v696_v6  ;;  %v364_v30 = vsel %vm5259_vm2, %v359_v17, %v363_v5  ;;  %v369_v32 = vrot.slane %v368_v18, 4  ;;  %v1247_v36 = vunpack.c.l.b16 %v1135_v33  ;;  %v4656_v18 = vld [vmem:[%s5247_s6 + $0x20] sm:$0x1] }
  0x61   : > { %v672_v34 = vunpack.c.l.b16 %v364_v30  ;;  %v1815_v41 = vrot.slane %v1813_v24, 4  ;;  %v1818_v43 = vrot.slane %v1816_v25, 5  ;;  %v1824_v44 = vrot.slane %v1822_v26, 5  ;;  %v5021_v26 = vld [vmem:[%s5247_s6 + $0xc] sm:$0xff] }
  0x62   : > { %4410 = vmatmul.msk.bf16.gmra.mxu3 %vm720_vm3, %v713_v29  ;;  %v374_v60 = vsel %vm5259_vm2, %v369_v32, %v373_v9  ;;  %v1828_v45 = vrot.slane %v1826_v28, 4  ;;  %v1138_v47 = vsel %vm5442_vm6, %v1136_v35, %v1137_v40  ;;  %v1832_v53 = vshll.u32 %v4653_v37, 16  ;;  %v4658_v37 = vld [vmem:[%s5247_s6 + $0x28] sm:$0xf] }
  0x63   : > { %v673_v46 = vunpack.c.l.b16 %v374_v60  ;;  %v1248_v49 = vunpack.c.l.b16 %v1138_v47  ;;  %v1819_v50 = vor.u32 %v1818_v43, %v1815_v41  ;;  %v1141_v40 = vrot.slane %v5318_v23, 5  ;;  %v1083_v60 = vld [vmem:[%s5247_s6 + $0x18] sm:$0xe] }
  0x64   : > { %v1829_v52 = vor.u32 %v1828_v45, %v1824_v44  ;;  %v1834_v62 = vrot.slane %v1832_v53, 5  ;;  %v1837_v1 = vshrl.u32 %v4654_v61, 16  ;;  %v1840_v2 = vshll.u32 %v4654_v61, 16 }
  0x65   : > { %v701_v54 = vpack.c.b16 %v673_v46, %v672_v34  ;;  %v1279_v55 = vpack.c.b16 %v1248_v49, %v1247_v36  ;;  %v1820_v56 = vrot.slane %v1819_v50, 4  ;;  %v1846_v5 = vshll.u32 %v4655_v63, 16  ;;  %v4657_v34 = vld [vmem:[%s5247_s6 + $0x24] sm:$0xf] }
  0x66   : > { %v1830_v57 = vrot.slane %v1829_v52, 4  ;;  %v1850_v6 = vshrl.u32 %v4655_v63, 16  ;;  %v4496_v8 = vrot.slane %v1082_v0, 9  ;;  %v1143_v9 = vrot.slane %v1141_v40, 4  ;;  %v5040_v52 = vld [vmem:[%s5247_s6 + $0x18] sm:$0xff] }
  0x67   : > { %4398 = vmatmul.msk.bf16.gmra.mxu0 %vm720_vm3, %v701_v54  ;;  %v1825_v3 = vsel %vm5259_vm2, %v1820_v56, %v1824_v44  ;;  %v1144_v23 = vrot.slane %v5321_v27, 5  ;;  %v1839_v12 = vrot.slane %v1837_v1, 4  ;;  %v1842_v13 = vrot.slane %v1840_v2, 5  ;;  %v4659_v63 = vld [vmem:[%s5247_s6 + $0x2c] sm:$0x1] }
  0x68   : > { %4479 = vmatmul.msk.bf16.vlgmr.msrb.gmra.mxu1 %vm720_vm3, %v5020_v48  ;;  %v1835_v4 = vsel %vm5259_vm2, %v1830_v57, %v1834_v62  ;;  %v2199_v10 = vunpack.c.l.b16 %v1825_v3  ;;  %v1848_v14 = vrot.slane %v1846_v5, 5  ;;  %v1852_v17 = vrot.slane %v1850_v6, 4 }
  0x69   : > { %v2200_v11 = vunpack.c.l.b16 %v1835_v4  ;;  %v1142_v21 = vsel %vm5442_vm6, %v4496_v8, %v1141_v40  ;;  %v1145_v24 = vsel %vm5442_vm6, %v1143_v9, %v1144_v23  ;;  %v1843_v27 = vor.u32 %v1842_v13, %v1839_v12  ;;  %v5022_v4 = vld [vmem:[%s5247_s6 + $0x18] sm:$0xff] }
  0x6a   : > { %v1853_v28 = vor.u32 %v1852_v17, %v1848_v14  ;;  %v1856_v29 = vshll.u32 %v4656_v18, 16  ;;  %v1249_v30 = vunpack.c.l.b16 %v1142_v21  ;;  %v1250_v32 = vunpack.c.l.b16 %v1145_v24  ;;  %v1084_v17 = vld [vmem:[%s5247_s6 + $0x24] sm:$0xe] }
  0x6b   : > { %v2231_v25 = vpack.c.b16 %v2200_v11, %v2199_v10  ;;  %v1844_v33 = vrot.slane %v1843_v27, 4  ;;  %v1148_v43 = vrot.slane %v5364_v58, 5  ;;  %v1861_v44 = vshrl.u32 %v4657_v34, 16  ;;  %v4660_v10 = vld [vmem:[%s5247_s6 + $0x30] sm:$0xf]  ;;  %v5041_v27 = vld [vmem:[%s5247_s6 + $0x24] sm:$0xff] }
  0x6c   : > { %v1854_v35 = vrot.slane %v1853_v28, 4  ;;  %v1858_v36 = vrot.slane %v1856_v29, 5  ;;  %v1280_v41 = vpack.c.b16 %v1250_v32, %v1249_v30  ;;  %v1864_v46 = vshll.u32 %v4657_v34, 16  ;;  %v4661_v11 = vld [vmem:[%s5247_s6 + $0x34] sm:$0xf] }
  0x6d   : > { %4517 = vmatmul.msk.bf16.vlgmr.msrb.gmra.mxu2 %vm720_vm3, %v1279_v55  ;;  %v1849_v45 = vsel %vm5259_vm2, %v1844_v33, %v1848_v14  ;;  %v1870_v47 = vshll.u32 %v4658_v37, 16  ;;  %v1874_v48 = vshrl.u32 %v4658_v37, 16  ;;  %v4497_v50 = vrot.slane %v1083_v60, 9 }
  0x6e   : > { %v1859_v49 = vsel %vm5259_vm2, %v1854_v35, %v1858_v36  ;;  %v2201_v53 = vunpack.c.l.b16 %v1849_v45  ;;  %v1150_v54 = vrot.slane %v1148_v43, 4  ;;  %v1151_v58 = vrot.slane %v5367_v59, 5  ;;  %v4662_v36 = vld [vmem:[%s5247_s6 + $0x38] sm:$0x1] }
  0x6f   : > { %v1863_v55 = vrot.slane %v1861_v44, 4  ;;  %v2202_v56 = vunpack.c.l.b16 %v1859_v49  ;;  %v1866_v57 = vrot.slane %v1864_v46, 5  ;;  %v1872_v62 = vrot.slane %v1870_v47, 5  ;;  %v4664_v49 = vld [vmem:[%s5247_s6 + $0x40] sm:$0xf] }
  0x70   : > { %v1876_v61 = vrot.slane %v1874_v48, 4  ;;  %v1149_v40 = vsel %vm5442_vm6, %v4497_v50, %v1148_v43  ;;  %v1152_v0 = vsel %vm5442_vm6, %v1150_v54, %v1151_v58  ;;  %v1880_v59 = vshll.u32 %v4659_v63, 16  ;;  %v4663_v48 = vld [vmem:[%s5247_s6 + $0x3c] sm:$0xf]  ;;  %v5108_v58 = vld [vmem:[%s5247_s6 + $0x34] sm:$0xf] }
  0x71   : > { %v2232_v1 = vpack.c.b16 %v2202_v56, %v2201_v53  ;;  %v1867_v2 = vor.u32 %v1866_v57, %v1863_v55  ;;  %v1251_v5 = vunpack.c.l.b16 %v1149_v40  ;;  %v1252_v6 = vunpack.c.l.b16 %v1152_v0  ;;  %v1085_v56 = vld [vmem:[%s5247_s6 + $0x30] sm:$0xe] }
  0x72   : > { %4635 = vmatmul.msk.bf16.vlgmr.msrb.gmra.mxu3 %vm720_vm3, %v5039_v7  ;;  %v1877_v3 = vor.u32 %v1876_v61, %v1872_v62  ;;  %v1882_v9 = vrot.slane %v1880_v59, 5  ;;  %v1155_v12 = vrot.slane %v5413_v38, 5  ;;  %v1885_v18 = vshrl.u32 %v4660_v10, 16  ;;  %v5109_v59 = vld [vmem:[%s5247_s6 + $0x38] sm:$0x1] }
  0x73   : > { %v1868_v7 = vrot.slane %v1867_v2, 4  ;;  %v1281_v23 = vpack.c.b16 %v1252_v6, %v1251_v5  ;;  %v1888_v21 = vshll.u32 %v4660_v10, 16  ;;  %v1894_v24 = vshll.u32 %v4661_v11, 16  ;;  %v5042_v5 = vld [vmem:[%s5247_s6 + $0x30] sm:$0xff] }
  0x74   : > { %v1878_v8 = vrot.slane %v1877_v3, 4  ;;  %v1157_v28 = vrot.slane %v1155_v12, 4  ;;  %v1158_v38 = vrot.slane %v5416_v39, 5  ;;  %v1887_v32 = vrot.slane %v1885_v18, 4  ;;  %v5023_v39 = vld [vmem:[%s5247_s6 + $0x24] sm:$0xff] }
  0x75   : > { %v1873_v13 = vsel %vm5259_vm2, %v1868_v7, %v1872_v62  ;;  %v1890_v33 = vrot.slane %v1888_v21, 5  ;;  %v1896_v34 = vrot.slane %v1894_v24, 5  ;;  %v1904_v45 = vshll.u32 %v4662_v36, 16  ;;  %v5024_v24 = vld [vmem:[%s5247_s6 + $0x30] sm:$0xff] }
  0x76   : > { %v1883_v14 = vsel %vm5259_vm2, %v1878_v8, %v1882_v9  ;;  %v2203_v29 = vunpack.c.l.b16 %v1873_v13  ;;  %v1162_v55 = vrot.slane %v5108_v58, 5  ;;  %v1909_v57 = vshrl.u32 %v4663_v48, 16 }
  0x77   : > { %4705 = vmatmul.msk.bf16.vlgmr.msrb.gmra.mxu0 %vm720_vm3, %v2231_v25  ;;  %v1898_v25 = vshrl.u32 %v4661_v11, 16  ;;  %v2204_v30 = vunpack.c.l.b16 %v1883_v14  ;;  %v1891_v43 = vor.u32 %v1890_v33, %v1887_v32  ;;  %v1906_v53 = vrot.slane %v1904_v45, 5  ;;  %v4665_v11 = vld [vmem:[%s5247_s6 + $0x44] sm:$0x1]  ;;  %v4666_v32 = vld [vmem:[%s5247_s6 + $0x48] sm:$0xf] }
  0x78   : > { %4480 = vmatmul.msk.bf16.gmra.mxu1 %vm720_vm3, %v5021_v26  ;;  %v4498_v26 = vrot.slane %v1084_v17, 9  ;;  %v1912_v62 = vshll.u32 %v4663_v48, 16  ;;  %v1918_v61 = vshll.u32 %v4664_v49, 16  ;;  %v1922_v63 = vshrl.u32 %v4664_v49, 16  ;;  %v4667_v33 = vld [vmem:[%s5247_s6 + $0x4c] sm:$0xf] }
  0x79   : > { %v1900_v35 = vrot.slane %v1898_v25, 4  ;;  %v2233_v60 = vpack.c.b16 %v2204_v30, %v2203_v29  ;;  %v1892_v50 = vrot.slane %v1891_v43, 4  ;;  %v4499_v2 = vrot.slane %v1085_v56, 9  ;;  %v5043_v48 = vld [vmem:[%s5247_s6 + $0x3c] sm:$0xff] }
  0x7a   : > { %v1156_v37 = vsel %vm5442_vm6, %v4498_v26, %v1155_v12  ;;  %v1164_v3 = vrot.slane %v1162_v55, 4  ;;  %v1911_v6 = vrot.slane %v1909_v57, 4  ;;  %v1914_v7 = vrot.slane %v1912_v62, 5  ;;  %v4668_v62 = vld [vmem:[%s5247_s6 + $0x50] sm:$0x1] }
  0x7b   : > { %v1901_v44 = vor.u32 %v1900_v35, %v1896_v34  ;;  %v1253_v46 = vunpack.c.l.b16 %v1156_v37  ;;  %v1897_v0 = vsel %vm5259_vm2, %v1892_v50, %v1896_v34  ;;  %v1920_v8 = vrot.slane %v1918_v61, 5 }
  0x7c   : > { %v1924_v9 = vrot.slane %v1922_v63, 4  ;;  %v1163_v12 = vsel %vm5442_vm6, %v4499_v2, %v1162_v55  ;;  %v1915_v14 = vor.u32 %v1914_v7, %v1911_v6  ;;  %v1928_v18 = vshll.u32 %v4665_v11, 16 }
  0x7d   : > { %4518 = vmatmul.msk.bf16.gmra.mxu2 %vm720_vm3, %v1280_v41  ;;  %v1159_v41 = vsel %vm5442_vm6, %v1157_v28, %v1158_v38  ;;  %v1933_v43 = vshrl.u32 %v4666_v32, 16  ;;  %v1942_v45 = vshll.u32 %v4667_v33, 16 }
  0x7e   : > { %v1254_v47 = vunpack.c.l.b16 %v1159_v41  ;;  %v1925_v17 = vor.u32 %v1924_v9, %v1920_v8  ;;  %v1916_v38 = vrot.slane %v1915_v14, 4  ;;  %v1930_v30 = vrot.slane %v1928_v18, 5 }
  0x7f   : > { %v1944_v56 = vrot.slane %v1942_v45, 5  ;;  %v1176_v14 = vrot.slane %v5331_v42, 5 }
  0x80   : > { %v1282_v54 = vpack.c.b16 %v1254_v47, %v1253_v46  ;;  %v1926_v29 = vrot.slane %v1925_v17, 4  ;;  %v1921_v36 = vsel %vm5259_vm2, %v1916_v38, %v1920_v8  ;;  %v1946_v46 = vshrl.u32 %v4667_v33, 16 }
  0x81   : > { %v2207_v47 = vunpack.c.l.b16 %v1921_v36  ;;  %v1178_v33 = vrot.slane %v1176_v14, 4 }
  0x82   : > { %4636 = vmatmul.msk.bf16.gmra.mxu3 %vm720_vm3, %v5040_v52  ;;  %v1902_v52 = vrot.slane %v1901_v44, 4  ;;  %v1931_v37 = vsel %vm5259_vm2, %v1926_v29, %v1930_v30  ;;  %v1936_v44 = vshll.u32 %v4666_v32, 16  ;;  %v1948_v57 = vrot.slane %v1946_v46, 4  ;;  %v5044_v30 = vld [vmem:[%s5247_s6 + $0x48] sm:$0xff]  ;;  %v4671_v46 = vld [vmem:[%s5247_s6 + $0x5c] sm:$0x1] }
  0x83   : > { %v2208_v49 = vunpack.c.l.b16 %v1931_v37 }
  0x84   : > { %v1938_v55 = vrot.slane %v1936_v44, 5  ;;  %v1949_v2 = vor.u32 %v1948_v57, %v1944_v56 }
  0x86   : > { %v1950_v8 = vrot.slane %v1949_v2, 4 }
  0x87   : > { %4706 = vmatmul.msk.bf16.gmra.mxu0 %vm720_vm3, %v2232_v1  ;;  %v1907_v1 = vsel %vm5259_vm2, %v1902_v52, %v1906_v53 }
  0x88   : > { %4481 = vmatmul.msk.bf16.gmra.mxu1 %vm720_vm3, %v5022_v4  ;;  %v1165_v4 = vrot.slane %v5109_v59, 5  ;;  %v2206_v10 = vunpack.c.l.b16 %v1907_v1 }
  0x8a   : > { %v1166_v13 = vsel %vm5442_vm6, %v1164_v3, %v1165_v4  ;;  %v1952_v3 = vshll.u32 %v4668_v62, 16  ;;  %v5025_v4 = vld [vmem:[%s5247_s6 + $0x3c] sm:$0xff] }
  0x8b   : > { %v1256_v26 = vunpack.c.l.b16 %v1166_v13  ;;  %v4670_v13 = vld [vmem:[%s5247_s6 + $0x58] sm:$0xf]  ;;  %v4672_v62 = vld [vmem:[%s5247_s6 + $0x60] sm:$0xf] }
  0x8c   : > { %v1954_v9 = vrot.slane %v1952_v3, 5  ;;  %v1970_v38 = vshrl.u32 %v4670_v13, 16 }
  0x8d   : > { %4519 = vmatmul.msk.bf16.gmra.mxu2 %vm720_vm3, %v1281_v23  ;;  %v2205_v23 = vunpack.c.l.b16 %v1897_v0  ;;  %v2235_v0 = vpack.c.b16 %v2208_v49, %v2207_v47 }
  0x8e   : > { %v1955_v18 = vsel %vm5259_vm2, %v1950_v8, %v1954_v9  ;;  %v1972_v44 = vrot.slane %v1970_v38, 4 }
  0x8f   : > { %v2234_v21 = vpack.c.b16 %v2206_v10, %v2205_v23  ;;  %v2210_v37 = vunpack.c.l.b16 %v1955_v18 }
  0x92   : > { %4637 = vmatmul.msk.bf16.gmra.mxu3 %vm720_vm3, %v5041_v27  ;;  %v1255_v27 = vunpack.c.l.b16 %v1163_v12  ;;  %v4669_v12 = vld [vmem:[%s5247_s6 + $0x54] sm:$0xf] }
  0x94   : > { %v1283_v35 = vpack.c.b16 %v1256_v26, %v1255_v27  ;;  %v1960_v27 = vshll.u32 %v4669_v12, 16  ;;  %v1966_v26 = vshll.u32 %v4670_v13, 16 }
  0x97   : > { %4707 = vmatmul.msk.bf16.gmra.mxu0 %vm720_vm3, %v2233_v60  ;;  %v1169_v60 = vrot.slane %v5287_v15, 5  ;;  %v1935_v15 = vrot.slane %v1933_v43, 4  ;;  %v1968_v43 = vrot.slane %v1966_v26, 5  ;;  %v1186_v26 = vrot.slane %v5382_v22, 5 }
  0x98   : > { %4482 = vmatmul.msk.bf16.gmra.mxu1 %vm720_vm3, %v5023_v39  ;;  %v1086_v39 = vld [vmem:[%s5247_s6 + $0x3c] sm:$0xe] }
  0x99   : > { %v4500_v52 = vrot.slane %v1086_v39, 9  ;;  %v1171_v53 = vrot.slane %v1169_v60, 4  ;;  %v1962_v39 = vrot.slane %v1960_v27, 5 }
  0x9b   : > { %v1170_v61 = vsel %vm5442_vm6, %v4500_v52, %v1169_v60  ;;  %v5026_v52 = vld [vmem:[%s5247_s6 + $0x48] sm:$0xff] }
  0x9d   : > { %v5526_v40 = vpop.f32.mrf.mxu1  ;;  %4520 = vmatmul.msk.bf16.gmra.mxu2 %vm720_vm3, %v1282_v54  ;;  %v1172_v54 = vrot.slane %v5292_v20, 5  ;;  %v1939_v20 = vor.u32 %v1938_v55, %v1935_v15  ;;  %v1976_v15 = vshll.u32 %v4671_v46, 16  ;;  %v5027_v46 = vld [vmem:[%s5247_s6 + $0x54] sm:$0xff] }
  0x9f   : > { %v1173_v63 = vsel %vm5442_vm6, %v1171_v53, %v1172_v54  ;;  %v1940_v7 = vrot.slane %v1939_v20, 4  ;;  %v1973_v54 = vor.u32 %v1972_v44, %v1968_v43  ;;  %v1978_v2 = vrot.slane %v1976_v15, 5 }
  0xa0   : > { %v1258_v6 = vunpack.c.l.b16 %v1173_v63 }
  0xa1   : > { %v1945_v17 = vsel %vm5259_vm2, %v1940_v7, %v1944_v56  ;;  %v1974_v20 = vrot.slane %v1973_v54, 4  ;;  %v1183_v7 = vrot.slane %v5377_v16, 5 }
  0xa2   : > { %4638 = vmatmul.msk.bf16.gmra.mxu3 %vm720_vm3, %v5042_v5  ;;  %v1257_v5 = vunpack.c.l.b16 %v1170_v61  ;;  %v2209_v36 = vunpack.c.l.b16 %v1945_v17  ;;  %v4673_v61 = vld [vmem:[%s5247_s6 + $0x64] sm:$0xf] }
  0xa3   : > { %v1994_v8 = vshrl.u32 %v4673_v61, 16  ;;  %v1979_v13 = vsel %vm5259_vm2, %v1974_v20, %v1978_v2  ;;  %v1185_v27 = vrot.slane %v1183_v7, 4  ;;  %v5110_v2 = vld [vmem:[%s5247_s6 + $0x64] sm:$0xf] }
  0xa4   : > { %v1284_v10 = vpack.c.b16 %v1258_v6, %v1257_v5  ;;  %v2236_v49 = vpack.c.b16 %v2210_v37, %v2209_v36  ;;  %v1984_v5 = vshll.u32 %v4672_v62, 16  ;;  %v1990_v6 = vshll.u32 %v4673_v61, 16 }
  0xa5   : > { %v5542_v25 = vpop.f32.mrf.mxu1  ;;  %v1996_v38 = vrot.slane %v1994_v8, 4 }
  0xa6   : > { %v1986_v18 = vrot.slane %v1984_v5, 5  ;;  %v1089_v5 = vld [vmem:[%s5247_s6 + $0x60] sm:$0xe] }
  0xa7   : > { %v5544_v28 = vpop.f32.mrf.mxu2  ;;  %4708 = vmatmul.msk.bf16.gmra.mxu0 %vm720_vm3, %v2234_v21  ;;  %v1087_v21 = vld [vmem:[%s5247_s6 + $0x48] sm:$0xe] }
  0xa8   : > { %4483 = vmatmul.msk.bf16.gmra.mxu1 %vm720_vm3, %v5024_v24  ;;  %v1957_v24 = vshrl.u32 %v4669_v12, 16  ;;  %v4501_v42 = vrot.slane %v1087_v21, 9  ;;  %v1992_v21 = vrot.slane %v1990_v6, 5 }
  0xaa   : > { %v5550_v34 = vpop.f32.mrf.mxu0  ;;  %v1959_v60 = vrot.slane %v1957_v24, 4  ;;  %v5045_v24 = vld [vmem:[%s5247_s6 + $0x54] sm:$0xff]  ;;  %v1997_v22 = vor.u32 %v1996_v38, %v1992_v21 }
  0xab   : > { %v5556_v41 = vpop.f32.mrf.mxu3 }
  0xac   : > { %v1963_v53 = vor.u32 %v1962_v39, %v1959_v60  ;;  %v1187_v39 = vsel %vm5442_vm6, %v1185_v27, %v1186_v26  ;;  %v1998_v54 = vrot.slane %v1997_v22, 4 }
  0xad   : > { %4521 = vmatmul.msk.bf16.gmra.mxu2 %vm720_vm3, %v1283_v35  ;;  %v1179_v35 = vrot.slane %v5336_v51, 5 }
  0xaf   : > { %v5562_v50 = vpop.f32.mrf.mxu1  ;;  %v5565_v58 = vpop.f32.mrf.mxu2  ;;  %v1180_v51 = vsel %vm5442_vm6, %v1178_v33, %v1179_v35  ;;  %v4674_v33 = vld [vmem:[%s5247_s6 + $0x68] sm:$0x1] }
  0xb0   : > { %v1260_v56 = vunpack.c.l.b16 %v1180_v51 }
  0xb2   : > { %4639 = vmatmul.msk.bf16.gmra.mxu3 %vm720_vm3, %v5043_v48  ;;  %v5573_v1 = vpop.f32.mrf.mxu0  ;;  %v1177_v48 = vsel %vm5442_vm6, %v4501_v42, %v1176_v14  ;;  %v2212_v42 = vunpack.c.l.b16 %v1979_v13 }
  0xb3   : > { %v5575_v59 = vpop.f32.mrf.mxu3  ;;  %v1259_v55 = vunpack.c.l.b16 %v1177_v48 }
  0xb5   : > { %v1285_v3 = vpack.c.b16 %v1260_v56, %v1259_v55  ;;  %v4675_v55 = vld [vmem:[%s5247_s6 + $0x6c] sm:$0xf]  ;;  %v4676_v56 = vld [vmem:[%s5247_s6 + $0x70] sm:$0xf] }
  0xb6   : > { %v2005_v6 = vshrl.u32 %v4675_v55, 16  ;;  %v2014_v8 = vshll.u32 %v4676_v56, 16 }
  0xb7   : > { %4709 = vmatmul.msk.bf16.gmra.mxu0 %vm720_vm3, %v2235_v0  ;;  %v5579_v23 = vpop.f32.mrf.mxu1  ;;  %v1964_v0 = vrot.slane %v1963_v53, 4 }
  0xb8   : > { %4484 = vmatmul.msk.bf16.gmra.mxu1 %vm720_vm3, %v5025_v4  ;;  %v1981_v4 = vshrl.u32 %v4672_v62, 16  ;;  %v2007_v26 = vrot.slane %v2005_v6, 4  ;;  %v4679_v6 = vld [vmem:[%s5247_s6 + $0x7c] sm:$0xf] }
  0xb9   : > { %v1969_v12 = vsel %vm5259_vm2, %v1964_v0, %v1968_v43  ;;  %v2000_v43 = vshll.u32 %v4674_v33, 16 }
  0xba   : > { %v5582_v11 = vpop.f32.mrf.mxu2  ;;  %v1983_v17 = vrot.slane %v1981_v4, 4 }
  0xbb   : > { %v2002_v15 = vrot.slane %v2000_v43, 5 }
  0xbc   : > { %v1987_v37 = vor.u32 %v1986_v18, %v1983_v17  ;;  %v5046_v18 = vld [vmem:[%s5247_s6 + $0x60] sm:$0xff] }
  0xbd   : > { %4522 = vmatmul.msk.bf16.gmra.mxu2 %vm720_vm3, %v1284_v10  ;;  %v1088_v10 = vld [vmem:[%s5247_s6 + $0x54] sm:$0xe]  ;;  %v2003_v20 = vsel %vm5259_vm2, %v1998_v54, %v2002_v15 }
  0xbe   : > { %v5592_v29 = vpop.f32.mrf.mxu0  ;;  %v4502_v16 = vrot.slane %v1088_v10, 9  ;;  %v1988_v53 = vrot.slane %v1987_v37, 4  ;;  %v2018_v10 = vshrl.u32 %v4676_v56, 16  ;;  %v4677_v37 = vld [vmem:[%s5247_s6 + $0x74] sm:$0x1] }
  0xbf   : > { %v5596_v32 = vpop.f32.mrf.mxu3 }
  0xc0   : > { %v1184_v60 = vsel %vm5442_vm6, %v4502_v16, %v1183_v7  ;;  %v1993_v0 = vsel %vm5259_vm2, %v1988_v53, %v1992_v21  ;;  %v2008_v7 = vshll.u32 %v4675_v55, 16  ;;  %v4503_v16 = vrot.slane %v1089_v5, 9  ;;  %v4678_v5 = vld [vmem:[%s5247_s6 + $0x78] sm:$0xf] }
  0xc1   : > { %v5599_v45 = vpop.f32.mrf.mxu1  ;;  %v1261_v51 = vunpack.c.l.b16 %v1184_v60  ;;  %v2213_v21 = vunpack.c.l.b16 %v1993_v0 }
  0xc2   : > { %4640 = vmatmul.msk.bf16.gmra.mxu3 %vm720_vm3, %v5044_v30  ;;  %v5603_v47 = vpop.f32.mrf.mxu2  ;;  %v2211_v30 = vunpack.c.l.b16 %v1969_v12  ;;  %v5111_v12 = vld [vmem:[%s5247_s6 + $0x68] sm:$0x1]  ;;  %v2010_v38 = vrot.slane %v2008_v7, 5  ;;  %v5112_v7 = vld [vmem:[%s5247_s6 + $0x70] sm:$0xf] }
  0xc3   : > { %v1193_v13 = vrot.slane %v5111_v12, 5  ;;  %v1090_v12 = vld [vmem:[%s5247_s6 + $0x6c] sm:$0xe] }
  0xc4   : > { %v2237_v44 = vpack.c.b16 %v2212_v42, %v2211_v30  ;;  %v2016_v30 = vrot.slane %v2014_v8, 5  ;;  %v2020_v42 = vrot.slane %v2018_v10, 4  ;;  %v2011_v43 = vor.u32 %v2010_v38, %v2007_v26  ;;  %v5113_v38 = vld [vmem:[%s5247_s6 + $0x74] sm:$0x1] }
  0xc5   : > { %v1197_v8 = vrot.slane %v5112_v7, 5 }
  0xc6   : > { %v5610_v57 = vpop.f32.mrf.mxu0 }
  0xc7   : > { %4710 = vmatmul.msk.bf16.gmra.mxu0 %vm720_vm3, %v2236_v49  ;;  %v5615_v63 = vpop.f32.mrf.mxu3  ;;  %v1262_v49 = vunpack.c.l.b16 %v1187_v39 }
  0xc8   : > { %4485 = vmatmul.msk.bf16.gmra.mxu1 %vm720_vm3, %v5026_v52 }
  0xc9   : > { %v5619_v9 = vpop.f32.mrf.mxu1  ;;  %v1286_v62 = vpack.c.b16 %v1262_v49, %v1261_v51  ;;  %v5028_v49 = vld [vmem:[%s5247_s6 + $0x60] sm:$0xff] }
  0xcd   : > { %v5626_v14 = vpop.f32.mrf.mxu2  ;;  %4523 = vmatmul.msk.bf16.gmra.mxu2 %vm720_vm3, %v1285_v3  ;;  %v1190_v3 = vrot.slane %v5110_v2, 5 }
  0xcf   : > { %v1192_v27 = vrot.slane %v1190_v3, 4  ;;  %v1191_v60 = vsel %vm5442_vm6, %v4503_v16, %v1190_v3  ;;  %v2042_v16 = vshrl.u32 %v4679_v6, 16 }
  0xd0   : > { %v5632_v35 = vpop.f32.mrf.mxu0  ;;  %v1263_v15 = vunpack.c.l.b16 %v1191_v60  ;;  %v4504_v60 = vrot.slane %v1090_v12, 9 }
  0xd1   : > { %v5634_v36 = vpop.f32.mrf.mxu3  ;;  %v1194_v39 = vsel %vm5442_vm6, %v1192_v27, %v1193_v13 }
  0xd2   : > { %4641 = vmatmul.msk.bf16.gmra.mxu3 %vm720_vm3, %v5045_v24  ;;  %v2214_v24 = vunpack.c.l.b16 %v2003_v20  ;;  %v1264_v55 = vunpack.c.l.b16 %v1194_v39  ;;  %v1199_v39 = vrot.slane %v1197_v8, 4 }
  0xd4   : > { %v2238_v22 = vpack.c.b16 %v2214_v24, %v2213_v21  ;;  %v1287_v3 = vpack.c.b16 %v1264_v55, %v1263_v15  ;;  %v2032_v21 = vshll.u32 %v4678_v5, 16  ;;  %v2038_v24 = vshll.u32 %v4679_v6, 16 }
  0xd5   : > { %v5642_v48 = vpop.f32.mrf.mxu1  ;;  %v5644_v52 = vpop.f32.mrf.mxu2  ;;  %v2044_v15 = vrot.slane %v2042_v16, 4 }
  0xd7   : > { %4711 = vmatmul.msk.bf16.gmra.mxu0 %vm720_vm3, %v2237_v44  ;;  %v2021_v44 = vor.u32 %v2020_v42, %v2016_v30  ;;  %v1200_v42 = vrot.slane %v5113_v38, 5 }
  0xd8   : > { %4486 = vmatmul.msk.bf16.gmra.mxu1 %vm720_vm3, %v5027_v46  ;;  %v5650_v61 = vpop.f32.mrf.mxu0  ;;  %v2024_v46 = vshll.u32 %v4677_v37, 16  ;;  %v5047_v37 = vld [vmem:[%s5247_s6 + $0x6c] sm:$0xff] }
  0xd9   : > { %v5657_v4 = vpop.f32.mrf.mxu3  ;;  %v2022_v0 = vrot.slane %v2021_v44, 4 }
  0xda   : > { %v2026_v20 = vrot.slane %v2024_v46, 5 }
  0xdd   : > { %4524 = vmatmul.msk.bf16.gmra.mxu2 %vm720_vm3, %v1286_v62  ;;  %v5662_v17 = vpop.f32.mrf.mxu1  ;;  %v2012_v62 = vrot.slane %v2011_v43, 4 }
  0xdf   : > { %v2017_v10 = vsel %vm5259_vm2, %v2012_v62, %v2016_v30  ;;  %v4680_v62 = vld [vmem:[%s5247_s6 + $0x80] sm:$0x1] }
  0xe0   : > { %v5665_v33 = vpop.f32.mrf.mxu2 }
  0xe2   : > { %4642 = vmatmul.msk.bf16.gmra.mxu3 %vm720_vm3, %v5046_v18  ;;  %v2029_v18 = vshrl.u32 %v4678_v5, 16  ;;  %v5029_v5 = vld [vmem:[%s5247_s6 + $0x6c] sm:$0xff] }
  0xe4   : > { %v5673_v51 = vpop.f32.mrf.mxu0  ;;  %v2031_v46 = vrot.slane %v2029_v18, 4 }
  0xe5   : > { %v5676_v53 = vpop.f32.mrf.mxu3  ;;  %v1001_v54 = vpop.f32.mrf.mxu1 }
  0xe6   : > { %v1002_v56 = vadd.f32 %v1001_v54, %v5550_v34  ;;  %v2027_v34 = vsel %vm5259_vm2, %v2022_v0, %v2026_v20  ;;  %v2040_v54 = vrot.slane %v2038_v24, 5  ;;  %v1198_v0 = vsel %vm5442_vm6, %v4504_v60, %v1197_v8 }
  0xe7   : > { %4712 = vmatmul.msk.bf16.gmra.mxu0 %vm720_vm3, %v2238_v22  ;;  %v2215_v22 = vunpack.c.l.b16 %v2017_v10  ;;  %v2216_v43 = vunpack.c.l.b16 %v2027_v34  ;;  %v2048_v10 = vshll.u32 %v4680_v62, 16 }
  0xe8   : > { %v5680_v2 = vpop.f32.mrf.mxu2  ;;  %4487 = vmatmul.msk.bf16.gmra.mxu1 %vm720_vm3, %v5028_v49  ;;  %v2034_v49 = vrot.slane %v2032_v21, 5  ;;  %v2045_v7 = vor.u32 %v2044_v15, %v2040_v54 }
  0xe9   : > { %v2239_v20 = vpack.c.b16 %v2216_v43, %v2215_v22  ;;  %v2050_v38 = vrot.slane %v2048_v10, 5  ;;  %v4682_v22 = vld [vmem:[%s5247_s6 + $0x88] sm:$0xf]  ;;  %v5114_v43 = vld [vmem:[%s5247_s6 + $0x7c] sm:$0xf] }
  0xea   : > { %v2035_v6 = vor.u32 %v2034_v49, %v2031_v46  ;;  %v1091_v46 = vld [vmem:[%s5247_s6 + $0x78] sm:$0xe] }
  0xec   : > { %v5691_v13 = vpop.f32.mrf.mxu0  ;;  %v2036_v16 = vrot.slane %v2035_v6, 4 }
  0xed   : > { %v5693_v27 = vpop.f32.mrf.mxu3  ;;  %4525 = vmatmul.msk.bf16.gmra.mxu2 %vm720_vm3, %v1287_v3  ;;  %v1003_v26 = vpop.f32.mrf.mxu1 }
  0xee   : > { %v1004_v30 = vadd.f32 %v1003_v26, %v5573_v1  ;;  %v1201_v1 = vsel %vm5442_vm6, %v1199_v39, %v1200_v42  ;;  %v2046_v26 = vrot.slane %v2045_v7, 4  ;;  %v4681_v42 = vld [vmem:[%s5247_s6 + $0x84] sm:$0xf]  ;;  %v5048_v7 = vld [vmem:[%s5247_s6 + $0x78] sm:$0xff] }
  0xef   : > { %v1266_v18 = vunpack.c.l.b16 %v1201_v1  ;;  %v2056_v49 = vshll.u32 %v4681_v42, 16  ;;  %v2066_v1 = vshrl.u32 %v4682_v22, 16 }
  0xf0   : > { %v1358_v44 = vpop.f32.mrf.mxu2  ;;  %v2051_v62 = vsel %vm5259_vm2, %v2046_v26, %v2050_v38 }
  0xf1   : > { %v1438_v55 = vadd.f32 %v1358_v44, %v1002_v56  ;;  %v1265_v56 = vunpack.c.l.b16 %v1198_v0  ;;  %v1204_v44 = vrot.slane %v5114_v43, 5  ;;  %v2062_v0 = vshll.u32 %v4682_v22, 16 }
  0xf2   : > { %4643 = vmatmul.msk.bf16.gmra.mxu3 %vm720_vm3, %v5047_v37  ;;  %v2068_v26 = vrot.slane %v2066_v1, 4 }
  0xf3   : > { %v1288_v39 = vpack.c.b16 %v1266_v18, %v1265_v56 }
  0xf4   : > { %v2310_v3 = vpop.f32.mrf.mxu0 }
  0xf5   : > { %v1652_v34 = vpop.f32.mrf.mxu3  ;;  %v1006_v12 = vpop.f32.mrf.mxu1 }
  0xf6   : > { %v1732_v21 = vadd.f32 %v1652_v34, %v1438_v55  ;;  %v1007_v8 = vadd.f32 %v1006_v12, %v5592_v29  ;;  %v2053_v29 = vshrl.u32 %v4681_v42, 16  ;;  %v2041_v55 = vsel %vm5259_vm2, %v2036_v16, %v2040_v54 }
  0xf7   : > { %4713 = vmatmul.msk.bf16.gmra.mxu0 %vm720_vm3, %v2239_v20  ;;  %v5115_v20 = vld [vmem:[%s5247_s6 + $0x80] sm:$0x1]  ;;  %v4505_v34 = vrot.slane %v1091_v46, 9  ;;  %v1206_v12 = vrot.slane %v1204_v44, 4  ;;  %v2217_v56 = vunpack.c.l.b16 %v2041_v55  ;;  %v2218_v54 = vunpack.c.l.b16 %v2051_v62 }
  0xf8   : > { %v1360_v24 = vpop.f32.mrf.mxu2  ;;  %4488 = vmatmul.msk.bf16.gmra.mxu1 %vm720_vm3, %v5029_v5  ;;  %v5710_v37 = vadd.f32 %v2310_v3, %v1732_v21  ;;  %v1207_v3 = vrot.slane %v5115_v20, 5  ;;  %v2055_v18 = vrot.slane %v2053_v29, 4  ;;  %v2058_v21 = vrot.slane %v2056_v49, 5  ;;  %v5030_v29 = vld [vmem:[%s5247_s6 + $0x78] sm:$0xff] }
  0xf9   : > { %v1439_v60 = vadd.f32 %v1360_v24, %v1004_v30  ;;  %v2064_v16 = vrot.slane %v2062_v0, 5  ;;  %v2240_v22 = vpack.c.b16 %v2218_v54, %v2217_v56  ;;  %v4685_v56 = vld [vmem:[%s5247_s6 + $0x94] sm:$0xf]  ;;  %v5116_v54 = vld [vmem:[%s5247_s6 + $0x88] sm:$0xf] }
  0xfa   : > { %v2059_v43 = vor.u32 %v2058_v21, %v2055_v18  ;;  %v1211_v18 = vrot.slane %v5116_v54, 5  ;;  %v1092_v21 = vld [vmem:[%s5247_s6 + $0x84] sm:$0xe] }
  0xfb   : > { %v2069_v49 = vor.u32 %v2068_v26, %v2064_v16 }
  0xfc   : > { %v2312_v15 = vpop.f32.mrf.mxu0  ;;  %v2060_v20 = vrot.slane %v2059_v43, 4 }
  0xfd   : > { %v1654_v30 = vpop.f32.mrf.mxu3  ;;  %4526 = vmatmul.msk.bf16.gmra.mxu2 %vm720_vm3, %v1288_v39  ;;  %v1008_v5 = vpop.f32.mrf.mxu1  ;;  %v4683_v39 = vld [vmem:[%s5247_s6 + $0x8c] sm:$0x1] }
  0xfe   : > { %v1733_v6 = vadd.f32 %v1654_v30, %v1439_v60  ;;  %v1009_v10 = vadd.f32 %v1008_v5, %v5610_v57  ;;  %v1205_v60 = vsel %vm5442_vm6, %v4505_v34, %v1204_v44  ;;  %v1208_v57 = vsel %vm5442_vm6, %v1206_v12, %v1207_v3 }
  0xff   : > { %v2072_v55 = vshll.u32 %v4683_v39, 16  ;;  %v1268_v0 = vunpack.c.l.b16 %v1208_v57  ;;  %v2070_v30 = vrot.slane %v2069_v49, 4  ;;  %v2090_v57 = vshrl.u32 %v4685_v56, 16  ;;  %v5049_v49 = vld [vmem:[%s5247_s6 + $0x84] sm:$0xff] }
 0x100   : > { %v1363_v24 = vpop.f32.mrf.mxu2  ;;  %v5723_v38 = vadd.f32 %v2312_v15, %v1733_v6  ;;  %v4684_v6 = vld [vmem:[%s5247_s6 + $0x90] sm:$0xf] }
 0x101   : > { %v1440_v42 = vadd.f32 %v1363_v24, %v1007_v8  ;;  %v1267_v8 = vunpack.c.l.b16 %v1205_v60  ;;  %v2074_v5 = vrot.slane %v2072_v55, 5  ;;  %v2077_v24 = vshrl.u32 %v4684_v6, 16 }
 0x102   : > { %4644 = vmatmul.msk.bf16.gmra.mxu3 %vm720_vm3, %v5048_v7  ;;  %v2080_v39 = vshll.u32 %v4684_v6, 16  ;;  %v2086_v60 = vshll.u32 %v4685_v56, 16  ;;  %v4506_v55 = vrot.slane %v1092_v21, 9 }
 0x103   : > { %v1289_v12 = vpack.c.b16 %v1268_v0, %v1267_v8  ;;  %v2079_v0 = vrot.slane %v2077_v24, 4 }
 0x104   : > { %v2315_v46 = vpop.f32.mrf.mxu0 }
 0x105   : > { %v1657_v62 = vpop.f32.mrf.mxu3  ;;  %v1011_v15 = vpop.f32.mrf.mxu1 }
 0x106   : > { %v1734_v1 = vadd.f32 %v1657_v62, %v1440_v42  ;;  %v1012_v44 = vadd.f32 %v1011_v15, %v5632_v35  ;;  %v2065_v35 = vsel %vm5259_vm2, %v2060_v20, %v2064_v16  ;;  %v2075_v42 = vsel %vm5259_vm2, %v2070_v30, %v2074_v5 }
 0x107   : > { %4714 = vmatmul.msk.bf16.gmra.mxu0 %vm720_vm3, %v2240_v22  ;;  %v5117_v22 = vld [vmem:[%s5247_s6 + $0x8c] sm:$0x1]  ;;  %v1213_v62 = vrot.slane %v1211_v18, 4  ;;  %v2219_v15 = vunpack.c.l.b16 %v2065_v35  ;;  %v2220_v8 = vunpack.c.l.b16 %v2075_v42  ;;  %v2082_v20 = vrot.slane %v2080_v39, 5  ;;  %v5031_v35 = vld [vmem:[%s5247_s6 + $0x84] sm:$0xff] }
 0x108   : > { %v1365_v3 = vpop.f32.mrf.mxu2  ;;  %4489 = vmatmul.msk.bf16.gmra.mxu1 %vm720_vm3, %v5030_v29  ;;  %v5736_v7 = vadd.f32 %v2315_v46, %v1734_v1  ;;  %v1214_v43 = vrot.slane %v5117_v22, 5  ;;  %v2092_v30 = vrot.slane %v2090_v57, 4 }
 0x109   : > { %v1441_v34 = vadd.f32 %v1365_v3, %v1009_v10  ;;  %v2088_v3 = vrot.slane %v2086_v60, 5  ;;  %v2241_v56 = vpack.c.b16 %v2220_v8, %v2219_v15  ;;  %v2083_v21 = vor.u32 %v2082_v20, %v2079_v0  ;;  %v4688_v15 = vld [vmem:[%s5247_s6 + $0xa0] sm:$0xf]  ;;  %v1093_v20 = vld [vmem:[%s5247_s6 + $0x90] sm:$0xe] }
 0x10b   : > { %v2093_v24 = vor.u32 %v2092_v30, %v2088_v3 }
 0x10c   : > { %v2317_v26 = vpop.f32.mrf.mxu0 }
 0x10d   : > { %v1659_v10 = vpop.f32.mrf.mxu3  ;;  %4527 = vmatmul.msk.bf16.gmra.mxu2 %vm720_vm3, %v1289_v12  ;;  %v1013_v46 = vpop.f32.mrf.mxu1  ;;  %v4686_v12 = vld [vmem:[%s5247_s6 + $0x98] sm:$0x1] }
 0x10e   : > { %v1735_v29 = vadd.f32 %v1659_v10, %v1441_v34  ;;  %v1014_v16 = vadd.f32 %v1013_v46, %v5650_v61  ;;  %v1212_v61 = vsel %vm5442_vm6, %v4506_v55, %v1211_v18  ;;  %v1215_v34 = vsel %vm5442_vm6, %v1213_v62, %v1214_v43  ;;  %v4687_v18 = vld [vmem:[%s5247_s6 + $0x9c] sm:$0xf] }
 0x10f   : > { %v2096_v42 = vshll.u32 %v4686_v12, 16  ;;  %v1270_v60 = vunpack.c.l.b16 %v1215_v34  ;;  %v2084_v10 = vrot.slane %v2083_v21, 4  ;;  %v2094_v46 = vrot.slane %v2093_v24, 4 }
 0x110   : > { %v1368_v1 = vpop.f32.mrf.mxu2  ;;  %v5749_v5 = vadd.f32 %v2317_v26, %v1735_v29  ;;  %v2101_v8 = vshrl.u32 %v4687_v18, 16  ;;  %v2104_v0 = vshll.u32 %v4687_v18, 16  ;;  %v2114_v34 = vshrl.u32 %v4688_v15, 16 }
 0x111   : > { %v1442_v6 = vadd.f32 %v1368_v1, %v1012_v44  ;;  %v1269_v44 = vunpack.c.l.b16 %v1212_v61  ;;  %v2098_v29 = vrot.slane %v2096_v42, 5  ;;  %v5118_v1 = vld [vmem:[%s5247_s6 + $0x94] sm:$0xf]  ;;  %v2110_v61 = vshll.u32 %v4688_v15, 16 }
 0x112   : > { %4645 = vmatmul.msk.bf16.gmra.mxu3 %vm720_vm3, %v5049_v49  ;;  %v2103_v21 = vrot.slane %v2101_v8, 4  ;;  %v2106_v24 = vrot.slane %v2104_v0, 5 }
 0x113   : > { %v1290_v62 = vpack.c.b16 %v1270_v60, %v1269_v44  ;;  %v2099_v12 = vsel %vm5259_vm2, %v2094_v46, %v2098_v29  ;;  %v4507_v44 = vrot.slane %v1093_v20, 9 }
 0x114   : > { %v2320_v54 = vpop.f32.mrf.mxu0  ;;  %v2107_v15 = vor.u32 %v2106_v24, %v2103_v21  ;;  %v4691_v21 = vld [vmem:[%s5247_s6 + $0xac] sm:$0xf] }
 0x115   : > { %v1662_v39 = vpop.f32.mrf.mxu3  ;;  %v1016_v26 = vpop.f32.mrf.mxu1 }
 0x116   : > { %v1736_v57 = vadd.f32 %v1662_v39, %v1442_v6  ;;  %v1017_v22 = vadd.f32 %v1016_v26, %v5673_v51  ;;  %v1218_v51 = vrot.slane %v5118_v1, 5  ;;  %v2089_v6 = vsel %vm5259_vm2, %v2084_v10, %v2088_v3  ;;  %v5050_v39 = vld [vmem:[%s5247_s6 + $0x90] sm:$0xff] }
 0x117   : > { %4715 = vmatmul.msk.bf16.gmra.mxu0 %vm720_vm3, %v2241_v56  ;;  %v5119_v56 = vld [vmem:[%s5247_s6 + $0x98] sm:$0x1]  ;;  %v2221_v60 = vunpack.c.l.b16 %v2089_v6  ;;  %v2116_v10 = vrot.slane %v2114_v34, 4  ;;  %v5032_v1 = vld [vmem:[%s5247_s6 + $0x90] sm:$0xff] }
 0x118   : > { %v1370_v43 = vpop.f32.mrf.mxu2  ;;  %4490 = vmatmul.msk.bf16.gmra.mxu1 %vm720_vm3, %v5031_v35  ;;  %v5762_v49 = vadd.f32 %v2320_v54, %v1736_v57  ;;  %v1221_v54 = vrot.slane %v5119_v56, 5  ;;  %v1220_v3 = vrot.slane %v1218_v51, 4  ;;  %v2222_v57 = vunpack.c.l.b16 %v2099_v12 }
 0x119   : > { %v1443_v55 = vadd.f32 %v1370_v43, %v1014_v16  ;;  %v2112_v43 = vrot.slane %v2110_v61, 5  ;;  %v2108_v56 = vrot.slane %v2107_v15, 4  ;;  %v5121_v15 = vld [vmem:[%s5247_s6 + $0xa4] sm:$0x1] }
 0x11a   : > { %v2242_v8 = vpack.c.b16 %v2222_v57, %v2221_v60  ;;  %v5120_v60 = vld [vmem:[%s5247_s6 + $0xa0] sm:$0xf] }
 0x11b   : > { %v2117_v20 = vor.u32 %v2116_v10, %v2112_v43  ;;  %v1225_v57 = vrot.slane %v5120_v60, 5  ;;  %v1094_v10 = vld [vmem:[%s5247_s6 + $0x9c] sm:$0xe] }
 0x11c   : > { %v2322_v30 = vpop.f32.mrf.mxu0 }
 0x11d   : > { %v1664_v16 = vpop.f32.mrf.mxu3  ;;  %4528 = vmatmul.msk.bf16.gmra.mxu2 %vm720_vm3, %v1290_v62  ;;  %v1018_v35 = vpop.f32.mrf.mxu1  ;;  %v4689_v62 = vld [vmem:[%s5247_s6 + $0xa4] sm:$0x1] }
 0x11e   : > { %v1737_v42 = vadd.f32 %v1664_v16, %v1443_v55  ;;  %v1019_v26 = vadd.f32 %v1018_v35, %v5691_v13  ;;  %v1219_v55 = vsel %vm5442_vm6, %v4507_v44, %v1218_v51  ;;  %v1222_v13 = vsel %vm5442_vm6, %v1220_v3, %v1221_v54  ;;  %v4690_v16 = vld [vmem:[%s5247_s6 + $0xa8] sm:$0xf] }
 0x11f   : > { %v2120_v6 = vshll.u32 %v4689_v62, 16  ;;  %v1272_v61 = vunpack.c.l.b16 %v1222_v13  ;;  %v2118_v54 = vrot.slane %v2117_v20, 4  ;;  %v2125_v44 = vshrl.u32 %v4690_v16, 16 }
 0x120   : > { %v1373_v18 = vpop.f32.mrf.mxu2  ;;  %v5775_v46 = vadd.f32 %v2322_v30, %v1737_v42  ;;  %v2113_v3 = vsel %vm5259_vm2, %v2108_v56, %v2112_v43  ;;  %v2138_v62 = vshrl.u32 %v4691_v21, 16 }
 0x121   : > { %v1444_v29 = vadd.f32 %v1373_v18, %v1017_v22  ;;  %v1271_v22 = vunpack.c.l.b16 %v1219_v55  ;;  %v2122_v35 = vrot.slane %v2120_v6, 5  ;;  %v2128_v18 = vshll.u32 %v4690_v16, 16  ;;  %v5051_v6 = vld [vmem:[%s5247_s6 + $0x9c] sm:$0xff] }
 0x122   : > { %4646 = vmatmul.msk.bf16.gmra.mxu3 %vm720_vm3, %v5050_v39  ;;  %v2127_v43 = vrot.slane %v2125_v44, 4 }
 0x123   : > { %v1291_v39 = vpack.c.b16 %v1272_v61, %v1271_v22  ;;  %v2123_v13 = vsel %vm5259_vm2, %v2118_v54, %v2122_v35  ;;  %v1227_v22 = vrot.slane %v1225_v57, 4  ;;  %v2130_v61 = vrot.slane %v2128_v18, 5  ;;  %v4692_v35 = vld [vmem:[%s5247_s6 + $0xb0] sm:$0x1] }
 0x124   : > { %v2325_v0 = vpop.f32.mrf.mxu0  ;;  %v2224_v56 = vunpack.c.l.b16 %v2123_v13 }
 0x125   : > { %v1667_v30 = vpop.f32.mrf.mxu3  ;;  %v1021_v12 = vpop.f32.mrf.mxu1  ;;  %v2131_v44 = vor.u32 %v2130_v61, %v2127_v43 }
 0x126   : > { %v1738_v34 = vadd.f32 %v1667_v30, %v1444_v29  ;;  %v2134_v29 = vshll.u32 %v4691_v21, 16  ;;  %v4508_v30 = vrot.slane %v1094_v10, 9  ;;  %v5033_v10 = vld [vmem:[%s5247_s6 + $0x9c] sm:$0xff] }
 0x127   : > { %4716 = vmatmul.msk.bf16.gmra.mxu0 %vm720_vm3, %v2242_v8  ;;  %v1228_v8 = vrot.slane %v5121_v15, 5 }
 0x128   : > { %v1375_v51 = vpop.f32.mrf.mxu2  ;;  %4491 = vmatmul.msk.bf16.gmra.mxu1 %vm720_vm3, %v5032_v1  ;;  %v5788_v24 = vadd.f32 %v2325_v0, %v1738_v34  ;;  %v2223_v0 = vunpack.c.l.b16 %v2113_v3  ;;  %v1022_v34 = vadd.f32 %v1021_v12, %v5526_v40  ;;  %v2136_v16 = vrot.slane %v2134_v29, 5 }
 0x129   : > { %v1445_v42 = vadd.f32 %v1375_v51, %v1019_v26  ;;  %v2140_v51 = vrot.slane %v2138_v62, 4  ;;  %v2144_v3 = vshll.u32 %v4692_v35, 16 }
 0x12a   : > { %v2243_v40 = vpack.c.b16 %v2224_v56, %v2223_v0  ;;  %v4693_v0 = vld [vmem:[%s5247_s6 + $0xb4] sm:$0xf] }
 0x12b   : > { %v2141_v12 = vor.u32 %v2140_v51, %v2136_v16  ;;  %v2146_v43 = vrot.slane %v2144_v3, 5  ;;  %v2152_v35 = vshll.u32 %v4693_v0, 16 }
 0x12c   : > { %v2327_v55 = vpop.f32.mrf.mxu0 }
 0x12d   : > { %v1669_v26 = vpop.f32.mrf.mxu3  ;;  %4529 = vmatmul.msk.bf16.gmra.mxu2 %vm720_vm3, %v1291_v39  ;;  %v1023_v1 = vpop.f32.mrf.mxu1  ;;  %v1229_v39 = vsel %vm5442_vm6, %v1227_v22, %v1228_v8  ;;  %v2142_v8 = vrot.slane %v2141_v12, 4 }
 0x12e   : > { %v1739_v20 = vadd.f32 %v1669_v26, %v1445_v42  ;;  %v1226_v42 = vsel %vm5442_vm6, %v4508_v30, %v1225_v57  ;;  %v1274_v13 = vunpack.c.l.b16 %v1229_v39  ;;  %v2132_v26 = vrot.slane %v2131_v44, 4  ;;  %v5123_v44 = vld [vmem:[%s5247_s6 + $0xb0] sm:$0x1] }
 0x12f   : > { %v1024_v57 = vadd.f32 %v1023_v1, %v5542_v25  ;;  %v2149_v25 = vshrl.u32 %v4693_v0, 16  ;;  %v2147_v1 = vsel %vm5259_vm2, %v2142_v8, %v2146_v43 }
 0x130   : > { %v1378_v54 = vpop.f32.mrf.mxu2  ;;  %v5801_v21 = vadd.f32 %v2327_v55, %v1739_v20  ;;  %v1273_v55 = vunpack.c.l.b16 %v1226_v42  ;;  %v2137_v51 = vsel %vm5259_vm2, %v2132_v26, %v2136_v16 }
 0x131   : > { %v1446_v60 = vadd.f32 %v1378_v54, %v1022_v34  ;;  %v5122_v34 = vld [vmem:[%s5247_s6 + $0xac] sm:$0xf]  ;;  %v1095_v54 = vld [vmem:[%s5247_s6 + $0xa8] sm:$0xe] }
 0x132   : > { %4647 = vmatmul.msk.bf16.gmra.mxu3 %vm720_vm3, %v5051_v6  ;;  %v4694_v6 = vld [vmem:[%s5247_s6 + $0xb8] sm:$0xf]  ;;  %v1292_v61 = vpack.c.b16 %v1274_v13, %v1273_v55  ;;  %v1232_v56 = vrot.slane %v5122_v34, 5  ;;  %v2225_v55 = vunpack.c.l.b16 %v2137_v51  ;;  %v2226_v13 = vunpack.c.l.b16 %v2147_v1  ;;  %v4695_v34 = vld [vmem:[%s5247_s6 + $0xbc] sm:$0x1] }
 0x133   : > { %v2162_v42 = vshrl.u32 %v4694_v6, 16 }
 0x134   : > { %v2330_v18 = vpop.f32.mrf.mxu0 }
 0x135   : > { %v1672_v29 = vpop.f32.mrf.mxu3  ;;  %v1026_v62 = vpop.f32.mrf.mxu1  ;;  %v2164_v43 = vrot.slane %v2162_v42, 4 }
 0x136   : > { %v1740_v15 = vadd.f32 %v1672_v29, %v1446_v60  ;;  %v2158_v60 = vshll.u32 %v4694_v6, 16  ;;  %v5052_v29 = vld [vmem:[%s5247_s6 + $0xa8] sm:$0xff]  ;;  %v1027_v26 = vadd.f32 %v1026_v62, %v5562_v50  ;;  %v2244_v50 = vpack.c.b16 %v2226_v13, %v2225_v55 }
 0x137   : > { %4717 = vmatmul.msk.bf16.gmra.mxu0 %vm720_vm3, %v2243_v40  ;;  %v1235_v40 = vrot.slane %v5123_v44, 5 }
 0x138   : > { %v1380_v20 = vpop.f32.mrf.mxu2  ;;  %4492 = vmatmul.msk.bf16.gmra.mxu1 %vm720_vm3, %v5033_v10  ;;  %v5814_v30 = vadd.f32 %v2330_v18, %v1740_v15  ;;  %v4509_v18 = vrot.slane %v1095_v54, 9  ;;  %v1234_v10 = vrot.slane %v1232_v56, 4  ;;  %v2151_v15 = vrot.slane %v2149_v25, 4  ;;  %v5034_v25 = vld [vmem:[%s5247_s6 + $0xa8] sm:$0xff] }
 0x139   : > { %v1447_v22 = vadd.f32 %v1380_v20, %v1024_v57  ;;  %v2154_v57 = vrot.slane %v2152_v35, 5  ;;  %v5826_v8 = vrot.slane %v2158_v60, 5  ;;  %v2168_v60 = vshll.u32 %v4695_v34, 16 }
 0x13b   : > { %v2155_v62 = vor.u32 %v2154_v57, %v2151_v15  ;;  %v2165_v51 = vor.u32 %v2164_v43, %v5826_v8  ;;  %v2170_v15 = vrot.slane %v2168_v60, 5 }
 0x13c   : > { %v2332_v39 = vpop.f32.mrf.mxu0 }
 0x13d   : > { %v1674_v12 = vpop.f32.mrf.mxu3  ;;  %4530 = vmatmul.msk.bf16.gmra.mxu2 %vm720_vm3, %v1292_v61  ;;  %v1028_v3 = vpop.f32.mrf.mxu1  ;;  %v1233_v61 = vsel %vm5442_vm6, %v4509_v18, %v1232_v56  ;;  %v4696_v56 = vld [vmem:[%s5247_s6 + $0xc0] sm:$0xf]  ;;  %v5124_v18 = vld [vmem:[%s5247_s6 + $0x10] sm:$0xf] }
 0x13e   : > { %v1741_v16 = vadd.f32 %v1674_v12, %v1447_v22  ;;  %v1236_v22 = vsel %vm5442_vm6, %v1234_v10, %v1235_v40  ;;  %v1275_v1 = vunpack.c.l.b16 %v1233_v61  ;;  %v4697_v12 = vld [vmem:[%s5247_s6 + $0xc4] sm:$0xf]  ;;  %v2488_v40 = vrot.slane %v5124_v18, 5 }
 0x13f   : > { %v1276_v35 = vunpack.c.l.b16 %v1236_v22  ;;  %v1029_v10 = vadd.f32 %v1028_v3, %v5579_v23  ;;  %v2176_v57 = vshll.u32 %v4696_v56, 16  ;;  %v5125_v22 = vld [vmem:[%s5247_s6 + $0xb8] sm:$0xf]  ;;  %v1096_v3 = vld [vmem:[%s5247_s6 + $0xb4] sm:$0xe] }
 0x140   : > { %v1383_v0 = vpop.f32.mrf.mxu2  ;;  %v5828_v20 = vadd.f32 %v2332_v39, %v1741_v16  ;;  %v2156_v16 = vrot.slane %v2155_v62, 4  ;;  %v1239_v34 = vrot.slane %v5125_v22, 5  ;;  %v2490_v62 = vrot.slane %v2488_v40, 4  ;;  %v5053_v22 = vld [vmem:[%s5247_s6 + $0xb4] sm:$0xff] }
 0x141   : > { %v1448_v6 = vadd.f32 %v1383_v0, %v1027_v26  ;;  %v1293_v13 = vpack.c.b16 %v1276_v35, %v1275_v1  ;;  %v2173_v26 = vshrl.u32 %v4696_v56, 16  ;;  %v2182_v0 = vshll.u32 %v4697_v12, 16 }
 0x142   : > { %4648 = vmatmul.msk.bf16.gmra.mxu3 %vm720_vm3, %v5052_v29  ;;  %v2166_v29 = vrot.slane %v2165_v51, 4  ;;  %v5127_v51 = vld [vmem:[%s5247_s6 + $0x14] sm:$0x1]  ;;  %v2161_v1 = vsel %vm5259_vm2, %v2156_v16, %v5826_v8 }
 0x143   : > { %v2175_v56 = vrot.slane %v2173_v26, 4  ;;  %v2227_v16 = vunpack.c.l.b16 %v2161_v1 }
 0x144   : > { %v2335_v54 = vpop.f32.mrf.mxu0  ;;  %v2171_v35 = vsel %vm5259_vm2, %v2166_v29, %v2170_v15 }
 0x145   : > { %v1677_v42 = vpop.f32.mrf.mxu3  ;;  %v1031_v39 = vpop.f32.mrf.mxu1  ;;  %v2228_v29 = vunpack.c.l.b16 %v2171_v35 }
 0x146   : > { %v1742_v44 = vadd.f32 %v1677_v42, %v1448_v6  ;;  %v2186_v6 = vshrl.u32 %v4697_v12, 16  ;;  %v2491_v42 = vrot.slane %v5127_v51, 5  ;;  %v5856_v12 = vrot.slane %v2182_v0, 5 }
 0x147   : > { %4718 = vmatmul.msk.bf16.gmra.mxu0 %vm720_vm3, %v2244_v50  ;;  %v5126_v50 = vld [vmem:[%s5247_s6 + $0xbc] sm:$0x1]  ;;  %v1241_v51 = vrot.slane %v1239_v34, 4  ;;  %v1032_v8 = vadd.f32 %v1031_v39, %v5599_v45 }
 0x148   : > { %v1385_v55 = vpop.f32.mrf.mxu2  ;;  %4493 = vmatmul.msk.bf16.gmra.mxu1 %vm720_vm3, %v5034_v25  ;;  %v5844_v61 = vadd.f32 %v2335_v54, %v1742_v44  ;;  %v1242_v23 = vrot.slane %v5126_v50, 5  ;;  %v2178_v44 = vrot.slane %v2176_v57, 5  ;;  %v2188_v18 = vrot.slane %v2186_v6, 4 }
 0x149   : > { %v1449_v43 = vadd.f32 %v1385_v55, %v1029_v10  ;;  %v4721_v10 = vld [vmem:[%s5247_s6 + $0xc] sm:$0xe]  ;;  %v4510_v50 = vrot.slane %v1096_v3, 9  ;;  %v2492_v57 = vsel %vm5442_vm6, %v2490_v62, %v2491_v42  ;;  %v4893_v62 = vld [vmem:[%s5247_s6 + $0x18] sm:$0xf] }
 0x14a   : > { %6569 = vst [vmem:[#allocation2_spill] sm:$0xff] %v5844_v61  ;;  %v4737_v61 = vrot.slane %v4721_v10, 9  ;;  %v2179_v0 = vor.u32 %v2178_v44, %v2175_v56  ;;  %v2602_v3 = vunpack.c.l.b16 %v2492_v57  ;;  %v1243_v39 = vsel %vm5442_vm6, %v1241_v51, %v1242_v23  ;;  %v5035_v56 = vld [vmem:[%s5247_s6 + $0xb4] sm:$0xff]  ;;  %v5879_v44 = vld [vmem:[%s5247_s6 + $0x1c] sm:$0xf] }
 0x14b   : > { %v1240_v45 = vsel %vm5442_vm6, %v4510_v50, %v1239_v34  ;;  %v2189_v1 = vor.u32 %v2188_v18, %v5856_v12  ;;  %v1278_v34 = vunpack.c.l.b16 %v1243_v39  ;;  %v3167_v51 = vshrl.u32 %v4893_v62, 16 }
 0x14c   : > { %v2337_v25 = vpop.f32.mrf.mxu0  ;;  %v2489_v26 = vsel %vm5442_vm6, %v4737_v61, %v2488_v40  ;;  %v2245_v40 = vpack.c.b16 %v2228_v29, %v2227_v16  ;;  %v2180_v50 = vrot.slane %v2179_v0, 4  ;;  %v3170_v18 = vshll.u32 %v4893_v62, 16 }
 0x14d   : > { %v1679_v54 = vpop.f32.mrf.mxu3  ;;  %4531 = vmatmul.msk.bf16.gmra.mxu2 %vm720_vm3, %v1293_v13  ;;  %v1033_v60 = vpop.f32.mrf.mxu1  ;;  %v4698_v13 = vld [vmem:[%s5247_s6 + $0xc8] sm:$0x1]  ;;  %v2601_v6 = vunpack.c.l.b16 %v2489_v26  ;;  %v2190_v23 = vrot.slane %v2189_v1, 4  ;;  %v3180_v29 = vshrl.u32 %v5879_v44, 16  ;;  %v3169_v0 = vrot.slane %v3167_v51, 4 }
 0x14e   : > { %v1743_v55 = vadd.f32 %v1679_v54, %v1449_v43  ;;  %v2192_v61 = vshll.u32 %v4698_v13, 16  ;;  %v1034_v16 = vadd.f32 %v1033_v60, %v5619_v9  ;;  %v2185_v9 = vsel %vm5259_vm2, %v2180_v50, %v5856_v12  ;;  %v4895_v1 = vld [vmem:[%s5247_s6 + $0x20] sm:$0x1]  ;;  %v4896_v51 = vld [vmem:[%s5247_s6 + $0x24] sm:$0xf] }
 0x14f   : > { %v5872_v35 = vpack.c.b16 %v2602_v3, %v2601_v6  ;;  %v3172_v6 = vrot.slane %v3170_v18, 5  ;;  %v3186_v50 = vshll.u32 %v4895_v1, 16  ;;  %v5899_v18 = vld [vmem:[%s5247_s6 + $0x28] sm:$0xf] }
 0x150   : > { %v1388_v15 = vpop.f32.mrf.mxu2  ;;  %v5875_v42 = vadd.f32 %v2337_v25, %v1743_v55  ;;  %v2194_v25 = vrot.slane %v2192_v61, 5  ;;  %v3176_v55 = vshll.u32 %v5879_v44, 16 }
 0x151   : > { %v1450_v43 = vadd.f32 %v1388_v15, %v1032_v8  ;;  %v1277_v8 = vunpack.c.l.b16 %v1240_v45  ;;  %v3182_v45 = vrot.slane %v3180_v29, 4  ;;  %v3188_v29 = vrot.slane %v3186_v50, 5 }
 0x152   : > { %4649 = vmatmul.msk.bf16.gmra.mxu3 %vm720_vm3, %v5053_v22  ;;  %v2195_v60 = vsel %vm5259_vm2, %v2190_v23, %v2194_v25  ;;  %v3178_v3 = vrot.slane %v3176_v55, 5 }
 0x153   : > { %v1294_v57 = vpack.c.b16 %v1278_v34, %v1277_v8  ;;  %v3173_v8 = vor.u32 %v3172_v6, %v3169_v0  ;;  %v3194_v0 = vshll.u32 %v4896_v51, 16  ;;  %v3200_v6 = vshll.u32 %v5899_v18, 16 }
 0x154   : > { %v2340_v54 = vpop.f32.mrf.mxu0  ;;  %v3183_v34 = vor.u32 %v3182_v45, %v3178_v3 }
 0x155   : > { %v1682_v10 = vpop.f32.mrf.mxu3  ;;  %v1036_v22 = vpop.f32.mrf.mxu1  ;;  %v3174_v25 = vrot.slane %v3173_v8, 4 }
 0x156   : > { %v1744_v15 = vadd.f32 %v1682_v10, %v1450_v43  ;;  %v2230_v10 = vunpack.c.l.b16 %v2195_v60  ;;  %v1037_v12 = vadd.f32 %v1036_v22, %v5642_v48  ;;  %v3184_v55 = vrot.slane %v3183_v34, 4 }
 0x157   : > { %4719 = vmatmul.msk.bf16.gmra.mxu0 %vm720_vm3, %v2245_v40 }
 0x158   : > { %v1390_v13 = vpop.f32.mrf.mxu2  ;;  %4494 = vmatmul.msk.bf16.gmra.mxu1 %vm720_vm3, %v5035_v56  ;;  %v5886_v43 = vadd.f32 %v2340_v54, %v1744_v15  ;;  %v5054_v54 = vld [vmem:[%s5247_s6 + $0xc0] sm:$0xff]  ;;  %v2229_v56 = vunpack.c.l.b16 %v2185_v9  ;;  %v3204_v9 = vshrl.u32 %v5899_v18, 16  ;;  %v3189_v34 = vsel %vm5259_vm2, %v3184_v55, %v3188_v29  ;;  %v5925_v29 = vld [vmem:[%s5247_s6 + $0x2c] sm:$0x1] }
 0x159   : > { %v1451_v26 = vadd.f32 %v1390_v13, %v1034_v16  ;;  %v4963_v13 = vld [vmem:[%s5247_s6 + $0x18] sm:$0xe]  ;;  %v3554_v55 = vunpack.c.l.b16 %v3189_v34 }
 0x15a   : > { %v2246_v16 = vpack.c.b16 %v2230_v10, %v2229_v56  ;;  %v5129_v56 = vld [vmem:[%s5247_s6 + $0x20] sm:$0x1] }
 0x15b   : > { %v2498_v10 = vrot.slane %v5129_v56, 5 }
 0x15c   : > { %v2342_v39 = vpop.f32.mrf.mxu0 }
 0x15d   : > { %v1684_v40 = vpop.f32.mrf.mxu3  ;;  %4532 = vmatmul.msk.bf16.gmra.mxu2 %vm720_vm3, %v1294_v57  ;;  %v1038_v61 = vpop.f32.mrf.mxu1  ;;  %v3191_v57 = vshrl.u32 %v4896_v51, 16 }
 0x15e   : > { %v1745_v62 = vadd.f32 %v1684_v40, %v1451_v26  ;;  %v3842_v26 = vrot.slane %v5879_v44, 5  ;;  %v5128_v40 = vld [vmem:[%s5247_s6 + $0x1c] sm:$0xf]  ;;  %v3179_v44 = vsel %vm5259_vm2, %v3174_v25, %v3178_v3  ;;  %v3206_v3 = vrot.slane %v3204_v9, 4 }
 0x160   : > { %v1393_v15 = vpop.f32.mrf.mxu2  ;;  %v5904_v48 = vadd.f32 %v2342_v39, %v1745_v62  ;;  %v4979_v39 = vrot.slane %v4963_v13, 9  ;;  %v4722_v62 = vld [vmem:[%s5247_s6 + $0x18] sm:$0xe]  ;;  %v3844_v50 = vrot.slane %v3842_v26, 4 }
 0x161   : > { %v1452_v23 = vadd.f32 %v1393_v15, %v1037_v12  ;;  %v1039_v12 = vadd.f32 %v1038_v61, %v5662_v17  ;;  %v3845_v15 = vrot.slane %v4895_v1, 5  ;;  %v5058_v13 = vld [vmem:[%s5247_s6 + $0x18] sm:$0xff]  ;;  %v3553_v61 = vunpack.c.l.b16 %v3179_v44 }
 0x162   : > { %4650 = vmatmul.msk.bf16.gmra.mxu3 %vm720_vm3, %v5054_v54  ;;  %6570 = vst [vmem:[#allocation3_spill] sm:$0xff] %v5904_v48  ;;  %v2495_v54 = vrot.slane %v5128_v40, 5  ;;  %v5919_v40 = vrot.slane %v3200_v6, 5  ;;  %v3843_v48 = vsel %vm5442_vm6, %v4979_v39, %v3842_v26  ;;  %v3210_v26 = vshll.u32 %v5925_v29, 16 }
 0x163   : > { %v3585_v39 = vpack.c.b16 %v3554_v55, %v3553_v61  ;;  %v5130_v61 = vld [vmem:[%s5247_s6 + $0x28] sm:$0xf] }
 0x164   : > { %v2345_v22 = vpop.f32.mrf.mxu0  ;;  %v2497_v56 = vrot.slane %v2495_v54, 4  ;;  %v2502_v55 = vrot.slane %v5130_v61, 5 }
 0x165   : > { %v1687_v60 = vpop.f32.mrf.mxu3  ;;  %v1041_v45 = vpop.f32.mrf.mxu1 }
 0x166   : > { %v1746_v8 = vadd.f32 %v1687_v60, %v1452_v23  ;;  %v3193_v23 = vrot.slane %v3191_v57, 4  ;;  %v3196_v60 = vrot.slane %v3194_v0, 5  ;;  %v2499_v9 = vsel %vm5442_vm6, %v2497_v56, %v2498_v10  ;;  %v5944_v56 = vld [vmem:[%s5247_s6 + $0x34] sm:$0xf] }
 0x167   : > { %4720 = vmatmul.msk.bf16.gmra.mxu0 %vm720_vm3, %v2246_v16  ;;  %v4738_v16 = vrot.slane %v4722_v62, 9  ;;  %v1042_v62 = vadd.f32 %v1041_v45, %v5544_v28 }
 0x168   : > { %v1395_v51 = vpop.f32.mrf.mxu2  ;;  %4759 = vmatmul.msk.bf16.vlgmr.msra.gmra.mxu1 %vm720_vm3, %v5872_v35  ;;  %v5922_v17 = vadd.f32 %v2345_v22, %v1746_v8  ;;  %v3846_v35 = vsel %vm5442_vm6, %v3844_v50, %v3845_v15  ;;  %v3197_v57 = vor.u32 %v3196_v60, %v3193_v23  ;;  %v3207_v8 = vor.u32 %v3206_v3, %v5919_v40  ;;  %v4964_v3 = vld [vmem:[%s5247_s6 + $0x24] sm:$0xe] }
 0x169   : > { %v1453_v25 = vadd.f32 %v1395_v51, %v1039_v12  ;;  %v2496_v22 = vsel %vm5442_vm6, %v4738_v16, %v2495_v54  ;;  %v3955_v12 = vunpack.c.l.b16 %v3843_v48  ;;  %v3956_v34 = vunpack.c.l.b16 %v3846_v35 }
 0x16a   : > { %v2603_v15 = vunpack.c.l.b16 %v2496_v22  ;;  %v2604_v54 = vunpack.c.l.b16 %v2499_v9  ;;  %v3198_v23 = vrot.slane %v3197_v57, 4  ;;  %v3208_v10 = vrot.slane %v3207_v8, 4 }
 0x16b   : > { %v3212_v60 = vrot.slane %v3210_v26, 5  ;;  %v3849_v16 = vrot.slane %v5899_v18, 5  ;;  %v4980_v9 = vrot.slane %v4964_v3, 9  ;;  %v4723_v18 = vld [vmem:[%s5247_s6 + $0x24] sm:$0xe] }
 0x16c   : > { %v2347_v1 = vpop.f32.mrf.mxu0  ;;  %v2634_v45 = vpack.c.b16 %v2604_v54, %v2603_v15 }
 0x16d   : > { %v1689_v0 = vpop.f32.mrf.mxu3  ;;  %4877 = vmatmul.msk.bf16.vlgmr.msra.gmra.mxu2 %vm720_vm3, %v5058_v13  ;;  %v1043_v6 = vpop.f32.mrf.mxu1  ;;  %v4899_v13 = vld [vmem:[%s5247_s6 + $0x30] sm:$0xf]  ;;  %v3213_v22 = vsel %vm5259_vm2, %v3208_v10, %v3212_v60  ;;  %v5059_v60 = vld [vmem:[%s5247_s6 + $0x24] sm:$0xff] }
 0x16e   : > { %v1747_v44 = vadd.f32 %v1689_v0, %v1453_v25  ;;  %v3987_v25 = vpack.c.b16 %v3956_v34, %v3955_v12  ;;  %v3203_v0 = vsel %vm5259_vm2, %v3198_v23, %v5919_v40  ;;  %v3215_v8 = vshrl.u32 %v4899_v13, 16  ;;  %v5131_v34 = vld [vmem:[%s5247_s6 + $0x2c] sm:$0x1] }
 0x16f   : > { %v3851_v12 = vrot.slane %v3849_v16, 4  ;;  %v3852_v40 = vrot.slane %v5925_v29, 5  ;;  %v3555_v54 = vunpack.c.l.b16 %v3203_v0  ;;  %v2504_v23 = vrot.slane %v2502_v55, 4 }
 0x170   : > { %v1398_v50 = vpop.f32.mrf.mxu2  ;;  %v5946_v28 = vadd.f32 %v2347_v1, %v1747_v44  ;;  %v3218_v1 = vshll.u32 %v4899_v13, 16  ;;  %v3224_v44 = vshll.u32 %v5944_v56, 16  ;;  %v3556_v3 = vunpack.c.l.b16 %v3213_v22 }
 0x171   : > { %v1454_v51 = vadd.f32 %v1398_v50, %v1042_v62  ;;  %v1044_v62 = vadd.f32 %v1043_v6, %v5565_v58  ;;  %v2505_v50 = vrot.slane %v5131_v34, 5  ;;  %v3850_v13 = vsel %vm5442_vm6, %v4980_v9, %v3849_v16 }
 0x172   : > { %4947 = vmatmul.msk.bf16.vlgmr.msra.gmra.mxu3 %vm720_vm3, %v3585_v39  ;;  %v3228_v39 = vshrl.u32 %v5944_v56, 16  ;;  %v3217_v58 = vrot.slane %v3215_v8, 4  ;;  %v3220_v6 = vrot.slane %v3218_v1, 5  ;;  %v5967_v29 = vrot.slane %v3224_v44, 5 }
 0x173   : > { %v2506_v22 = vsel %vm5442_vm6, %v2504_v23, %v2505_v50  ;;  %v3957_v9 = vunpack.c.l.b16 %v3850_v13  ;;  %v4965_v13 = vld [vmem:[%s5247_s6 + $0x30] sm:$0xe] }
 0x174   : > { %v2350_v48 = vpop.f32.mrf.mxu0  ;;  %v3230_v61 = vrot.slane %v3228_v39, 4  ;;  %v3221_v44 = vor.u32 %v3220_v6, %v3217_v58 }
 0x175   : > { %v1692_v35 = vpop.f32.mrf.mxu3  ;;  %v1046_v57 = vpop.f32.mrf.mxu1 }
 0x176   : > { %v1748_v26 = vadd.f32 %v1692_v35, %v1454_v51  ;;  %v4739_v51 = vrot.slane %v4723_v18, 9  ;;  %v5976_v18 = vld [vmem:[%s5247_s6 + $0x38] sm:$0x1]  ;;  %v3231_v39 = vor.u32 %v3230_v61, %v5967_v29  ;;  %v3222_v23 = vrot.slane %v3221_v44, 4 }
 0x177   : > { %5001 = vmatmul.msk.bf16.vlgmr.msra.gmra.mxu0 %vm720_vm3, %v3987_v25 }
 0x178   : > { %v1400_v15 = vpop.f32.mrf.mxu2  ;;  %4760 = vmatmul.msk.bf16.gmra.mxu1 %vm720_vm3, %v2634_v45  ;;  %v5965_v25 = vadd.f32 %v2350_v48, %v1748_v26  ;;  %v3853_v45 = vsel %vm5442_vm6, %v3851_v12, %v3852_v40  ;;  %v2503_v0 = vsel %vm5442_vm6, %v4739_v51, %v2502_v55  ;;  %v3586_v48 = vpack.c.b16 %v3556_v3, %v3555_v54  ;;  %v5984_v51 = vld [vmem:[%s5247_s6 + $0x40] sm:$0xf] }
 0x179   : > { %v1455_v10 = vadd.f32 %v1400_v15, %v1044_v62  ;;  %v3958_v1 = vunpack.c.l.b16 %v3853_v45  ;;  %v1047_v55 = vadd.f32 %v1046_v57, %v5582_v11  ;;  %v2605_v62 = vunpack.c.l.b16 %v2503_v0  ;;  %v4902_v15 = vld [vmem:[%s5247_s6 + $0x3c] sm:$0xf] }
 0x17a   : > { %v2606_v12 = vunpack.c.l.b16 %v2506_v22  ;;  %v3234_v40 = vshll.u32 %v5976_v18, 16  ;;  %v3856_v11 = vrot.slane %v5944_v56, 5  ;;  %v3239_v6 = vshrl.u32 %v4902_v15, 16 }
 0x17b   : > { %v3988_v54 = vpack.c.b16 %v3958_v1, %v3957_v9  ;;  %v3242_v61 = vshll.u32 %v4902_v15, 16  ;;  %v3248_v45 = vshll.u32 %v5984_v51, 16  ;;  %v3252_v0 = vshrl.u32 %v5984_v51, 16  ;;  %v5133_v1 = vld [vmem:[%s5247_s6 + $0x38] sm:$0x1] }
 0x17c   : > { %v2352_v35 = vpop.f32.mrf.mxu0  ;;  %v3236_v3 = vrot.slane %v3234_v40, 5  ;;  %v2512_v44 = vrot.slane %v5133_v1, 5  ;;  %v3859_v56 = vrot.slane %v5976_v18, 5  ;;  %v3858_v40 = vrot.slane %v3856_v11, 4  ;;  %v6011_v1 = vld [vmem:[%s5247_s6 + $0x44] sm:$0x1] }
 0x17d   : > { %v1694_v16 = vpop.f32.mrf.mxu3  ;;  %4878 = vmatmul.msk.bf16.gmra.mxu2 %vm720_vm3, %v5059_v60  ;;  %v1048_v8 = vpop.f32.mrf.mxu1  ;;  %v2635_v60 = vpack.c.b16 %v2606_v12, %v2605_v62  ;;  %v3227_v62 = vsel %vm5259_vm2, %v3222_v23, %v5967_v29  ;;  %v3244_v15 = vrot.slane %v3242_v61, 5  ;;  %v6005_v18 = vrot.slane %v3248_v45, 5 }
 0x17e   : > { %v1749_v26 = vadd.f32 %v1694_v16, %v1455_v10  ;;  %v3232_v10 = vrot.slane %v3231_v39, 4  ;;  %v3557_v29 = vunpack.c.l.b16 %v3227_v62 }
 0x180   : > { %v1403_v34 = vpop.f32.mrf.mxu2  ;;  %v5989_v57 = vadd.f32 %v2352_v35, %v1749_v26  ;;  %v4724_v35 = vld [vmem:[%s5247_s6 + $0x30] sm:$0xe]  ;;  %v1049_v26 = vadd.f32 %v1048_v8, %v5603_v47  ;;  %v3237_v12 = vsel %vm5259_vm2, %v3232_v10, %v3236_v3 }
 0x181   : > { %v1456_v50 = vadd.f32 %v1403_v34, %v1047_v55  ;;  %v4981_v55 = vrot.slane %v4965_v13, 9  ;;  %v3254_v13 = vrot.slane %v3252_v0, 4  ;;  %v4740_v47 = vrot.slane %v4724_v35, 9 }
 0x182   : > { %4948 = vmatmul.msk.bf16.gmra.mxu3 %vm720_vm3, %v3586_v48  ;;  %v5132_v48 = vld [vmem:[%s5247_s6 + $0x34] sm:$0xf]  ;;  %v3558_v23 = vunpack.c.l.b16 %v3237_v12 }
 0x183   : > { %v2509_v9 = vrot.slane %v5132_v48, 5  ;;  %v3857_v3 = vsel %vm5442_vm6, %v4981_v55, %v3856_v11  ;;  %v3258_v11 = vshll.u32 %v6011_v1, 16 }
 0x184   : > { %v2355_v58 = vpop.f32.mrf.mxu0  ;;  %v3587_v35 = vpack.c.b16 %v3558_v23, %v3557_v29  ;;  %v5134_v23 = vld [vmem:[%s5247_s6 + $0x40] sm:$0xf] }
 0x185   : > { %v1697_v22 = vpop.f32.mrf.mxu3  ;;  %v1051_v16 = vpop.f32.mrf.mxu1  ;;  %v2511_v8 = vrot.slane %v2509_v9, 4 }
 0x186   : > { %v1750_v39 = vadd.f32 %v1697_v22, %v1456_v50  ;;  %v3241_v50 = vrot.slane %v3239_v6, 4  ;;  %v5060_v22 = vld [vmem:[%s5247_s6 + $0x30] sm:$0xff] }
 0x187   : > { %5002 = vmatmul.msk.bf16.gmra.mxu0 %vm720_vm3, %v3988_v54  ;;  %v2513_v0 = vsel %vm5442_vm6, %v2511_v8, %v2512_v44  ;;  %v6030_v8 = vld [vmem:[%s5247_s6 + $0x4c] sm:$0xf] }
 0x188   : > { %v1405_v34 = vpop.f32.mrf.mxu2  ;;  %4761 = vmatmul.msk.bf16.gmra.mxu1 %vm720_vm3, %v2635_v60  ;;  %v6008_v48 = vadd.f32 %v2355_v58, %v1750_v39  ;;  %v3860_v60 = vsel %vm5442_vm6, %v3858_v40, %v3859_v56  ;;  %v3245_v6 = vor.u32 %v3244_v15, %v3241_v50  ;;  %v2510_v58 = vsel %vm5442_vm6, %v4740_v47, %v2509_v9 }
 0x189   : > { %v1457_v54 = vadd.f32 %v1405_v34, %v1049_v26  ;;  %v3255_v39 = vor.u32 %v3254_v13, %v6005_v18  ;;  %v1052_v56 = vadd.f32 %v1051_v16, %v5626_v14  ;;  %v3959_v26 = vunpack.c.l.b16 %v3857_v3  ;;  %v4966_v13 = vld [vmem:[%s5247_s6 + $0x3c] sm:$0xe] }
 0x18a   : > { %v3960_v62 = vunpack.c.l.b16 %v3860_v60  ;;  %v2607_v40 = vunpack.c.l.b16 %v2510_v58  ;;  %v2608_v9 = vunpack.c.l.b16 %v2513_v0  ;;  %v3246_v50 = vrot.slane %v3245_v6, 4 }
 0x18b   : > { %v3256_v44 = vrot.slane %v3255_v39, 4  ;;  %v3260_v15 = vrot.slane %v3258_v11, 5  ;;  %v3863_v47 = vrot.slane %v5984_v51, 5  ;;  %v2516_v3 = vrot.slane %v5134_v23, 5  ;;  %v4725_v51 = vld [vmem:[%s5247_s6 + $0x3c] sm:$0xe] }
 0x18c   : > { %v2357_v10 = vpop.f32.mrf.mxu0  ;;  %v2636_v29 = vpack.c.b16 %v2608_v9, %v2607_v40  ;;  %v4982_v0 = vrot.slane %v4966_v13, 9 }
 0x18d   : > { %v1699_v61 = vpop.f32.mrf.mxu3  ;;  %4879 = vmatmul.msk.bf16.gmra.mxu2 %vm720_vm3, %v5060_v22  ;;  %v1053_v45 = vpop.f32.mrf.mxu1  ;;  %v4905_v22 = vld [vmem:[%s5247_s6 + $0x48] sm:$0xf]  ;;  %v3261_v58 = vsel %vm5259_vm2, %v3256_v44, %v3260_v15  ;;  %v5061_v15 = vld [vmem:[%s5247_s6 + $0x3c] sm:$0xff] }
 0x18e   : > { %v1751_v55 = vadd.f32 %v1699_v61, %v1457_v54  ;;  %v3989_v54 = vpack.c.b16 %v3960_v62, %v3959_v26  ;;  %v3251_v61 = vsel %vm5259_vm2, %v3246_v50, %v6005_v18  ;;  %v3263_v39 = vshrl.u32 %v4905_v22, 16  ;;  %v5135_v62 = vld [vmem:[%s5247_s6 + $0x44] sm:$0x1] }
 0x18f   : > { %v3865_v26 = vrot.slane %v3863_v47, 4  ;;  %v3866_v18 = vrot.slane %v6011_v1, 5  ;;  %v3559_v9 = vunpack.c.l.b16 %v3251_v61  ;;  %v2518_v50 = vrot.slane %v2516_v3, 4 }
 0x190   : > { %v1408_v12 = vpop.f32.mrf.mxu2  ;;  %v6032_v14 = vadd.f32 %v2357_v10, %v1751_v55  ;;  %v3266_v10 = vshll.u32 %v4905_v22, 16  ;;  %v3272_v55 = vshll.u32 %v6030_v8, 16  ;;  %v3560_v13 = vunpack.c.l.b16 %v3261_v58 }
 0x191   : > { %v1458_v34 = vadd.f32 %v1408_v12, %v1052_v56  ;;  %v1054_v56 = vadd.f32 %v1053_v45, %v5644_v52  ;;  %v2519_v12 = vrot.slane %v5135_v62, 5  ;;  %v3864_v22 = vsel %vm5442_vm6, %v4982_v0, %v3863_v47 }
 0x192   : > { %4949 = vmatmul.msk.bf16.gmra.mxu3 %vm720_vm3, %v3587_v35  ;;  %v3276_v35 = vshrl.u32 %v6030_v8, 16  ;;  %v3265_v52 = vrot.slane %v3263_v39, 4  ;;  %v3268_v45 = vrot.slane %v3266_v10, 5  ;;  %v6053_v1 = vrot.slane %v3272_v55, 5 }
 0x193   : > { %v2520_v58 = vsel %vm5442_vm6, %v2518_v50, %v2519_v12  ;;  %v3961_v0 = vunpack.c.l.b16 %v3864_v22  ;;  %v4967_v22 = vld [vmem:[%s5247_s6 + $0x48] sm:$0xe] }
 0x194   : > { %v2360_v16 = vpop.f32.mrf.mxu0  ;;  %v3278_v23 = vrot.slane %v3276_v35, 4  ;;  %v3269_v55 = vor.u32 %v3268_v45, %v3265_v52 }
 0x195   : > { %v1702_v60 = vpop.f32.mrf.mxu3  ;;  %v1056_v6 = vpop.f32.mrf.mxu1 }
 0x196   : > { %v1752_v11 = vadd.f32 %v1702_v60, %v1458_v34  ;;  %v4741_v34 = vrot.slane %v4725_v51, 9  ;;  %v6062_v51 = vld [vmem:[%s5247_s6 + $0x50] sm:$0x1]  ;;  %v3279_v35 = vor.u32 %v3278_v23, %v6053_v1  ;;  %v3270_v50 = vrot.slane %v3269_v55, 4 }
 0x197   : > { %5003 = vmatmul.msk.bf16.gmra.mxu0 %vm720_vm3, %v3989_v54 }
 0x198   : > { %v1410_v40 = vpop.f32.mrf.mxu2  ;;  %4762 = vmatmul.msk.bf16.gmra.mxu1 %vm720_vm3, %v2636_v29  ;;  %v6051_v54 = vadd.f32 %v2360_v16, %v1752_v11  ;;  %v3867_v29 = vsel %vm5442_vm6, %v3865_v26, %v3866_v18  ;;  %v2517_v61 = vsel %vm5442_vm6, %v4741_v34, %v2516_v3  ;;  %v3588_v16 = vpack.c.b16 %v3560_v13, %v3559_v9  ;;  %v6070_v34 = vld [vmem:[%s5247_s6 + $0x58] sm:$0xf] }
 0x199   : > { %v1459_v44 = vadd.f32 %v1410_v40, %v1054_v56  ;;  %v3962_v10 = vunpack.c.l.b16 %v3867_v29  ;;  %v1057_v3 = vadd.f32 %v1056_v6, %v5665_v33  ;;  %v2609_v56 = vunpack.c.l.b16 %v2517_v61  ;;  %v4908_v40 = vld [vmem:[%s5247_s6 + $0x54] sm:$0xf] }
 0x19a   : > { %v2610_v26 = vunpack.c.l.b16 %v2520_v58  ;;  %v3282_v18 = vshll.u32 %v6062_v51, 16  ;;  %v3870_v33 = vrot.slane %v6030_v8, 5  ;;  %v3287_v45 = vshrl.u32 %v4908_v40, 16 }
 0x19b   : > { %v3990_v9 = vpack.c.b16 %v3962_v10, %v3961_v0  ;;  %v3290_v23 = vshll.u32 %v4908_v40, 16  ;;  %v3296_v29 = vshll.u32 %v6070_v34, 16  ;;  %v3300_v61 = vshrl.u32 %v6070_v34, 16  ;;  %v5137_v10 = vld [vmem:[%s5247_s6 + $0x50] sm:$0x1] }
 0x19c   : > { %v2362_v60 = vpop.f32.mrf.mxu0  ;;  %v3284_v13 = vrot.slane %v3282_v18, 5  ;;  %v2526_v55 = vrot.slane %v5137_v10, 5  ;;  %v3873_v8 = vrot.slane %v6062_v51, 5  ;;  %v3872_v18 = vrot.slane %v3870_v33, 4  ;;  %v6097_v10 = vld [vmem:[%s5247_s6 + $0x5c] sm:$0x1] }
 0x19d   : > { %v1704_v47 = vpop.f32.mrf.mxu3  ;;  %4880 = vmatmul.msk.bf16.gmra.mxu2 %vm720_vm3, %v5061_v15  ;;  %v1058_v39 = vpop.f32.mrf.mxu1  ;;  %v2637_v15 = vpack.c.b16 %v2610_v26, %v2609_v56  ;;  %v3275_v56 = vsel %vm5259_vm2, %v3270_v50, %v6053_v1  ;;  %v3292_v40 = vrot.slane %v3290_v23, 5  ;;  %v6091_v51 = vrot.slane %v3296_v29, 5 }
 0x19e   : > { %v1753_v11 = vadd.f32 %v1704_v47, %v1459_v44  ;;  %v3280_v44 = vrot.slane %v3279_v35, 4  ;;  %v3561_v1 = vunpack.c.l.b16 %v3275_v56 }
 0x1a0   : > { %v1413_v62 = vpop.f32.mrf.mxu2  ;;  %v6075_v6 = vadd.f32 %v2362_v60, %v1753_v11  ;;  %v4726_v60 = vld [vmem:[%s5247_s6 + $0x48] sm:$0xe]  ;;  %v1059_v11 = vadd.f32 %v1058_v39, %v5680_v2  ;;  %v3285_v26 = vsel %vm5259_vm2, %v3280_v44, %v3284_v13 }
 0x1a1   : > { %v1460_v12 = vadd.f32 %v1413_v62, %v1057_v3  ;;  %v4983_v3 = vrot.slane %v4967_v22, 9  ;;  %v3302_v22 = vrot.slane %v3300_v61, 4  ;;  %v4742_v2 = vrot.slane %v4726_v60, 9 }
 0x1a2   : > { %4950 = vmatmul.msk.bf16.gmra.mxu3 %vm720_vm3, %v3588_v16  ;;  %v5136_v16 = vld [vmem:[%s5247_s6 + $0x4c] sm:$0xf]  ;;  %v3562_v50 = vunpack.c.l.b16 %v3285_v26 }
 0x1a3   : > { %v2523_v0 = vrot.slane %v5136_v16, 5  ;;  %v3871_v13 = vsel %vm5442_vm6, %v4983_v3, %v3870_v33  ;;  %v3306_v33 = vshll.u32 %v6097_v10, 16 }
 0x1a4   : > { %v2365_v52 = vpop.f32.mrf.mxu0  ;;  %v3589_v60 = vpack.c.b16 %v3562_v50, %v3561_v1  ;;  %v5138_v50 = vld [vmem:[%s5247_s6 + $0x58] sm:$0xf] }
 0x1a5   : > { %v1707_v58 = vpop.f32.mrf.mxu3  ;;  %v1061_v47 = vpop.f32.mrf.mxu1  ;;  %v2525_v39 = vrot.slane %v2523_v0, 4 }
 0x1a6   : > { %v1754_v35 = vadd.f32 %v1707_v58, %v1460_v12  ;;  %v3289_v12 = vrot.slane %v3287_v45, 4  ;;  %v5062_v58 = vld [vmem:[%s5247_s6 + $0x48] sm:$0xff] }
 0x1a7   : > { %5004 = vmatmul.msk.bf16.gmra.mxu0 %vm720_vm3, %v3990_v9  ;;  %v2527_v61 = vsel %vm5442_vm6, %v2525_v39, %v2526_v55  ;;  %v6116_v39 = vld [vmem:[%s5247_s6 + $0x64] sm:$0xf] }
 0x1a8   : > { %v1415_v62 = vpop.f32.mrf.mxu2  ;;  %4763 = vmatmul.msk.bf16.gmra.mxu1 %vm720_vm3, %v2637_v15  ;;  %v6094_v16 = vadd.f32 %v2365_v52, %v1754_v35  ;;  %v3874_v15 = vsel %vm5442_vm6, %v3872_v18, %v3873_v8  ;;  %v3293_v45 = vor.u32 %v3292_v40, %v3289_v12  ;;  %v2524_v52 = vsel %vm5442_vm6, %v4742_v2, %v2523_v0 }
 0x1a9   : > { %v1461_v9 = vadd.f32 %v1415_v62, %v1059_v11  ;;  %v3303_v35 = vor.u32 %v3302_v22, %v6091_v51  ;;  %v1062_v8 = vadd.f32 %v1061_v47, %v5556_v41  ;;  %v3963_v11 = vunpack.c.l.b16 %v3871_v13  ;;  %v4968_v22 = vld [vmem:[%s5247_s6 + $0x54] sm:$0xe] }
 0x1aa   : > { %v3964_v56 = vunpack.c.l.b16 %v3874_v15  ;;  %v2611_v18 = vunpack.c.l.b16 %v2524_v52  ;;  %v2612_v0 = vunpack.c.l.b16 %v2527_v61  ;;  %v3294_v12 = vrot.slane %v3293_v45, 4 }
 0x1ab   : > { %v3304_v55 = vrot.slane %v3303_v35, 4  ;;  %v3308_v40 = vrot.slane %v3306_v33, 5  ;;  %v3877_v2 = vrot.slane %v6070_v34, 5  ;;  %v2530_v13 = vrot.slane %v5138_v50, 5  ;;  %v4727_v34 = vld [vmem:[%s5247_s6 + $0x54] sm:$0xe] }
 0x1ac   : > { %v2367_v44 = vpop.f32.mrf.mxu0  ;;  %v2638_v1 = vpack.c.b16 %v2612_v0, %v2611_v18  ;;  %v4984_v61 = vrot.slane %v4968_v22, 9 }
 0x1ad   : > { %v1709_v23 = vpop.f32.mrf.mxu3  ;;  %4881 = vmatmul.msk.bf16.gmra.mxu2 %vm720_vm3, %v5062_v58  ;;  %v1063_v29 = vpop.f32.mrf.mxu1  ;;  %v4911_v58 = vld [vmem:[%s5247_s6 + $0x60] sm:$0xf]  ;;  %v3309_v52 = vsel %vm5259_vm2, %v3304_v55, %v3308_v40  ;;  %v5063_v40 = vld [vmem:[%s5247_s6 + $0x54] sm:$0xff] }
 0x1ae   : > { %v1755_v3 = vadd.f32 %v1709_v23, %v1461_v9  ;;  %v3991_v9 = vpack.c.b16 %v3964_v56, %v3963_v11  ;;  %v3299_v23 = vsel %vm5259_vm2, %v3294_v12, %v6091_v51  ;;  %v3311_v35 = vshrl.u32 %v4911_v58, 16  ;;  %v5139_v56 = vld [vmem:[%s5247_s6 + $0x5c] sm:$0x1] }
 0x1af   : > { %v3879_v11 = vrot.slane %v3877_v2, 4  ;;  %v3880_v51 = vrot.slane %v6097_v10, 5  ;;  %v3563_v0 = vunpack.c.l.b16 %v3299_v23  ;;  %v2532_v12 = vrot.slane %v2530_v13, 4 }
 0x1b0   : > { %v1418_v26 = vpop.f32.mrf.mxu2  ;;  %v6118_v41 = vadd.f32 %v2367_v44, %v1755_v3  ;;  %v3314_v44 = vshll.u32 %v4911_v58, 16  ;;  %v3320_v3 = vshll.u32 %v6116_v39, 16  ;;  %v3564_v22 = vunpack.c.l.b16 %v3309_v52 }
 0x1b1   : > { %v1462_v62 = vadd.f32 %v1418_v26, %v1062_v8  ;;  %v1064_v8 = vadd.f32 %v1063_v29, %v5575_v59  ;;  %v2533_v26 = vrot.slane %v5139_v56, 5  ;;  %v3878_v58 = vsel %vm5442_vm6, %v4984_v61, %v3877_v2 }
 0x1b2   : > { %4951 = vmatmul.msk.bf16.gmra.mxu3 %vm720_vm3, %v3589_v60  ;;  %v3324_v60 = vshrl.u32 %v6116_v39, 16  ;;  %v3313_v59 = vrot.slane %v3311_v35, 4  ;;  %v3316_v29 = vrot.slane %v3314_v44, 5  ;;  %v6139_v10 = vrot.slane %v3320_v3, 5 }
 0x1b3   : > { %v2534_v52 = vsel %vm5442_vm6, %v2532_v12, %v2533_v26  ;;  %v3965_v61 = vunpack.c.l.b16 %v3878_v58  ;;  %v4969_v58 = vld [vmem:[%s5247_s6 + $0x60] sm:$0xe] }
 0x1b4   : > { %v2370_v47 = vpop.f32.mrf.mxu0  ;;  %v3326_v50 = vrot.slane %v3324_v60, 4  ;;  %v3317_v3 = vor.u32 %v3316_v29, %v3313_v59 }
 0x1b5   : > { %v1712_v15 = vpop.f32.mrf.mxu3  ;;  %v1066_v45 = vpop.f32.mrf.mxu1 }
 0x1b6   : > { %v1756_v33 = vadd.f32 %v1712_v15, %v1462_v62  ;;  %v4743_v62 = vrot.slane %v4727_v34, 9  ;;  %v6148_v34 = vld [vmem:[%s5247_s6 + $0x68] sm:$0x1]  ;;  %v3327_v60 = vor.u32 %v3326_v50, %v6139_v10  ;;  %v3318_v12 = vrot.slane %v3317_v3, 4 }
 0x1b7   : > { %5005 = vmatmul.msk.bf16.gmra.mxu0 %vm720_vm3, %v3991_v9 }
 0x1b8   : > { %v1420_v18 = vpop.f32.mrf.mxu2  ;;  %4764 = vmatmul.msk.bf16.gmra.mxu1 %vm720_vm3, %v2638_v1  ;;  %v6137_v9 = vadd.f32 %v2370_v47, %v1756_v33  ;;  %v3881_v1 = vsel %vm5442_vm6, %v3879_v11, %v3880_v51  ;;  %v2531_v23 = vsel %vm5442_vm6, %v4743_v62, %v2530_v13  ;;  %v3590_v47 = vpack.c.b16 %v3564_v22, %v3563_v0  ;;  %v6156_v62 = vld [vmem:[%s5247_s6 + $0x70] sm:$0xf] }
 0x1b9   : > { %v1463_v55 = vadd.f32 %v1420_v18, %v1064_v8  ;;  %v3966_v44 = vunpack.c.l.b16 %v3881_v1  ;;  %v1067_v13 = vadd.f32 %v1066_v45, %v5596_v32  ;;  %v2613_v8 = vunpack.c.l.b16 %v2531_v23  ;;  %v4914_v18 = vld [vmem:[%s5247_s6 + $0x6c] sm:$0xf] }
 0x1ba   : > { %v2614_v11 = vunpack.c.l.b16 %v2534_v52  ;;  %v3330_v51 = vshll.u32 %v6148_v34, 16  ;;  %v3884_v32 = vrot.slane %v6116_v39, 5  ;;  %v3335_v29 = vshrl.u32 %v4914_v18, 16 }
 0x1bb   : > { %v3992_v0 = vpack.c.b16 %v3966_v44, %v3965_v61  ;;  %v3338_v50 = vshll.u32 %v4914_v18, 16  ;;  %v3344_v1 = vshll.u32 %v6156_v62, 16  ;;  %v3348_v23 = vshrl.u32 %v6156_v62, 16  ;;  %v5141_v44 = vld [vmem:[%s5247_s6 + $0x68] sm:$0x1] }
 0x1bc   : > { %v2372_v15 = vpop.f32.mrf.mxu0  ;;  %v3332_v22 = vrot.slane %v3330_v51, 5  ;;  %v2540_v3 = vrot.slane %v5141_v44, 5  ;;  %v3887_v39 = vrot.slane %v6148_v34, 5  ;;  %v3886_v51 = vrot.slane %v3884_v32, 4 }
 0x1bd   : > { %v1714_v2 = vpop.f32.mrf.mxu3  ;;  %4882 = vmatmul.msk.bf16.gmra.mxu2 %vm720_vm3, %v5063_v40  ;;  %v1068_v35 = vpop.f32.mrf.mxu1  ;;  %v2639_v40 = vpack.c.b16 %v2614_v11, %v2613_v8  ;;  %v3323_v8 = vsel %vm5259_vm2, %v3318_v12, %v6139_v10  ;;  %v3340_v18 = vrot.slane %v3338_v50, 5  ;;  %v3346_v34 = vrot.slane %v3344_v1, 5  ;;  %v6181_v12 = vld [vmem:[%s5247_s6 + $0x74] sm:$0x1] }
 0x1be   : > { %v1757_v33 = vadd.f32 %v1714_v2, %v1463_v55  ;;  %v3328_v55 = vrot.slane %v3327_v60, 4  ;;  %v3565_v44 = vunpack.c.l.b16 %v3323_v8 }
 0x1c0   : > { %v1423_v56 = vpop.f32.mrf.mxu2  ;;  %v6161_v45 = vadd.f32 %v2372_v15, %v1757_v33  ;;  %v4728_v15 = vld [vmem:[%s5247_s6 + $0x60] sm:$0xe]  ;;  %v1069_v33 = vadd.f32 %v1068_v35, %v5615_v63  ;;  %v3333_v11 = vsel %vm5259_vm2, %v3328_v55, %v3332_v22 }
 0x1c1   : > { %v1464_v26 = vadd.f32 %v1423_v56, %v1067_v13  ;;  %v4985_v13 = vrot.slane %v4969_v58, 9  ;;  %v3350_v58 = vrot.slane %v3348_v23, 4  ;;  %v3566_v10 = vunpack.c.l.b16 %v3333_v11 }
 0x1c2   : > { %4952 = vmatmul.msk.bf16.gmra.mxu3 %vm720_vm3, %v3590_v47  ;;  %6571 = vst [vmem:[#allocation4_spill] sm:$0xff] %v6161_v45  ;;  %v5140_v47 = vld [vmem:[%s5247_s6 + $0x64] sm:$0xf] }
 0x1c3   : > { %v2537_v61 = vrot.slane %v5140_v47, 5  ;;  %v4744_v47 = vrot.slane %v4728_v15, 9  ;;  %v3885_v55 = vsel %vm5442_vm6, %v4985_v13, %v3884_v32  ;;  %v3351_v23 = vor.u32 %v3350_v58, %v3346_v34 }
 0x1c4   : > { %v2375_v59 = vpop.f32.mrf.mxu0  ;;  %v3591_v13 = vpack.c.b16 %v3566_v10, %v3565_v44  ;;  %v3967_v15 = vunpack.c.l.b16 %v3885_v55 }
 0x1c5   : > { %v1717_v52 = vpop.f32.mrf.mxu3  ;;  %v1071_v2 = vpop.f32.mrf.mxu1  ;;  %v2539_v63 = vrot.slane %v2537_v61, 4 }
 0x1c6   : > { %v1758_v60 = vadd.f32 %v1717_v52, %v1464_v26  ;;  %v3337_v26 = vrot.slane %v3335_v29, 4 }
 0x1c7   : > { %5006 = vmatmul.msk.bf16.gmra.mxu0 %vm720_vm3, %v3992_v0  ;;  %v5064_v0 = vld [vmem:[%s5247_s6 + $0x60] sm:$0xff]  ;;  %v2541_v1 = vsel %vm5442_vm6, %v2539_v63, %v2540_v3  ;;  %v3891_v63 = vrot.slane %v6156_v62, 5 }
 0x1c8   : > { %v1425_v56 = vpop.f32.mrf.mxu2  ;;  %4765 = vmatmul.msk.bf16.gmra.mxu1 %vm720_vm3, %v2639_v40  ;;  %v6178_v35 = vadd.f32 %v2375_v59, %v1758_v60  ;;  %v3888_v40 = vsel %vm5442_vm6, %v3886_v51, %v3887_v39  ;;  %v3341_v22 = vor.u32 %v3340_v18, %v3337_v26  ;;  %v2538_v59 = vsel %vm5442_vm6, %v4744_v47, %v2537_v61  ;;  %v4917_v18 = vld [vmem:[%s5247_s6 + $0x78] sm:$0xf]  ;;  %v4970_v47 = vld [vmem:[%s5247_s6 + $0x6c] sm:$0xe] }
 0x1c9   : > { %v1465_v52 = vadd.f32 %v1425_v56, %v1069_v33  ;;  %v3354_v60 = vshll.u32 %v6181_v12, 16  ;;  %v1072_v39 = vadd.f32 %v1071_v2, %v5634_v36  ;;  %v3968_v33 = vunpack.c.l.b16 %v3888_v40 }
 0x1ca   : > { %v2615_v11 = vunpack.c.l.b16 %v2538_v59  ;;  %v2616_v51 = vunpack.c.l.b16 %v2541_v1  ;;  %v3342_v61 = vrot.slane %v3341_v22, 4  ;;  %v3352_v26 = vrot.slane %v3351_v23, 4  ;;  %v4729_v22 = vld [vmem:[%s5247_s6 + $0x6c] sm:$0xe] }
 0x1cb   : > { %v3356_v3 = vrot.slane %v3354_v60, 5  ;;  %v3993_v58 = vpack.c.b16 %v3968_v33, %v3967_v15  ;;  %v3359_v1 = vshrl.u32 %v4917_v18, 16  ;;  %v3362_v23 = vshll.u32 %v4917_v18, 16 }
 0x1cc   : > { %v2377_v45 = vpop.f32.mrf.mxu0  ;;  %v2640_v2 = vpack.c.b16 %v2616_v51, %v2615_v11  ;;  %v3347_v55 = vsel %vm5259_vm2, %v3342_v61, %v3346_v34  ;;  %v4986_v34 = vrot.slane %v4970_v47, 9  ;;  %v4745_v11 = vrot.slane %v4729_v22, 9  ;;  %v6222_v47 = vld [vmem:[%s5247_s6 + $0x80] sm:$0x1] }
 0x1cd   : > { %v1719_v29 = vpop.f32.mrf.mxu3  ;;  %4883 = vmatmul.msk.bf16.gmra.mxu2 %vm720_vm3, %v5064_v0  ;;  %v1073_v50 = vpop.f32.mrf.mxu1  ;;  %v3357_v40 = vsel %vm5259_vm2, %v3352_v26, %v3356_v3  ;;  %v3567_v15 = vunpack.c.l.b16 %v3347_v55  ;;  %v5143_v26 = vld [vmem:[%s5247_s6 + $0x74] sm:$0x1] }
 0x1ce   : > { %v1759_v32 = vadd.f32 %v1719_v29, %v1465_v52  ;;  %v6197_v52 = vld [vmem:[%s5247_s6 + $0x7c] sm:$0xf]  ;;  %v5142_v29 = vld [vmem:[%s5247_s6 + $0x70] sm:$0xf]  ;;  %v3568_v33 = vunpack.c.l.b16 %v3357_v40  ;;  %v2547_v3 = vrot.slane %v5143_v26, 5 }
 0x1cf   : > { %v2544_v59 = vrot.slane %v5142_v29, 5  ;;  %v3368_v60 = vshll.u32 %v6197_v52, 16  ;;  %v3372_v62 = vshrl.u32 %v6197_v52, 16  ;;  %v3898_v26 = vrot.slane %v6197_v52, 5 }
 0x1d0   : > { %v1428_v8 = vpop.f32.mrf.mxu2  ;;  %v6199_v0 = vadd.f32 %v2377_v45, %v1759_v32  ;;  %v1074_v32 = vadd.f32 %v1073_v50, %v5657_v4  ;;  %v3364_v4 = vrot.slane %v3362_v23, 5 }
 0x1d1   : > { %v1466_v56 = vadd.f32 %v1428_v8, %v1072_v39  ;;  %v3893_v8 = vrot.slane %v3891_v63, 4  ;;  %v2546_v61 = vrot.slane %v2544_v59, 4  ;;  %v6219_v50 = vrot.slane %v3368_v60, 5 }
 0x1d2   : > { %4953 = vmatmul.msk.bf16.gmra.mxu3 %vm720_vm3, %v3591_v13  ;;  %v3894_v13 = vrot.slane %v6181_v12, 5  ;;  %v3374_v12 = vrot.slane %v3372_v62, 4  ;;  %v2545_v29 = vsel %vm5442_vm6, %v4745_v11, %v2544_v59  ;;  %v3378_v60 = vshll.u32 %v6222_v47, 16  ;;  %v4920_v59 = vld [vmem:[%s5247_s6 + $0x84] sm:$0xf] }
 0x1d4   : > { %v2380_v36 = vpop.f32.mrf.mxu0  ;;  %v3895_v55 = vsel %vm5442_vm6, %v3893_v8, %v3894_v13 }
 0x1d5   : > { %v1722_v44 = vpop.f32.mrf.mxu3  ;;  %v1076_v10 = vpop.f32.mrf.mxu1 }
 0x1d6   : > { %v1760_v45 = vadd.f32 %v1722_v44, %v1466_v56  ;;  %v5065_v56 = vld [vmem:[%s5247_s6 + $0x6c] sm:$0xff]  ;;  %v1077_v62 = vadd.f32 %v1076_v10, %v5676_v53 }
 0x1d7   : > { %5007 = vmatmul.msk.bf16.gmra.mxu0 %vm720_vm3, %v3993_v58  ;;  %v3361_v58 = vrot.slane %v3359_v1, 4  ;;  %v2548_v1 = vsel %vm5442_vm6, %v2546_v61, %v2547_v3 }
 0x1d8   : > { %v1430_v39 = vpop.f32.mrf.mxu2  ;;  %4766 = vmatmul.msk.bf16.gmra.mxu1 %vm720_vm3, %v2640_v2  ;;  %v6217_v18 = vadd.f32 %v2380_v36, %v1760_v45  ;;  %v3892_v2 = vsel %vm5442_vm6, %v4986_v34, %v3891_v63  ;;  %v3592_v36 = vpack.c.b16 %v3568_v33, %v3567_v15  ;;  %v3375_v63 = vor.u32 %v3374_v12, %v6219_v50 }
 0x1d9   : > { %v1467_v51 = vadd.f32 %v1430_v39, %v1074_v32  ;;  %v3365_v23 = vor.u32 %v3364_v4, %v3361_v58  ;;  %v3969_v32 = vunpack.c.l.b16 %v3892_v2  ;;  %v3970_v34 = vunpack.c.l.b16 %v3895_v55  ;;  %v6243_v58 = vld [vmem:[%s5247_s6 + $0x88] sm:$0xf] }
 0x1da   : > { %v2617_v39 = vunpack.c.l.b16 %v2545_v29  ;;  %v2618_v15 = vunpack.c.l.b16 %v2548_v1  ;;  %v3376_v11 = vrot.slane %v3375_v63, 4  ;;  %v3383_v4 = vshrl.u32 %v4920_v59, 16  ;;  %v5144_v29 = vld [vmem:[%s5247_s6 + $0x7c] sm:$0xf] }
 0x1db   : > { %v3366_v8 = vrot.slane %v3365_v23, 4  ;;  %v3994_v61 = vpack.c.b16 %v3970_v34, %v3969_v32  ;;  %v3386_v12 = vshll.u32 %v4920_v59, 16  ;;  %v2551_v1 = vrot.slane %v5144_v29, 5 }
 0x1dc   : > { %v2382_v44 = vpop.f32.mrf.mxu0  ;;  %v2641_v3 = vpack.c.b16 %v2618_v15, %v2617_v39  ;;  %v3396_v32 = vshrl.u32 %v6243_v58, 16 }
 0x1dd   : > { %v1724_v40 = vpop.f32.mrf.mxu3  ;;  %4884 = vmatmul.msk.bf16.gmra.mxu2 %vm720_vm3, %v5065_v56  ;;  %v1078_v22 = vpop.f32.mrf.mxu1  ;;  %v4971_v56 = vld [vmem:[%s5247_s6 + $0x78] sm:$0xe]  ;;  %v3371_v52 = vsel %vm5259_vm2, %v3366_v8, %v6219_v50  ;;  %v3385_v50 = vrot.slane %v3383_v4, 4  ;;  %v3388_v39 = vrot.slane %v3386_v12, 5  ;;  %v2553_v59 = vrot.slane %v2551_v1, 4 }
 0x1de   : > { %v1761_v45 = vadd.f32 %v1724_v40, %v1467_v51  ;;  %v3380_v51 = vrot.slane %v3378_v60, 5  ;;  %v4987_v40 = vrot.slane %v4971_v56, 9  ;;  %v1079_v63 = vadd.f32 %v1078_v22, %v5693_v27  ;;  %v6267_v4 = vld [vmem:[%s5247_s6 + $0x8c] sm:$0x1] }
 0x1df   : > { %v3900_v60 = vrot.slane %v3898_v26, 4  ;;  %v3569_v27 = vunpack.c.l.b16 %v3371_v52 }
 0x1e0   : > { %v1433_v13 = vpop.f32.mrf.mxu2  ;;  %v6240_v53 = vadd.f32 %v2382_v44, %v1761_v45  ;;  %v3381_v44 = vsel %vm5259_vm2, %v3376_v11, %v3380_v51  ;;  %v3901_v45 = vrot.slane %v6222_v47, 5  ;;  %v5145_v47 = vld [vmem:[%s5247_s6 + $0x80] sm:$0x1]  ;;  %v3899_v51 = vsel %vm5442_vm6, %v4987_v40, %v3898_v26 }
 0x1e1   : > { %v1468_v33 = vadd.f32 %v1433_v13, %v1077_v62  ;;  %v3392_v62 = vshll.u32 %v6243_v58, 16  ;;  %v2554_v8 = vrot.slane %v5145_v47, 5  ;;  %v3570_v22 = vunpack.c.l.b16 %v3381_v44  ;;  %v4923_v47 = vld [vmem:[%s5247_s6 + $0x90] sm:$0xf] }
 0x1e2   : > { %4954 = vmatmul.msk.bf16.gmra.mxu3 %vm720_vm3, %v3592_v36  ;;  %v4730_v36 = vld [vmem:[%s5247_s6 + $0x78] sm:$0xe]  ;;  %v3902_v56 = vsel %vm5442_vm6, %v3900_v60, %v3901_v45  ;;  %v3389_v26 = vor.u32 %v3388_v39, %v3385_v50  ;;  %v3971_v52 = vunpack.c.l.b16 %v3899_v51  ;;  %v4972_v39 = vld [vmem:[%s5247_s6 + $0x84] sm:$0xe] }
 0x1e3   : > { %v4746_v13 = vrot.slane %v4730_v36, 9  ;;  %v2555_v29 = vsel %vm5442_vm6, %v2553_v59, %v2554_v8  ;;  %v3972_v44 = vunpack.c.l.b16 %v3902_v56  ;;  %v3905_v59 = vrot.slane %v6243_v58, 5  ;;  %v4731_v58 = vld [vmem:[%s5247_s6 + $0x84] sm:$0xe] }
 0x1e4   : > { %v2385_v10 = vpop.f32.mrf.mxu0 }
 0x1e5   : > { %v1727_v2 = vpop.f32.mrf.mxu3  ;;  %v2712_v55 = vpop.f32.mrf.mxu1 }
 0x1e6   : > { %v1762_v23 = vadd.f32 %v1727_v2, %v1468_v33  ;;  %v5066_v33 = vld [vmem:[%s5247_s6 + $0x78] sm:$0xff]  ;;  %v2792_v60 = vadd.f32 %v2712_v55, %v5710_v37 }
 0x1e7   : > { %5008 = vmatmul.msk.bf16.gmra.mxu0 %vm720_vm3, %v3994_v61  ;;  %v3394_v61 = vrot.slane %v3392_v62, 5 }
 0x1e8   : > { %v1435_v34 = vpop.f32.mrf.mxu2  ;;  %4767 = vmatmul.msk.bf16.gmra.mxu1 %vm720_vm3, %v2641_v3  ;;  %v6260_v11 = vadd.f32 %v2385_v10, %v1762_v23  ;;  %v3398_v3 = vrot.slane %v3396_v32, 4  ;;  %v2552_v10 = vsel %vm5442_vm6, %v4746_v13, %v2551_v1  ;;  %v3593_v23 = vpack.c.b16 %v3570_v22, %v3569_v27  ;;  %v6283_v27 = vld [vmem:[%s5247_s6 + $0x94] sm:$0xf] }
 0x1e9   : > { %v1469_v15 = vadd.f32 %v1435_v34, %v1079_v63  ;;  %v3402_v63 = vshll.u32 %v6267_v4, 16  ;;  %v2619_v32 = vunpack.c.l.b16 %v2552_v10  ;;  %v2620_v34 = vunpack.c.l.b16 %v2555_v29 }
 0x1ea   : > { %v3399_v45 = vor.u32 %v3398_v3, %v3394_v61  ;;  %v3390_v1 = vrot.slane %v3389_v26, 4  ;;  %v3995_v13 = vpack.c.b16 %v3972_v44, %v3971_v52  ;;  %v4988_v3 = vrot.slane %v4972_v39, 9 }
 0x1eb   : > { %v2642_v55 = vpack.c.b16 %v2620_v34, %v2619_v32  ;;  %v3908_v26 = vrot.slane %v6267_v4, 5  ;;  %v3907_v52 = vrot.slane %v3905_v59, 4  ;;  %v3416_v44 = vshll.u32 %v6283_v27, 16 }
 0x1ec   : > { %v2387_v2 = vpop.f32.mrf.mxu0  ;;  %v3395_v56 = vsel %vm5259_vm2, %v3390_v1, %v3394_v61  ;;  %v3420_v61 = vshrl.u32 %v6283_v27, 16  ;;  %v3906_v32 = vsel %vm5442_vm6, %v4988_v3, %v3905_v59  ;;  %v4747_v34 = vrot.slane %v4731_v58, 9 }
 0x1ed   : > { %v1729_v12 = vpop.f32.mrf.mxu3  ;;  %4885 = vmatmul.msk.bf16.gmra.mxu2 %vm720_vm3, %v5066_v33  ;;  %v2714_v36 = vpop.f32.mrf.mxu1  ;;  %v3404_v33 = vrot.slane %v3402_v63, 5  ;;  %v3571_v4 = vunpack.c.l.b16 %v3395_v56  ;;  %v3973_v59 = vunpack.c.l.b16 %v3906_v32 }
 0x1ee   : > { %v1763_v40 = vadd.f32 %v1729_v12, %v1469_v15  ;;  %v3400_v15 = vrot.slane %v3399_v45, 4  ;;  %v5146_v12 = vld [vmem:[%s5247_s6 + $0x88] sm:$0xf]  ;;  %v2793_v45 = vadd.f32 %v2714_v36, %v5723_v38  ;;  %v3909_v38 = vsel %vm5442_vm6, %v3907_v52, %v3908_v26 }
 0x1ef   : > { %v2558_v10 = vrot.slane %v5146_v12, 5  ;;  %v6303_v36 = vrot.slane %v3416_v44, 5 }
 0x1f0   : > { %v3006_v62 = vpop.f32.mrf.mxu2  ;;  %v6280_v8 = vadd.f32 %v2387_v2, %v1763_v40  ;;  %v3410_v2 = vshll.u32 %v4923_v47, 16  ;;  %v3405_v40 = vsel %vm5259_vm2, %v3400_v15, %v3404_v33 }
 0x1f1   : > { %v3086_v50 = vadd.f32 %v3006_v62, %v2792_v60  ;;  %v5067_v62 = vld [vmem:[%s5247_s6 + $0x84] sm:$0xff]  ;;  %v2560_v1 = vrot.slane %v2558_v10, 4  ;;  %v3572_v15 = vunpack.c.l.b16 %v3405_v40  ;;  %v2559_v12 = vsel %vm5442_vm6, %v4747_v34, %v2558_v10  ;;  %v6318_v10 = vld [vmem:[%s5247_s6 + $0xa0] sm:$0xf] }
 0x1f2   : > { %4955 = vmatmul.msk.bf16.gmra.mxu3 %vm720_vm3, %v3593_v23  ;;  %v3407_v23 = vshrl.u32 %v4923_v47, 16  ;;  %v3412_v47 = vrot.slane %v3410_v2, 5 }
 0x1f3   : > { %v3594_v58 = vpack.c.b16 %v3572_v15, %v3571_v4 }
 0x1f4   : > { %v4066_v37 = vpop.f32.mrf.mxu0  ;;  %v3409_v33 = vrot.slane %v3407_v23, 4  ;;  %v3974_v23 = vunpack.c.l.b16 %v3909_v38 }
 0x1f5   : > { %v3664_v22 = vpop.f32.mrf.mxu3  ;;  %v2717_v51 = vpop.f32.mrf.mxu1 }
 0x1f6   : > { %v3744_v29 = vadd.f32 %v3664_v22, %v3086_v50  ;;  %v6306_v22 = vld [vmem:[%s5247_s6 + $0x98] sm:$0x1]  ;;  %v3413_v2 = vor.u32 %v3412_v47, %v3409_v33  ;;  %v2794_v44 = vadd.f32 %v2717_v51, %v5736_v7  ;;  %v3996_v4 = vpack.c.b16 %v3974_v23, %v3973_v59 }
 0x1f7   : > { %5009 = vmatmul.msk.bf16.gmra.mxu0 %vm720_vm3, %v3995_v13  ;;  %v5147_v13 = vld [vmem:[%s5247_s6 + $0x8c] sm:$0x1]  ;;  %v3426_v52 = vshll.u32 %v6306_v22, 16  ;;  %v3912_v33 = vrot.slane %v6283_v27, 5  ;;  %v3440_v47 = vshll.u32 %v6318_v10, 16  ;;  %v3444_v59 = vshrl.u32 %v6318_v10, 16 }
 0x1f8   : > { %v4146_v63 = vadd.f32 %v4066_v37, %v3744_v29  ;;  %v3008_v60 = vpop.f32.mrf.mxu2  ;;  %4768 = vmatmul.msk.bf16.gmra.mxu1 %vm720_vm3, %v2642_v55  ;;  %v2561_v50 = vrot.slane %v5147_v13, 5  ;;  %v3422_v37 = vrot.slane %v3420_v61, 4  ;;  %v3414_v34 = vrot.slane %v3413_v2, 4 }
 0x1f9   : > { %v3087_v39 = vadd.f32 %v3008_v60, %v2793_v45  ;;  %v3428_v13 = vrot.slane %v3426_v52, 5 }
 0x1fa   : > { %4178 = vxpose.xlu0.b32.start [1/16] (narrow) %v4146_v63, 16  ;;  %v2562_v29 = vsel %vm5442_vm6, %v2560_v1, %v2561_v50  ;;  %v3423_v40 = vor.u32 %v3422_v37, %v6303_v36  ;;  %v2621_v63 = vunpack.c.l.b16 %v2559_v12  ;;  %v4973_v50 = vld [vmem:[%s5247_s6 + $0x90] sm:$0xe]  ;;  %v3419_v27 = vsel %vm5259_vm2, %v3414_v34, %v6303_v36 }
 0x1fb   : > { %v2622_v60 = vunpack.c.l.b16 %v2562_v29  ;;  %v4989_v29 = vrot.slane %v4973_v50, 9  ;;  %v3446_v36 = vrot.slane %v3444_v59, 4  ;;  %v4928_v50 = vld [vmem:[%s5247_s6 + $0xa4] sm:$0x1] }
 0x1fc   : > { %v4068_v55 = vpop.f32.mrf.mxu0  ;;  %v3424_v1 = vrot.slane %v3423_v40, 4  ;;  %v3450_v59 = vshll.u32 %v4928_v50, 16 }
 0x1fd   : > { %v3666_v56 = vpop.f32.mrf.mxu3  ;;  %4886 = vmatmul.msk.bf16.gmra.mxu2 %vm720_vm3, %v5067_v62  ;;  %v2719_v3 = vpop.f32.mrf.mxu1  ;;  %v4926_v62 = vld [vmem:[%s5247_s6 + $0x9c] sm:$0xf]  ;;  %v2643_v15 = vpack.c.b16 %v2622_v60, %v2621_v63  ;;  %v5068_v63 = vld [vmem:[%s5247_s6 + $0x90] sm:$0xff] }
 0x1fe   : > { %v3745_v26 = vadd.f32 %v3666_v56, %v3087_v39  ;;  %v3431_v39 = vshrl.u32 %v4926_v62, 16  ;;  %v3434_v7 = vshll.u32 %v4926_v62, 16  ;;  %v3429_v23 = vsel %vm5259_vm2, %v3424_v1, %v3428_v13 }
 0x1ff   : > { %v2795_v52 = vadd.f32 %v2719_v3, %v5749_v5  ;;  %v3573_v1 = vunpack.c.l.b16 %v3419_v27  ;;  %v3574_v13 = vunpack.c.l.b16 %v3429_v23  ;;  %v3913_v3 = vsel %vm5442_vm6, %v4989_v29, %v3912_v33 }
 0x200   : > { %v4147_v61 = vadd.f32 %v4068_v55, %v3745_v26  ;;  %v3011_v45 = vpop.f32.mrf.mxu2  ;;  %v5148_v55 = vld [vmem:[%s5247_s6 + $0x94] sm:$0xf]  ;;  %v3915_v26 = vrot.slane %v6306_v22, 5  ;;  %v3433_v2 = vrot.slane %v3431_v39, 4  ;;  %v3436_v40 = vrot.slane %v3434_v7, 5 }
 0x201   : > { %v3088_v32 = vadd.f32 %v3011_v45, %v2794_v44  ;;  %v2565_v56 = vrot.slane %v5148_v55, 5  ;;  %v3914_v22 = vrot.slane %v3912_v33, 4  ;;  %v3442_v45 = vrot.slane %v3440_v47, 5 }
 0x202   : > { %4956 = vmatmul.msk.bf16.gmra.mxu3 %vm720_vm3, %v3594_v58  ;;  %4179 = vxpose.xlu0.b32.cont [2/16] (narrow) %v4147_v61, 16  ;;  %v4732_v58 = vld [vmem:[%s5247_s6 + $0x90] sm:$0xe]  ;;  %v3437_v39 = vor.u32 %v3436_v40, %v3433_v2  ;;  %v3975_v33 = vunpack.c.l.b16 %v3913_v3 }
 0x203   : > { %v4748_v60 = vrot.slane %v4732_v58, 9  ;;  %v2567_v62 = vrot.slane %v2565_v56, 4  ;;  %v3916_v7 = vsel %vm5442_vm6, %v3914_v22, %v3915_v26  ;;  %v3447_v55 = vor.u32 %v3446_v36, %v3442_v45 }
 0x204   : > { %v4071_v51 = vpop.f32.mrf.mxu0  ;;  %v3595_v58 = vpack.c.b16 %v3574_v13, %v3573_v1  ;;  %v3976_v29 = vunpack.c.l.b16 %v3916_v7  ;;  %v3438_v27 = vrot.slane %v3437_v39, 4  ;;  %v3919_v26 = vrot.slane %v6318_v10, 5 }
 0x205   : > { %v3669_v38 = vpop.f32.mrf.mxu3  ;;  %v2722_v37 = vpop.f32.mrf.mxu1  ;;  %v2566_v47 = vsel %vm5442_vm6, %v4748_v60, %v2565_v56  ;;  %v3452_v22 = vrot.slane %v3450_v59, 5  ;;  %v4929_v60 = vld [vmem:[%s5247_s6 + $0xa8] sm:$0xf] }
 0x206   : > { %v3746_v12 = vadd.f32 %v3669_v38, %v3088_v32  ;;  %v2796_v23 = vadd.f32 %v2722_v37, %v5762_v49  ;;  %v3443_v37 = vsel %vm5259_vm2, %v3438_v27, %v3442_v45  ;;  %v3921_v36 = vrot.slane %v3919_v26, 4 }
 0x207   : > { %5010 = vmatmul.msk.bf16.gmra.mxu0 %vm720_vm3, %v3996_v4  ;;  %v5149_v4 = vld [vmem:[%s5247_s6 + $0x98] sm:$0x1]  ;;  %v3455_v7 = vshrl.u32 %v4929_v60, 16  ;;  %v3575_v45 = vunpack.c.l.b16 %v3443_v37 }
 0x208   : > { %v4148_v44 = vadd.f32 %v4071_v51, %v3746_v12  ;;  %v3013_v61 = vpop.f32.mrf.mxu2  ;;  %4769 = vmatmul.msk.bf16.gmra.mxu1 %vm720_vm3, %v2643_v15  ;;  %v2568_v32 = vrot.slane %v5149_v4, 5 }
 0x209   : > { %v3089_v34 = vadd.f32 %v3013_v61, %v2795_v52  ;;  %v2623_v52 = vunpack.c.l.b16 %v2566_v47  ;;  %v3448_v61 = vrot.slane %v3447_v55, 4  ;;  %v4733_v47 = vld [vmem:[%s5247_s6 + $0x9c] sm:$0xe] }
 0x20a   : > { %4180 = vxpose.xlu0.b32.cont [3/16] (narrow) %v4148_v44, 16  ;;  %v2569_v38 = vsel %vm5442_vm6, %v2567_v62, %v2568_v32  ;;  %v4974_v44 = vld [vmem:[%s5247_s6 + $0x9c] sm:$0xe]  ;;  %v3997_v62 = vpack.c.b16 %v3976_v29, %v3975_v33  ;;  %v6354_v32 = vld [vmem:[%s5247_s6 + $0xac] sm:$0xf] }
 0x20b   : > { %v2624_v56 = vunpack.c.l.b16 %v2569_v38  ;;  %v4990_v4 = vrot.slane %v4974_v44, 9  ;;  %v3453_v39 = vsel %vm5259_vm2, %v3448_v61, %v3452_v22  ;;  %v3458_v38 = vshll.u32 %v4929_v60, 16 }
 0x20c   : > { %v4073_v5 = vpop.f32.mrf.mxu0  ;;  %v3464_v55 = vshll.u32 %v6354_v32, 16  ;;  %v3468_v59 = vshrl.u32 %v6354_v32, 16  ;;  %v3576_v29 = vunpack.c.l.b16 %v3453_v39  ;;  %v3457_v44 = vrot.slane %v3455_v7, 4 }
 0x20d   : > { %v3671_v51 = vpop.f32.mrf.mxu3  ;;  %4887 = vmatmul.msk.bf16.gmra.mxu2 %vm720_vm3, %v5068_v63  ;;  %v2724_v15 = vpop.f32.mrf.mxu1  ;;  %v2644_v49 = vpack.c.b16 %v2624_v56, %v2623_v52  ;;  %v5151_v52 = vld [vmem:[%s5247_s6 + $0xa4] sm:$0x1] }
 0x20e   : > { %v3747_v12 = vadd.f32 %v3671_v51, %v3089_v34  ;;  %v3922_v34 = vrot.slane %v4928_v50, 5  ;;  %v3920_v50 = vsel %vm5442_vm6, %v4990_v4, %v3919_v26  ;;  %v2575_v56 = vrot.slane %v5151_v52, 5 }
 0x20f   : > { %v3460_v26 = vrot.slane %v3458_v38, 5  ;;  %v6373_v22 = vrot.slane %v3464_v55, 5  ;;  %v3977_v60 = vunpack.c.l.b16 %v3920_v50  ;;  %v3596_v4 = vpack.c.b16 %v3576_v29, %v3575_v45  ;;  %v6388_v45 = vld [vmem:[%s5247_s6 + $0xb8] sm:$0xf]  ;;  %v4975_v29 = vld [vmem:[%s5247_s6 + $0xa8] sm:$0xe] }
 0x210   : > { %v4149_v2 = vadd.f32 %v4073_v5, %v3747_v12  ;;  %v3016_v40 = vpop.f32.mrf.mxu2  ;;  %v5150_v5 = vld [vmem:[%s5247_s6 + $0xa0] sm:$0xf]  ;;  %v2797_v12 = vadd.f32 %v2724_v15, %v5775_v46  ;;  %v3923_v27 = vsel %vm5442_vm6, %v3921_v36, %v3922_v34  ;;  %v3470_v46 = vrot.slane %v3468_v59, 4  ;;  %v6376_v15 = vld [vmem:[%s5247_s6 + $0xb0] sm:$0x1] }
 0x211   : > { %v3090_v63 = vadd.f32 %v3016_v40, %v2796_v23  ;;  %v2572_v3 = vrot.slane %v5150_v5, 5  ;;  %v5069_v23 = vld [vmem:[%s5247_s6 + $0x9c] sm:$0xff]  ;;  %v3474_v5 = vshll.u32 %v6376_v15, 16  ;;  %v4932_v59 = vld [vmem:[%s5247_s6 + $0xb4] sm:$0xf]  ;;  %v3926_v52 = vrot.slane %v6354_v32, 5 }
 0x212   : > { %4957 = vmatmul.msk.bf16.gmra.mxu3 %vm720_vm3, %v3595_v58  ;;  %4181 = vxpose.xlu0.b32.cont [4/16] (narrow) %v4149_v2, 16  ;;  %v4749_v2 = vrot.slane %v4733_v47, 9  ;;  %v3471_v39 = vor.u32 %v3470_v46, %v6373_v22 }
 0x213   : > { %v2574_v40 = vrot.slane %v2572_v3, 4 }
 0x214   : > { %v4076_v10 = vpop.f32.mrf.mxu0  ;;  %v2573_v37 = vsel %vm5442_vm6, %v4749_v2, %v2572_v3 }
 0x215   : > { %v3674_v1 = vpop.f32.mrf.mxu3  ;;  %v2727_v13 = vpop.f32.mrf.mxu1  ;;  %v2576_v36 = vsel %vm5442_vm6, %v2574_v40, %v2575_v56  ;;  %v2625_v38 = vunpack.c.l.b16 %v2573_v37 }
 0x216   : > { %v3748_v51 = vadd.f32 %v3674_v1, %v3090_v63  ;;  %v3461_v1 = vor.u32 %v3460_v26, %v3457_v44  ;;  %v2798_v7 = vadd.f32 %v2727_v13, %v5788_v24  ;;  %v2626_v55 = vunpack.c.l.b16 %v2576_v36 }
 0x217   : > { %5011 = vmatmul.msk.bf16.gmra.mxu0 %vm720_vm3, %v3997_v62  ;;  %v3482_v24 = vshll.u32 %v4932_v59, 16  ;;  %v3488_v13 = vshll.u32 %v6388_v45, 16 }
 0x218   : > { %v4150_v58 = vadd.f32 %v4076_v10, %v3748_v51  ;;  %v3018_v33 = vpop.f32.mrf.mxu2  ;;  %4770 = vmatmul.msk.bf16.gmra.mxu1 %vm720_vm3, %v2644_v49  ;;  %v3978_v10 = vunpack.c.l.b16 %v3923_v27  ;;  %v3479_v27 = vshrl.u32 %v4932_v59, 16  ;;  %v2645_v40 = vpack.c.b16 %v2626_v55, %v2625_v38  ;;  %v5153_v55 = vld [vmem:[%s5247_s6 + $0xb0] sm:$0x1] }
 0x219   : > { %v3091_v61 = vadd.f32 %v3018_v33, %v2797_v12  ;;  %v3462_v12 = vrot.slane %v3461_v1, 4  ;;  %v3476_v33 = vrot.slane %v3474_v5, 5  ;;  %v6403_v37 = vrot.slane %v3488_v13, 5 }
 0x21a   : > { %4182 = vxpose.xlu0.b32.cont [5/16] (narrow) %v4150_v58, 16  ;;  %v3998_v3 = vpack.c.b16 %v3978_v10, %v3977_v60  ;;  %v3472_v58 = vrot.slane %v3471_v39, 4  ;;  %v3481_v32 = vrot.slane %v3479_v27, 4  ;;  %v3484_v10 = vrot.slane %v3482_v24, 5 }
 0x21b   : > { %v3929_v5 = vrot.slane %v6376_v15, 5  ;;  %v2582_v59 = vrot.slane %v5153_v55, 5  ;;  %v5154_v55 = vld [vmem:[%s5247_s6 + $0xb8] sm:$0xf] }
 0x21c   : > { %v4078_v63 = vpop.f32.mrf.mxu0  ;;  %v3477_v60 = vsel %vm5259_vm2, %v3472_v58, %v3476_v33 }
 0x21d   : > { %v3676_v62 = vpop.f32.mrf.mxu3  ;;  %4888 = vmatmul.msk.bf16.gmra.mxu2 %vm720_vm3, %v5069_v23  ;;  %v2729_v49 = vpop.f32.mrf.mxu1  ;;  %v3492_v23 = vshrl.u32 %v6388_v45, 16 }
 0x21e   : > { %v3749_v34 = vadd.f32 %v3676_v62, %v3091_v61  ;;  %v5152_v61 = vld [vmem:[%s5247_s6 + $0xac] sm:$0xf]  ;;  %v4991_v62 = vrot.slane %v4975_v29, 9 }
 0x21f   : > { %v2579_v26 = vrot.slane %v5152_v61, 5  ;;  %v3494_v36 = vrot.slane %v3492_v23, 4 }
 0x220   : > { %v4151_v51 = vadd.f32 %v4078_v63, %v3749_v34  ;;  %v3021_v47 = vpop.f32.mrf.mxu2  ;;  %v3467_v63 = vsel %vm5259_vm2, %v3462_v12, %v6373_v22  ;;  %v2799_v34 = vadd.f32 %v2729_v49, %v5801_v21  ;;  %v3928_v22 = vrot.slane %v3926_v52, 4 }
 0x221   : > { %v3092_v50 = vadd.f32 %v3021_v47, %v2798_v7  ;;  %v6409_v7 = vld [vmem:[%s5247_s6 + $0xbc] sm:$0x1]  ;;  %v2581_v38 = vrot.slane %v2579_v26, 4  ;;  %v3578_v12 = vunpack.c.l.b16 %v3477_v60  ;;  %v3927_v21 = vsel %vm5442_vm6, %v4991_v62, %v3926_v52 }
 0x222   : > { %4958 = vmatmul.msk.bf16.gmra.mxu3 %vm720_vm3, %v3596_v4  ;;  %4183 = vxpose.xlu0.b32.cont [6/16] (narrow) %v4151_v51, 16  ;;  %v4734_v4 = vld [vmem:[%s5247_s6 + $0xa8] sm:$0xe]  ;;  %v3485_v49 = vor.u32 %v3484_v10, %v3481_v32  ;;  %v3495_v58 = vor.u32 %v3494_v36, %v6403_v37  ;;  %v3498_v33 = vshll.u32 %v6409_v7, 16  ;;  %v3930_v29 = vsel %vm5442_vm6, %v3928_v22, %v3929_v5  ;;  %v4935_v36 = vld [vmem:[%s5247_s6 + $0xc0] sm:$0xf] }
 0x223   : > { %v5070_v51 = vld [vmem:[%s5247_s6 + $0xa8] sm:$0xff]  ;;  %v4750_v47 = vrot.slane %v4734_v4, 9  ;;  %v2583_v23 = vsel %vm5442_vm6, %v2581_v38, %v2582_v59  ;;  %v3979_v52 = vunpack.c.l.b16 %v3927_v21  ;;  %v4976_v5 = vld [vmem:[%s5247_s6 + $0xb4] sm:$0xe]  ;;  %v2586_v59 = vrot.slane %v5154_v55, 5  ;;  %v6572_v55 = vld [vmem:[#allocation2_spill] sm:$0xff] }
 0x224   : > { %v4081_v2 = vpop.f32.mrf.mxu0  ;;  %v3486_v61 = vrot.slane %v3485_v49, 4  ;;  %v3506_v21 = vshll.u32 %v4935_v36, 16 }
 0x225   : > { %v3679_v56 = vpop.f32.mrf.mxu3  ;;  %v2732_v44 = vpop.f32.mrf.mxu1  ;;  %v2580_v13 = vsel %vm5442_vm6, %v4750_v47, %v2579_v26  ;;  %v2628_v26 = vunpack.c.l.b16 %v2583_v23  ;;  %v3936_v23 = vrot.slane %v6409_v7, 5 }
 0x226   : > { %v3750_v46 = vadd.f32 %v3679_v56, %v3092_v50  ;;  %v3577_v50 = vunpack.c.l.b16 %v3467_v63  ;;  %v3980_v56 = vunpack.c.l.b16 %v3930_v29  ;;  %v3500_v63 = vrot.slane %v3498_v33, 5 }
 0x227   : > { %5012 = vmatmul.msk.bf16.gmra.mxu0 %vm720_vm3, %v3998_v3  ;;  %v2800_v60 = vadd.f32 %v2732_v44, %v5814_v30  ;;  %v2627_v32 = vunpack.c.l.b16 %v2580_v13  ;;  %v3491_v30 = vsel %vm5259_vm2, %v3486_v61, %v6403_v37 }
 0x228   : > { %v4152_v1 = vadd.f32 %v4081_v2, %v3750_v46  ;;  %v3023_v39 = vpop.f32.mrf.mxu2  ;;  %4771 = vmatmul.msk.bf16.gmra.mxu1 %vm720_vm3, %v2645_v40  ;;  %v3597_v40 = vpack.c.b16 %v3578_v12, %v3577_v50  ;;  %v3496_v46 = vrot.slane %v3495_v58, 4  ;;  %v4735_v12 = vld [vmem:[%s5247_s6 + $0xb4] sm:$0xe]  ;;  %v3579_v58 = vunpack.c.l.b16 %v3491_v30 }
 0x229   : > { %v3093_v3 = vadd.f32 %v3023_v39, %v2799_v34  ;;  %v3999_v34 = vpack.c.b16 %v3980_v56, %v3979_v52  ;;  %v2646_v22 = vpack.c.b16 %v2628_v26, %v2627_v32  ;;  %v2588_v52 = vrot.slane %v2586_v59, 4  ;;  %v5155_v56 = vld [vmem:[%s5247_s6 + $0xbc] sm:$0x1] }
 0x22a   : > { %4184 = vxpose.xlu0.b32.cont [7/16] (narrow) %v4152_v1, 16  ;;  %v6428_v1 = vld [vmem:[%s5247_s6 + $0xc4] sm:$0xf]  ;;  %v3501_v44 = vsel %vm5259_vm2, %v3496_v46, %v3500_v63  ;;  %v2589_v61 = vrot.slane %v5155_v56, 5 }
 0x22b   : > { %v3512_v49 = vshll.u32 %v6428_v1, 16  ;;  %v3516_v37 = vshrl.u32 %v6428_v1, 16  ;;  %v3580_v33 = vunpack.c.l.b16 %v3501_v44 }
 0x22c   : > { %v4083_v15 = vpop.f32.mrf.mxu0 }
 0x22d   : > { %v3681_v27 = vpop.f32.mrf.mxu3  ;;  %4889 = vmatmul.msk.bf16.gmra.mxu2 %vm720_vm3, %v5070_v51  ;;  %v2734_v24 = vpop.f32.mrf.mxu1  ;;  %v3933_v51 = vrot.slane %v6388_v45, 5 }
 0x22e   : > { %v3751_v2 = vadd.f32 %v3681_v27, %v3093_v3  ;;  %v3503_v3 = vshrl.u32 %v4935_v36, 16  ;;  %v2801_v45 = vadd.f32 %v2734_v24, %v5828_v20  ;;  %v3518_v20 = vrot.slane %v3516_v37, 4  ;;  %v6450_v24 = vld [vmem:[%s5247_s6 + $0xc8] sm:$0x1] }
 0x22f   : > { %v3935_v13 = vrot.slane %v3933_v51, 4 }
 0x230   : > { %v4153_v62 = vadd.f32 %v4083_v15, %v3751_v2  ;;  %v3026_v4 = vpop.f32.mrf.mxu2  ;;  %v4992_v15 = vrot.slane %v4976_v5, 9  ;;  %v5071_v2 = vld [vmem:[%s5247_s6 + $0xb4] sm:$0xff]  ;;  %v3505_v46 = vrot.slane %v3503_v3, 4  ;;  %v3522_v5 = vshll.u32 %v6450_v24, 16 }
 0x231   : > { %v3094_v10 = vadd.f32 %v3026_v4, %v2800_v60  ;;  %v3508_v60 = vrot.slane %v3506_v21, 5  ;;  %v3937_v7 = vsel %vm5442_vm6, %v3935_v13, %v3936_v23  ;;  %v4938_v13 = vld [vmem:[%s5247_s6 + $0xcc] sm:$0xf]  ;;  %v6469_v23 = vld [vmem:[%s5247_s6 + $0xd0] sm:$0xf] }
 0x232   : > { %4959 = vmatmul.msk.bf16.gmra.mxu3 %vm720_vm3, %v3597_v40  ;;  %4185 = vxpose.xlu0.b32.cont [8/16] (narrow) %v4153_v62, 16  ;;  %v4751_v40 = vrot.slane %v4735_v12, 9  ;;  %v6447_v62 = vrot.slane %v3512_v49, 5  ;;  %v3934_v32 = vsel %vm5442_vm6, %v4992_v15, %v3933_v51 }
 0x233   : > { %v3509_v30 = vor.u32 %v3508_v60, %v3505_v46  ;;  %v3981_v51 = vunpack.c.l.b16 %v3934_v32  ;;  %v3536_v32 = vshll.u32 %v6469_v23, 16 }
 0x234   : > { %v4086_v39 = vpop.f32.mrf.mxu0  ;;  %v3519_v44 = vor.u32 %v3518_v20, %v6447_v62  ;;  %v4736_v20 = vld [vmem:[%s5247_s6 + $0xc0] sm:$0xe] }
 0x235   : > { %v3684_v47 = vpop.f32.mrf.mxu3  ;;  %v2737_v38 = vpop.f32.mrf.mxu1  ;;  %v3510_v37 = vrot.slane %v3509_v30, 4  ;;  %v4752_v30 = vrot.slane %v4736_v20, 9 }
 0x236   : > { %v3752_v50 = vadd.f32 %v3684_v47, %v3094_v10  ;;  %v3598_v10 = vpack.c.b16 %v3580_v33, %v3579_v58  ;;  %v3982_v47 = vunpack.c.l.b16 %v3937_v7  ;;  %v2802_v3 = vadd.f32 %v2737_v38, %v6572_v55 }
 0x237   : > { %5013 = vmatmul.msk.bf16.gmra.mxu0 %vm720_vm3, %v3999_v34  ;;  %v2587_v34 = vsel %vm5442_vm6, %v4751_v40, %v2586_v59  ;;  %v3520_v58 = vrot.slane %v3519_v44, 4  ;;  %v3524_v33 = vrot.slane %v3522_v5, 5  ;;  %v3940_v38 = vrot.slane %v6428_v1, 5  ;;  %v5157_v5 = vld [vmem:[%s5247_s6 + $0xc8] sm:$0x1] }
 0x238   : > { %v4154_v29 = vadd.f32 %v4086_v39, %v3752_v50  ;;  %v3028_v27 = vpop.f32.mrf.mxu2  ;;  %4772 = vmatmul.msk.bf16.gmra.mxu1 %vm720_vm3, %v2646_v22  ;;  %v2590_v39 = vsel %vm5442_vm6, %v2588_v52, %v2589_v61  ;;  %v2629_v21 = vunpack.c.l.b16 %v2587_v34  ;;  %v4000_v15 = vpack.c.b16 %v3982_v47, %v3981_v51  ;;  %v5156_v52 = vld [vmem:[%s5247_s6 + $0xc4] sm:$0xf] }
 0x239   : > { %v3095_v63 = vadd.f32 %v3028_v27, %v2801_v45  ;;  %v2630_v59 = vunpack.c.l.b16 %v2590_v39  ;;  %v4977_v45 = vld [vmem:[%s5247_s6 + $0xc0] sm:$0xe]  ;;  %v2593_v56 = vrot.slane %v5156_v52, 5  ;;  %v3515_v46 = vsel %vm5259_vm2, %v3510_v37, %v6447_v62 }
 0x23a   : > { %4186 = vxpose.xlu0.b32.cont [9/16] (narrow) %v4154_v29, 16  ;;  %v4993_v60 = vrot.slane %v4977_v45, 9  ;;  %v3527_v1 = vshrl.u32 %v4938_v13, 16  ;;  %v3540_v7 = vshrl.u32 %v6469_v23, 16  ;;  %v3942_v62 = vrot.slane %v3940_v38, 4 }
 0x23b   : > { %v2647_v27 = vpack.c.b16 %v2630_v59, %v2629_v21  ;;  %v3943_v39 = vrot.slane %v6450_v24, 5  ;;  %v2595_v44 = vrot.slane %v2593_v56, 4  ;;  %v2596_v51 = vrot.slane %v5157_v5, 5  ;;  %v6573_v5 = vld [vmem:[#allocation3_spill] sm:$0xff] }
 0x23c   : > { %v4088_v4 = vpop.f32.mrf.mxu0  ;;  %v3581_v55 = vunpack.c.l.b16 %v3515_v46  ;;  %v3542_v21 = vrot.slane %v3540_v7, 4 }
 0x23d   : > { %v3686_v26 = vpop.f32.mrf.mxu3  ;;  %4890 = vmatmul.msk.bf16.gmra.mxu2 %vm720_vm3, %v5071_v2  ;;  %v2739_v36 = vpop.f32.mrf.mxu1  ;;  %v3944_v24 = vsel %vm5442_vm6, %v3942_v62, %v3943_v39  ;;  %v3947_v62 = vrot.slane %v6469_v23, 5 }
 0x23e   : > { %v3753_v22 = vadd.f32 %v3686_v26, %v3095_v63  ;;  %v3525_v63 = vsel %vm5259_vm2, %v3520_v58, %v3524_v33  ;;  %v2803_v26 = vadd.f32 %v2739_v36, %v5875_v42  ;;  %v3941_v42 = vsel %vm5442_vm6, %v4993_v60, %v3940_v38 }
 0x23f   : > { %v3529_v36 = vrot.slane %v3527_v1, 4  ;;  %v2594_v33 = vsel %vm5442_vm6, %v4752_v30, %v2593_v56  ;;  %v3984_v38 = vunpack.c.l.b16 %v3944_v24 }
 0x240   : > { %v4155_v50 = vadd.f32 %v4088_v4, %v3753_v22  ;;  %v3031_v12 = vpop.f32.mrf.mxu2  ;;  %v3530_v4 = vshll.u32 %v4938_v13, 16  ;;  %v5072_v22 = vld [vmem:[%s5247_s6 + $0xc0] sm:$0xff]  ;;  %v2631_v60 = vunpack.c.l.b16 %v2594_v33 }
 0x241   : > { %v3096_v49 = vadd.f32 %v3031_v12, %v2802_v3  ;;  %v3582_v3 = vunpack.c.l.b16 %v3525_v63  ;;  %v3538_v12 = vrot.slane %v3536_v32, 5 }
 0x242   : > { %4960 = vmatmul.msk.bf16.gmra.mxu3 %vm720_vm3, %v3598_v10  ;;  %4187 = vxpose.xlu0.b32.cont [10/16] (narrow) %v4155_v50, 16  ;;  %v3532_v50 = vrot.slane %v3530_v4, 5 }
 0x244   : > { %v4091_v29 = vpop.f32.mrf.mxu0  ;;  %v3533_v13 = vor.u32 %v3532_v50, %v3529_v36 }
 0x245   : > { %v3689_v2 = vpop.f32.mrf.mxu3  ;;  %v2742_v40 = vpop.f32.mrf.mxu1 }
 0x246   : > { %v3754_v61 = vadd.f32 %v3689_v2, %v3096_v49  ;;  %v4940_v49 = vld [vmem:[%s5247_s6 + $0xd4] sm:$0x1]  ;;  %v3543_v2 = vor.u32 %v3542_v21, %v3538_v12  ;;  %v3534_v4 = vrot.slane %v3533_v13, 4 }
 0x247   : > { %5014 = vmatmul.msk.bf16.gmra.mxu0 %vm720_vm3, %v4000_v15  ;;  %v2597_v15 = vsel %vm5442_vm6, %v2595_v44, %v2596_v51  ;;  %v3546_v52 = vshll.u32 %v4940_v49, 16  ;;  %v3950_v23 = vrot.slane %v4940_v49, 5 }
 0x248   : > { %v4156_v10 = vadd.f32 %v4091_v29, %v3754_v61  ;;  %v3033_v34 = vpop.f32.mrf.mxu2  ;;  %4773 = vmatmul.msk.bf16.gmra.mxu1 %vm720_vm3, %v2647_v27  ;;  %v3599_v29 = vpack.c.b16 %v3582_v3, %v3581_v55  ;;  %v3983_v27 = vunpack.c.l.b16 %v3941_v42  ;;  %v2804_v61 = vadd.f32 %v2742_v40, %v5886_v43  ;;  %v5073_v42 = vld [vmem:[%s5247_s6 + $0xcc] sm:$0xff] }
 0x249   : > { %v3097_v47 = vadd.f32 %v3033_v34, %v2803_v26  ;;  %v2632_v20 = vunpack.c.l.b16 %v2597_v15  ;;  %v3544_v32 = vrot.slane %v3543_v2, 4  ;;  %v3548_v7 = vrot.slane %v3546_v52, 5  ;;  %v4978_v34 = vld [vmem:[%s5247_s6 + $0xcc] sm:$0xe] }
 0x24a   : > { %4188 = vxpose.xlu0.b32.cont [11/16] (narrow) %v4156_v10, 16  ;;  %v4001_v1 = vpack.c.b16 %v3984_v38, %v3983_v27  ;;  %v4994_v44 = vrot.slane %v4978_v34, 9  ;;  %v3949_v3 = vrot.slane %v3947_v62, 4 }
 0x24b   : > { %v2648_v10 = vpack.c.b16 %v2632_v20, %v2631_v60  ;;  %v3549_v30 = vsel %vm5259_vm2, %v3544_v32, %v3548_v7 }
 0x24c   : > { %v4093_v59 = vpop.f32.mrf.mxu0  ;;  %v3584_v21 = vunpack.c.l.b16 %v3549_v30  ;;  %v3951_v31 = vsel %vm5442_vm6, %v3949_v3, %v3950_v23 }
 0x24d   : > { %v3691_v37 = vpop.f32.mrf.mxu3  ;;  %4891 = vmatmul.msk.bf16.gmra.mxu2 %vm720_vm3, %v5072_v22  ;;  %v2744_v58 = vpop.f32.mrf.mxu1  ;;  %v3539_v22 = vsel %vm5259_vm2, %v3534_v4, %v3538_v12  ;;  %v3948_v12 = vsel %vm5442_vm6, %v4994_v44, %v3947_v62  ;;  %v3986_v49 = vunpack.c.l.b16 %v3951_v31 }
 0x24e   : > { %v3755_v45 = vadd.f32 %v3691_v37, %v3097_v47  ;;  %v2805_v51 = vadd.f32 %v2744_v58, %v6573_v5  ;;  %v3583_v50 = vunpack.c.l.b16 %v3539_v22  ;;  %v3985_v15 = vunpack.c.l.b16 %v3948_v12  ;;  %v4243_v12 = vld [vmem:[%s6562_s2 + $0x8] sm:$0xff] }
 0x250   : > { %v4157_v46 = vadd.f32 %v4093_v59, %v3755_v45  ;;  %v3036_v63 = vpop.f32.mrf.mxu2  ;;  %v3600_v33 = vpack.c.b16 %v3584_v21, %v3583_v50  ;;  %v4002_v13 = vpack.c.b16 %v3986_v49, %v3985_v15 }
 0x251   : > { %v3098_v56 = vadd.f32 %v3036_v63, %v2804_v61 }
 0x252   : > { %4961 = vmatmul.msk.bf16.gmra.mxu3 %vm720_vm3, %v3599_v29  ;;  %4189 = vxpose.xlu0.b32.cont [12/16] (narrow) %v4157_v46, 16 }
 0x254   : > { %v4096_v26 = vpop.f32.mrf.mxu0 }
 0x255   : > { %v3694_v39 = vpop.f32.mrf.mxu3  ;;  %v2747_v43 = vpop.f32.mrf.mxu1 }
 0x256   : > { %v3756_v40 = vadd.f32 %v3694_v39, %v3098_v56  ;;  %v2806_v45 = vadd.f32 %v2747_v43, %v5922_v17 }
 0x257   : > { %5015 = vmatmul.msk.bf16.gmra.mxu0 %vm720_vm3, %v4001_v1 }
 0x258   : > { %v4158_v47 = vadd.f32 %v4096_v26, %v3756_v40  ;;  %v3038_v55 = vpop.f32.mrf.mxu2  ;;  %4774 = vmatmul.msk.bf16.gmra.mxu1 %vm720_vm3, %v2648_v10 }
 0x259   : > { %v3099_v36 = vadd.f32 %v3038_v55, %v2805_v51  ;;  %v4242_v55 = vld [vmem:[%s6562_s2] sm:$0xff] }
 0x25a   : > { %4190 = vxpose.xlu0.b32.cont [13/16] (narrow) %v4158_v47, 16  ;;  %v5182_v47 = vmov 0  }
 0x25b   : > { %5106 = vset.pattern.permute.xlu2 %v5182_v47 }
 0x25c   : > { %v4098_v59 = vpop.f32.mrf.mxu0  ;;  %4246 = vperm.xlu2 %5106, %v4242_v55  }
 0x25d   : > { %v3696_v24 = vpop.f32.mrf.mxu3  ;;  %4892 = vmatmul.msk.bf16.gmra.mxu2 %vm720_vm3, %v5073_v42  ;;  %v2749_v37 = vpop.f32.mrf.mxu1 }
 0x25e   : > { %v3757_v58 = vadd.f32 %v3696_v24, %v3099_v36  ;;  %v2807_v46 = vadd.f32 %v2749_v37, %v5946_v28 }
 0x260   : > { %v4159_v29 = vadd.f32 %v4098_v59, %v3757_v58  ;;  %v3041_v27 = vpop.f32.mrf.mxu2 }
 0x261   : > { %v3100_v38 = vadd.f32 %v3041_v27, %v2806_v45  ;;  %v4258_v45 = vld [vmem:[%s6563_s3] sm:$0xff] }
 0x262   : > { %4962 = vmatmul.msk.bf16.gmra.mxu3 %vm720_vm3, %v3600_v33  ;;  %4191 = vxpose.xlu0.b32.cont [14/16] (narrow) %v4159_v29, 16 }
 0x264   : > { %v4101_v2 = vpop.f32.mrf.mxu0  ;;  %4251 = vperm.xlu2 %5106, %v4243_v12  }
 0x265   : > { %v3699_v19 = vpop.f32.mrf.mxu3  ;;  %v2752_v52 = vpop.f32.mrf.mxu1 }
 0x266   : > { %v3758_v61 = vadd.f32 %v3699_v19, %v3100_v38  ;;  %v2808_v32 = vadd.f32 %v2752_v52, %v5965_v25 }
 0x267   : > { %5016 = vmatmul.msk.bf16.gmra.mxu0 %vm720_vm3, %v4002_v13 }
 0x268   : > { %v4160_v63 = vadd.f32 %v4101_v2, %v3758_v61  ;;  %v3043_v60 = vpop.f32.mrf.mxu2  ;;  %v4259_v61 = vld [vmem:[%s6563_s3 + $0x8] sm:$0xff] }
 0x269   : > { %v3101_v20 = vadd.f32 %v3043_v60, %v2807_v46 }
 0x26a   : > { %4192 = vxpose.xlu0.b32.cont [15/16] (narrow) %v4160_v63, 16 }
 0x26c   : > { %v4103_v17 = vpop.f32.mrf.mxu0  ;;  %4262 = vperm.xlu2 %5106, %v4258_v45  }
 0x26d   : > { %v3701_v56 = vpop.f32.mrf.mxu3  ;;  %v2754_v1 = vpop.f32.mrf.mxu1 }
 0x26e   : > { %v3759_v4 = vadd.f32 %v3701_v56, %v3101_v20  ;;  %v2809_v28 = vadd.f32 %v2754_v1, %v5989_v57 }
 0x270   : > { %v4161_v7 = vadd.f32 %v4103_v17, %v3759_v4  ;;  %v3046_v26 = vpop.f32.mrf.mxu2 }
 0x271   : > { %v3102_v10 = vadd.f32 %v3046_v26, %v2808_v32 }
 0x272   : > { %4193 = vxpose.xlu0.b32.end [16/16] (narrow) %v4161_v7, 16 }
 0x274   : > { %v4106_v34 = vpop.f32.mrf.mxu0  ;;  %4267 = vperm.xlu2 %5106, %v4259_v61  }
 0x275   : > { %v3704_v62 = vpop.f32.mrf.mxu3  ;;  %v2757_v39 = vpop.f32.mrf.mxu1 }
 0x276   : > { %v3760_v43 = vadd.f32 %v3704_v62, %v3102_v10  ;;  %v2810_v3 = vadd.f32 %v2757_v39, %v6008_v48 }
 0x278   : > { %v4162_v40 = vadd.f32 %v4106_v34, %v3760_v43  ;;  %v3048_v22 = vpop.f32.mrf.mxu2 }
 0x279   : > { %v3103_v30 = vadd.f32 %v3048_v22, %v2809_v28 }
 0x27a   : > { %4210 = vxpose.xlu1.b32.start [1/16] (narrow) %v4162_v40, 16 }
 0x27c   : > { %v4108_v44 = vpop.f32.mrf.mxu0 }
 0x27d   : > { %v3706_v5 = vpop.f32.mrf.mxu3  ;;  %v2759_v51 = vpop.f32.mrf.mxu1 }
 0x27e   : > { %v3761_v25 = vadd.f32 %v3706_v5, %v3103_v30  ;;  %v2811_v31 = vadd.f32 %v2759_v51, %v6032_v14 }
 0x280   : > { %v4163_v23 = vadd.f32 %v4108_v44, %v3761_v25  ;;  %v3051_v57 = vpop.f32.mrf.mxu2 }
 0x281   : > { %v3104_v42 = vadd.f32 %v3051_v57, %v2810_v3 }
 0x282   : > { %4211 = vxpose.xlu1.b32.cont [2/16] (narrow) %v4163_v23, 16 }
 0x284   : > { %v4111_v36 = vpop.f32.mrf.mxu0 }
 0x285   : > { %v3709_v50 = vpop.f32.mrf.mxu3  ;;  %v2762_v21 = vpop.f32.mrf.mxu1 }
 0x286   : > { %v3762_v59 = vadd.f32 %v3709_v50, %v3104_v42  ;;  %v2812_v29 = vadd.f32 %v2762_v21, %v6051_v54 }
 0x288   : > { %v4164_v24 = vadd.f32 %v4111_v36, %v3762_v59  ;;  %v3053_v37 = vpop.f32.mrf.mxu2  ;;  %v6574_v36 = vld [vmem:[#allocation4_spill] sm:$0xff] }
 0x289   : > { %v3105_v58 = vadd.f32 %v3053_v37, %v2811_v31 }
 0x28a   : > { %4212 = vxpose.xlu1.b32.cont [3/16] (narrow) %v4164_v24, 16 }
 0x28c   : > { %v4113_v48 = vpop.f32.mrf.mxu0 }
 0x28d   : > { %v3711_v33 = vpop.f32.mrf.mxu3  ;;  %v2764_v15 = vpop.f32.mrf.mxu1 }
 0x28e   : > { %v3763_v49 = vadd.f32 %v3711_v33, %v3105_v58  ;;  %v2813_v46 = vadd.f32 %v2764_v15, %v6075_v6 }
 0x290   : > { %v4165_v27 = vadd.f32 %v4113_v48, %v3763_v49  ;;  %v3056_v38 = vpop.f32.mrf.mxu2 }
 0x291   : > { %v3106_v13 = vadd.f32 %v3056_v38, %v2812_v29 }
 0x292   : > { %4213 = vxpose.xlu1.b32.cont [4/16] (narrow) %v4165_v27, 16 }
 0x294   : > { %v4116_v14 = vpop.f32.mrf.mxu0 }
 0x295   : > { %v3714_v2 = vpop.f32.mrf.mxu3  ;;  %v2767_v19 = vpop.f32.mrf.mxu1 }
 0x296   : > { %v3764_v52 = vadd.f32 %v3714_v2, %v3106_v13  ;;  %v2814_v4 = vadd.f32 %v2767_v19, %v6094_v16 }
 0x298   : > { %v4166_v63 = vadd.f32 %v4116_v14, %v3764_v52  ;;  %v3058_v60 = vpop.f32.mrf.mxu2 }
 0x299   : > { %v3107_v20 = vadd.f32 %v3058_v60, %v2813_v46 }
 0x29a   : > { %4214 = vxpose.xlu1.b32.cont [5/16] (narrow) %v4166_v63, 16 }
 0x29c   : > { %v4118_v54 = vpop.f32.mrf.mxu0 }
 0x29d   : > { %v3716_v17 = vpop.f32.mrf.mxu3  ;;  %v2769_v56 = vpop.f32.mrf.mxu1 }
 0x29e   : > { %v3765_v1 = vadd.f32 %v3716_v17, %v3107_v20  ;;  %v2815_v6 = vadd.f32 %v2769_v56, %v6118_v41 }
 0x2a0   : > { %v4167_v32 = vadd.f32 %v4118_v54, %v3765_v1  ;;  %v3061_v7 = vpop.f32.mrf.mxu2 }
 0x2a1   : > { %v3108_v26 = vadd.f32 %v3061_v7, %v2814_v4 }
 0x2a2   : > { %4215 = vxpose.xlu1.b32.cont [6/16] (narrow) %v4167_v32, 16 }
 0x2a4   : > { %v4121_v10 = vpop.f32.mrf.mxu0 }
 0x2a5   : > { %v3719_v34 = vpop.f32.mrf.mxu3  ;;  %v2772_v62 = vpop.f32.mrf.mxu1 }
 0x2a6   : > { %v3766_v39 = vadd.f32 %v3719_v34, %v3108_v26  ;;  %v2816_v16 = vadd.f32 %v2772_v62, %v6137_v9 }
 0x2a8   : > { %v4168_v43 = vadd.f32 %v4121_v10, %v3766_v39  ;;  %v3063_v28 = vpop.f32.mrf.mxu2 }
 0x2a9   : > { %v3109_v40 = vadd.f32 %v3063_v28, %v2815_v6 }
 0x2aa   : > { %4216 = vxpose.xlu1.b32.cont [7/16] (narrow) %v4168_v43, 16  ;;  %v4194_v43 = vpop.trf.xlu0 }
 0x2ac   : > { %v4123_v22 = vpop.f32.mrf.mxu0 }
 0x2ad   : > { %v3721_v30 = vpop.f32.mrf.mxu3  ;;  %v2774_v44 = vpop.f32.mrf.mxu1 }
 0x2ae   : > { %v3767_v5 = vadd.f32 %v3721_v30, %v3109_v40  ;;  %v2817_v41 = vadd.f32 %v2774_v44, %v6574_v36 }
 0x2b0   : > { %v4169_v51 = vadd.f32 %v4123_v22, %v3767_v5  ;;  %v3066_v25 = vpop.f32.mrf.mxu2 }
 0x2b1   : > { %v3110_v55 = vadd.f32 %v3066_v25, %v2816_v16 }
 0x2b2   : > { %4217 = vxpose.xlu1.b32.cont [8/16] (narrow) %v4169_v51, 16 }
 0x2b4   : > { %v4126_v3 = vpop.f32.mrf.mxu0 }
 0x2b5   : > { %v3724_v23 = vpop.f32.mrf.mxu3  ;;  %v2777_v57 = vpop.f32.mrf.mxu1 }
 0x2b6   : > { %v3768_v42 = vadd.f32 %v3724_v23, %v3110_v55  ;;  %v2818_v9 = vadd.f32 %v2777_v57, %v6178_v35  ;;  %v4247_v4 = vpop.permute.xlu2 %4246  ;;  %v4195_v55 = vpop.trf.xlu0 }
 0x2b8   : > { %v4170_v50 = vadd.f32 %v4126_v3, %v3768_v42  ;;  %v3068_v21 = vpop.f32.mrf.mxu2 }
 0x2b9   : > { %v3111_v59 = vadd.f32 %v3068_v21, %v2817_v41 }
 0x2ba   : > { %4218 = vxpose.xlu1.b32.cont [9/16] (narrow) %v4170_v50, 16 }
 0x2bc   : > { %v4128_v12 = vpop.f32.mrf.mxu0 }
 0x2bd   : > { %v3726_v31 = vpop.f32.mrf.mxu3  ;;  %v2779_v24 = vpop.f32.mrf.mxu1 }
 0x2be   : > { %v3769_v37 = vadd.f32 %v3726_v31, %v3111_v59  ;;  %v2819_v27 = vadd.f32 %v2779_v24, %v6199_v0  ;;  %v4252_v6 = vpop.permute.xlu2 %4251 }
 0x2bf   : > { %v4256_v36 = vmul.f32 %v4252_v6, %v4195_v55 }
 0x2c0   : > { %v4171_v58 = vadd.f32 %v4128_v12, %v3769_v37  ;;  %v3071_v48 = vpop.f32.mrf.mxu2 }
 0x2c1   : > { %v3112_v33 = vadd.f32 %v3071_v48, %v2818_v9 }
 0x2c2   : > { %4219 = vxpose.xlu1.b32.cont [10/16] (narrow) %v4171_v58, 16 }
 0x2c4   : > { %v4131_v15 = vpop.f32.mrf.mxu0 }
 0x2c5   : > { %v3729_v49 = vpop.f32.mrf.mxu3  ;;  %v2782_v29 = vpop.f32.mrf.mxu1 }
 0x2c6   : > { %v3770_v45 = vadd.f32 %v3729_v49, %v3112_v33  ;;  %v2820_v61 = vadd.f32 %v2782_v29, %v6217_v18  ;;  %v4263_v51 = vpop.permute.xlu2 %4262 }
 0x2c8   : > { %v4172_v38 = vadd.f32 %v4131_v15, %v3770_v45  ;;  %v3073_v13 = vpop.f32.mrf.mxu2 }
 0x2c9   : > { %v3113_v14 = vadd.f32 %v3073_v13, %v2819_v27 }
 0x2ca   : > { %4220 = vxpose.xlu1.b32.cont [11/16] (narrow) %v4172_v38, 16 }
 0x2cc   : > { %v4133_v2 = vpop.f32.mrf.mxu0 }
 0x2cd   : > { %v3731_v19 = vpop.f32.mrf.mxu3  ;;  %v2784_v63 = vpop.f32.mrf.mxu1 }
 0x2ce   : > { %v3771_v52 = vadd.f32 %v3731_v19, %v3113_v14  ;;  %v2821_v56 = vadd.f32 %v2784_v63, %v6240_v53  ;;  %v4268_v50 = vpop.permute.xlu2 %4267 }
 0x2cf   : > { %v4272_v21 = vadd.f32 %v4268_v50, %v4256_v36 }
 0x2d0   : > { %v4173_v35 = vadd.f32 %v4133_v2, %v3771_v52  ;;  %v3076_v46 = vpop.f32.mrf.mxu2 }
 0x2d1   : > { %v3114_v60 = vadd.f32 %v3076_v46, %v2820_v61  ;;  %vm4276_vm8 = vcmp.gt.f32.partialorder %v4272_v21, 0.0  ;;  %v4280_v59 = vmul.f32 0.1, %v4272_v21 }
 0x2d2   : > { %4221 = vxpose.xlu1.b32.cont [12/16] (narrow) %v4173_v35, 16 }
 0x2d3   : > { %v4284_v12 = vsel %vm4276_vm8, %v4272_v21, %v4280_v59 }
 0x2d4   : > { %v4136_v20 = vpop.f32.mrf.mxu0  ;;  %4288 = vst [vmem:[%s219_s30 + $0x10] sm:$0xff] %v4284_v12 }
 0x2d5   : > { %v3734_v54 = vpop.f32.mrf.mxu3  ;;  %v2787_v7 = vpop.f32.mrf.mxu1 }
 0x2d6   : > { %v3772_v17 = vadd.f32 %v3734_v54, %v3114_v60  ;;  %v2822_v34 = vadd.f32 %v2787_v7, %v6260_v11 }
 0x2d8   : > { %v4174_v0 = vadd.f32 %v4136_v20, %v3772_v17  ;;  %v3078_v1 = vpop.f32.mrf.mxu2 }
 0x2d9   : > { %5107 = vset.pattern.permute.xlu0 %v5182_v47  ;;  %v3115_v32 = vadd.f32 %v3078_v1, %v2821_v56  ;;  %v4254_v47 = vmul.f32 %v4247_v4, %v4194_v43 }
 0x2da   : > { %4222 = vxpose.xlu1.b32.cont [13/16] (narrow) %v4174_v0, 16 }
 0x2db   : > { %v4270_v25 = vadd.f32 %v4263_v51, %v4254_v47 }
 0x2dc   : > { %v4138_v26 = vpop.f32.mrf.mxu0 }
 0x2dd   : > { %v3736_v18 = vpop.f32.mrf.mxu3  ;;  %v2789_v28 = vpop.f32.mrf.mxu1  ;;  %vm4274_vm7 = vcmp.gt.f32.partialorder %v4270_v25, 0.0  ;;  %v4278_v3 = vmul.f32 0.1, %v4270_v25 }
 0x2de   : > { %v3773_v10 = vadd.f32 %v3736_v18, %v3115_v32  ;;  %v2823_v44 = vadd.f32 %v2789_v28, %v6280_v8 }
 0x2df   : > { %v4282_v42 = vsel %vm4274_vm7, %v4270_v25, %v4278_v3 }
 0x2e0   : > { %v4175_v62 = vadd.f32 %v4138_v26, %v3773_v10  ;;  %v3081_v39 = vpop.f32.mrf.mxu2  ;;  %4286 = vst [vmem:[%s219_s30] sm:$0xff] %v4282_v42 }
 0x2e1   : > { %v3116_v53 = vadd.f32 %v3081_v39, %v2822_v34 }
 0x2e2   : > { %4223 = vxpose.xlu1.b32.cont [14/16] (narrow) %v4175_v62, 16 }
 0x2e4   : > { %v4141_v40 = vpop.f32.mrf.mxu0 }
 0x2e5   : > { %v3739_v22 = vpop.f32.mrf.mxu3 }
 0x2e6   : > { %v3774_v30 = vadd.f32 %v3739_v22, %v3116_v53 }
 0x2e8   : > { %v4176_v5 = vadd.f32 %v4141_v40, %v3774_v30  ;;  %v3083_v16 = vpop.f32.mrf.mxu2 }
 0x2e9   : > { %v3117_v11 = vadd.f32 %v3083_v16, %v2823_v44 }
 0x2ea   : > { %4224 = vxpose.xlu1.b32.cont [15/16] (narrow) %v4176_v5, 16 }
 0x2ec   : > { %v4143_v41 = vpop.f32.mrf.mxu0 }
 0x2ed   : > { %v3741_v23 = vpop.f32.mrf.mxu3 }
 0x2ee   : > { %v3775_v57 = vadd.f32 %v3741_v23, %v3117_v11 }
 0x2f0   : > { %v4177_v8 = vadd.f32 %v4143_v41, %v3775_v57 }
 0x2f2   : > { %4225 = vxpose.xlu1.b32.end [16/16] (narrow) %v4177_v8, 16 }
 0x31e   : > { %v4226_v31 = vpop.trf.xlu1 }
 0x31f   : > { %v4255_v24 = vmul.f32 %v4247_v4, %v4226_v31 }
 0x321   : > { %v4271_v37 = vadd.f32 %v4263_v51, %v4255_v24 }
 0x323   : > { %vm4275_vm9 = vcmp.gt.f32.partialorder %v4271_v37, 0.0  ;;  %v4279_v9 = vmul.f32 0.1, %v4271_v37 }
 0x325   : > { %v4283_v58 = vsel %vm4275_vm9, %v4271_v37, %v4279_v9 }
 0x326   : > { %4287 = vst [vmem:[%s219_s30 + $0x8] sm:$0xff] %v4283_v58  ;;  %v4227_v48 = vpop.trf.xlu1 }
 0x327   : > { %v4257_v33 = vmul.f32 %v4252_v6, %v4227_v48 }
 0x329   : > { %v4273_v15 = vadd.f32 %v4268_v50, %v4257_v33 }
 0x32b   : > { %vm4277_vm10 = vcmp.gt.f32.partialorder %v4273_v15, 0.0  ;;  %v4281_v49 = vmul.f32 0.1, %v4273_v15 }
 0x32d   : > { %v4285_v45 = vsel %vm4277_vm10, %v4273_v15, %v4281_v49 }
 0x32e   : > { %4289 = vst [vmem:[%s219_s30 + $0x18] sm:$0xff] %v4285_v45 }
 0x32f PF: > { %s14_s17 = sadd.s32 1, %s5180_s17   ;;  %s6575_s15 = smov %s5176_s16 }
 0x330   : > { %p11_p5 = scmp.ge.s32.totalorder %s14_s17, 4   ;;  %s6576_s16 = smov %s6578_s18 }
 0x332   :  { %13 = sbr.rel (!%p11_p5) target bundleno = 2 (0x2), region = 77 }

// kernel: conv_block.2
= control target key start
LH: loop header
LB: loop body
LE: loop exit
PB: predicated region body
PF: predicated region fallthrough
CT: control target
= control target key end

     0   :  { %s5111_s9 = smov 0   ;;  %s5113_s10 = smov 0   ;;  %s6453_s0 = inlined_call_operand.vmem [shape: bf16[2,18,18,16], index: 0, kind: input, shape index: {}]   ;;  %s6454_s1 = inlined_call_operand.vmem [shape: bf16[9,16,128], index: 1, kind: input, shape index: {}]   ;;  %s6455_s2 = inlined_call_operand.vmem [shape: f32[2,2,128], index: 2, kind: output, shape index: {}]  }
   0x1   :  { %s5115_s11 = smov 0  }
   0x2 LB: > { %s24_s12 = sadd.s32 1, %s5090_s10  ;;  %p4304_p0 = scmp.ge.s32.totalorder %s5094_s11, 1  ;;  %s5094_s11 = sphi %s5115_s11, %s12_s11   ;;  %s5090_s10 = sphi %s5113_s10, %s6467_s10   ;;  %s5086_s9 = sphi %s5111_s9, %s6466_s9  }
   0x3   : > { %p26_p1 = scmp.ge.s32.totalorder %s24_s12, 2  ;;  %p126_p2 = scmp.lt.s32.totalorder %s5094_s11, 3 }
   0x5   : > { %s6469_s12 = smov (%p26_p1, %s24_s12), 0  ;;  %p127_p3 = pnand %p4304_p0, %p126_p2 }
   0x7   : > { %130 = sbr.rel (%p127_p3) target bundleno = 772 (0x304), region = 28 }
   0xc   : > { %v4954_v0 = vld [vmem:[%s6454_s1 + $0x8] sm:$0xff]  ;;  %p148_p4 = scmp.lt.s32.totalorder %s5086_s9, 1  ;;  %v4955_v1 = vld [vmem:[%s6454_s1 + $0x10] sm:$0xff]  ;;  %v4972_v2 = vld [vmem:[%s6454_s1 + $0x18] sm:$0xff]  ;;  %vm214_vm0 = vsmask.f32 3328 }
   0xd   : > { %4994 = vmatpush.bf16.msra.mxu1 %v4954_v0  ;;  %4995 = vmatpush.bf16.msra.mxu2 %v4954_v0  ;;  %v4953_v3 = vld [vmem:[%s6454_s1] sm:$0xff]  ;;  %vm215_vm1 = vsmask.f32 7440  ;;  %vm658_vm3 = vcmask 130048   ;;  %vm1067_vm4 = vcmask 1042432   ;;  %vm1068_vm5 = vcmask 1046532  }
   0xe   : > { %s6471_s9 = smov (!%p148_p4, %s5086_s9), 1  ;;  %4996 = vmatpush.bf16.msra.mxu3 %v4954_v0  ;;  %714 = vmatpush.bf16.msra.mxu0 %v4954_v0  ;;  %v4973_v4 = vld [vmem:[%s6454_s1 + $0x20] sm:$0xff]  ;;  %vm5162_vm2 = vmor %vm214_vm0, %vm215_vm1  ;;  %vm4222_vm7 = vcmask 1040384  }
   0xf   : > { %s4997_s23 = smul.u32 216, %s6471_s9  ;;  %vm5345_vm6 = vmor %vm1067_vm4, %vm1068_vm5  ;;  %s4306_s7 = sshll.u32 %s6471_s9, 1 }
  0x10   : > { %s157_s14 = scalar_lea.vmem %s6455_s2, %s4306_s7 }
  0x11   : > { %1294 = vmatpush.bf16.msrb.mxu2 %v4955_v1  ;;  %937 = vmatpush.bf16.msrb.mxu1 %v4953_v3  ;;  %s5150_s26 = scalar_lea.vmem %s6453_s0, %s4997_s23 }
  0x12   : > { %1588 = vmatpush.bf16.msrb.mxu3 %v4972_v2  ;;  %2246 = vmatpush.bf16.msrb.mxu0 %v4973_v4  ;;  %v172_v5 = vld [vmem:[%s5150_s26 + $0x30] sm:$0xf]  ;;  %v173_v6 = vld [vmem:[%s5150_s26 + $0x34] sm:$0xf]  ;;  %v202_v7 = vld [vmem:[%s5150_s26 + $0x38] sm:$0x1] }
  0x13   : > { %v314_v8 = vshrl.u32 %v172_v5, 16  ;;  %v317_v9 = vshll.u32 %v172_v5, 16  ;;  %v323_v10 = vshll.u32 %v173_v6, 16  ;;  %v327_v11 = vshrl.u32 %v173_v6, 16  ;;  %v180_v12 = vld [vmem:[%s5150_s26 + $0x60] sm:$0xf] }
  0x14   : > { %v333_v13 = vshll.u32 %v202_v7, 16  ;;  %v181_v14 = vld [vmem:[%s5150_s26 + $0x64] sm:$0xf]  ;;  %v206_v15 = vld [vmem:[%s5150_s26 + $0x68] sm:$0x1]  ;;  %v410_v16 = vshrl.u32 %v180_v12, 16 }
  0x15   : > { %v316_v17 = vrot.slane %v314_v8, 4  ;;  %v319_v18 = vrot.slane %v317_v9, 5  ;;  %v325_v19 = vrot.slane %v323_v10, 5  ;;  %v329_v20 = vrot.slane %v327_v11, 4  ;;  %v188_v21 = vld [vmem:[%s5150_s26 + $0x90] sm:$0xf] }
  0x16   : > { %v335_v22 = vrot.slane %v333_v13, 5  ;;  %v412_v23 = vrot.slane %v410_v16, 4  ;;  %v413_v24 = vshll.u32 %v180_v12, 16  ;;  %v419_v25 = vshll.u32 %v181_v14, 16  ;;  %v189_v30 = vld [vmem:[%s5150_s26 + $0x94] sm:$0xf] }
  0x17   : > { %v320_v26 = vor.u32 %v319_v18, %v316_v17  ;;  %v330_v27 = vor.u32 %v329_v20, %v325_v19  ;;  %v423_v28 = vshrl.u32 %v181_v14, 16  ;;  %v429_v29 = vshll.u32 %v206_v15, 16  ;;  %v210_v40 = vld [vmem:[%s5150_s26 + $0x98] sm:$0x1]  ;;  %v164_v56 = vld [vmem:[%s5150_s26] sm:$0xf] }
  0x18   : > { %v415_v32 = vrot.slane %v413_v24, 5  ;;  %v421_v33 = vrot.slane %v419_v25, 5  ;;  %v506_v34 = vshrl.u32 %v188_v21, 16  ;;  %v509_v42 = vshll.u32 %v188_v21, 16  ;;  %v5175_v60 = vld [vmem:[%s5150_s26 + $0x4] sm:$0xf] }
  0x19   : > { %v321_v35 = vrot.slane %v320_v26, 4  ;;  %v331_v36 = vrot.slane %v330_v27, 4  ;;  %v425_v37 = vrot.slane %v423_v28, 4  ;;  %v431_v38 = vrot.slane %v429_v29, 5  ;;  %v5178_v61 = vld [vmem:[%s5150_s26 + $0x8] sm:$0x1] }
  0x1a   : > { %v416_v39 = vor.u32 %v415_v32, %v412_v23  ;;  %v508_v41 = vrot.slane %v506_v34, 4  ;;  %v515_v43 = vshll.u32 %v189_v30, 16  ;;  %v519_v47 = vshrl.u32 %v189_v30, 16  ;;  %v174_v14 = vld [vmem:[%s5150_s26 + $0x3c] sm:$0xf] }
  0x1b   : > { %v326_v44 = vsel %vm5162_vm2, %v321_v35, %v325_v19  ;;  %v336_v45 = vsel %vm5162_vm2, %v331_v36, %v335_v22  ;;  %v426_v46 = vor.u32 %v425_v37, %v421_v33  ;;  %v511_v51 = vrot.slane %v509_v42, 5  ;;  %v5190_v15 = vld [vmem:[%s5150_s26 + $0x40] sm:$0xf]  ;;  %v5195_v20 = vld [vmem:[%s5150_s26 + $0x44] sm:$0x1] }
  0x1c   : > { %v612_v48 = vunpack.c.l.b16 %v326_v44  ;;  %v613_v49 = vunpack.c.l.b16 %v336_v45  ;;  %v417_v50 = vrot.slane %v416_v39, 4  ;;  %v517_v53 = vrot.slane %v515_v43, 5  ;;  %v182_v28 = vld [vmem:[%s5150_s26 + $0x6c] sm:$0xf]  ;;  %v207_v42 = vld [vmem:[%s5150_s26 + $0x74] sm:$0x1] }
  0x1d   : > { %v427_v52 = vrot.slane %v426_v46, 4  ;;  %v521_v54 = vrot.slane %v519_v47, 4  ;;  %v525_v55 = vshll.u32 %v210_v40, 16  ;;  %v512_v59 = vor.u32 %v511_v51, %v508_v41 }
  0x1e   : > { %v640_v57 = vpack.c.b16 %v613_v49, %v612_v48  ;;  %v422_v58 = vsel %vm5162_vm2, %v417_v50, %v421_v33  ;;  %v218_v4 = vshrl.u32 %v164_v56, 16  ;;  %v221_v5 = vshll.u32 %v164_v56, 16  ;;  %v190_v56 = vld [vmem:[%s5150_s26 + $0x9c] sm:$0xf] }
  0x1f   : > { %v432_v62 = vsel %vm5162_vm2, %v427_v52, %v431_v38  ;;  %v620_v63 = vunpack.c.l.b16 %v422_v58  ;;  %v522_v0 = vor.u32 %v521_v54, %v517_v53  ;;  %v527_v1 = vrot.slane %v525_v55, 5  ;;  %v183_v38 = vld [vmem:[%s5150_s26 + $0x70] sm:$0xf] }
  0x20   : > { %4317 = vmatmul.msk.bf16.vlgmr.msra.gmra.mxu1 %vm658_vm3, %v640_v57  ;;  %v621_v2 = vunpack.c.l.b16 %v432_v62  ;;  %v513_v3 = vrot.slane %v512_v59, 4  ;;  %v227_v7 = vshll.u32 %v5175_v60, 16  ;;  %v231_v8 = vshrl.u32 %v5175_v60, 16  ;;  %v191_v62 = vld [vmem:[%s5150_s26 + $0xa0] sm:$0xf] }
  0x21   : > { %v523_v6 = vrot.slane %v522_v0, 4  ;;  %v237_v9 = vshll.u32 %v5178_v61, 16  ;;  %v220_v12 = vrot.slane %v218_v4, 4  ;;  %v223_v13 = vrot.slane %v221_v5, 5 }
  0x22   : > { %v644_v10 = vpack.c.b16 %v621_v2, %v620_v63  ;;  %v518_v11 = vsel %vm5162_vm2, %v513_v3, %v517_v53  ;;  %v229_v18 = vrot.slane %v227_v7, 5  ;;  %v233_v19 = vrot.slane %v231_v8, 4  ;;  %v211_v3 = vld [vmem:[%s5150_s26 + $0xa4] sm:$0x1] }
  0x23   : > { %v528_v16 = vsel %vm5162_vm2, %v523_v6, %v527_v1  ;;  %v628_v17 = vunpack.c.l.b16 %v518_v11  ;;  %v224_v22 = vor.u32 %v223_v13, %v220_v12  ;;  %v239_v23 = vrot.slane %v237_v9, 5 }
  0x24   : > { %4321 = vmatmul.msk.bf16.vlgmr.msra.gmra.mxu2 %vm658_vm3, %v644_v10  ;;  %v629_v21 = vunpack.c.l.b16 %v528_v16  ;;  %v234_v24 = vor.u32 %v233_v19, %v229_v18  ;;  %v338_v25 = vshrl.u32 %v174_v14, 16  ;;  %v341_v26 = vshll.u32 %v174_v14, 16 }
  0x25   : > { %v347_v27 = vshll.u32 %v5190_v15, 16  ;;  %v225_v30 = vrot.slane %v224_v22, 4  ;;  %v351_v32 = vshrl.u32 %v5190_v15, 16  ;;  %v357_v33 = vshll.u32 %v5195_v20, 16 }
  0x26   : > { %v648_v29 = vpack.c.b16 %v629_v21, %v628_v17  ;;  %v235_v34 = vrot.slane %v234_v24, 4  ;;  %v340_v35 = vrot.slane %v338_v25, 4  ;;  %v343_v36 = vrot.slane %v341_v26, 5  ;;  %v166_v17 = vld [vmem:[%s5150_s26 + $0xc] sm:$0xf] }
  0x27   : > { %v349_v37 = vrot.slane %v347_v27, 5  ;;  %v230_v39 = vsel %vm5162_vm2, %v225_v30, %v229_v18  ;;  %v353_v40 = vrot.slane %v351_v32, 4  ;;  %v359_v41 = vrot.slane %v357_v33, 5  ;;  %v5224_v27 = vld [vmem:[%s5150_s26 + $0x14] sm:$0x1] }
  0x28   : > { %4325 = vmatmul.msk.bf16.vlgmr.msra.gmra.mxu3 %vm658_vm3, %v648_v29  ;;  %v434_v43 = vshrl.u32 %v182_v28, 16  ;;  %v240_v44 = vsel %vm5162_vm2, %v235_v34, %v239_v23  ;;  %v604_v45 = vunpack.c.l.b16 %v230_v39  ;;  %v344_v46 = vor.u32 %v343_v36, %v340_v35  ;;  %v5221_v23 = vld [vmem:[%s5150_s26 + $0x10] sm:$0xf] }
  0x29   : > { %v437_v47 = vshll.u32 %v182_v28, 16  ;;  %v605_v48 = vunpack.c.l.b16 %v240_v44  ;;  %v354_v49 = vor.u32 %v353_v40, %v349_v37  ;;  %v443_v51 = vshll.u32 %v183_v38, 16 }
  0x2a   : > { %v436_v50 = vrot.slane %v434_v43, 4  ;;  %v345_v52 = vrot.slane %v344_v46, 4  ;;  %v447_v54 = vshrl.u32 %v183_v38, 16  ;;  %v453_v55 = vshll.u32 %v207_v42, 16  ;;  %v5234_v42 = vld [vmem:[%s5150_s26 + $0x4c] sm:$0xf] }
  0x2b   : > { %v439_v53 = vrot.slane %v437_v47, 5  ;;  %v636_v57 = vpack.c.b16 %v605_v48, %v604_v45  ;;  %v355_v58 = vrot.slane %v354_v49, 4  ;;  %v445_v59 = vrot.slane %v443_v51, 5  ;;  %v5239_v51 = vld [vmem:[%s5150_s26 + $0x50] sm:$0x1] }
  0x2c   : > { %v350_v63 = vsel %vm5162_vm2, %v345_v52, %v349_v37  ;;  %v449_v1 = vrot.slane %v447_v54, 4  ;;  %v455_v2 = vrot.slane %v453_v55, 5  ;;  %v530_v6 = vshrl.u32 %v190_v56, 16  ;;  %v176_v37 = vld [vmem:[%s5150_s26 + $0x48] sm:$0xf] }
  0x2d   : > { %v440_v0 = vor.u32 %v439_v53, %v436_v50  ;;  %4313 = vmatmul.msk.bf16.vlgmr.msra.gmra.mxu0 %vm658_vm3, %v636_v57  ;;  %v360_v4 = vsel %vm5162_vm2, %v355_v58, %v359_v41  ;;  %v614_v5 = vunpack.c.l.b16 %v350_v63  ;;  %v533_v7 = vshll.u32 %v190_v56, 16 }
  0x2e   : > { %v615_v8 = vunpack.c.l.b16 %v360_v4  ;;  %v450_v10 = vor.u32 %v449_v1, %v445_v59  ;;  %v539_v11 = vshll.u32 %v191_v62, 16  ;;  %v532_v12 = vrot.slane %v530_v6, 4 }
  0x2f   : > { %v441_v9 = vrot.slane %v440_v0, 4  ;;  %v535_v13 = vrot.slane %v533_v7, 5  ;;  %v543_v14 = vshrl.u32 %v191_v62, 16  ;;  %v549_v16 = vshll.u32 %v211_v3, 16  ;;  %v184_v62 = vld [vmem:[%s5150_s26 + $0x78] sm:$0xf] }
  0x30   : > { %v641_v18 = vpack.c.b16 %v615_v8, %v614_v5  ;;  %v451_v21 = vrot.slane %v450_v10, 4  ;;  %v541_v22 = vrot.slane %v539_v11, 5  ;;  %v242_v30 = vshrl.u32 %v166_v17, 16  ;;  %v185_v3 = vld [vmem:[%s5150_s26 + $0x7c] sm:$0xf] }
  0x31   : > { %v446_v19 = vsel %vm5162_vm2, %v441_v9, %v445_v59  ;;  %v536_v25 = vor.u32 %v535_v13, %v532_v12  ;;  %v545_v26 = vrot.slane %v543_v14, 4  ;;  %v551_v29 = vrot.slane %v549_v16, 5  ;;  %v208_v11 = vld [vmem:[%s5150_s26 + $0x80] sm:$0x1] }
  0x32   : > { %v622_v24 = vunpack.c.l.b16 %v446_v19  ;;  %4318 = vmatmul.msk.bf16.gmra.mxu1 %vm658_vm3, %v641_v18  ;;  %v456_v28 = vsel %vm5162_vm2, %v451_v21, %v455_v2  ;;  %v245_v32 = vshll.u32 %v166_v17, 16  ;;  %v251_v36 = vshll.u32 %v5221_v23, 16 }
  0x33   : > { %v623_v33 = vunpack.c.l.b16 %v456_v28  ;;  %v537_v34 = vrot.slane %v536_v25, 4  ;;  %v546_v35 = vor.u32 %v545_v26, %v541_v22  ;;  %v244_v38 = vrot.slane %v242_v30, 4 }
  0x34   : > { %v247_v39 = vrot.slane %v245_v32, 5  ;;  %v255_v40 = vshrl.u32 %v5221_v23, 16  ;;  %v261_v41 = vshll.u32 %v5224_v27, 16  ;;  %v253_v46 = vrot.slane %v251_v36, 5 }
  0x35   : > { %v645_v43 = vpack.c.b16 %v623_v33, %v622_v24  ;;  %v542_v44 = vsel %vm5162_vm2, %v537_v34, %v541_v22  ;;  %v547_v45 = vrot.slane %v546_v35, 4  ;;  %v362_v53 = vshrl.u32 %v176_v37, 16  ;;  %v193_v34 = vld [vmem:[%s5150_s26 + $0xac] sm:$0xf]  ;;  %v212_v35 = vld [vmem:[%s5150_s26 + $0xb0] sm:$0x1] }
  0x36   : > { %v630_v47 = vunpack.c.l.b16 %v542_v44  ;;  %v248_v48 = vor.u32 %v247_v39, %v244_v38  ;;  %v257_v49 = vrot.slane %v255_v40, 4  ;;  %v263_v50 = vrot.slane %v261_v41, 5 }
  0x37   : > { %4322 = vmatmul.msk.bf16.gmra.mxu2 %vm658_vm3, %v645_v43  ;;  %v552_v52 = vsel %vm5162_vm2, %v547_v45, %v551_v29  ;;  %v365_v54 = vshll.u32 %v176_v37, 16  ;;  %v371_v55 = vshll.u32 %v5234_v42, 16  ;;  %v375_v59 = vshrl.u32 %v5234_v42, 16  ;;  %v192_v29 = vld [vmem:[%s5150_s26 + $0xa8] sm:$0xf] }
  0x38   : > { %v631_v56 = vunpack.c.l.b16 %v552_v52  ;;  %v249_v57 = vrot.slane %v248_v48, 4  ;;  %v258_v58 = vor.u32 %v257_v49, %v253_v46  ;;  %v364_v63 = vrot.slane %v362_v53, 4 }
  0x39   : > { %v367_v0 = vrot.slane %v365_v54, 5  ;;  %v373_v1 = vrot.slane %v371_v55, 5  ;;  %v381_v2 = vshll.u32 %v5239_v51, 16  ;;  %v377_v7 = vrot.slane %v375_v59, 4  ;;  %v168_v54 = vld [vmem:[%s5150_s26 + $0x18] sm:$0xf] }
  0x3a   : > { %v649_v4 = vpack.c.b16 %v631_v56, %v630_v47  ;;  %v254_v5 = vsel %vm5162_vm2, %v249_v57, %v253_v46  ;;  %v259_v6 = vrot.slane %v258_v58, 4  ;;  %v458_v12 = vshrl.u32 %v184_v62, 16  ;;  %v5267_v58 = vld [vmem:[%s5150_s26 + $0x1c] sm:$0xf]  ;;  %v5270_v59 = vld [vmem:[%s5150_s26 + $0x20] sm:$0x1] }
  0x3b   : > { %v606_v8 = vunpack.c.l.b16 %v254_v5  ;;  %v368_v9 = vor.u32 %v367_v0, %v364_v63  ;;  %v383_v10 = vrot.slane %v381_v2, 5  ;;  %v378_v14 = vor.u32 %v377_v7, %v373_v1 }
  0x3c   : > { %4326 = vmatmul.msk.bf16.gmra.mxu3 %vm658_vm3, %v649_v4  ;;  %v264_v13 = vsel %vm5162_vm2, %v259_v6, %v263_v50  ;;  %v461_v16 = vshll.u32 %v184_v62, 16  ;;  %v467_v17 = vshll.u32 %v185_v3, 16  ;;  %v460_v21 = vrot.slane %v458_v12, 4 }
  0x3d   : > { %v607_v18 = vunpack.c.l.b16 %v264_v13  ;;  %v369_v19 = vrot.slane %v368_v9, 4  ;;  %v471_v22 = vshrl.u32 %v185_v3, 16  ;;  %v379_v24 = vrot.slane %v378_v14, 4 }
  0x3e   : > { %v463_v25 = vrot.slane %v461_v16, 5  ;;  %v469_v26 = vrot.slane %v467_v17, 5  ;;  %v477_v28 = vshll.u32 %v208_v11, 16  ;;  %v554_v43 = vshrl.u32 %v192_v29, 16  ;;  %v5280_v16 = vld [vmem:[%s5150_s26 + $0x58] sm:$0xf] }
  0x3f   : > { %v637_v30 = vpack.c.b16 %v607_v18, %v606_v8  ;;  %v374_v32 = vsel %vm5162_vm2, %v369_v19, %v373_v1  ;;  %v473_v33 = vrot.slane %v471_v22, 4  ;;  %v384_v36 = vsel %vm5162_vm2, %v379_v24, %v383_v10  ;;  %v178_v10 = vld [vmem:[%s5150_s26 + $0x54] sm:$0xf]  ;;  %v5285_v22 = vld [vmem:[%s5150_s26 + $0x5c] sm:$0x1] }
  0x40   : > { %v616_v37 = vunpack.c.l.b16 %v374_v32  ;;  %v464_v38 = vor.u32 %v463_v25, %v460_v21  ;;  %v479_v39 = vrot.slane %v477_v28, 5  ;;  %v617_v40 = vunpack.c.l.b16 %v384_v36 }
  0x41   : > { %4314 = vmatmul.msk.bf16.gmra.mxu0 %vm658_vm3, %v637_v30  ;;  %v474_v41 = vor.u32 %v473_v33, %v469_v26  ;;  %v557_v44 = vshll.u32 %v192_v29, 16  ;;  %v563_v46 = vshll.u32 %v193_v34, 16  ;;  %v567_v47 = vshrl.u32 %v193_v34, 16  ;;  %v186_v34 = vld [vmem:[%s5150_s26 + $0x84] sm:$0xf] }
  0x42   : > { %v465_v45 = vrot.slane %v464_v38, 4  ;;  %v573_v48 = vshll.u32 %v212_v35, 16  ;;  %v642_v49 = vpack.c.b16 %v617_v40, %v616_v37  ;;  %v556_v52 = vrot.slane %v554_v43, 4 }
  0x43   : > { %v475_v50 = vrot.slane %v474_v41, 4  ;;  %v559_v53 = vrot.slane %v557_v44, 5  ;;  %v565_v56 = vrot.slane %v563_v46, 5  ;;  %v569_v57 = vrot.slane %v567_v47, 4  ;;  %v187_v44 = vld [vmem:[%s5150_s26 + $0x88] sm:$0xf] }
  0x44   : > { %v470_v55 = vsel %vm5162_vm2, %v465_v45, %v469_v26  ;;  %4319 = vmatmul.msk.bf16.gmra.mxu1 %vm658_vm3, %v642_v49  ;;  %v575_v1 = vrot.slane %v573_v48, 5  ;;  %v266_v4 = vshrl.u32 %v168_v54, 16  ;;  %v269_v5 = vshll.u32 %v168_v54, 16  ;;  %v209_v48 = vld [vmem:[%s5150_s26 + $0x8c] sm:$0x1] }
  0x45   : > { %v480_v62 = vsel %vm5162_vm2, %v475_v50, %v479_v39  ;;  %v624_v63 = vunpack.c.l.b16 %v470_v55  ;;  %v560_v0 = vor.u32 %v559_v53, %v556_v52  ;;  %v570_v3 = vor.u32 %v569_v57, %v565_v56 }
  0x46   : > { %v625_v2 = vunpack.c.l.b16 %v480_v62  ;;  %v275_v7 = vshll.u32 %v5267_v58, 16  ;;  %v279_v8 = vshrl.u32 %v5267_v58, 16  ;;  %v285_v9 = vshll.u32 %v5270_v59, 16 }
  0x47   : > { %v561_v6 = vrot.slane %v560_v0, 4  ;;  %v571_v12 = vrot.slane %v570_v3, 4  ;;  %v268_v13 = vrot.slane %v266_v4, 4  ;;  %v271_v14 = vrot.slane %v269_v5, 5  ;;  %v194_v3 = vld [vmem:[%s5150_s26 + $0xb4] sm:$0xf] }
  0x48   : > { %v646_v11 = vpack.c.b16 %v625_v2, %v624_v63  ;;  %v277_v18 = vrot.slane %v275_v7, 5  ;;  %v281_v19 = vrot.slane %v279_v8, 4  ;;  %v287_v21 = vrot.slane %v285_v9, 5  ;;  %v195_v7 = vld [vmem:[%s5150_s26 + $0xb8] sm:$0xf] }
  0x49   : > { %v566_v17 = vsel %vm5162_vm2, %v561_v6, %v565_v56  ;;  %v576_v24 = vsel %vm5162_vm2, %v571_v12, %v575_v1  ;;  %v272_v26 = vor.u32 %v271_v14, %v268_v13  ;;  %v386_v28 = vshrl.u32 %v178_v10, 16  ;;  %v213_v12 = vld [vmem:[%s5150_s26 + $0xbc] sm:$0x1]  ;;  %v4991_v13 = vld [vmem:[%s6454_s1 + $0x30] sm:$0xff] }
  0x4a   : > { %4323 = vmatmul.msk.bf16.gmra.mxu2 %vm658_vm3, %v646_v11  ;;  %v632_v25 = vunpack.c.l.b16 %v566_v17  ;;  %v633_v29 = vunpack.c.l.b16 %v576_v24  ;;  %v282_v30 = vor.u32 %v281_v19, %v277_v18  ;;  %v389_v32 = vshll.u32 %v178_v10, 16 }
  0x4b   : > { %v395_v33 = vshll.u32 %v5280_v16, 16  ;;  %v273_v35 = vrot.slane %v272_v26, 4  ;;  %v388_v36 = vrot.slane %v386_v28, 4  ;;  %v399_v37 = vshrl.u32 %v5280_v16, 16  ;;  %2942 = vmatpush.bf16.msra.mxu2 %v4991_v13 }
  0x4c   : > { %v405_v38 = vshll.u32 %v5285_v22, 16  ;;  %v650_v39 = vpack.c.b16 %v633_v29, %v632_v25  ;;  %v283_v40 = vrot.slane %v282_v30, 4  ;;  %v391_v41 = vrot.slane %v389_v32, 5 }
  0x4d   : > { %v397_v43 = vrot.slane %v395_v33, 5  ;;  %v278_v45 = vsel %vm5162_vm2, %v273_v35, %v277_v18  ;;  %v401_v46 = vrot.slane %v399_v37, 4  ;;  %v482_v49 = vshrl.u32 %v186_v34, 16  ;;  %v170_v33 = vld [vmem:[%s5150_s26 + $0x24] sm:$0xf] }
  0x4e   : > { %v407_v47 = vrot.slane %v405_v38, 5  ;;  %4327 = vmatmul.msk.bf16.gmra.mxu3 %vm658_vm3, %v650_v39  ;;  %v288_v50 = vsel %vm5162_vm2, %v283_v40, %v287_v21  ;;  %v608_v52 = vunpack.c.l.b16 %v278_v45  ;;  %v392_v53 = vor.u32 %v391_v41, %v388_v36  ;;  %v5316_v38 = vld [vmem:[%s5150_s26 + $0x28] sm:$0xf]  ;;  %v5319_v39 = vld [vmem:[%s5150_s26 + $0x2c] sm:$0x1]  ;;  %v4992_v45 = vld [vmem:[%s6454_s1 + $0x38] sm:$0xff] }
  0x4f   : > { %v485_v54 = vshll.u32 %v186_v34, 16  ;;  %v609_v55 = vunpack.c.l.b16 %v288_v50  ;;  %v402_v56 = vor.u32 %v401_v46, %v397_v43  ;;  %v484_v57 = vrot.slane %v482_v49, 4  ;;  %v4974_v46 = vld [vmem:[%s6454_s1 + $0x28] sm:$0xff]  ;;  %3600 = vmatpush.bf16.msra.mxu3 %v4992_v45 }
  0x50   : > { %v491_v62 = vshll.u32 %v187_v44, 16  ;;  %v393_v63 = vrot.slane %v392_v53, 4  ;;  %v495_v1 = vshrl.u32 %v187_v44, 16  ;;  %v501_v2 = vshll.u32 %v209_v48, 16  ;;  %2648 = vmatpush.bf16.msra.mxu1 %v4974_v46 }
  0x51   : > { %v487_v0 = vrot.slane %v485_v54, 5  ;;  %v638_v4 = vpack.c.b16 %v609_v55, %v608_v52  ;;  %v403_v5 = vrot.slane %v402_v56, 4  ;;  %v578_v18 = vshrl.u32 %v194_v3, 16 }
  0x52   : > { %v493_v6 = vrot.slane %v491_v62, 5  ;;  %v398_v8 = vsel %vm5162_vm2, %v393_v63, %v397_v43  ;;  %v497_v10 = vrot.slane %v495_v1, 4  ;;  %v503_v11 = vrot.slane %v501_v2, 5  ;;  %v1019_v1 = vld [vmem:[%s5150_s26] sm:$0xe] }
  0x53   : > { %v488_v9 = vor.u32 %v487_v0, %v484_v57  ;;  %4315 = vmatmul.msk.bf16.gmra.mxu0 %vm658_vm3, %v638_v4  ;;  %v408_v14 = vsel %vm5162_vm2, %v403_v5, %v407_v47  ;;  %v618_v17 = vunpack.c.l.b16 %v398_v8  ;;  %v581_v19 = vshll.u32 %v194_v3, 16  ;;  %v4993_v47 = vld [vmem:[%s6454_s1 + $0x40] sm:$0xff] }
  0x54   : > { %v619_v21 = vunpack.c.l.b16 %v408_v14  ;;  %v498_v25 = vor.u32 %v497_v10, %v493_v6  ;;  %v587_v26 = vshll.u32 %v195_v7, 16  ;;  %v580_v28 = vrot.slane %v578_v18, 4  ;;  %4002 = vmatpush.bf16.msra.mxu0 %v4993_v47  ;;  %v4569_v10 = vld [vmem:[%s5150_s26 + $0xc] sm:$0xf] }
  0x55   : > { %v489_v24 = vrot.slane %v488_v9, 4  ;;  %v583_v29 = vrot.slane %v581_v19, 5  ;;  %v591_v30 = vshrl.u32 %v195_v7, 16  ;;  %v597_v32 = vshll.u32 %v213_v12, 16 }
  0x56   : > { %v643_v34 = vpack.c.b16 %v619_v21, %v618_v17  ;;  %v499_v36 = vrot.slane %v498_v25, 4  ;;  %v589_v37 = vrot.slane %v587_v26, 5  ;;  %v1075_v40 = vrot.slane %v5178_v61, 5  ;;  %v4572_v61 = vld [vmem:[%s5150_s26 + $0x18] sm:$0xf] }
  0x57   : > { %v494_v35 = vsel %vm5162_vm2, %v489_v24, %v493_v6  ;;  %v584_v43 = vor.u32 %v583_v29, %v580_v28  ;;  %v593_v44 = vrot.slane %v591_v30, 4  ;;  %v599_v49 = vrot.slane %v597_v32, 5 }
  0x58   : > { %v626_v41 = vunpack.c.l.b16 %v494_v35  ;;  %4320 = vmatmul.msk.bf16.gmra.mxu1 %vm658_vm3, %v643_v34  ;;  %v504_v48 = vsel %vm5162_vm2, %v499_v36, %v503_v11  ;;  %v290_v50 = vshrl.u32 %v170_v33, 16  ;;  %v293_v52 = vshll.u32 %v170_v33, 16  ;;  %v4570_v11 = vld [vmem:[%s5150_s26 + $0x10] sm:$0xf] }
  0x59   : > { %v627_v53 = vunpack.c.l.b16 %v504_v48  ;;  %v585_v54 = vrot.slane %v584_v43, 4  ;;  %v594_v55 = vor.u32 %v593_v44, %v589_v37  ;;  %v299_v56 = vshll.u32 %v5316_v38, 16  ;;  %v4937_v48 = vld [vmem:[%s5150_s26] sm:$0xff] }
  0x5a   : > { %v292_v57 = vrot.slane %v290_v50, 4  ;;  %v295_v62 = vrot.slane %v293_v52, 5  ;;  %v303_v63 = vshrl.u32 %v5316_v38, 16  ;;  %v309_v0 = vshll.u32 %v5319_v39, 16 }
  0x5b   : > { %v647_v2 = vpack.c.b16 %v627_v53, %v626_v41  ;;  %v590_v3 = vsel %vm5162_vm2, %v585_v54, %v589_v37  ;;  %v595_v4 = vrot.slane %v594_v55, 4  ;;  %v301_v5 = vrot.slane %v299_v56, 5  ;;  %v4571_v37 = vld [vmem:[%s5150_s26 + $0x14] sm:$0x1] }
  0x5c   : > { %v634_v6 = vunpack.c.l.b16 %v590_v3  ;;  %v296_v7 = vor.u32 %v295_v62, %v292_v57  ;;  %v305_v8 = vrot.slane %v303_v63, 4  ;;  %v311_v9 = vrot.slane %v309_v0, 5  ;;  %v4573_v63 = vld [vmem:[%s5150_s26 + $0x1c] sm:$0xf]  ;;  %v1020_v0 = vld [vmem:[%s5150_s26 + $0xc] sm:$0xe] }
  0x5d   : > { %4324 = vmatmul.msk.bf16.gmra.mxu2 %vm658_vm3, %v647_v2  ;;  %v600_v12 = vsel %vm5162_vm2, %v595_v4, %v599_v49  ;;  %v4413_v13 = vrot.slane %v1019_v1, 9  ;;  %v1072_v21 = vrot.slane %v5175_v60, 5  ;;  %v1751_v24 = vshrl.u32 %v4569_v10, 16 }
  0x5e   : > { %v635_v14 = vunpack.c.l.b16 %v600_v12  ;;  %v297_v17 = vrot.slane %v296_v7, 4  ;;  %v306_v18 = vor.u32 %v305_v8, %v301_v5  ;;  %v1754_v25 = vshll.u32 %v4569_v10, 16  ;;  %v4956_v7 = vld [vmem:[%s5150_s26 + $0xc] sm:$0xff] }
  0x5f   : > { %v1760_v26 = vshll.u32 %v4570_v11, 16  ;;  %v1764_v28 = vshrl.u32 %v4570_v11, 16  ;;  %v1073_v33 = vsel %vm5345_vm6, %v4413_v13, %v1072_v21  ;;  %v1074_v35 = vrot.slane %v1072_v21, 4 }
  0x60   : > { %v651_v29 = vpack.c.b16 %v635_v14, %v634_v6  ;;  %v302_v30 = vsel %vm5162_vm2, %v297_v17, %v301_v5  ;;  %v307_v32 = vrot.slane %v306_v18, 4  ;;  %v1185_v36 = vunpack.c.l.b16 %v1073_v33  ;;  %v4574_v18 = vld [vmem:[%s5150_s26 + $0x20] sm:$0x1] }
  0x61   : > { %v610_v34 = vunpack.c.l.b16 %v302_v30  ;;  %v1753_v41 = vrot.slane %v1751_v24, 4  ;;  %v1756_v43 = vrot.slane %v1754_v25, 5  ;;  %v1762_v44 = vrot.slane %v1760_v26, 5  ;;  %v4938_v26 = vld [vmem:[%s5150_s26 + $0xc] sm:$0xff] }
  0x62   : > { %4328 = vmatmul.msk.bf16.gmra.mxu3 %vm658_vm3, %v651_v29  ;;  %v312_v60 = vsel %vm5162_vm2, %v307_v32, %v311_v9  ;;  %v1766_v45 = vrot.slane %v1764_v28, 4  ;;  %v1076_v47 = vsel %vm5345_vm6, %v1074_v35, %v1075_v40  ;;  %v1770_v53 = vshll.u32 %v4571_v37, 16  ;;  %v4576_v37 = vld [vmem:[%s5150_s26 + $0x28] sm:$0xf] }
  0x63   : > { %v611_v46 = vunpack.c.l.b16 %v312_v60  ;;  %v1186_v49 = vunpack.c.l.b16 %v1076_v47  ;;  %v1757_v50 = vor.u32 %v1756_v43, %v1753_v41  ;;  %v1079_v40 = vrot.slane %v5221_v23, 5  ;;  %v1021_v60 = vld [vmem:[%s5150_s26 + $0x18] sm:$0xe] }
  0x64   : > { %v1767_v52 = vor.u32 %v1766_v45, %v1762_v44  ;;  %v1772_v62 = vrot.slane %v1770_v53, 5  ;;  %v1775_v1 = vshrl.u32 %v4572_v61, 16  ;;  %v1778_v2 = vshll.u32 %v4572_v61, 16 }
  0x65   : > { %v639_v54 = vpack.c.b16 %v611_v46, %v610_v34  ;;  %v1217_v55 = vpack.c.b16 %v1186_v49, %v1185_v36  ;;  %v1758_v56 = vrot.slane %v1757_v50, 4  ;;  %v1784_v5 = vshll.u32 %v4573_v63, 16  ;;  %v4575_v34 = vld [vmem:[%s5150_s26 + $0x24] sm:$0xf] }
  0x66   : > { %v1768_v57 = vrot.slane %v1767_v52, 4  ;;  %v1788_v6 = vshrl.u32 %v4573_v63, 16  ;;  %v4414_v8 = vrot.slane %v1020_v0, 9  ;;  %v1081_v9 = vrot.slane %v1079_v40, 4  ;;  %v4957_v52 = vld [vmem:[%s5150_s26 + $0x18] sm:$0xff] }
  0x67   : > { %4316 = vmatmul.msk.bf16.gmra.mxu0 %vm658_vm3, %v639_v54  ;;  %v1763_v3 = vsel %vm5162_vm2, %v1758_v56, %v1762_v44  ;;  %v1082_v23 = vrot.slane %v5224_v27, 5  ;;  %v1777_v12 = vrot.slane %v1775_v1, 4  ;;  %v1780_v13 = vrot.slane %v1778_v2, 5  ;;  %v4577_v63 = vld [vmem:[%s5150_s26 + $0x2c] sm:$0x1] }
  0x68   : > { %4397 = vmatmul.msk.bf16.vlgmr.msrb.gmra.mxu1 %vm658_vm3, %v4937_v48  ;;  %v1773_v4 = vsel %vm5162_vm2, %v1768_v57, %v1772_v62  ;;  %v2137_v10 = vunpack.c.l.b16 %v1763_v3  ;;  %v1786_v14 = vrot.slane %v1784_v5, 5  ;;  %v1790_v17 = vrot.slane %v1788_v6, 4 }
  0x69   : > { %v2138_v11 = vunpack.c.l.b16 %v1773_v4  ;;  %v1080_v21 = vsel %vm5345_vm6, %v4414_v8, %v1079_v40  ;;  %v1083_v24 = vsel %vm5345_vm6, %v1081_v9, %v1082_v23  ;;  %v1781_v27 = vor.u32 %v1780_v13, %v1777_v12  ;;  %v4939_v4 = vld [vmem:[%s5150_s26 + $0x18] sm:$0xff] }
  0x6a   : > { %v1791_v28 = vor.u32 %v1790_v17, %v1786_v14  ;;  %v1794_v29 = vshll.u32 %v4574_v18, 16  ;;  %v1187_v30 = vunpack.c.l.b16 %v1080_v21  ;;  %v1188_v32 = vunpack.c.l.b16 %v1083_v24  ;;  %v1022_v17 = vld [vmem:[%s5150_s26 + $0x24] sm:$0xe] }
  0x6b   : > { %v2169_v25 = vpack.c.b16 %v2138_v11, %v2137_v10  ;;  %v1782_v33 = vrot.slane %v1781_v27, 4  ;;  %v1086_v43 = vrot.slane %v5267_v58, 5  ;;  %v1799_v44 = vshrl.u32 %v4575_v34, 16  ;;  %v4578_v10 = vld [vmem:[%s5150_s26 + $0x30] sm:$0xf]  ;;  %v4958_v27 = vld [vmem:[%s5150_s26 + $0x24] sm:$0xff] }
  0x6c   : > { %v1792_v35 = vrot.slane %v1791_v28, 4  ;;  %v1796_v36 = vrot.slane %v1794_v29, 5  ;;  %v1218_v41 = vpack.c.b16 %v1188_v32, %v1187_v30  ;;  %v1802_v46 = vshll.u32 %v4575_v34, 16  ;;  %v4579_v11 = vld [vmem:[%s5150_s26 + $0x34] sm:$0xf] }
  0x6d   : > { %4435 = vmatmul.msk.bf16.vlgmr.msrb.gmra.mxu2 %vm658_vm3, %v1217_v55  ;;  %v1787_v45 = vsel %vm5162_vm2, %v1782_v33, %v1786_v14  ;;  %v1808_v47 = vshll.u32 %v4576_v37, 16  ;;  %v1812_v48 = vshrl.u32 %v4576_v37, 16  ;;  %v4415_v50 = vrot.slane %v1021_v60, 9 }
  0x6e   : > { %v1797_v49 = vsel %vm5162_vm2, %v1792_v35, %v1796_v36  ;;  %v2139_v53 = vunpack.c.l.b16 %v1787_v45  ;;  %v1088_v54 = vrot.slane %v1086_v43, 4  ;;  %v1089_v58 = vrot.slane %v5270_v59, 5  ;;  %v4580_v36 = vld [vmem:[%s5150_s26 + $0x38] sm:$0x1] }
  0x6f   : > { %v1801_v55 = vrot.slane %v1799_v44, 4  ;;  %v2140_v56 = vunpack.c.l.b16 %v1797_v49  ;;  %v1804_v57 = vrot.slane %v1802_v46, 5  ;;  %v1810_v62 = vrot.slane %v1808_v47, 5  ;;  %v4582_v49 = vld [vmem:[%s5150_s26 + $0x40] sm:$0xf] }
  0x70   : > { %v1814_v61 = vrot.slane %v1812_v48, 4  ;;  %v1087_v40 = vsel %vm5345_vm6, %v4415_v50, %v1086_v43  ;;  %v1090_v0 = vsel %vm5345_vm6, %v1088_v54, %v1089_v58  ;;  %v1818_v59 = vshll.u32 %v4577_v63, 16  ;;  %v4581_v48 = vld [vmem:[%s5150_s26 + $0x3c] sm:$0xf]  ;;  %v5022_v58 = vld [vmem:[%s5150_s26 + $0x34] sm:$0xf] }
  0x71   : > { %v2170_v1 = vpack.c.b16 %v2140_v56, %v2139_v53  ;;  %v1805_v2 = vor.u32 %v1804_v57, %v1801_v55  ;;  %v1189_v5 = vunpack.c.l.b16 %v1087_v40  ;;  %v1190_v6 = vunpack.c.l.b16 %v1090_v0  ;;  %v1023_v56 = vld [vmem:[%s5150_s26 + $0x30] sm:$0xe] }
  0x72   : > { %4553 = vmatmul.msk.bf16.vlgmr.msrb.gmra.mxu3 %vm658_vm3, %v4956_v7  ;;  %v1815_v3 = vor.u32 %v1814_v61, %v1810_v62  ;;  %v1820_v9 = vrot.slane %v1818_v59, 5  ;;  %v1093_v12 = vrot.slane %v5316_v38, 5  ;;  %v1823_v18 = vshrl.u32 %v4578_v10, 16  ;;  %v5023_v59 = vld [vmem:[%s5150_s26 + $0x38] sm:$0x1] }
  0x73   : > { %v1806_v7 = vrot.slane %v1805_v2, 4  ;;  %v1219_v23 = vpack.c.b16 %v1190_v6, %v1189_v5  ;;  %v1826_v21 = vshll.u32 %v4578_v10, 16  ;;  %v1832_v24 = vshll.u32 %v4579_v11, 16  ;;  %v4959_v5 = vld [vmem:[%s5150_s26 + $0x30] sm:$0xff] }
  0x74   : > { %v1816_v8 = vrot.slane %v1815_v3, 4  ;;  %v1095_v28 = vrot.slane %v1093_v12, 4  ;;  %v1096_v38 = vrot.slane %v5319_v39, 5  ;;  %v1825_v32 = vrot.slane %v1823_v18, 4  ;;  %v4940_v39 = vld [vmem:[%s5150_s26 + $0x24] sm:$0xff] }
  0x75   : > { %v1811_v13 = vsel %vm5162_vm2, %v1806_v7, %v1810_v62  ;;  %v1828_v33 = vrot.slane %v1826_v21, 5  ;;  %v1834_v34 = vrot.slane %v1832_v24, 5  ;;  %v1842_v45 = vshll.u32 %v4580_v36, 16  ;;  %v4941_v24 = vld [vmem:[%s5150_s26 + $0x30] sm:$0xff] }
  0x76   : > { %v1821_v14 = vsel %vm5162_vm2, %v1816_v8, %v1820_v9  ;;  %v2141_v29 = vunpack.c.l.b16 %v1811_v13  ;;  %v1100_v55 = vrot.slane %v5022_v58, 5  ;;  %v1847_v57 = vshrl.u32 %v4581_v48, 16 }
  0x77   : > { %4623 = vmatmul.msk.bf16.vlgmr.msrb.gmra.mxu0 %vm658_vm3, %v2169_v25  ;;  %v1836_v25 = vshrl.u32 %v4579_v11, 16  ;;  %v2142_v30 = vunpack.c.l.b16 %v1821_v14  ;;  %v1829_v43 = vor.u32 %v1828_v33, %v1825_v32  ;;  %v1844_v53 = vrot.slane %v1842_v45, 5  ;;  %v4583_v11 = vld [vmem:[%s5150_s26 + $0x44] sm:$0x1]  ;;  %v4584_v32 = vld [vmem:[%s5150_s26 + $0x48] sm:$0xf] }
  0x78   : > { %4398 = vmatmul.msk.bf16.gmra.mxu1 %vm658_vm3, %v4938_v26  ;;  %v4416_v26 = vrot.slane %v1022_v17, 9  ;;  %v1850_v62 = vshll.u32 %v4581_v48, 16  ;;  %v1856_v61 = vshll.u32 %v4582_v49, 16  ;;  %v1860_v63 = vshrl.u32 %v4582_v49, 16  ;;  %v4585_v33 = vld [vmem:[%s5150_s26 + $0x4c] sm:$0xf] }
  0x79   : > { %v1838_v35 = vrot.slane %v1836_v25, 4  ;;  %v2171_v60 = vpack.c.b16 %v2142_v30, %v2141_v29  ;;  %v1830_v50 = vrot.slane %v1829_v43, 4  ;;  %v4417_v2 = vrot.slane %v1023_v56, 9  ;;  %v4960_v48 = vld [vmem:[%s5150_s26 + $0x3c] sm:$0xff] }
  0x7a   : > { %v1094_v37 = vsel %vm5345_vm6, %v4416_v26, %v1093_v12  ;;  %v1102_v3 = vrot.slane %v1100_v55, 4  ;;  %v1849_v6 = vrot.slane %v1847_v57, 4  ;;  %v1852_v7 = vrot.slane %v1850_v62, 5  ;;  %v4586_v62 = vld [vmem:[%s5150_s26 + $0x50] sm:$0x1] }
  0x7b   : > { %v1839_v44 = vor.u32 %v1838_v35, %v1834_v34  ;;  %v1191_v46 = vunpack.c.l.b16 %v1094_v37  ;;  %v1835_v0 = vsel %vm5162_vm2, %v1830_v50, %v1834_v34  ;;  %v1858_v8 = vrot.slane %v1856_v61, 5 }
  0x7c   : > { %v1862_v9 = vrot.slane %v1860_v63, 4  ;;  %v1101_v12 = vsel %vm5345_vm6, %v4417_v2, %v1100_v55  ;;  %v1853_v14 = vor.u32 %v1852_v7, %v1849_v6  ;;  %v1866_v18 = vshll.u32 %v4583_v11, 16 }
  0x7d   : > { %4436 = vmatmul.msk.bf16.gmra.mxu2 %vm658_vm3, %v1218_v41  ;;  %v1097_v41 = vsel %vm5345_vm6, %v1095_v28, %v1096_v38  ;;  %v1871_v43 = vshrl.u32 %v4584_v32, 16  ;;  %v1880_v45 = vshll.u32 %v4585_v33, 16 }
  0x7e   : > { %v1192_v47 = vunpack.c.l.b16 %v1097_v41  ;;  %v1863_v17 = vor.u32 %v1862_v9, %v1858_v8  ;;  %v1854_v38 = vrot.slane %v1853_v14, 4  ;;  %v1868_v30 = vrot.slane %v1866_v18, 5 }
  0x7f   : > { %v1882_v56 = vrot.slane %v1880_v45, 5  ;;  %v1114_v14 = vrot.slane %v5234_v42, 5 }
  0x80   : > { %v1220_v54 = vpack.c.b16 %v1192_v47, %v1191_v46  ;;  %v1864_v29 = vrot.slane %v1863_v17, 4  ;;  %v1859_v36 = vsel %vm5162_vm2, %v1854_v38, %v1858_v8  ;;  %v1884_v46 = vshrl.u32 %v4585_v33, 16 }
  0x81   : > { %v2145_v47 = vunpack.c.l.b16 %v1859_v36  ;;  %v1116_v33 = vrot.slane %v1114_v14, 4 }
  0x82   : > { %4554 = vmatmul.msk.bf16.gmra.mxu3 %vm658_vm3, %v4957_v52  ;;  %v1840_v52 = vrot.slane %v1839_v44, 4  ;;  %v1869_v37 = vsel %vm5162_vm2, %v1864_v29, %v1868_v30  ;;  %v1874_v44 = vshll.u32 %v4584_v32, 16  ;;  %v1886_v57 = vrot.slane %v1884_v46, 4  ;;  %v4961_v30 = vld [vmem:[%s5150_s26 + $0x48] sm:$0xff]  ;;  %v4589_v46 = vld [vmem:[%s5150_s26 + $0x5c] sm:$0x1] }
  0x83   : > { %v2146_v49 = vunpack.c.l.b16 %v1869_v37 }
  0x84   : > { %v1876_v55 = vrot.slane %v1874_v44, 5  ;;  %v1887_v2 = vor.u32 %v1886_v57, %v1882_v56 }
  0x86   : > { %v1888_v8 = vrot.slane %v1887_v2, 4 }
  0x87   : > { %4624 = vmatmul.msk.bf16.gmra.mxu0 %vm658_vm3, %v2170_v1  ;;  %v1845_v1 = vsel %vm5162_vm2, %v1840_v52, %v1844_v53 }
  0x88   : > { %4399 = vmatmul.msk.bf16.gmra.mxu1 %vm658_vm3, %v4939_v4  ;;  %v1103_v4 = vrot.slane %v5023_v59, 5  ;;  %v2144_v10 = vunpack.c.l.b16 %v1845_v1 }
  0x8a   : > { %v1104_v13 = vsel %vm5345_vm6, %v1102_v3, %v1103_v4  ;;  %v1890_v3 = vshll.u32 %v4586_v62, 16  ;;  %v4942_v4 = vld [vmem:[%s5150_s26 + $0x3c] sm:$0xff] }
  0x8b   : > { %v1194_v26 = vunpack.c.l.b16 %v1104_v13  ;;  %v4588_v13 = vld [vmem:[%s5150_s26 + $0x58] sm:$0xf]  ;;  %v4590_v62 = vld [vmem:[%s5150_s26 + $0x60] sm:$0xf] }
  0x8c   : > { %v1892_v9 = vrot.slane %v1890_v3, 5  ;;  %v1908_v38 = vshrl.u32 %v4588_v13, 16 }
  0x8d   : > { %4437 = vmatmul.msk.bf16.gmra.mxu2 %vm658_vm3, %v1219_v23  ;;  %v2143_v23 = vunpack.c.l.b16 %v1835_v0  ;;  %v2173_v0 = vpack.c.b16 %v2146_v49, %v2145_v47 }
  0x8e   : > { %v1893_v18 = vsel %vm5162_vm2, %v1888_v8, %v1892_v9  ;;  %v1910_v44 = vrot.slane %v1908_v38, 4 }
  0x8f   : > { %v2172_v21 = vpack.c.b16 %v2144_v10, %v2143_v23  ;;  %v2148_v37 = vunpack.c.l.b16 %v1893_v18 }
  0x92   : > { %4555 = vmatmul.msk.bf16.gmra.mxu3 %vm658_vm3, %v4958_v27  ;;  %v1193_v27 = vunpack.c.l.b16 %v1101_v12  ;;  %v4587_v12 = vld [vmem:[%s5150_s26 + $0x54] sm:$0xf] }
  0x94   : > { %v1221_v35 = vpack.c.b16 %v1194_v26, %v1193_v27  ;;  %v1898_v27 = vshll.u32 %v4587_v12, 16  ;;  %v1904_v26 = vshll.u32 %v4588_v13, 16 }
  0x97   : > { %4625 = vmatmul.msk.bf16.gmra.mxu0 %vm658_vm3, %v2171_v60  ;;  %v1107_v60 = vrot.slane %v5190_v15, 5  ;;  %v1873_v15 = vrot.slane %v1871_v43, 4  ;;  %v1906_v43 = vrot.slane %v1904_v26, 5  ;;  %v1124_v26 = vrot.slane %v5285_v22, 5 }
  0x98   : > { %4400 = vmatmul.msk.bf16.gmra.mxu1 %vm658_vm3, %v4940_v39  ;;  %v1024_v39 = vld [vmem:[%s5150_s26 + $0x3c] sm:$0xe] }
  0x99   : > { %v4418_v52 = vrot.slane %v1024_v39, 9  ;;  %v1109_v53 = vrot.slane %v1107_v60, 4  ;;  %v1900_v39 = vrot.slane %v1898_v27, 5 }
  0x9b   : > { %v1108_v61 = vsel %vm5345_vm6, %v4418_v52, %v1107_v60  ;;  %v4943_v52 = vld [vmem:[%s5150_s26 + $0x48] sm:$0xff] }
  0x9d   : > { %v5429_v40 = vpop.f32.mrf.mxu1  ;;  %4438 = vmatmul.msk.bf16.gmra.mxu2 %vm658_vm3, %v1220_v54  ;;  %v1110_v54 = vrot.slane %v5195_v20, 5  ;;  %v1877_v20 = vor.u32 %v1876_v55, %v1873_v15  ;;  %v1914_v15 = vshll.u32 %v4589_v46, 16  ;;  %v4944_v46 = vld [vmem:[%s5150_s26 + $0x54] sm:$0xff] }
  0x9f   : > { %v1111_v63 = vsel %vm5345_vm6, %v1109_v53, %v1110_v54  ;;  %v1878_v7 = vrot.slane %v1877_v20, 4  ;;  %v1911_v54 = vor.u32 %v1910_v44, %v1906_v43  ;;  %v1916_v2 = vrot.slane %v1914_v15, 5 }
  0xa0   : > { %v1196_v6 = vunpack.c.l.b16 %v1111_v63 }
  0xa1   : > { %v1883_v17 = vsel %vm5162_vm2, %v1878_v7, %v1882_v56  ;;  %v1912_v20 = vrot.slane %v1911_v54, 4  ;;  %v1121_v7 = vrot.slane %v5280_v16, 5 }
  0xa2   : > { %4556 = vmatmul.msk.bf16.gmra.mxu3 %vm658_vm3, %v4959_v5  ;;  %v1195_v5 = vunpack.c.l.b16 %v1108_v61  ;;  %v2147_v36 = vunpack.c.l.b16 %v1883_v17  ;;  %v4591_v61 = vld [vmem:[%s5150_s26 + $0x64] sm:$0xf] }
  0xa3   : > { %v1932_v8 = vshrl.u32 %v4591_v61, 16  ;;  %v1917_v13 = vsel %vm5162_vm2, %v1912_v20, %v1916_v2  ;;  %v1123_v27 = vrot.slane %v1121_v7, 4  ;;  %v5024_v2 = vld [vmem:[%s5150_s26 + $0x64] sm:$0xf] }
  0xa4   : > { %v1222_v10 = vpack.c.b16 %v1196_v6, %v1195_v5  ;;  %v2174_v49 = vpack.c.b16 %v2148_v37, %v2147_v36  ;;  %v1922_v5 = vshll.u32 %v4590_v62, 16  ;;  %v1928_v6 = vshll.u32 %v4591_v61, 16 }
  0xa5   : > { %v5445_v25 = vpop.f32.mrf.mxu1  ;;  %v1934_v38 = vrot.slane %v1932_v8, 4 }
  0xa6   : > { %v1924_v18 = vrot.slane %v1922_v5, 5  ;;  %v1027_v5 = vld [vmem:[%s5150_s26 + $0x60] sm:$0xe] }
  0xa7   : > { %v5447_v28 = vpop.f32.mrf.mxu2  ;;  %4626 = vmatmul.msk.bf16.gmra.mxu0 %vm658_vm3, %v2172_v21  ;;  %v1025_v21 = vld [vmem:[%s5150_s26 + $0x48] sm:$0xe] }
  0xa8   : > { %4401 = vmatmul.msk.bf16.gmra.mxu1 %vm658_vm3, %v4941_v24  ;;  %v1895_v24 = vshrl.u32 %v4587_v12, 16  ;;  %v4419_v42 = vrot.slane %v1025_v21, 9  ;;  %v1930_v21 = vrot.slane %v1928_v6, 5 }
  0xaa   : > { %v5453_v34 = vpop.f32.mrf.mxu0  ;;  %v1897_v60 = vrot.slane %v1895_v24, 4  ;;  %v4962_v24 = vld [vmem:[%s5150_s26 + $0x54] sm:$0xff]  ;;  %v1935_v22 = vor.u32 %v1934_v38, %v1930_v21 }
  0xab   : > { %v5459_v41 = vpop.f32.mrf.mxu3 }
  0xac   : > { %v1901_v53 = vor.u32 %v1900_v39, %v1897_v60  ;;  %v1125_v39 = vsel %vm5345_vm6, %v1123_v27, %v1124_v26  ;;  %v1936_v54 = vrot.slane %v1935_v22, 4 }
  0xad   : > { %4439 = vmatmul.msk.bf16.gmra.mxu2 %vm658_vm3, %v1221_v35  ;;  %v1117_v35 = vrot.slane %v5239_v51, 5 }
  0xaf   : > { %v5465_v50 = vpop.f32.mrf.mxu1  ;;  %v5468_v58 = vpop.f32.mrf.mxu2  ;;  %v1118_v51 = vsel %vm5345_vm6, %v1116_v33, %v1117_v35  ;;  %v4592_v33 = vld [vmem:[%s5150_s26 + $0x68] sm:$0x1] }
  0xb0   : > { %v1198_v56 = vunpack.c.l.b16 %v1118_v51 }
  0xb2   : > { %4557 = vmatmul.msk.bf16.gmra.mxu3 %vm658_vm3, %v4960_v48  ;;  %v5476_v1 = vpop.f32.mrf.mxu0  ;;  %v1115_v48 = vsel %vm5345_vm6, %v4419_v42, %v1114_v14  ;;  %v2150_v42 = vunpack.c.l.b16 %v1917_v13 }
  0xb3   : > { %v5478_v59 = vpop.f32.mrf.mxu3  ;;  %v1197_v55 = vunpack.c.l.b16 %v1115_v48 }
  0xb5   : > { %v1223_v3 = vpack.c.b16 %v1198_v56, %v1197_v55  ;;  %v4593_v55 = vld [vmem:[%s5150_s26 + $0x6c] sm:$0xf]  ;;  %v4594_v56 = vld [vmem:[%s5150_s26 + $0x70] sm:$0xf] }
  0xb6   : > { %v1943_v6 = vshrl.u32 %v4593_v55, 16  ;;  %v1952_v8 = vshll.u32 %v4594_v56, 16 }
  0xb7   : > { %4627 = vmatmul.msk.bf16.gmra.mxu0 %vm658_vm3, %v2173_v0  ;;  %v5482_v23 = vpop.f32.mrf.mxu1  ;;  %v1902_v0 = vrot.slane %v1901_v53, 4 }
  0xb8   : > { %4402 = vmatmul.msk.bf16.gmra.mxu1 %vm658_vm3, %v4942_v4  ;;  %v1919_v4 = vshrl.u32 %v4590_v62, 16  ;;  %v1945_v26 = vrot.slane %v1943_v6, 4  ;;  %v4597_v6 = vld [vmem:[%s5150_s26 + $0x7c] sm:$0xf] }
  0xb9   : > { %v1907_v12 = vsel %vm5162_vm2, %v1902_v0, %v1906_v43  ;;  %v1938_v43 = vshll.u32 %v4592_v33, 16 }
  0xba   : > { %v5485_v11 = vpop.f32.mrf.mxu2  ;;  %v1921_v17 = vrot.slane %v1919_v4, 4 }
  0xbb   : > { %v1940_v15 = vrot.slane %v1938_v43, 5 }
  0xbc   : > { %v1925_v37 = vor.u32 %v1924_v18, %v1921_v17  ;;  %v4963_v18 = vld [vmem:[%s5150_s26 + $0x60] sm:$0xff] }
  0xbd   : > { %4440 = vmatmul.msk.bf16.gmra.mxu2 %vm658_vm3, %v1222_v10  ;;  %v1026_v10 = vld [vmem:[%s5150_s26 + $0x54] sm:$0xe]  ;;  %v1941_v20 = vsel %vm5162_vm2, %v1936_v54, %v1940_v15 }
  0xbe   : > { %v5495_v29 = vpop.f32.mrf.mxu0  ;;  %v4420_v16 = vrot.slane %v1026_v10, 9  ;;  %v1926_v53 = vrot.slane %v1925_v37, 4  ;;  %v1956_v10 = vshrl.u32 %v4594_v56, 16  ;;  %v4595_v37 = vld [vmem:[%s5150_s26 + $0x74] sm:$0x1] }
  0xbf   : > { %v5499_v32 = vpop.f32.mrf.mxu3 }
  0xc0   : > { %v1122_v60 = vsel %vm5345_vm6, %v4420_v16, %v1121_v7  ;;  %v1931_v0 = vsel %vm5162_vm2, %v1926_v53, %v1930_v21  ;;  %v1946_v7 = vshll.u32 %v4593_v55, 16  ;;  %v4421_v16 = vrot.slane %v1027_v5, 9  ;;  %v4596_v5 = vld [vmem:[%s5150_s26 + $0x78] sm:$0xf] }
  0xc1   : > { %v5502_v45 = vpop.f32.mrf.mxu1  ;;  %v1199_v51 = vunpack.c.l.b16 %v1122_v60  ;;  %v2151_v21 = vunpack.c.l.b16 %v1931_v0 }
  0xc2   : > { %4558 = vmatmul.msk.bf16.gmra.mxu3 %vm658_vm3, %v4961_v30  ;;  %v5506_v47 = vpop.f32.mrf.mxu2  ;;  %v2149_v30 = vunpack.c.l.b16 %v1907_v12  ;;  %v5025_v12 = vld [vmem:[%s5150_s26 + $0x68] sm:$0x1]  ;;  %v1948_v38 = vrot.slane %v1946_v7, 5  ;;  %v5026_v7 = vld [vmem:[%s5150_s26 + $0x70] sm:$0xf] }
  0xc3   : > { %v1131_v13 = vrot.slane %v5025_v12, 5  ;;  %v1028_v12 = vld [vmem:[%s5150_s26 + $0x6c] sm:$0xe] }
  0xc4   : > { %v2175_v44 = vpack.c.b16 %v2150_v42, %v2149_v30  ;;  %v1954_v30 = vrot.slane %v1952_v8, 5  ;;  %v1958_v42 = vrot.slane %v1956_v10, 4  ;;  %v1949_v43 = vor.u32 %v1948_v38, %v1945_v26  ;;  %v5027_v38 = vld [vmem:[%s5150_s26 + $0x74] sm:$0x1] }
  0xc5   : > { %v1135_v8 = vrot.slane %v5026_v7, 5 }
  0xc6   : > { %v5513_v57 = vpop.f32.mrf.mxu0 }
  0xc7   : > { %4628 = vmatmul.msk.bf16.gmra.mxu0 %vm658_vm3, %v2174_v49  ;;  %v5518_v63 = vpop.f32.mrf.mxu3  ;;  %v1200_v49 = vunpack.c.l.b16 %v1125_v39 }
  0xc8   : > { %4403 = vmatmul.msk.bf16.gmra.mxu1 %vm658_vm3, %v4943_v52 }
  0xc9   : > { %v5522_v9 = vpop.f32.mrf.mxu1  ;;  %v1224_v62 = vpack.c.b16 %v1200_v49, %v1199_v51  ;;  %v4945_v49 = vld [vmem:[%s5150_s26 + $0x60] sm:$0xff] }
  0xcd   : > { %v5529_v14 = vpop.f32.mrf.mxu2  ;;  %4441 = vmatmul.msk.bf16.gmra.mxu2 %vm658_vm3, %v1223_v3  ;;  %v1128_v3 = vrot.slane %v5024_v2, 5 }
  0xcf   : > { %v1130_v27 = vrot.slane %v1128_v3, 4  ;;  %v1129_v60 = vsel %vm5345_vm6, %v4421_v16, %v1128_v3  ;;  %v1980_v16 = vshrl.u32 %v4597_v6, 16 }
  0xd0   : > { %v5535_v35 = vpop.f32.mrf.mxu0  ;;  %v1201_v15 = vunpack.c.l.b16 %v1129_v60  ;;  %v4422_v60 = vrot.slane %v1028_v12, 9 }
  0xd1   : > { %v5537_v36 = vpop.f32.mrf.mxu3  ;;  %v1132_v39 = vsel %vm5345_vm6, %v1130_v27, %v1131_v13 }
  0xd2   : > { %4559 = vmatmul.msk.bf16.gmra.mxu3 %vm658_vm3, %v4962_v24  ;;  %v2152_v24 = vunpack.c.l.b16 %v1941_v20  ;;  %v1202_v55 = vunpack.c.l.b16 %v1132_v39  ;;  %v1137_v39 = vrot.slane %v1135_v8, 4 }
  0xd4   : > { %v2176_v22 = vpack.c.b16 %v2152_v24, %v2151_v21  ;;  %v1225_v3 = vpack.c.b16 %v1202_v55, %v1201_v15  ;;  %v1970_v21 = vshll.u32 %v4596_v5, 16  ;;  %v1976_v24 = vshll.u32 %v4597_v6, 16 }
  0xd5   : > { %v5545_v48 = vpop.f32.mrf.mxu1  ;;  %v5547_v52 = vpop.f32.mrf.mxu2  ;;  %v1982_v15 = vrot.slane %v1980_v16, 4 }
  0xd7   : > { %4629 = vmatmul.msk.bf16.gmra.mxu0 %vm658_vm3, %v2175_v44  ;;  %v1959_v44 = vor.u32 %v1958_v42, %v1954_v30  ;;  %v1138_v42 = vrot.slane %v5027_v38, 5 }
  0xd8   : > { %4404 = vmatmul.msk.bf16.gmra.mxu1 %vm658_vm3, %v4944_v46  ;;  %v5553_v61 = vpop.f32.mrf.mxu0  ;;  %v1962_v46 = vshll.u32 %v4595_v37, 16  ;;  %v4964_v37 = vld [vmem:[%s5150_s26 + $0x6c] sm:$0xff] }
  0xd9   : > { %v5560_v4 = vpop.f32.mrf.mxu3  ;;  %v1960_v0 = vrot.slane %v1959_v44, 4 }
  0xda   : > { %v1964_v20 = vrot.slane %v1962_v46, 5 }
  0xdd   : > { %4442 = vmatmul.msk.bf16.gmra.mxu2 %vm658_vm3, %v1224_v62  ;;  %v5565_v17 = vpop.f32.mrf.mxu1  ;;  %v1950_v62 = vrot.slane %v1949_v43, 4 }
  0xdf   : > { %v1955_v10 = vsel %vm5162_vm2, %v1950_v62, %v1954_v30  ;;  %v4598_v62 = vld [vmem:[%s5150_s26 + $0x80] sm:$0x1] }
  0xe0   : > { %v5568_v33 = vpop.f32.mrf.mxu2 }
  0xe2   : > { %4560 = vmatmul.msk.bf16.gmra.mxu3 %vm658_vm3, %v4963_v18  ;;  %v1967_v18 = vshrl.u32 %v4596_v5, 16  ;;  %v4946_v5 = vld [vmem:[%s5150_s26 + $0x6c] sm:$0xff] }
  0xe4   : > { %v5576_v51 = vpop.f32.mrf.mxu0  ;;  %v1969_v46 = vrot.slane %v1967_v18, 4 }
  0xe5   : > { %v5579_v53 = vpop.f32.mrf.mxu3  ;;  %v939_v54 = vpop.f32.mrf.mxu1 }
  0xe6   : > { %v940_v56 = vadd.f32 %v939_v54, %v5453_v34  ;;  %v1965_v34 = vsel %vm5162_vm2, %v1960_v0, %v1964_v20  ;;  %v1978_v54 = vrot.slane %v1976_v24, 5  ;;  %v1136_v0 = vsel %vm5345_vm6, %v4422_v60, %v1135_v8 }
  0xe7   : > { %4630 = vmatmul.msk.bf16.gmra.mxu0 %vm658_vm3, %v2176_v22  ;;  %v2153_v22 = vunpack.c.l.b16 %v1955_v10  ;;  %v2154_v43 = vunpack.c.l.b16 %v1965_v34  ;;  %v1986_v10 = vshll.u32 %v4598_v62, 16 }
  0xe8   : > { %v5583_v2 = vpop.f32.mrf.mxu2  ;;  %4405 = vmatmul.msk.bf16.gmra.mxu1 %vm658_vm3, %v4945_v49  ;;  %v1972_v49 = vrot.slane %v1970_v21, 5  ;;  %v1983_v7 = vor.u32 %v1982_v15, %v1978_v54 }
  0xe9   : > { %v2177_v20 = vpack.c.b16 %v2154_v43, %v2153_v22  ;;  %v1988_v38 = vrot.slane %v1986_v10, 5  ;;  %v4600_v22 = vld [vmem:[%s5150_s26 + $0x88] sm:$0xf]  ;;  %v5028_v43 = vld [vmem:[%s5150_s26 + $0x7c] sm:$0xf] }
  0xea   : > { %v1973_v6 = vor.u32 %v1972_v49, %v1969_v46  ;;  %v1029_v46 = vld [vmem:[%s5150_s26 + $0x78] sm:$0xe] }
  0xec   : > { %v5594_v13 = vpop.f32.mrf.mxu0  ;;  %v1974_v16 = vrot.slane %v1973_v6, 4 }
  0xed   : > { %v5596_v27 = vpop.f32.mrf.mxu3  ;;  %4443 = vmatmul.msk.bf16.gmra.mxu2 %vm658_vm3, %v1225_v3  ;;  %v941_v26 = vpop.f32.mrf.mxu1 }
  0xee   : > { %v942_v30 = vadd.f32 %v941_v26, %v5476_v1  ;;  %v1139_v1 = vsel %vm5345_vm6, %v1137_v39, %v1138_v42  ;;  %v1984_v26 = vrot.slane %v1983_v7, 4  ;;  %v4599_v42 = vld [vmem:[%s5150_s26 + $0x84] sm:$0xf]  ;;  %v4965_v7 = vld [vmem:[%s5150_s26 + $0x78] sm:$0xff] }
  0xef   : > { %v1204_v18 = vunpack.c.l.b16 %v1139_v1  ;;  %v1994_v49 = vshll.u32 %v4599_v42, 16  ;;  %v2004_v1 = vshrl.u32 %v4600_v22, 16 }
  0xf0   : > { %v1296_v44 = vpop.f32.mrf.mxu2  ;;  %v1989_v62 = vsel %vm5162_vm2, %v1984_v26, %v1988_v38 }
  0xf1   : > { %v1376_v55 = vadd.f32 %v1296_v44, %v940_v56  ;;  %v1203_v56 = vunpack.c.l.b16 %v1136_v0  ;;  %v1142_v44 = vrot.slane %v5028_v43, 5  ;;  %v2000_v0 = vshll.u32 %v4600_v22, 16 }
  0xf2   : > { %4561 = vmatmul.msk.bf16.gmra.mxu3 %vm658_vm3, %v4964_v37  ;;  %v2006_v26 = vrot.slane %v2004_v1, 4 }
  0xf3   : > { %v1226_v39 = vpack.c.b16 %v1204_v18, %v1203_v56 }
  0xf4   : > { %v2248_v3 = vpop.f32.mrf.mxu0 }
  0xf5   : > { %v1590_v34 = vpop.f32.mrf.mxu3  ;;  %v944_v12 = vpop.f32.mrf.mxu1 }
  0xf6   : > { %v1670_v21 = vadd.f32 %v1590_v34, %v1376_v55  ;;  %v945_v8 = vadd.f32 %v944_v12, %v5495_v29  ;;  %v1991_v29 = vshrl.u32 %v4599_v42, 16  ;;  %v1979_v55 = vsel %vm5162_vm2, %v1974_v16, %v1978_v54 }
  0xf7   : > { %4631 = vmatmul.msk.bf16.gmra.mxu0 %vm658_vm3, %v2177_v20  ;;  %v5029_v20 = vld [vmem:[%s5150_s26 + $0x80] sm:$0x1]  ;;  %v4423_v34 = vrot.slane %v1029_v46, 9  ;;  %v1144_v12 = vrot.slane %v1142_v44, 4  ;;  %v2155_v56 = vunpack.c.l.b16 %v1979_v55  ;;  %v2156_v54 = vunpack.c.l.b16 %v1989_v62 }
  0xf8   : > { %v1298_v24 = vpop.f32.mrf.mxu2  ;;  %4406 = vmatmul.msk.bf16.gmra.mxu1 %vm658_vm3, %v4946_v5  ;;  %v5613_v37 = vadd.f32 %v2248_v3, %v1670_v21  ;;  %v1145_v3 = vrot.slane %v5029_v20, 5  ;;  %v1993_v18 = vrot.slane %v1991_v29, 4  ;;  %v1996_v21 = vrot.slane %v1994_v49, 5  ;;  %v4947_v29 = vld [vmem:[%s5150_s26 + $0x78] sm:$0xff] }
  0xf9   : > { %v1377_v60 = vadd.f32 %v1298_v24, %v942_v30  ;;  %v2002_v16 = vrot.slane %v2000_v0, 5  ;;  %v2178_v22 = vpack.c.b16 %v2156_v54, %v2155_v56  ;;  %v4603_v56 = vld [vmem:[%s5150_s26 + $0x94] sm:$0xf]  ;;  %v5030_v54 = vld [vmem:[%s5150_s26 + $0x88] sm:$0xf] }
  0xfa   : > { %v1997_v43 = vor.u32 %v1996_v21, %v1993_v18  ;;  %v1149_v18 = vrot.slane %v5030_v54, 5  ;;  %v1030_v21 = vld [vmem:[%s5150_s26 + $0x84] sm:$0xe] }
  0xfb   : > { %v2007_v49 = vor.u32 %v2006_v26, %v2002_v16 }
  0xfc   : > { %v2250_v15 = vpop.f32.mrf.mxu0  ;;  %v1998_v20 = vrot.slane %v1997_v43, 4 }
  0xfd   : > { %v1592_v30 = vpop.f32.mrf.mxu3  ;;  %4444 = vmatmul.msk.bf16.gmra.mxu2 %vm658_vm3, %v1226_v39  ;;  %v946_v5 = vpop.f32.mrf.mxu1  ;;  %v4601_v39 = vld [vmem:[%s5150_s26 + $0x8c] sm:$0x1] }
  0xfe   : > { %v1671_v6 = vadd.f32 %v1592_v30, %v1377_v60  ;;  %v947_v10 = vadd.f32 %v946_v5, %v5513_v57  ;;  %v1143_v60 = vsel %vm5345_vm6, %v4423_v34, %v1142_v44  ;;  %v1146_v57 = vsel %vm5345_vm6, %v1144_v12, %v1145_v3 }
  0xff   : > { %v2010_v55 = vshll.u32 %v4601_v39, 16  ;;  %v1206_v0 = vunpack.c.l.b16 %v1146_v57  ;;  %v2008_v30 = vrot.slane %v2007_v49, 4  ;;  %v2028_v57 = vshrl.u32 %v4603_v56, 16  ;;  %v4966_v49 = vld [vmem:[%s5150_s26 + $0x84] sm:$0xff] }
 0x100   : > { %v1301_v24 = vpop.f32.mrf.mxu2  ;;  %v5626_v38 = vadd.f32 %v2250_v15, %v1671_v6  ;;  %v4602_v6 = vld [vmem:[%s5150_s26 + $0x90] sm:$0xf] }
 0x101   : > { %v1378_v42 = vadd.f32 %v1301_v24, %v945_v8  ;;  %v1205_v8 = vunpack.c.l.b16 %v1143_v60  ;;  %v2012_v5 = vrot.slane %v2010_v55, 5  ;;  %v2015_v24 = vshrl.u32 %v4602_v6, 16 }
 0x102   : > { %4562 = vmatmul.msk.bf16.gmra.mxu3 %vm658_vm3, %v4965_v7  ;;  %v2018_v39 = vshll.u32 %v4602_v6, 16  ;;  %v2024_v60 = vshll.u32 %v4603_v56, 16  ;;  %v4424_v55 = vrot.slane %v1030_v21, 9 }
 0x103   : > { %v1227_v12 = vpack.c.b16 %v1206_v0, %v1205_v8  ;;  %v2017_v0 = vrot.slane %v2015_v24, 4 }
 0x104   : > { %v2253_v46 = vpop.f32.mrf.mxu0 }
 0x105   : > { %v1595_v62 = vpop.f32.mrf.mxu3  ;;  %v949_v15 = vpop.f32.mrf.mxu1 }
 0x106   : > { %v1672_v1 = vadd.f32 %v1595_v62, %v1378_v42  ;;  %v950_v44 = vadd.f32 %v949_v15, %v5535_v35  ;;  %v2003_v35 = vsel %vm5162_vm2, %v1998_v20, %v2002_v16  ;;  %v2013_v42 = vsel %vm5162_vm2, %v2008_v30, %v2012_v5 }
 0x107   : > { %4632 = vmatmul.msk.bf16.gmra.mxu0 %vm658_vm3, %v2178_v22  ;;  %v5031_v22 = vld [vmem:[%s5150_s26 + $0x8c] sm:$0x1]  ;;  %v1151_v62 = vrot.slane %v1149_v18, 4  ;;  %v2157_v15 = vunpack.c.l.b16 %v2003_v35  ;;  %v2158_v8 = vunpack.c.l.b16 %v2013_v42  ;;  %v2020_v20 = vrot.slane %v2018_v39, 5  ;;  %v4948_v35 = vld [vmem:[%s5150_s26 + $0x84] sm:$0xff] }
 0x108   : > { %v1303_v3 = vpop.f32.mrf.mxu2  ;;  %4407 = vmatmul.msk.bf16.gmra.mxu1 %vm658_vm3, %v4947_v29  ;;  %v5639_v7 = vadd.f32 %v2253_v46, %v1672_v1  ;;  %v1152_v43 = vrot.slane %v5031_v22, 5  ;;  %v2030_v30 = vrot.slane %v2028_v57, 4 }
 0x109   : > { %v1379_v34 = vadd.f32 %v1303_v3, %v947_v10  ;;  %v2026_v3 = vrot.slane %v2024_v60, 5  ;;  %v2179_v56 = vpack.c.b16 %v2158_v8, %v2157_v15  ;;  %v2021_v21 = vor.u32 %v2020_v20, %v2017_v0  ;;  %v4606_v15 = vld [vmem:[%s5150_s26 + $0xa0] sm:$0xf]  ;;  %v5032_v8 = vld [vmem:[%s5150_s26 + $0x94] sm:$0xf] }
 0x10a   : > { %v1156_v0 = vrot.slane %v5032_v8, 5 }
 0x10b   : > { %v2031_v24 = vor.u32 %v2030_v30, %v2026_v3 }
 0x10c   : > { %v2255_v26 = vpop.f32.mrf.mxu0 }
 0x10d   : > { %v1597_v10 = vpop.f32.mrf.mxu3  ;;  %4445 = vmatmul.msk.bf16.gmra.mxu2 %vm658_vm3, %v1227_v12  ;;  %v951_v46 = vpop.f32.mrf.mxu1  ;;  %v4604_v12 = vld [vmem:[%s5150_s26 + $0x98] sm:$0x1] }
 0x10e   : > { %v1673_v29 = vadd.f32 %v1597_v10, %v1379_v34  ;;  %v952_v16 = vadd.f32 %v951_v46, %v5553_v61  ;;  %v1150_v34 = vsel %vm5345_vm6, %v4424_v55, %v1149_v18  ;;  %v1153_v61 = vsel %vm5345_vm6, %v1151_v62, %v1152_v43 }
 0x10f   : > { %v2034_v42 = vshll.u32 %v4604_v12, 16  ;;  %v1208_v60 = vunpack.c.l.b16 %v1153_v61  ;;  %v2022_v43 = vrot.slane %v2021_v21, 4  ;;  %v2032_v10 = vrot.slane %v2031_v24, 4  ;;  %v4967_v24 = vld [vmem:[%s5150_s26 + $0x90] sm:$0xff] }
 0x110   : > { %v1306_v1 = vpop.f32.mrf.mxu2  ;;  %v5652_v5 = vadd.f32 %v2255_v26, %v1673_v29  ;;  %v4605_v29 = vld [vmem:[%s5150_s26 + $0x9c] sm:$0xf]  ;;  %v2052_v61 = vshrl.u32 %v4606_v15, 16 }
 0x111   : > { %v1380_v6 = vadd.f32 %v1306_v1, %v950_v44  ;;  %v1207_v44 = vunpack.c.l.b16 %v1150_v34  ;;  %v2036_v46 = vrot.slane %v2034_v42, 5  ;;  %v1031_v1 = vld [vmem:[%s5150_s26 + $0x90] sm:$0xe]  ;;  %v2042_v20 = vshll.u32 %v4605_v29, 16 }
 0x112   : > { %4563 = vmatmul.msk.bf16.gmra.mxu3 %vm658_vm3, %v4966_v49  ;;  %v2048_v34 = vshll.u32 %v4606_v15, 16 }
 0x113   : > { %v1228_v62 = vpack.c.b16 %v1208_v60, %v1207_v44  ;;  %v2037_v12 = vsel %vm5162_vm2, %v2032_v10, %v2036_v46  ;;  %v2054_v10 = vrot.slane %v2052_v61, 4 }
 0x114   : > { %v2258_v54 = vpop.f32.mrf.mxu0 }
 0x115   : > { %v1600_v39 = vpop.f32.mrf.mxu3  ;;  %v954_v26 = vpop.f32.mrf.mxu1 }
 0x116   : > { %v1674_v57 = vadd.f32 %v1600_v39, %v1380_v6  ;;  %v955_v18 = vadd.f32 %v954_v26, %v5576_v51  ;;  %v2039_v51 = vshrl.u32 %v4605_v29, 16  ;;  %v2027_v6 = vsel %vm5162_vm2, %v2022_v43, %v2026_v3 }
 0x117   : > { %4633 = vmatmul.msk.bf16.gmra.mxu0 %vm658_vm3, %v2179_v56  ;;  %v5033_v56 = vld [vmem:[%s5150_s26 + $0x98] sm:$0x1]  ;;  %v4425_v39 = vrot.slane %v1031_v1, 9  ;;  %v1158_v26 = vrot.slane %v1156_v0, 4  ;;  %v2159_v44 = vunpack.c.l.b16 %v2027_v6  ;;  %v2160_v3 = vunpack.c.l.b16 %v2037_v12 }
 0x118   : > { %v1308_v22 = vpop.f32.mrf.mxu2  ;;  %4408 = vmatmul.msk.bf16.gmra.mxu1 %vm658_vm3, %v4948_v35  ;;  %v5665_v49 = vadd.f32 %v2258_v54, %v1674_v57  ;;  %v1159_v54 = vrot.slane %v5033_v56, 5  ;;  %v2041_v60 = vrot.slane %v2039_v51, 4  ;;  %v2044_v57 = vrot.slane %v2042_v20, 5  ;;  %v4949_v51 = vld [vmem:[%s5150_s26 + $0x90] sm:$0xff] }
 0x119   : > { %v1381_v55 = vadd.f32 %v1308_v22, %v952_v16  ;;  %v2050_v43 = vrot.slane %v2048_v34, 5  ;;  %v2180_v15 = vpack.c.b16 %v2160_v3, %v2159_v44  ;;  %v4609_v3 = vld [vmem:[%s5150_s26 + $0xac] sm:$0xf] }
 0x11a   : > { %v2045_v8 = vor.u32 %v2044_v57, %v2041_v60  ;;  %v1032_v60 = vld [vmem:[%s5150_s26 + $0x9c] sm:$0xe] }
 0x11b   : > { %v2055_v20 = vor.u32 %v2054_v10, %v2050_v43 }
 0x11c   : > { %v2260_v30 = vpop.f32.mrf.mxu0 }
 0x11d   : > { %v1602_v16 = vpop.f32.mrf.mxu3  ;;  %4446 = vmatmul.msk.bf16.gmra.mxu2 %vm658_vm3, %v1228_v62  ;;  %v956_v35 = vpop.f32.mrf.mxu1  ;;  %v4607_v62 = vld [vmem:[%s5150_s26 + $0xa4] sm:$0x1] }
 0x11e   : > { %v1675_v21 = vadd.f32 %v1602_v16, %v1381_v55  ;;  %v957_v42 = vadd.f32 %v956_v35, %v5594_v13  ;;  %v1157_v55 = vsel %vm5345_vm6, %v4425_v39, %v1156_v0  ;;  %v1160_v13 = vsel %vm5345_vm6, %v1158_v26, %v1159_v54  ;;  %v4608_v35 = vld [vmem:[%s5150_s26 + $0xa8] sm:$0xf]  ;;  %v5034_v26 = vld [vmem:[%s5150_s26 + $0xa0] sm:$0xf] }
 0x11f   : > { %v2058_v6 = vshll.u32 %v4607_v62, 16  ;;  %v1210_v34 = vunpack.c.l.b16 %v1160_v13  ;;  %v2046_v0 = vrot.slane %v2045_v8, 4  ;;  %v2056_v54 = vrot.slane %v2055_v20, 4 }
 0x120   : > { %v1311_v22 = vpop.f32.mrf.mxu2  ;;  %v5678_v46 = vadd.f32 %v2260_v30, %v1675_v21  ;;  %v1163_v44 = vrot.slane %v5034_v26, 5  ;;  %v2066_v10 = vshll.u32 %v4608_v35, 16  ;;  %v2076_v13 = vshrl.u32 %v4609_v3, 16 }
 0x121   : > { %v1382_v29 = vadd.f32 %v1311_v22, %v955_v18  ;;  %v1209_v18 = vunpack.c.l.b16 %v1157_v55  ;;  %v2060_v16 = vrot.slane %v2058_v6, 5  ;;  %v2051_v57 = vsel %vm5162_vm2, %v2046_v0, %v2050_v43 }
 0x122   : > { %4564 = vmatmul.msk.bf16.gmra.mxu3 %vm658_vm3, %v4967_v24  ;;  %v2063_v22 = vshrl.u32 %v4608_v35, 16  ;;  %v2072_v55 = vshll.u32 %v4609_v3, 16  ;;  %v1165_v20 = vrot.slane %v1163_v44, 4  ;;  %v2161_v43 = vunpack.c.l.b16 %v2051_v57  ;;  %v4610_v3 = vld [vmem:[%s5150_s26 + $0xb0] sm:$0x1]  ;;  %v4950_v57 = vld [vmem:[%s5150_s26 + $0x9c] sm:$0xff] }
 0x123   : > { %v1229_v39 = vpack.c.b16 %v1210_v34, %v1209_v18  ;;  %v2061_v62 = vsel %vm5162_vm2, %v2056_v54, %v2060_v16  ;;  %v2068_v0 = vrot.slane %v2066_v10, 5  ;;  %v2078_v16 = vrot.slane %v2076_v13, 4 }
 0x124   : > { %v2263_v1 = vpop.f32.mrf.mxu0  ;;  %v2162_v34 = vunpack.c.l.b16 %v2061_v62  ;;  %v2074_v54 = vrot.slane %v2072_v55, 5  ;;  %v2082_v62 = vshll.u32 %v4610_v3, 16 }
 0x125   : > { %v1605_v30 = vpop.f32.mrf.mxu3  ;;  %v959_v12 = vpop.f32.mrf.mxu1 }
 0x126   : > { %v1676_v61 = vadd.f32 %v1605_v30, %v1382_v29  ;;  %v4968_v30 = vld [vmem:[%s5150_s26 + $0x9c] sm:$0xff]  ;;  %v960_v18 = vadd.f32 %v959_v12, %v5429_v40  ;;  %v2181_v40 = vpack.c.b16 %v2162_v34, %v2161_v43  ;;  %v2084_v43 = vrot.slane %v2082_v62, 5 }
 0x127   : > { %4634 = vmatmul.msk.bf16.gmra.mxu0 %vm658_vm3, %v2180_v15  ;;  %v5035_v15 = vld [vmem:[%s5150_s26 + $0xa4] sm:$0x1] }
 0x128   : > { %v1313_v56 = vpop.f32.mrf.mxu2  ;;  %4409 = vmatmul.msk.bf16.gmra.mxu1 %vm658_vm3, %v4949_v51  ;;  %v5690_v21 = vadd.f32 %v2263_v1, %v1676_v61  ;;  %v1166_v8 = vrot.slane %v5035_v15, 5  ;;  %v4426_v51 = vrot.slane %v1032_v60, 9  ;;  %v2065_v61 = vrot.slane %v2063_v22, 4 }
 0x129   : > { %v1383_v24 = vadd.f32 %v1313_v56, %v957_v42 }
 0x12a   : > { %v2069_v12 = vor.u32 %v2068_v0, %v2065_v61 }
 0x12c   : > { %v2265_v29 = vpop.f32.mrf.mxu0 }
 0x12d   : > { %v1607_v42 = vpop.f32.mrf.mxu3  ;;  %4447 = vmatmul.msk.bf16.gmra.mxu2 %vm658_vm3, %v1229_v39  ;;  %v961_v1 = vpop.f32.mrf.mxu1  ;;  %v1164_v39 = vsel %vm5345_vm6, %v4426_v51, %v1163_v44  ;;  %v4611_v44 = vld [vmem:[%s5150_s26 + $0xb4] sm:$0xf]  ;;  %v2070_v51 = vrot.slane %v2069_v12, 4 }
 0x12e   : > { %v1677_v6 = vadd.f32 %v1607_v42, %v1383_v24  ;;  %v1167_v24 = vsel %vm5345_vm6, %v1165_v20, %v1166_v8  ;;  %v1211_v22 = vunpack.c.l.b16 %v1164_v39  ;;  %v4612_v42 = vld [vmem:[%s5150_s26 + $0xb8] sm:$0xf]  ;;  %v962_v8 = vadd.f32 %v961_v1, %v5445_v25 }
 0x12f   : > { %v1212_v10 = vunpack.c.l.b16 %v1167_v24  ;;  %v2087_v61 = vshrl.u32 %v4611_v44, 16  ;;  %v2090_v0 = vshll.u32 %v4611_v44, 16  ;;  %v2100_v39 = vshrl.u32 %v4612_v42, 16  ;;  %v1033_v24 = vld [vmem:[%s5150_s26 + $0xa8] sm:$0xe] }
 0x130   : > { %v1316_v56 = vpop.f32.mrf.mxu2  ;;  %v5703_v35 = vadd.f32 %v2265_v29, %v1677_v6  ;;  %v2079_v29 = vor.u32 %v2078_v16, %v2074_v54  ;;  %v5036_v16 = vld [vmem:[%s5150_s26 + $0xac] sm:$0xf]  ;;  %v2075_v1 = vsel %vm5162_vm2, %v2070_v51, %v2074_v54 }
 0x131   : > { %v1384_v26 = vadd.f32 %v1316_v56, %v960_v18  ;;  %v1230_v6 = vpack.c.b16 %v1212_v10, %v1211_v22  ;;  %v2096_v56 = vshll.u32 %v4612_v42, 16  ;;  %v2089_v22 = vrot.slane %v2087_v61, 4 }
 0x132   : > { %4565 = vmatmul.msk.bf16.gmra.mxu3 %vm658_vm3, %v4968_v30  ;;  %v2080_v30 = vrot.slane %v2079_v29, 4  ;;  %v2092_v10 = vrot.slane %v2090_v0, 5  ;;  %v2102_v42 = vrot.slane %v2100_v39, 4  ;;  %v4951_v39 = vld [vmem:[%s5150_s26 + $0xa8] sm:$0xff] }
 0x133   : > { %v2098_v29 = vrot.slane %v2096_v56, 5 }
 0x134   : > { %v2268_v60 = vpop.f32.mrf.mxu0  ;;  %v2085_v3 = vsel %vm5162_vm2, %v2080_v30, %v2084_v43 }
 0x135   : > { %v1610_v55 = vpop.f32.mrf.mxu3  ;;  %v964_v13 = vpop.f32.mrf.mxu1  ;;  %v2164_v51 = vunpack.c.l.b16 %v2085_v3  ;;  %v2103_v0 = vor.u32 %v2102_v42, %v2098_v29 }
 0x136   : > { %v1678_v15 = vadd.f32 %v1610_v55, %v1384_v26  ;;  %v1170_v26 = vrot.slane %v5036_v16, 5  ;;  %v4969_v55 = vld [vmem:[%s5150_s26 + $0xa8] sm:$0xff]  ;;  %v965_v54 = vadd.f32 %v964_v13, %v5465_v50 }
 0x137   : > { %4635 = vmatmul.msk.bf16.gmra.mxu0 %vm658_vm3, %v2181_v40  ;;  %v5037_v40 = vld [vmem:[%s5150_s26 + $0xb0] sm:$0x1] }
 0x138   : > { %v1318_v20 = vpop.f32.mrf.mxu2  ;;  %4410 = vmatmul.msk.bf16.gmra.mxu1 %vm658_vm3, %v4950_v57  ;;  %v5717_v18 = vadd.f32 %v2268_v60, %v1678_v15  ;;  %v1173_v12 = vrot.slane %v5037_v40, 5  ;;  %v4427_v15 = vrot.slane %v1033_v24, 9  ;;  %v1172_v44 = vrot.slane %v1170_v26, 4 }
 0x139   : > { %v1385_v34 = vadd.f32 %v1318_v20, %v962_v8  ;;  %v2163_v8 = vunpack.c.l.b16 %v2075_v1  ;;  %v4613_v20 = vld [vmem:[%s5150_s26 + $0xbc] sm:$0x1] }
 0x13a   : > { %v1174_v61 = vsel %vm5345_vm6, %v1172_v44, %v1173_v12  ;;  %v2106_v50 = vshll.u32 %v4613_v20, 16  ;;  %v4615_v44 = vld [vmem:[%s5150_s26 + $0xc4] sm:$0xf] }
 0x13b   : > { %v2182_v13 = vpack.c.b16 %v2164_v51, %v2163_v8  ;;  %v1214_v3 = vunpack.c.l.b16 %v1174_v61  ;;  %v1034_v8 = vld [vmem:[%s5150_s26 + $0xb4] sm:$0xe]  ;;  %v5039_v51 = vld [vmem:[%s5150_s26 + $0xb8] sm:$0xf]  ;;  %v2124_v61 = vshrl.u32 %v4615_v44, 16 }
 0x13c   : > { %v2270_v25 = vpop.f32.mrf.mxu0  ;;  %v1177_v20 = vrot.slane %v5039_v51, 5 }
 0x13d   : > { %v1612_v60 = vpop.f32.mrf.mxu3  ;;  %4448 = vmatmul.msk.bf16.gmra.mxu2 %vm658_vm3, %v1230_v6  ;;  %v966_v57 = vpop.f32.mrf.mxu1  ;;  %v2093_v6 = vor.u32 %v2092_v10, %v2089_v22  ;;  %v2108_v22 = vrot.slane %v2106_v50, 5  ;;  %v4614_v10 = vld [vmem:[%s5150_s26 + $0xc0] sm:$0xf]  ;;  %v5040_v50 = vld [vmem:[%s5150_s26 + $0x14] sm:$0x1] }
 0x13e   : > { %v1679_v62 = vadd.f32 %v1612_v60, %v1385_v34  ;;  %v1171_v34 = vsel %vm5345_vm6, %v4427_v15, %v1170_v26  ;;  %v2104_v26 = vrot.slane %v2103_v0, 4  ;;  %v967_v12 = vadd.f32 %v966_v57, %v5482_v23 }
 0x13f   : > { %v1213_v1 = vunpack.c.l.b16 %v1171_v34  ;;  %v2094_v60 = vrot.slane %v2093_v6, 4  ;;  %v2111_v57 = vshrl.u32 %v4614_v10, 16  ;;  %v2114_v6 = vshll.u32 %v4614_v10, 16  ;;  %v4970_v10 = vld [vmem:[%s5150_s26 + $0xb4] sm:$0xff] }
 0x140   : > { %v1321_v30 = vpop.f32.mrf.mxu2  ;;  %v5730_v43 = vadd.f32 %v2270_v25, %v1679_v62  ;;  %v5038_v62 = vld [vmem:[%s5150_s26 + $0x10] sm:$0xf]  ;;  %v2109_v23 = vsel %vm5162_vm2, %v2104_v26, %v2108_v22  ;;  %v2120_v34 = vshll.u32 %v4615_v44, 16  ;;  %v1179_v26 = vrot.slane %v1177_v20, 4  ;;  %v4639_v22 = vld [vmem:[%s5150_s26 + $0xc] sm:$0xe] }
 0x141   : > { %v1386_v16 = vadd.f32 %v1321_v30, %v965_v54  ;;  %v1231_v54 = vpack.c.b16 %v1214_v3, %v1213_v1  ;;  %v5041_v1 = vld [vmem:[%s5150_s26 + $0xbc] sm:$0x1]  ;;  %v4655_v44 = vrot.slane %v4639_v22, 9 }
 0x142   : > { %4566 = vmatmul.msk.bf16.gmra.mxu3 %vm658_vm3, %v4969_v55  ;;  %v2426_v55 = vrot.slane %v5038_v62, 5  ;;  %v2113_v62 = vrot.slane %v2111_v57, 4 }
 0x144   : > { %v2273_v56 = vpop.f32.mrf.mxu0  ;;  %v2428_v0 = vrot.slane %v2426_v55, 4 }
 0x145   : > { %v1615_v24 = vpop.f32.mrf.mxu3  ;;  %v969_v25 = vpop.f32.mrf.mxu1 }
 0x146   : > { %v1680_v40 = vadd.f32 %v1615_v24, %v1386_v16  ;;  %v2099_v16 = vsel %vm5162_vm2, %v2094_v60, %v2098_v29  ;;  %v4428_v24 = vrot.slane %v1034_v8, 9  ;;  %v970_v51 = vadd.f32 %v969_v25, %v5502_v45 }
 0x147   : > { %4636 = vmatmul.msk.bf16.gmra.mxu0 %vm658_vm3, %v2182_v13  ;;  %v2429_v13 = vrot.slane %v5040_v50, 5  ;;  %v2165_v29 = vunpack.c.l.b16 %v2099_v16  ;;  %v2122_v8 = vrot.slane %v2120_v34, 5  ;;  %v2126_v50 = vrot.slane %v2124_v61, 4  ;;  %v4616_v16 = vld [vmem:[%s5150_s26 + $0xc8] sm:$0x1] }
 0x148   : > { %v1323_v15 = vpop.f32.mrf.mxu2  ;;  %4411 = vmatmul.msk.bf16.gmra.mxu1 %vm658_vm3, %v4951_v39  ;;  %v5746_v30 = vadd.f32 %v2273_v56, %v1680_v40  ;;  %v1180_v56 = vrot.slane %v5041_v1, 5  ;;  %v2166_v40 = vunpack.c.l.b16 %v2109_v23  ;;  %v2427_v23 = vsel %vm5345_vm6, %v4655_v44, %v2426_v55  ;;  %v4811_v34 = vld [vmem:[%s5150_s26 + $0x18] sm:$0xf] }
 0x149   : > { %v1387_v42 = vadd.f32 %v1323_v15, %v967_v12  ;;  %v2116_v15 = vrot.slane %v2114_v6, 5  ;;  %v2539_v45 = vunpack.c.l.b16 %v2427_v23  ;;  %v2130_v22 = vshll.u32 %v4616_v16, 16 }
 0x14a   : > { %v1181_v6 = vsel %vm5345_vm6, %v1179_v26, %v1180_v56  ;;  %v2183_v61 = vpack.c.b16 %v2166_v40, %v2165_v29  ;;  %v3105_v56 = vshrl.u32 %v4811_v34, 16  ;;  %v3108_v26 = vshll.u32 %v4811_v34, 16 }
 0x14c   : > { %v2275_v39 = vpop.f32.mrf.mxu0  ;;  %v3107_v16 = vrot.slane %v3105_v56, 4 }
 0x14d   : > { %v1617_v3 = vpop.f32.mrf.mxu3  ;;  %4449 = vmatmul.msk.bf16.gmra.mxu2 %vm658_vm3, %v1231_v54  ;;  %v971_v60 = vpop.f32.mrf.mxu1  ;;  %v1178_v54 = vsel %vm5345_vm6, %v4428_v24, %v1177_v20  ;;  %v5770_v20 = vld [vmem:[%s5150_s26 + $0x1c] sm:$0xf]  ;;  %v2127_v24 = vor.u32 %v2126_v50, %v2122_v8 }
 0x14e   : > { %v1681_v12 = vadd.f32 %v1617_v3, %v1387_v42  ;;  %v2430_v42 = vsel %vm5345_vm6, %v2428_v0, %v2429_v13  ;;  %v2117_v3 = vor.u32 %v2116_v15, %v2113_v62  ;;  %v4952_v13 = vld [vmem:[%s5150_s26 + $0xb4] sm:$0xff]  ;;  %v3118_v29 = vshrl.u32 %v5770_v20, 16 }
 0x14f   : > { %v2540_v25 = vunpack.c.l.b16 %v2430_v42  ;;  %v972_v62 = vadd.f32 %v971_v60, %v5522_v9 }
 0x150   : > { %v1326_v1 = vpop.f32.mrf.mxu2  ;;  %v5774_v44 = vadd.f32 %v2275_v39, %v1681_v12  ;;  %v2118_v39 = vrot.slane %v2117_v3, 4  ;;  %v2128_v12 = vrot.slane %v2127_v24, 4  ;;  %v3120_v34 = vrot.slane %v3118_v29, 4 }
 0x151   : > { %v1388_v57 = vadd.f32 %v1326_v1, %v970_v51  ;;  %v5772_v55 = vpack.c.b16 %v2540_v25, %v2539_v45  ;;  %v1215_v51 = vunpack.c.l.b16 %v1178_v54  ;;  %v1216_v1 = vunpack.c.l.b16 %v1181_v6 }
 0x152   : > { %4567 = vmatmul.msk.bf16.gmra.mxu3 %vm658_vm3, %v4970_v10  ;;  %6460 = vst [vmem:[#allocation2_spill] sm:$0xff] %v5774_v44  ;;  %v3114_v10 = vshll.u32 %v5770_v20, 16  ;;  %v2132_v54 = vrot.slane %v2130_v22, 5  ;;  %v3110_v6 = vrot.slane %v3108_v26, 5  ;;  %v2123_v9 = vsel %vm5162_vm2, %v2118_v39, %v2122_v8  ;;  %v4881_v39 = vld [vmem:[%s5150_s26 + $0x18] sm:$0xe] }
 0x153   : > { %v1232_v50 = vpack.c.b16 %v1216_v1, %v1215_v51  ;;  %v4971_v1 = vld [vmem:[%s5150_s26 + $0xc0] sm:$0xff]  ;;  %v2167_v8 = vunpack.c.l.b16 %v2123_v9 }
 0x154   : > { %v2278_v0 = vpop.f32.mrf.mxu0  ;;  %v3116_v25 = vrot.slane %v3114_v10, 5  ;;  %v2133_v60 = vsel %vm5162_vm2, %v2128_v12, %v2132_v54  ;;  %v3111_v22 = vor.u32 %v3110_v6, %v3107_v16  ;;  %v4814_v12 = vld [vmem:[%s5150_s26 + $0x24] sm:$0xf]  ;;  %v5800_v54 = vld [vmem:[%s5150_s26 + $0x28] sm:$0xf] }
 0x155   : > { %v1620_v23 = vpop.f32.mrf.mxu3  ;;  %v974_v42 = vpop.f32.mrf.mxu1  ;;  %v2168_v26 = vunpack.c.l.b16 %v2133_v60 }
 0x156   : > { %v1682_v40 = vadd.f32 %v1620_v23, %v1388_v57  ;;  %v5785_v57 = vld [vmem:[%s5150_s26 + $0x20] sm:$0x1]  ;;  %v975_v56 = vadd.f32 %v974_v42, %v5545_v48  ;;  %v3112_v29 = vrot.slane %v3111_v22, 4  ;;  %v5042_v42 = vld [vmem:[%s5150_s26 + $0x1c] sm:$0xf] }
 0x157   : > { %4637 = vmatmul.msk.bf16.gmra.mxu0 %vm658_vm3, %v2183_v61  ;;  %v2433_v6 = vrot.slane %v5042_v42, 5  ;;  %v4640_v22 = vld [vmem:[%s5150_s26 + $0x18] sm:$0xe] }
 0x158   : > { %v1328_v15 = vpop.f32.mrf.mxu2  ;;  %4412 = vmatmul.msk.bf16.gmra.mxu1 %vm658_vm3, %v4952_v13  ;;  %v5782_v44 = vadd.f32 %v2278_v0, %v1682_v40  ;;  %v3121_v13 = vor.u32 %v3120_v34, %v3116_v25  ;;  %v3124_v0 = vshll.u32 %v5785_v57, 16  ;;  %v3117_v9 = vsel %vm5162_vm2, %v3112_v29, %v3116_v25 }
 0x159   : > { %v1389_v45 = vadd.f32 %v1328_v15, %v972_v62  ;;  %v2184_v15 = vpack.c.b16 %v2168_v26, %v2167_v8  ;;  %v3783_v25 = vrot.slane %v5785_v57, 5  ;;  %v5043_v8 = vld [vmem:[%s5150_s26 + $0x20] sm:$0x1]  ;;  %v4656_v29 = vrot.slane %v4640_v22, 9 }
 0x15a   : > { %v3122_v40 = vrot.slane %v3121_v13, 4  ;;  %v3126_v62 = vrot.slane %v3124_v0, 5  ;;  %v3129_v13 = vshrl.u32 %v4814_v12, 16  ;;  %v3132_v0 = vshll.u32 %v4814_v12, 16 }
 0x15b   : > { %v2436_v26 = vrot.slane %v5043_v8, 5  ;;  %v2434_v22 = vsel %vm5345_vm6, %v4656_v29, %v2433_v6  ;;  %v4817_v29 = vld [vmem:[%s5150_s26 + $0x30] sm:$0xf] }
 0x15c   : > { %v2280_v61 = vpop.f32.mrf.mxu0  ;;  %v3127_v60 = vsel %vm5162_vm2, %v3122_v40, %v3126_v62  ;;  %v2435_v40 = vrot.slane %v2433_v6, 4  ;;  %v3134_v57 = vrot.slane %v3132_v0, 5 }
 0x15d   : > { %v1622_v3 = vpop.f32.mrf.mxu3  ;;  %4450 = vmatmul.msk.bf16.gmra.mxu2 %vm658_vm3, %v1232_v50  ;;  %v976_v24 = vpop.f32.mrf.mxu1  ;;  %v3780_v50 = vrot.slane %v5770_v20, 5  ;;  %v3492_v12 = vunpack.c.l.b16 %v3127_v60 }
 0x15e   : > { %v1683_v51 = vadd.f32 %v1622_v3, %v1389_v45  ;;  %v4897_v3 = vrot.slane %v4881_v39, 9  ;;  %v4975_v39 = vld [vmem:[%s5150_s26 + $0x18] sm:$0xff]  ;;  %v2437_v60 = vsel %vm5345_vm6, %v2435_v40, %v2436_v26  ;;  %v5840_v40 = vld [vmem:[%s5150_s26 + $0x34] sm:$0xf] }
 0x160   : > { %v1331_v23 = vpop.f32.mrf.mxu2  ;;  %v5802_v16 = vadd.f32 %v2280_v61, %v1683_v51  ;;  %v3138_v61 = vshll.u32 %v5800_v54, 16  ;;  %v3142_v51 = vshrl.u32 %v5800_v54, 16 }
 0x161   : > { %v1390_v10 = vadd.f32 %v1331_v23, %v975_v56  ;;  %v3782_v56 = vrot.slane %v3780_v50, 4 }
 0x162   : > { %4568 = vmatmul.msk.bf16.gmra.mxu3 %vm658_vm3, %v4971_v1  ;;  %v977_v1 = vadd.f32 %v976_v24, %v5565_v17  ;;  %v3131_v24 = vrot.slane %v3129_v13, 4  ;;  %v5823_v42 = vrot.slane %v3138_v61, 5 }
 0x164   : > { %v2283_v48 = vpop.f32.mrf.mxu0  ;;  %v3135_v61 = vor.u32 %v3134_v57, %v3131_v24  ;;  %v4882_v24 = vld [vmem:[%s5150_s26 + $0x24] sm:$0xe] }
 0x165   : > { %v1625_v45 = vpop.f32.mrf.mxu3  ;;  %v979_v34 = vpop.f32.mrf.mxu1 }
 0x166   : > { %v1684_v20 = vadd.f32 %v1625_v45, %v1390_v10  ;;  %v3491_v10 = vunpack.c.l.b16 %v3117_v9  ;;  %v3144_v45 = vrot.slane %v3142_v51, 4  ;;  %v980_v6 = vadd.f32 %v979_v34, %v5447_v28 }
 0x167   : > { %4638 = vmatmul.msk.bf16.gmra.mxu0 %vm658_vm3, %v2184_v15  ;;  %v3781_v15 = vsel %vm5345_vm6, %v4897_v3, %v3780_v50  ;;  %v3787_v28 = vrot.slane %v5800_v54, 5 }
 0x168   : > { %v1333_v23 = vpop.f32.mrf.mxu2  ;;  %4677 = vmatmul.msk.bf16.vlgmr.msra.gmra.mxu1 %vm658_vm3, %v5772_v55  ;;  %v5821_v17 = vadd.f32 %v2283_v48, %v1684_v20  ;;  %v3784_v55 = vsel %vm5345_vm6, %v3782_v56, %v3783_v25  ;;  %v3523_v48 = vpack.c.b16 %v3492_v12, %v3491_v10  ;;  %v3893_v3 = vunpack.c.l.b16 %v3781_v15 }
 0x169   : > { %v1391_v62 = vadd.f32 %v1333_v23, %v977_v1  ;;  %v5832_v1 = vld [vmem:[%s5150_s26 + $0x2c] sm:$0x1]  ;;  %v3894_v0 = vunpack.c.l.b16 %v3784_v55  ;;  %v3145_v51 = vor.u32 %v3144_v45, %v5823_v42  ;;  %v2541_v56 = vunpack.c.l.b16 %v2434_v22 }
 0x16a   : > { %v2542_v25 = vunpack.c.l.b16 %v2437_v60  ;;  %v3148_v8 = vshll.u32 %v5832_v1, 16  ;;  %v3153_v45 = vshrl.u32 %v4817_v29, 16  ;;  %v3156_v55 = vshll.u32 %v4817_v29, 16 }
 0x16b   : > { %v3925_v10 = vpack.c.b16 %v3894_v0, %v3893_v3  ;;  %v3162_v22 = vshll.u32 %v5840_v40, 16  ;;  %v3166_v60 = vshrl.u32 %v5840_v40, 16  ;;  %v5044_v3 = vld [vmem:[%s5150_s26 + $0x28] sm:$0xf]  ;;  %v3790_v54 = vrot.slane %v5832_v1, 5 }
 0x16c   : > { %v2285_v9 = vpop.f32.mrf.mxu0  ;;  %v2572_v12 = vpack.c.b16 %v2542_v25, %v2541_v56  ;;  %v3150_v15 = vrot.slane %v3148_v8, 5  ;;  %v2440_v0 = vrot.slane %v5044_v3, 5  ;;  %v4898_v56 = vrot.slane %v4882_v24, 9  ;;  %v4976_v3 = vld [vmem:[%s5150_s26 + $0x24] sm:$0xff] }
 0x16d   : > { %v1627_v50 = vpop.f32.mrf.mxu3  ;;  %4795 = vmatmul.msk.bf16.vlgmr.msra.gmra.mxu2 %vm658_vm3, %v4975_v39  ;;  %v981_v13 = vpop.f32.mrf.mxu1  ;;  %v3146_v39 = vrot.slane %v3145_v51, 4  ;;  %v3158_v24 = vrot.slane %v3156_v55, 5  ;;  %v5861_v1 = vrot.slane %v3162_v22, 5 }
 0x16e   : > { %v1685_v20 = vadd.f32 %v1627_v50, %v1391_v62  ;;  %v3136_v62 = vrot.slane %v3135_v61, 4  ;;  %v5045_v61 = vld [vmem:[%s5150_s26 + $0x2c] sm:$0x1] }
 0x16f   : > { %v2443_v51 = vrot.slane %v5045_v61, 5  ;;  %v3151_v8 = vsel %vm5162_vm2, %v3146_v39, %v3150_v15  ;;  %v3788_v15 = vsel %vm5345_vm6, %v4898_v56, %v3787_v28 }
 0x170   : > { %v1336_v26 = vpop.f32.mrf.mxu2  ;;  %v5845_v34 = vadd.f32 %v2285_v9, %v1685_v20  ;;  %v4641_v9 = vld [vmem:[%s5150_s26 + $0x24] sm:$0xe]  ;;  %v982_v20 = vadd.f32 %v981_v13, %v5468_v58  ;;  %v3141_v25 = vsel %vm5162_vm2, %v3136_v62, %v5823_v42  ;;  %v2442_v13 = vrot.slane %v2440_v0, 4 }
 0x171   : > { %v1392_v23 = vadd.f32 %v1336_v26, %v980_v6  ;;  %v3789_v26 = vrot.slane %v3787_v28, 4  ;;  %v4657_v58 = vrot.slane %v4641_v9, 9  ;;  %v3493_v42 = vunpack.c.l.b16 %v3141_v25 }
 0x172   : > { %4865 = vmatmul.msk.bf16.vlgmr.msra.gmra.mxu3 %vm658_vm3, %v3523_v48  ;;  %6461 = vst [vmem:[#allocation3_spill] sm:$0xff] %v5845_v34  ;;  %v3494_v62 = vunpack.c.l.b16 %v3151_v8  ;;  %v5867_v34 = vld [vmem:[%s5150_s26 + $0x38] sm:$0x1] }
 0x173   : > { %v3172_v28 = vshll.u32 %v5867_v34, 16 }
 0x174   : > { %v2288_v57 = vpop.f32.mrf.mxu0  ;;  %v3524_v9 = vpack.c.b16 %v3494_v62, %v3493_v42  ;;  %v5046_v62 = vld [vmem:[%s5150_s26 + $0x34] sm:$0xf] }
 0x175   : > { %v1630_v50 = vpop.f32.mrf.mxu3  ;;  %v984_v48 = vpop.f32.mrf.mxu1 }
 0x176   : > { %v1686_v6 = vadd.f32 %v1630_v50, %v1392_v23  ;;  %v3155_v23 = vrot.slane %v3153_v45, 4  ;;  %v3168_v50 = vrot.slane %v3166_v60, 4  ;;  %v2444_v60 = vsel %vm5345_vm6, %v2442_v13, %v2443_v51  ;;  %v5886_v13 = vld [vmem:[%s5150_s26 + $0x40] sm:$0xf] }
 0x177   : > { %4919 = vmatmul.msk.bf16.vlgmr.msra.gmra.mxu0 %vm658_vm3, %v3925_v10 }
 0x178   : > { %v1338_v29 = vpop.f32.mrf.mxu2  ;;  %4678 = vmatmul.msk.bf16.gmra.mxu1 %vm658_vm3, %v2572_v12  ;;  %v5864_v61 = vadd.f32 %v2288_v57, %v1686_v6  ;;  %v3791_v12 = vsel %vm5345_vm6, %v3789_v26, %v3790_v54  ;;  %v3159_v45 = vor.u32 %v3158_v24, %v3155_v23  ;;  %v2441_v57 = vsel %vm5345_vm6, %v4657_v58, %v2440_v0 }
 0x179   : > { %v1393_v10 = vadd.f32 %v1338_v29, %v982_v20  ;;  %v3169_v6 = vor.u32 %v3168_v50, %v5861_v1  ;;  %v985_v54 = vadd.f32 %v984_v48, %v5485_v11  ;;  %v3895_v20 = vunpack.c.l.b16 %v3788_v15  ;;  %v4883_v50 = vld [vmem:[%s5150_s26 + $0x30] sm:$0xe] }
 0x17a   : > { %v3896_v25 = vunpack.c.l.b16 %v3791_v12  ;;  %v2543_v26 = vunpack.c.l.b16 %v2441_v57  ;;  %v2544_v0 = vunpack.c.l.b16 %v2444_v60  ;;  %v3160_v23 = vrot.slane %v3159_v45, 4 }
 0x17b   : > { %v3170_v51 = vrot.slane %v3169_v6, 4  ;;  %v3174_v24 = vrot.slane %v3172_v28, 5  ;;  %v3794_v58 = vrot.slane %v5840_v40, 5  ;;  %v2447_v15 = vrot.slane %v5046_v62, 5  ;;  %v4642_v40 = vld [vmem:[%s5150_s26 + $0x30] sm:$0xe] }
 0x17c   : > { %v2290_v39 = vpop.f32.mrf.mxu0  ;;  %v2573_v42 = vpack.c.b16 %v2544_v0, %v2543_v26  ;;  %v4899_v60 = vrot.slane %v4883_v50, 9 }
 0x17d   : > { %v1632_v55 = vpop.f32.mrf.mxu3  ;;  %4796 = vmatmul.msk.bf16.gmra.mxu2 %vm658_vm3, %v4976_v3  ;;  %v986_v22 = vpop.f32.mrf.mxu1  ;;  %v4820_v3 = vld [vmem:[%s5150_s26 + $0x3c] sm:$0xf]  ;;  %v3175_v57 = vsel %vm5162_vm2, %v3170_v51, %v3174_v24  ;;  %v4977_v24 = vld [vmem:[%s5150_s26 + $0x30] sm:$0xff] }
 0x17e   : > { %v1687_v56 = vadd.f32 %v1632_v55, %v1393_v10  ;;  %v3926_v10 = vpack.c.b16 %v3896_v25, %v3895_v20  ;;  %v3165_v55 = vsel %vm5162_vm2, %v3160_v23, %v5861_v1  ;;  %v3177_v6 = vshrl.u32 %v4820_v3, 16  ;;  %v5047_v25 = vld [vmem:[%s5150_s26 + $0x38] sm:$0x1] }
 0x17f   : > { %v3796_v20 = vrot.slane %v3794_v58, 4  ;;  %v3797_v1 = vrot.slane %v5867_v34, 5  ;;  %v3495_v0 = vunpack.c.l.b16 %v3165_v55  ;;  %v2449_v23 = vrot.slane %v2447_v15, 4 }
 0x180   : > { %v1341_v8 = vpop.f32.mrf.mxu2  ;;  %v5888_v11 = vadd.f32 %v2290_v39, %v1687_v56  ;;  %v3180_v39 = vshll.u32 %v4820_v3, 16  ;;  %v3186_v56 = vshll.u32 %v5886_v13, 16  ;;  %v3496_v50 = vunpack.c.l.b16 %v3175_v57 }
 0x181   : > { %v1394_v29 = vadd.f32 %v1341_v8, %v985_v54  ;;  %v987_v54 = vadd.f32 %v986_v22, %v5506_v47  ;;  %v2450_v8 = vrot.slane %v5047_v25, 5  ;;  %v3795_v3 = vsel %vm5345_vm6, %v4899_v60, %v3794_v58 }
 0x182   : > { %4866 = vmatmul.msk.bf16.gmra.mxu3 %vm658_vm3, %v3524_v9  ;;  %v3190_v9 = vshrl.u32 %v5886_v13, 16  ;;  %v3179_v47 = vrot.slane %v3177_v6, 4  ;;  %v3182_v22 = vrot.slane %v3180_v39, 5  ;;  %v5909_v34 = vrot.slane %v3186_v56, 5 }
 0x183   : > { %v2451_v57 = vsel %vm5345_vm6, %v2449_v23, %v2450_v8  ;;  %v3897_v60 = vunpack.c.l.b16 %v3795_v3  ;;  %v4884_v3 = vld [vmem:[%s5150_s26 + $0x3c] sm:$0xe] }
 0x184   : > { %v2293_v48 = vpop.f32.mrf.mxu0  ;;  %v3192_v62 = vrot.slane %v3190_v9, 4  ;;  %v3183_v56 = vor.u32 %v3182_v22, %v3179_v47 }
 0x185   : > { %v1635_v12 = vpop.f32.mrf.mxu3  ;;  %v989_v45 = vpop.f32.mrf.mxu1 }
 0x186   : > { %v1688_v28 = vadd.f32 %v1635_v12, %v1394_v29  ;;  %v4658_v29 = vrot.slane %v4642_v40, 9  ;;  %v5918_v40 = vld [vmem:[%s5150_s26 + $0x44] sm:$0x1]  ;;  %v3193_v9 = vor.u32 %v3192_v62, %v5909_v34  ;;  %v3184_v23 = vrot.slane %v3183_v56, 4 }
 0x187   : > { %4920 = vmatmul.msk.bf16.gmra.mxu0 %vm658_vm3, %v3926_v10 }
 0x188   : > { %v1343_v26 = vpop.f32.mrf.mxu2  ;;  %4679 = vmatmul.msk.bf16.gmra.mxu1 %vm658_vm3, %v2573_v42  ;;  %v5907_v10 = vadd.f32 %v2293_v48, %v1688_v28  ;;  %v3798_v42 = vsel %vm5345_vm6, %v3796_v20, %v3797_v1  ;;  %v2448_v55 = vsel %vm5345_vm6, %v4658_v29, %v2447_v15  ;;  %v3525_v48 = vpack.c.b16 %v3496_v50, %v3495_v0  ;;  %v5926_v29 = vld [vmem:[%s5150_s26 + $0x4c] sm:$0xf] }
 0x189   : > { %v1395_v51 = vadd.f32 %v1343_v26, %v987_v54  ;;  %v3898_v39 = vunpack.c.l.b16 %v3798_v42  ;;  %v990_v15 = vadd.f32 %v989_v45, %v5529_v14  ;;  %v2545_v54 = vunpack.c.l.b16 %v2448_v55  ;;  %v4823_v26 = vld [vmem:[%s5150_s26 + $0x48] sm:$0xf] }
 0x18a   : > { %v2546_v20 = vunpack.c.l.b16 %v2451_v57  ;;  %v3196_v1 = vshll.u32 %v5918_v40, 16  ;;  %v3801_v14 = vrot.slane %v5886_v13, 5  ;;  %v3201_v22 = vshrl.u32 %v4823_v26, 16 }
 0x18b   : > { %v3927_v0 = vpack.c.b16 %v3898_v39, %v3897_v60  ;;  %v3204_v62 = vshll.u32 %v4823_v26, 16  ;;  %v3210_v42 = vshll.u32 %v5926_v29, 16  ;;  %v3214_v55 = vshrl.u32 %v5926_v29, 16  ;;  %v5049_v39 = vld [vmem:[%s5150_s26 + $0x44] sm:$0x1] }
 0x18c   : > { %v2295_v12 = vpop.f32.mrf.mxu0  ;;  %v3198_v50 = vrot.slane %v3196_v1, 5  ;;  %v2457_v56 = vrot.slane %v5049_v39, 5  ;;  %v3804_v13 = vrot.slane %v5918_v40, 5  ;;  %v3803_v1 = vrot.slane %v3801_v14, 4  ;;  %v5953_v39 = vld [vmem:[%s5150_s26 + $0x50] sm:$0x1] }
 0x18d   : > { %v1637_v58 = vpop.f32.mrf.mxu3  ;;  %4797 = vmatmul.msk.bf16.gmra.mxu2 %vm658_vm3, %v4977_v24  ;;  %v991_v6 = vpop.f32.mrf.mxu1  ;;  %v2574_v24 = vpack.c.b16 %v2546_v20, %v2545_v54  ;;  %v3189_v54 = vsel %vm5162_vm2, %v3184_v23, %v5909_v34  ;;  %v3206_v26 = vrot.slane %v3204_v62, 5  ;;  %v5947_v40 = vrot.slane %v3210_v42, 5 }
 0x18e   : > { %v1689_v28 = vadd.f32 %v1637_v58, %v1395_v51  ;;  %v3194_v51 = vrot.slane %v3193_v9, 4  ;;  %v3497_v34 = vunpack.c.l.b16 %v3189_v54 }
 0x190   : > { %v1346_v25 = vpop.f32.mrf.mxu2  ;;  %v5931_v45 = vadd.f32 %v2295_v12, %v1689_v28  ;;  %v4643_v12 = vld [vmem:[%s5150_s26 + $0x3c] sm:$0xe]  ;;  %v992_v28 = vadd.f32 %v991_v6, %v5547_v52  ;;  %v3199_v20 = vsel %vm5162_vm2, %v3194_v51, %v3198_v50 }
 0x191   : > { %v1396_v8 = vadd.f32 %v1346_v25, %v990_v15  ;;  %v4900_v15 = vrot.slane %v4884_v3, 9  ;;  %v3216_v3 = vrot.slane %v3214_v55, 4  ;;  %v4659_v52 = vrot.slane %v4643_v12, 9 }
 0x192   : > { %4867 = vmatmul.msk.bf16.gmra.mxu3 %vm658_vm3, %v3525_v48  ;;  %v5048_v48 = vld [vmem:[%s5150_s26 + $0x40] sm:$0xf]  ;;  %v3498_v23 = vunpack.c.l.b16 %v3199_v20 }
 0x193   : > { %v2454_v60 = vrot.slane %v5048_v48, 5  ;;  %v3802_v50 = vsel %vm5345_vm6, %v4900_v15, %v3801_v14  ;;  %v3220_v14 = vshll.u32 %v5953_v39, 16 }
 0x194   : > { %v2298_v47 = vpop.f32.mrf.mxu0  ;;  %v3526_v12 = vpack.c.b16 %v3498_v23, %v3497_v34  ;;  %v5050_v23 = vld [vmem:[%s5150_s26 + $0x4c] sm:$0xf] }
 0x195   : > { %v1640_v57 = vpop.f32.mrf.mxu3  ;;  %v994_v58 = vpop.f32.mrf.mxu1  ;;  %v2456_v6 = vrot.slane %v2454_v60, 4 }
 0x196   : > { %v1690_v9 = vadd.f32 %v1640_v57, %v1396_v8  ;;  %v3203_v8 = vrot.slane %v3201_v22, 4  ;;  %v4978_v57 = vld [vmem:[%s5150_s26 + $0x3c] sm:$0xff] }
 0x197   : > { %4921 = vmatmul.msk.bf16.gmra.mxu0 %vm658_vm3, %v3927_v0  ;;  %v2458_v55 = vsel %vm5345_vm6, %v2456_v6, %v2457_v56  ;;  %v5972_v6 = vld [vmem:[%s5150_s26 + $0x58] sm:$0xf] }
 0x198   : > { %v1348_v25 = vpop.f32.mrf.mxu2  ;;  %4680 = vmatmul.msk.bf16.gmra.mxu1 %vm658_vm3, %v2574_v24  ;;  %v5950_v48 = vadd.f32 %v2298_v47, %v1690_v9  ;;  %v3805_v24 = vsel %vm5345_vm6, %v3803_v1, %v3804_v13  ;;  %v3207_v22 = vor.u32 %v3206_v26, %v3203_v8  ;;  %v2455_v47 = vsel %vm5345_vm6, %v4659_v52, %v2454_v60 }
 0x199   : > { %v1397_v0 = vadd.f32 %v1348_v25, %v992_v28  ;;  %v3217_v9 = vor.u32 %v3216_v3, %v5947_v40  ;;  %v995_v13 = vadd.f32 %v994_v58, %v5568_v33  ;;  %v3899_v28 = vunpack.c.l.b16 %v3802_v50  ;;  %v4885_v3 = vld [vmem:[%s5150_s26 + $0x48] sm:$0xe] }
 0x19a   : > { %v3900_v54 = vunpack.c.l.b16 %v3805_v24  ;;  %v2547_v1 = vunpack.c.l.b16 %v2455_v47  ;;  %v2548_v60 = vunpack.c.l.b16 %v2458_v55  ;;  %v3208_v8 = vrot.slane %v3207_v22, 4 }
 0x19b   : > { %v3218_v56 = vrot.slane %v3217_v9, 4  ;;  %v3222_v26 = vrot.slane %v3220_v14, 5  ;;  %v3808_v52 = vrot.slane %v5926_v29, 5  ;;  %v2461_v50 = vrot.slane %v5050_v23, 5  ;;  %v4644_v29 = vld [vmem:[%s5150_s26 + $0x48] sm:$0xe] }
 0x19c   : > { %v2300_v51 = vpop.f32.mrf.mxu0  ;;  %v2575_v34 = vpack.c.b16 %v2548_v60, %v2547_v1  ;;  %v4901_v55 = vrot.slane %v4885_v3, 9 }
 0x19d   : > { %v1642_v62 = vpop.f32.mrf.mxu3  ;;  %4798 = vmatmul.msk.bf16.gmra.mxu2 %vm658_vm3, %v4978_v57  ;;  %v996_v42 = vpop.f32.mrf.mxu1  ;;  %v4826_v57 = vld [vmem:[%s5150_s26 + $0x54] sm:$0xf]  ;;  %v3223_v47 = vsel %vm5162_vm2, %v3218_v56, %v3222_v26  ;;  %v4979_v26 = vld [vmem:[%s5150_s26 + $0x48] sm:$0xff] }
 0x19e   : > { %v1691_v15 = vadd.f32 %v1642_v62, %v1397_v0  ;;  %v3928_v0 = vpack.c.b16 %v3900_v54, %v3899_v28  ;;  %v3213_v62 = vsel %vm5162_vm2, %v3208_v8, %v5947_v40  ;;  %v3225_v9 = vshrl.u32 %v4826_v57, 16  ;;  %v5051_v54 = vld [vmem:[%s5150_s26 + $0x50] sm:$0x1] }
 0x19f   : > { %v3810_v28 = vrot.slane %v3808_v52, 4  ;;  %v3811_v40 = vrot.slane %v5953_v39, 5  ;;  %v3499_v60 = vunpack.c.l.b16 %v3213_v62  ;;  %v2463_v8 = vrot.slane %v2461_v50, 4 }
 0x1a0   : > { %v1351_v20 = vpop.f32.mrf.mxu2  ;;  %v5974_v33 = vadd.f32 %v2300_v51, %v1691_v15  ;;  %v3228_v51 = vshll.u32 %v4826_v57, 16  ;;  %v3234_v15 = vshll.u32 %v5972_v6, 16  ;;  %v3500_v3 = vunpack.c.l.b16 %v3223_v47 }
 0x1a1   : > { %v1398_v25 = vadd.f32 %v1351_v20, %v995_v13  ;;  %v997_v13 = vadd.f32 %v996_v42, %v5583_v2  ;;  %v2464_v20 = vrot.slane %v5051_v54, 5  ;;  %v3809_v57 = vsel %vm5345_vm6, %v4901_v55, %v3808_v52 }
 0x1a2   : > { %4868 = vmatmul.msk.bf16.gmra.mxu3 %vm658_vm3, %v3526_v12  ;;  %v3238_v12 = vshrl.u32 %v5972_v6, 16  ;;  %v3227_v2 = vrot.slane %v3225_v9, 4  ;;  %v3230_v42 = vrot.slane %v3228_v51, 5  ;;  %v5995_v39 = vrot.slane %v3234_v15, 5 }
 0x1a3   : > { %v2465_v47 = vsel %vm5345_vm6, %v2463_v8, %v2464_v20  ;;  %v3901_v55 = vunpack.c.l.b16 %v3809_v57  ;;  %v4886_v57 = vld [vmem:[%s5150_s26 + $0x54] sm:$0xe] }
 0x1a4   : > { %v2303_v58 = vpop.f32.mrf.mxu0  ;;  %v3240_v23 = vrot.slane %v3238_v12, 4  ;;  %v3231_v15 = vor.u32 %v3230_v42, %v3227_v2 }
 0x1a5   : > { %v1645_v24 = vpop.f32.mrf.mxu3  ;;  %v999_v22 = vpop.f32.mrf.mxu1 }
 0x1a6   : > { %v1692_v14 = vadd.f32 %v1645_v24, %v1398_v25  ;;  %v4660_v25 = vrot.slane %v4644_v29, 9  ;;  %v6004_v29 = vld [vmem:[%s5150_s26 + $0x5c] sm:$0x1]  ;;  %v3241_v12 = vor.u32 %v3240_v23, %v5995_v39  ;;  %v3232_v8 = vrot.slane %v3231_v15, 4 }
 0x1a7   : > { %4922 = vmatmul.msk.bf16.gmra.mxu0 %vm658_vm3, %v3928_v0 }
 0x1a8   : > { %v1353_v1 = vpop.f32.mrf.mxu2  ;;  %4681 = vmatmul.msk.bf16.gmra.mxu1 %vm658_vm3, %v2575_v34  ;;  %v5993_v0 = vadd.f32 %v2303_v58, %v1692_v14  ;;  %v3812_v34 = vsel %vm5345_vm6, %v3810_v28, %v3811_v40  ;;  %v2462_v62 = vsel %vm5345_vm6, %v4660_v25, %v2461_v50  ;;  %v3527_v58 = vpack.c.b16 %v3500_v3, %v3499_v60  ;;  %v6012_v25 = vld [vmem:[%s5150_s26 + $0x64] sm:$0xf] }
 0x1a9   : > { %v1399_v56 = vadd.f32 %v1353_v1, %v997_v13  ;;  %v3902_v51 = vunpack.c.l.b16 %v3812_v34  ;;  %v1000_v50 = vadd.f32 %v999_v22, %v5459_v41  ;;  %v2549_v13 = vunpack.c.l.b16 %v2462_v62  ;;  %v4829_v1 = vld [vmem:[%s5150_s26 + $0x60] sm:$0xf] }
 0x1aa   : > { %v2550_v28 = vunpack.c.l.b16 %v2465_v47  ;;  %v3244_v40 = vshll.u32 %v6004_v29, 16  ;;  %v3815_v41 = vrot.slane %v5972_v6, 5  ;;  %v3249_v42 = vshrl.u32 %v4829_v1, 16 }
 0x1ab   : > { %v3929_v60 = vpack.c.b16 %v3902_v51, %v3901_v55  ;;  %v3252_v23 = vshll.u32 %v4829_v1, 16  ;;  %v3258_v34 = vshll.u32 %v6012_v25, 16  ;;  %v3262_v62 = vshrl.u32 %v6012_v25, 16  ;;  %v5053_v51 = vld [vmem:[%s5150_s26 + $0x5c] sm:$0x1] }
 0x1ac   : > { %v2305_v24 = vpop.f32.mrf.mxu0  ;;  %v3246_v3 = vrot.slane %v3244_v40, 5  ;;  %v2471_v15 = vrot.slane %v5053_v51, 5  ;;  %v3818_v6 = vrot.slane %v6004_v29, 5  ;;  %v3817_v40 = vrot.slane %v3815_v41, 4  ;;  %v6039_v51 = vld [vmem:[%s5150_s26 + $0x68] sm:$0x1] }
 0x1ad   : > { %v1647_v52 = vpop.f32.mrf.mxu3  ;;  %4799 = vmatmul.msk.bf16.gmra.mxu2 %vm658_vm3, %v4979_v26  ;;  %v1001_v9 = vpop.f32.mrf.mxu1  ;;  %v2576_v26 = vpack.c.b16 %v2550_v28, %v2549_v13  ;;  %v3237_v13 = vsel %vm5162_vm2, %v3232_v8, %v5995_v39  ;;  %v3254_v1 = vrot.slane %v3252_v23, 5  ;;  %v6033_v29 = vrot.slane %v3258_v34, 5 }
 0x1ae   : > { %v1693_v14 = vadd.f32 %v1647_v52, %v1399_v56  ;;  %v3242_v56 = vrot.slane %v3241_v12, 4  ;;  %v3501_v39 = vunpack.c.l.b16 %v3237_v13 }
 0x1b0   : > { %v1356_v54 = vpop.f32.mrf.mxu2  ;;  %v6017_v22 = vadd.f32 %v2305_v24, %v1693_v14  ;;  %v4645_v24 = vld [vmem:[%s5150_s26 + $0x54] sm:$0xe]  ;;  %v1002_v14 = vadd.f32 %v1001_v9, %v5478_v59  ;;  %v3247_v28 = vsel %vm5162_vm2, %v3242_v56, %v3246_v3 }
 0x1b1   : > { %v1400_v20 = vadd.f32 %v1356_v54, %v1000_v50  ;;  %v4902_v50 = vrot.slane %v4886_v57, 9  ;;  %v3264_v57 = vrot.slane %v3262_v62, 4  ;;  %v4661_v59 = vrot.slane %v4645_v24, 9 }
 0x1b2   : > { %4869 = vmatmul.msk.bf16.gmra.mxu3 %vm658_vm3, %v3527_v58  ;;  %v5052_v58 = vld [vmem:[%s5150_s26 + $0x58] sm:$0xf]  ;;  %v3502_v8 = vunpack.c.l.b16 %v3247_v28 }
 0x1b3   : > { %v2468_v55 = vrot.slane %v5052_v58, 5  ;;  %v3816_v3 = vsel %vm5345_vm6, %v4902_v50, %v3815_v41  ;;  %v3268_v41 = vshll.u32 %v6039_v51, 16 }
 0x1b4   : > { %v2308_v2 = vpop.f32.mrf.mxu0  ;;  %v3528_v24 = vpack.c.b16 %v3502_v8, %v3501_v39 }
 0x1b5   : > { %v1650_v47 = vpop.f32.mrf.mxu3  ;;  %v1004_v52 = vpop.f32.mrf.mxu1  ;;  %v2470_v9 = vrot.slane %v2468_v55, 4 }
 0x1b6   : > { %v1694_v12 = vadd.f32 %v1650_v47, %v1400_v20  ;;  %v3251_v20 = vrot.slane %v3249_v42, 4  ;;  %v4980_v47 = vld [vmem:[%s5150_s26 + $0x54] sm:$0xff] }
 0x1b7   : > { %4923 = vmatmul.msk.bf16.gmra.mxu0 %vm658_vm3, %v3929_v60  ;;  %v2472_v62 = vsel %vm5345_vm6, %v2470_v9, %v2471_v15  ;;  %v3270_v15 = vrot.slane %v3268_v41, 5  ;;  %v6058_v9 = vld [vmem:[%s5150_s26 + $0x70] sm:$0xf]  ;;  %v4646_v41 = vld [vmem:[%s5150_s26 + $0x60] sm:$0xe] }
 0x1b8   : > { %v1358_v54 = vpop.f32.mrf.mxu2  ;;  %4682 = vmatmul.msk.bf16.gmra.mxu1 %vm658_vm3, %v2576_v26  ;;  %v6036_v58 = vadd.f32 %v2308_v2, %v1694_v12  ;;  %v3819_v26 = vsel %vm5345_vm6, %v3817_v40, %v3818_v6  ;;  %v3255_v42 = vor.u32 %v3254_v1, %v3251_v20  ;;  %v2469_v2 = vsel %vm5345_vm6, %v4661_v59, %v2468_v55 }
 0x1b9   : > { %v1401_v60 = vadd.f32 %v1358_v54, %v1002_v14  ;;  %v3265_v12 = vor.u32 %v3264_v57, %v6033_v29  ;;  %v1005_v6 = vadd.f32 %v1004_v52, %v5499_v32  ;;  %v3903_v14 = vunpack.c.l.b16 %v3816_v3  ;;  %v4832_v57 = vld [vmem:[%s5150_s26 + $0x6c] sm:$0xf] }
 0x1ba   : > { %v3904_v13 = vunpack.c.l.b16 %v3819_v26  ;;  %v2551_v40 = vunpack.c.l.b16 %v2469_v2  ;;  %v2552_v54 = vunpack.c.l.b16 %v2472_v62  ;;  %v3256_v20 = vrot.slane %v3255_v42, 4  ;;  %v5054_v2 = vld [vmem:[%s5150_s26 + $0x64] sm:$0xf] }
 0x1bb   : > { %v3266_v1 = vrot.slane %v3265_v12, 4  ;;  %v3822_v59 = vrot.slane %v6012_v25, 5  ;;  %v2475_v62 = vrot.slane %v5054_v2, 5  ;;  %v3273_v25 = vshrl.u32 %v4832_v57, 16 }
 0x1bc   : > { %v2310_v56 = vpop.f32.mrf.mxu0  ;;  %v2577_v39 = vpack.c.b16 %v2552_v54, %v2551_v40  ;;  %v3261_v42 = vsel %vm5162_vm2, %v3256_v20, %v6033_v29  ;;  %v3825_v29 = vrot.slane %v6039_v51, 5 }
 0x1bd   : > { %v1652_v23 = vpop.f32.mrf.mxu3  ;;  %4800 = vmatmul.msk.bf16.gmra.mxu2 %vm658_vm3, %v4980_v47  ;;  %v1006_v34 = vpop.f32.mrf.mxu1  ;;  %v4887_v47 = vld [vmem:[%s5150_s26 + $0x60] sm:$0xe]  ;;  %v3503_v54 = vunpack.c.l.b16 %v3261_v42  ;;  %v6086_v42 = vld [vmem:[%s5150_s26 + $0x74] sm:$0x1] }
 0x1be   : > { %v1695_v50 = vadd.f32 %v1652_v23, %v1401_v60  ;;  %v3930_v60 = vpack.c.b16 %v3904_v13, %v3903_v14  ;;  %v4903_v8 = vrot.slane %v4887_v47, 9  ;;  %v3271_v23 = vsel %vm5162_vm2, %v3266_v1, %v3270_v15  ;;  %v5055_v13 = vld [vmem:[%s5150_s26 + $0x68] sm:$0x1]  ;;  %v4981_v15 = vld [vmem:[%s5150_s26 + $0x60] sm:$0xff] }
 0x1bf   : > { %v3824_v14 = vrot.slane %v3822_v59, 4  ;;  %v4662_v47 = vrot.slane %v4646_v41, 9 }
 0x1c0   : > { %v1361_v28 = vpop.f32.mrf.mxu2  ;;  %v6060_v32 = vadd.f32 %v2310_v56, %v1695_v50  ;;  %v3276_v56 = vshll.u32 %v4832_v57, 16  ;;  %v3282_v50 = vshll.u32 %v6058_v9, 16  ;;  %v3823_v20 = vsel %vm5345_vm6, %v4903_v8, %v3822_v59 }
 0x1c1   : > { %v1402_v55 = vadd.f32 %v1361_v28, %v1005_v6  ;;  %v1007_v6 = vadd.f32 %v1006_v34, %v5518_v63  ;;  %v2478_v28 = vrot.slane %v5055_v13, 5  ;;  %v2477_v57 = vrot.slane %v2475_v62, 4 }
 0x1c2   : > { %4870 = vmatmul.msk.bf16.gmra.mxu3 %vm658_vm3, %v3528_v24  ;;  %v3286_v24 = vshrl.u32 %v6058_v9, 16  ;;  %v3275_v63 = vrot.slane %v3273_v25, 4  ;;  %v3278_v34 = vrot.slane %v3276_v56, 5  ;;  %v6081_v51 = vrot.slane %v3282_v50, 5 }
 0x1c3   : > { %v3826_v2 = vsel %vm5345_vm6, %v3824_v14, %v3825_v29  ;;  %v3905_v8 = vunpack.c.l.b16 %v3823_v20  ;;  %v2476_v25 = vsel %vm5345_vm6, %v4662_v47, %v2475_v62  ;;  %v3292_v14 = vshll.u32 %v6086_v42, 16  ;;  %v6098_v20 = vld [vmem:[%s5150_s26 + $0x7c] sm:$0xf]  ;;  %v4888_v47 = vld [vmem:[%s5150_s26 + $0x6c] sm:$0xe] }
 0x1c4   : > { %v2313_v52 = vpop.f32.mrf.mxu0  ;;  %v3906_v56 = vunpack.c.l.b16 %v3826_v2  ;;  %v3279_v50 = vor.u32 %v3278_v34, %v3275_v63  ;;  %v2553_v13 = vunpack.c.l.b16 %v2476_v25  ;;  %v3306_v2 = vshll.u32 %v6098_v20, 16 }
 0x1c5   : > { %v1655_v3 = vpop.f32.mrf.mxu3  ;;  %v1009_v26 = vpop.f32.mrf.mxu1 }
 0x1c6   : > { %v1696_v12 = vadd.f32 %v1655_v3, %v1402_v55  ;;  %v3504_v55 = vunpack.c.l.b16 %v3271_v23  ;;  %v3288_v3 = vrot.slane %v3286_v24, 4  ;;  %v3931_v62 = vpack.c.b16 %v3906_v56, %v3905_v8  ;;  %v4647_v8 = vld [vmem:[%s5150_s26 + $0x6c] sm:$0xe] }
 0x1c7   : > { %4924 = vmatmul.msk.bf16.gmra.mxu0 %vm658_vm3, %v3930_v60 }
 0x1c8   : > { %v1363_v40 = vpop.f32.mrf.mxu2  ;;  %4683 = vmatmul.msk.bf16.gmra.mxu1 %vm658_vm3, %v2577_v39  ;;  %v6079_v60 = vadd.f32 %v2313_v52, %v1696_v12  ;;  %v3529_v59 = vpack.c.b16 %v3504_v55, %v3503_v54  ;;  %v2479_v12 = vsel %vm5345_vm6, %v2477_v57, %v2478_v28  ;;  %v3289_v24 = vor.u32 %v3288_v3, %v6081_v51  ;;  %v4835_v54 = vld [vmem:[%s5150_s26 + $0x78] sm:$0xf] }
 0x1c9   : > { %v1403_v1 = vadd.f32 %v1363_v40, %v1007_v6  ;;  %v1010_v6 = vadd.f32 %v1009_v26, %v5537_v36  ;;  %v2554_v40 = vunpack.c.l.b16 %v2479_v12  ;;  %v3280_v28 = vrot.slane %v3279_v50, 4  ;;  %v5056_v12 = vld [vmem:[%s5150_s26 + $0x70] sm:$0xf] }
 0x1ca   : > { %v3829_v36 = vrot.slane %v6058_v9, 5  ;;  %v3297_v26 = vshrl.u32 %v4835_v54, 16  ;;  %v3300_v3 = vshll.u32 %v4835_v54, 16  ;;  %v2482_v56 = vrot.slane %v5056_v12, 5 }
 0x1cb   : > { %v2578_v34 = vpack.c.b16 %v2554_v40, %v2553_v13  ;;  %v3285_v9 = vsel %vm5162_vm2, %v3280_v28, %v6081_v51  ;;  %v4663_v40 = vrot.slane %v4647_v8, 9  ;;  %v3308_v51 = vrot.slane %v3306_v2, 5 }
 0x1cc   : > { %v2315_v39 = vpop.f32.mrf.mxu0  ;;  %v3302_v54 = vrot.slane %v3300_v3, 5 }
 0x1cd   : > { %v1657_v23 = vpop.f32.mrf.mxu3  ;;  %4801 = vmatmul.msk.bf16.gmra.mxu2 %vm658_vm3, %v4981_v15  ;;  %v1011_v52 = vpop.f32.mrf.mxu1  ;;  %v3294_v15 = vrot.slane %v3292_v14, 5  ;;  %v3831_v14 = vrot.slane %v3829_v36, 4 }
 0x1ce   : > { %v1697_v41 = vadd.f32 %v1657_v23, %v1403_v1  ;;  %v3290_v1 = vrot.slane %v3289_v24, 4  ;;  %v3310_v23 = vshrl.u32 %v6098_v20, 16  ;;  %v1012_v24 = vadd.f32 %v1011_v52, %v5560_v4 }
 0x1cf   : > { %v3505_v4 = vunpack.c.l.b16 %v3285_v9 }
 0x1d0   : > { %v1366_v29 = vpop.f32.mrf.mxu2  ;;  %v6103_v57 = vadd.f32 %v2315_v39, %v1697_v41  ;;  %v4904_v39 = vrot.slane %v4888_v47, 9  ;;  %v3832_v41 = vrot.slane %v6086_v42, 5  ;;  %v4982_v47 = vld [vmem:[%s5150_s26 + $0x6c] sm:$0xff]  ;;  %v2484_v42 = vrot.slane %v2482_v56, 4 }
 0x1d1   : > { %v1404_v55 = vadd.f32 %v1366_v29, %v1010_v6  ;;  %v3295_v6 = vsel %vm5162_vm2, %v3290_v1, %v3294_v15  ;;  %v3299_v29 = vrot.slane %v3297_v26, 4  ;;  %v6123_v1 = vld [vmem:[%s5150_s26 + $0x80] sm:$0x1] }
 0x1d2   : > { %4871 = vmatmul.msk.bf16.gmra.mxu3 %vm658_vm3, %v3529_v59  ;;  %v3506_v52 = vunpack.c.l.b16 %v3295_v6  ;;  %v3830_v26 = vsel %vm5345_vm6, %v4904_v39, %v3829_v36  ;;  %v3316_v9 = vshll.u32 %v6123_v1, 16 }
 0x1d3   : > { %v3303_v3 = vor.u32 %v3302_v54, %v3299_v29 }
 0x1d4   : > { %v2318_v63 = vpop.f32.mrf.mxu0  ;;  %v3530_v39 = vpack.c.b16 %v3506_v52, %v3505_v4 }
 0x1d5   : > { %v1660_v59 = vpop.f32.mrf.mxu3  ;;  %v1014_v25 = vpop.f32.mrf.mxu1  ;;  %v3304_v54 = vrot.slane %v3303_v3, 4 }
 0x1d6   : > { %v1698_v50 = vadd.f32 %v1660_v59, %v1404_v55  ;;  %v3312_v55 = vrot.slane %v3310_v23, 4  ;;  %v5057_v59 = vld [vmem:[%s5150_s26 + $0x74] sm:$0x1] }
 0x1d7   : > { %4925 = vmatmul.msk.bf16.gmra.mxu0 %vm658_vm3, %v3931_v62  ;;  %v2485_v62 = vrot.slane %v5057_v59, 5  ;;  %v3318_v59 = vrot.slane %v3316_v9, 5  ;;  %v4648_v9 = vld [vmem:[%s5150_s26 + $0x78] sm:$0xe] }
 0x1d8   : > { %v1368_v13 = vpop.f32.mrf.mxu2  ;;  %4684 = vmatmul.msk.bf16.gmra.mxu1 %vm658_vm3, %v2578_v34  ;;  %v6120_v12 = vadd.f32 %v2318_v63, %v1698_v50  ;;  %v3833_v34 = vsel %vm5345_vm6, %v3831_v14, %v3832_v41  ;;  %v2483_v63 = vsel %vm5345_vm6, %v4663_v40, %v2482_v56  ;;  %v3313_v50 = vor.u32 %v3312_v55, %v3308_v51 }
 0x1d9   : > { %v1405_v28 = vadd.f32 %v1368_v13, %v1012_v24  ;;  %v2486_v8 = vsel %vm5345_vm6, %v2484_v42, %v2485_v62  ;;  %v1015_v41 = vadd.f32 %v1014_v25, %v5579_v53  ;;  %v3907_v24 = vunpack.c.l.b16 %v3830_v26  ;;  %v4838_v42 = vld [vmem:[%s5150_s26 + $0x84] sm:$0xf]  ;;  %v6141_v25 = vld [vmem:[%s5150_s26 + $0x88] sm:$0xf] }
 0x1da   : > { %v3908_v6 = vunpack.c.l.b16 %v3833_v34  ;;  %v2555_v29 = vunpack.c.l.b16 %v2483_v63  ;;  %v2556_v13 = vunpack.c.l.b16 %v2486_v8  ;;  %v3314_v40 = vrot.slane %v3313_v50, 4 }
 0x1db   : > { %v3836_v55 = vrot.slane %v6098_v20, 5  ;;  %v3309_v26 = vsel %vm5162_vm2, %v3304_v54, %v3308_v51  ;;  %v3321_v34 = vshrl.u32 %v4838_v42, 16  ;;  %v3324_v3 = vshll.u32 %v4838_v42, 16  ;;  %v5059_v42 = vld [vmem:[%s5150_s26 + $0x80] sm:$0x1] }
 0x1dc   : > { %v2320_v15 = vpop.f32.mrf.mxu0  ;;  %v2579_v52 = vpack.c.b16 %v2556_v13, %v2555_v29  ;;  %v3319_v63 = vsel %vm5162_vm2, %v3314_v40, %v3318_v59  ;;  %v3839_v50 = vrot.slane %v6123_v1, 5  ;;  %v3330_v51 = vshll.u32 %v6141_v25, 16  ;;  %v4983_v40 = vld [vmem:[%s5150_s26 + $0x78] sm:$0xff] }
 0x1dd   : > { %v1662_v2 = vpop.f32.mrf.mxu3  ;;  %4802 = vmatmul.msk.bf16.gmra.mxu2 %vm658_vm3, %v4982_v47  ;;  %v1016_v23 = vpop.f32.mrf.mxu1  ;;  %v4889_v47 = vld [vmem:[%s5150_s26 + $0x78] sm:$0xe]  ;;  %v3838_v8 = vrot.slane %v3836_v55, 4  ;;  %v3508_v13 = vunpack.c.l.b16 %v3319_v63  ;;  %v4664_v54 = vrot.slane %v4648_v9, 9 }
 0x1de   : > { %v1699_v36 = vadd.f32 %v1662_v2, %v1405_v28  ;;  %v3932_v28 = vpack.c.b16 %v3908_v6, %v3907_v24  ;;  %v4905_v53 = vrot.slane %v4889_v47, 9  ;;  %v3334_v24 = vshrl.u32 %v6141_v25, 16 }
 0x1df   : > { %v1017_v6 = vadd.f32 %v1016_v23, %v5596_v27  ;;  %v3326_v47 = vrot.slane %v3324_v3, 5  ;;  %v3840_v27 = vsel %vm5345_vm6, %v3838_v8, %v3839_v50  ;;  %v6166_v23 = vrot.slane %v3330_v51, 5 }
 0x1e0   : > { %v1371_v14 = vpop.f32.mrf.mxu2  ;;  %v6143_v62 = vadd.f32 %v2320_v15, %v1699_v36  ;;  %v3837_v1 = vsel %vm5345_vm6, %v4905_v53, %v3836_v55  ;;  %v3336_v55 = vrot.slane %v3334_v24, 4  ;;  %v6169_v53 = vld [vmem:[%s5150_s26 + $0x8c] sm:$0x1]  ;;  %v4841_v24 = vld [vmem:[%s5150_s26 + $0x90] sm:$0xf] }
 0x1e1   : > { %v1406_v56 = vadd.f32 %v1371_v14, %v1015_v41  ;;  %v3507_v14 = vunpack.c.l.b16 %v3309_v26  ;;  %v3340_v51 = vshll.u32 %v6169_v53, 16 }
 0x1e2   : > { %4872 = vmatmul.msk.bf16.gmra.mxu3 %vm658_vm3, %v3530_v39  ;;  %v5058_v39 = vld [vmem:[%s5150_s26 + $0x7c] sm:$0xf] }
 0x1e3   : > { %v2489_v41 = vrot.slane %v5058_v39, 5  ;;  %v3531_v26 = vpack.c.b16 %v3508_v13, %v3507_v14 }
 0x1e4   : > { %v2323_v4 = vpop.f32.mrf.mxu0 }
 0x1e5   : > { %v1665_v2 = vpop.f32.mrf.mxu3  ;;  %v2650_v20 = vpop.f32.mrf.mxu1  ;;  %v2491_v59 = vrot.slane %v2489_v41, 4 }
 0x1e6   : > { %v1700_v15 = vadd.f32 %v1665_v2, %v1406_v56  ;;  %v2730_v36 = vadd.f32 %v2650_v20, %v5613_v37  ;;  %v3323_v37 = vrot.slane %v3321_v34, 4  ;;  %v2492_v2 = vrot.slane %v5059_v42, 5 }
 0x1e7   : > { %4926 = vmatmul.msk.bf16.gmra.mxu0 %vm658_vm3, %v3932_v28  ;;  %v3909_v34 = vunpack.c.l.b16 %v3837_v1  ;;  %v3910_v20 = vunpack.c.l.b16 %v3840_v27 }
 0x1e8   : > { %v1373_v29 = vpop.f32.mrf.mxu2  ;;  %4685 = vmatmul.msk.bf16.gmra.mxu1 %vm658_vm3, %v2579_v52  ;;  %v6162_v28 = vadd.f32 %v2323_v4, %v1700_v15  ;;  %v2490_v4 = vsel %vm5345_vm6, %v4664_v54, %v2489_v41  ;;  %v2493_v8 = vsel %vm5345_vm6, %v2491_v59, %v2492_v2  ;;  %v3327_v50 = vor.u32 %v3326_v47, %v3323_v37 }
 0x1e9   : > { %v1407_v56 = vadd.f32 %v1373_v29, %v1017_v6  ;;  %v3337_v15 = vor.u32 %v3336_v55, %v6166_v23  ;;  %v2557_v14 = vunpack.c.l.b16 %v2490_v4  ;;  %v2558_v1 = vunpack.c.l.b16 %v2493_v8  ;;  %v6181_v29 = vld [vmem:[%s5150_s26 + $0x94] sm:$0xf] }
 0x1ea   : > { %v3933_v13 = vpack.c.b16 %v3910_v20, %v3909_v34  ;;  %v3328_v54 = vrot.slane %v3327_v50, 4  ;;  %v3342_v47 = vrot.slane %v3340_v51, 5  ;;  %v3354_v59 = vshll.u32 %v6181_v29, 16  ;;  %v5060_v20 = vld [vmem:[%s5150_s26 + $0x88] sm:$0xf] }
 0x1eb   : > { %v3338_v37 = vrot.slane %v3337_v15, 4  ;;  %v3358_v42 = vshrl.u32 %v6181_v29, 16  ;;  %v2580_v55 = vpack.c.b16 %v2558_v1, %v2557_v14  ;;  %v3846_v1 = vrot.slane %v6169_v53, 5 }
 0x1ec   : > { %v2325_v52 = vpop.f32.mrf.mxu0  ;;  %v3333_v50 = vsel %vm5162_vm2, %v3328_v54, %v6166_v23  ;;  %v6199_v51 = vrot.slane %v3354_v59, 5  ;;  %v6204_v23 = vld [vmem:[%s5150_s26 + $0x98] sm:$0x1]  ;;  %v4984_v54 = vld [vmem:[%s5150_s26 + $0x84] sm:$0xff] }
 0x1ed   : > { %v1667_v3 = vpop.f32.mrf.mxu3  ;;  %4803 = vmatmul.msk.bf16.gmra.mxu2 %vm658_vm3, %v4983_v40  ;;  %v2652_v63 = vpop.f32.mrf.mxu1  ;;  %v3348_v40 = vshll.u32 %v4841_v24, 16  ;;  %v3364_v53 = vshll.u32 %v6204_v23, 16 }
 0x1ee   : > { %v1701_v9 = vadd.f32 %v1667_v3, %v1407_v56  ;;  %v2731_v39 = vadd.f32 %v2652_v63, %v5626_v38  ;;  %v4890_v56 = vld [vmem:[%s5150_s26 + $0x84] sm:$0xe]  ;;  %v3345_v38 = vshrl.u32 %v4841_v24, 16  ;;  %v2496_v63 = vrot.slane %v5060_v20, 5 }
 0x1ef   : > { %v4906_v3 = vrot.slane %v4890_v56, 9  ;;  %v3350_v15 = vrot.slane %v3348_v40, 5  ;;  %v3360_v24 = vrot.slane %v3358_v42, 4  ;;  %v5061_v56 = vld [vmem:[%s5150_s26 + $0x8c] sm:$0x1] }
 0x1f0   : > { %v2944_v6 = vpop.f32.mrf.mxu2  ;;  %v6187_v2 = vadd.f32 %v2325_v52, %v1701_v9  ;;  %v3343_v52 = vsel %vm5162_vm2, %v3338_v37, %v3342_v47  ;;  %v4649_v9 = vld [vmem:[%s5150_s26 + $0x84] sm:$0xe]  ;;  %v2498_v47 = vrot.slane %v2496_v63, 4 }
 0x1f1   : > { %v3024_v41 = vadd.f32 %v2944_v6, %v2730_v36  ;;  %v3843_v36 = vrot.slane %v6141_v25, 5  ;;  %v3347_v25 = vrot.slane %v3345_v38, 4  ;;  %v4665_v37 = vrot.slane %v4649_v9, 9  ;;  %v4844_v9 = vld [vmem:[%s5150_s26 + $0x9c] sm:$0xf] }
 0x1f2   : > { %4873 = vmatmul.msk.bf16.gmra.mxu3 %vm658_vm3, %v3531_v26  ;;  %6462 = vst [vmem:[#allocation4_spill] sm:$0xff] %v6187_v2  ;;  %v3509_v38 = vunpack.c.l.b16 %v3333_v50  ;;  %v3510_v40 = vunpack.c.l.b16 %v3343_v52  ;;  %v3850_v2 = vrot.slane %v6181_v29, 5 }
 0x1f3   : > { %v3844_v59 = vsel %vm5345_vm6, %v4906_v3, %v3843_v36  ;;  %v3351_v42 = vor.u32 %v3350_v15, %v3347_v25  ;;  %v2497_v20 = vsel %vm5345_vm6, %v4665_v37, %v2496_v63  ;;  %v6222_v25 = vld [vmem:[%s5150_s26 + $0xa0] sm:$0xf]  ;;  %v4891_v37 = vld [vmem:[%s5150_s26 + $0x90] sm:$0xe] }
 0x1f4   : > { %v4004_v27 = vpop.f32.mrf.mxu0  ;;  %v3911_v50 = vunpack.c.l.b16 %v3844_v59 }
 0x1f5   : > { %v3602_v34 = vpop.f32.mrf.mxu3  ;;  %v2655_v26 = vpop.f32.mrf.mxu1 }
 0x1f6   : > { %v3682_v4 = vadd.f32 %v3602_v34, %v3024_v41  ;;  %v2732_v8 = vadd.f32 %v2655_v26, %v5639_v7  ;;  %v3845_v7 = vrot.slane %v3843_v36, 4 }
 0x1f7   : > { %4927 = vmatmul.msk.bf16.gmra.mxu0 %vm658_vm3, %v3933_v13  ;;  %v2499_v13 = vrot.slane %v5061_v56, 5  ;;  %v2559_v56 = vunpack.c.l.b16 %v2497_v20 }
 0x1f8   : > { %v4084_v6 = vadd.f32 %v4004_v27, %v3682_v4  ;;  %v2946_v14 = vpop.f32.mrf.mxu2  ;;  %4686 = vmatmul.msk.bf16.gmra.mxu1 %vm658_vm3, %v2580_v55  ;;  %v3361_v27 = vor.u32 %v3360_v24, %v6199_v51  ;;  %v3532_v4 = vpack.c.b16 %v3510_v40, %v3509_v38  ;;  %v3352_v24 = vrot.slane %v3351_v42, 4 }
 0x1f9   : > { %v3025_v41 = vadd.f32 %v2946_v14, %v2731_v39  ;;  %v3847_v39 = vsel %vm5345_vm6, %v3845_v7, %v3846_v1  ;;  %v2500_v36 = vsel %vm5345_vm6, %v2498_v47, %v2499_v13  ;;  %v3366_v7 = vrot.slane %v3364_v53, 5 }
 0x1fa   : > { %v3912_v15 = vunpack.c.l.b16 %v3847_v39  ;;  %v3362_v14 = vrot.slane %v3361_v27, 4  ;;  %v2560_v63 = vunpack.c.l.b16 %v2500_v36  ;;  %v3372_v13 = vshll.u32 %v4844_v9, 16 }
 0x1fb   : > { %v4153_v38 = vmul.f32 %v4084_v6, %v4084_v6  ;;  %v3382_v42 = vshrl.u32 %v6222_v25, 16  ;;  %v4907_v53 = vrot.slane %v4891_v37, 9  ;;  %v5063_v37 = vld [vmem:[%s5150_s26 + $0x98] sm:$0x1] }
 0x1fc   : > { %v4006_v55 = vpop.f32.mrf.mxu0  ;;  %v3934_v27 = vpack.c.b16 %v3912_v15, %v3911_v50  ;;  %v4650_v50 = vld [vmem:[%s5150_s26 + $0x90] sm:$0xe] }
 0x1fd   : > { %v3604_v34 = vpop.f32.mrf.mxu3  ;;  %4804 = vmatmul.msk.bf16.gmra.mxu2 %vm658_vm3, %v4984_v54  ;;  %v2657_v26 = vpop.f32.mrf.mxu1 }
 0x1fe   : > { %v3683_v3 = vadd.f32 %v3604_v34, %v3025_v41  ;;  %v2733_v52 = vadd.f32 %v2657_v26, %v5652_v5  ;;  %v3369_v41 = vshrl.u32 %v4844_v9, 16  ;;  %v3378_v5 = vshll.u32 %v6222_v25, 16  ;;  %v5062_v26 = vld [vmem:[%s5150_s26 + $0x94] sm:$0xf] }
 0x1ff   : > { %v3357_v34 = vsel %vm5162_vm2, %v3352_v24, %v6199_v51  ;;  %v2503_v20 = vrot.slane %v5062_v26, 5  ;;  %v3384_v51 = vrot.slane %v3382_v42, 4 }
 0x200   : > { %v4085_v1 = vadd.f32 %v4006_v55, %v3683_v3  ;;  %v2949_v54 = vpop.f32.mrf.mxu2  ;;  %v3853_v55 = vrot.slane %v6204_v23, 5  ;;  %v3367_v3 = vsel %vm5162_vm2, %v3362_v14, %v3366_v7  ;;  %v3371_v9 = vrot.slane %v3369_v41, 4  ;;  %v6244_v41 = vld [vmem:[%s5150_s26 + $0xa4] sm:$0x1] }
 0x201   : > { %v3026_v47 = vadd.f32 %v2949_v54, %v2732_v8  ;;  %v2581_v8 = vpack.c.b16 %v2560_v63, %v2559_v56  ;;  %v3374_v23 = vrot.slane %v3372_v13, 5  ;;  %v6238_v54 = vrot.slane %v3378_v5, 5 }
 0x202   : > { %v4116_v40 = vadd.f32 %v4085_v1, %v4084_v6  ;;  %v4154_v59 = vmul.f32 %v4085_v1, %v4085_v1  ;;  %4874 = vmatmul.msk.bf16.gmra.mxu3 %vm658_vm3, %v3532_v4  ;;  %v3852_v4 = vrot.slane %v3850_v2, 4  ;;  %v3511_v24 = vunpack.c.l.b16 %v3357_v34 }
 0x203   : > { %v4666_v14 = vrot.slane %v4650_v50, 9  ;;  %v2505_v7 = vrot.slane %v2503_v20, 4  ;;  %v3388_v34 = vshll.u32 %v6244_v41, 16 }
 0x204   : > { %v4185_v39 = vadd.f32 %v4154_v59, %v4153_v38  ;;  %v4009_v29 = vpop.f32.mrf.mxu0  ;;  %v2506_v38 = vrot.slane %v5063_v37, 5  ;;  %v3512_v59 = vunpack.c.l.b16 %v3367_v3  ;;  %v3854_v5 = vsel %vm5345_vm6, %v3852_v4, %v3853_v55 }
 0x205   : > { %v3607_v6 = vpop.f32.mrf.mxu3  ;;  %v2660_v36 = vpop.f32.mrf.mxu1  ;;  %v3914_v55 = vunpack.c.l.b16 %v3854_v5  ;;  %v6269_v5 = vld [vmem:[%s5150_s26 + $0xac] sm:$0xf] }
 0x206   : > { %v3684_v15 = vadd.f32 %v3607_v6, %v3026_v47  ;;  %v2734_v1 = vadd.f32 %v2660_v36, %v5665_v49  ;;  %v4985_v47 = vld [vmem:[%s5150_s26 + $0x90] sm:$0xff]  ;;  %v3851_v49 = vsel %vm5345_vm6, %v4907_v53, %v3850_v2  ;;  %v2507_v36 = vsel %vm5345_vm6, %v2505_v7, %v2506_v38 }
 0x207   : > { %4928 = vmatmul.msk.bf16.gmra.mxu0 %vm658_vm3, %v3934_v27  ;;  %v3533_v53 = vpack.c.b16 %v3512_v59, %v3511_v24  ;;  %v4847_v24 = vld [vmem:[%s5150_s26 + $0xa8] sm:$0xf] }
 0x208   : > { %v4086_v56 = vadd.f32 %v4009_v29, %v3684_v15  ;;  %v2951_v63 = vpop.f32.mrf.mxu2  ;;  %4687 = vmatmul.msk.bf16.gmra.mxu1 %vm658_vm3, %v2581_v8  ;;  %v3375_v29 = vor.u32 %v3374_v23, %v3371_v9  ;;  %v3385_v8 = vor.u32 %v3384_v51, %v6238_v54  ;;  %v2562_v15 = vunpack.c.l.b16 %v2507_v36 }
 0x209   : > { %v3027_v13 = vadd.f32 %v2951_v63, %v2733_v52  ;;  %v2504_v52 = vsel %vm5345_vm6, %v4666_v14, %v2503_v20  ;;  %v3390_v51 = vrot.slane %v3388_v34, 5  ;;  %v4892_v20 = vld [vmem:[%s5150_s26 + $0x9c] sm:$0xe] }
 0x20a   : > { %v4117_v42 = vadd.f32 %v4116_v40, %v4086_v56  ;;  %v4155_v27 = vmul.f32 %v4086_v56, %v4086_v56  ;;  %v3913_v40 = vunpack.c.l.b16 %v3851_v49  ;;  %v3386_v9 = vrot.slane %v3385_v8, 4 }
 0x20b   : > { %v2561_v23 = vunpack.c.l.b16 %v2504_v52  ;;  %v3857_v56 = vrot.slane %v6222_v25, 5  ;;  %v3396_v8 = vshll.u32 %v4847_v24, 16  ;;  %v5064_v52 = vld [vmem:[%s5150_s26 + $0xa0] sm:$0xf] }
 0x20c   : > { %v4186_v26 = vadd.f32 %v4185_v39, %v4155_v27  ;;  %v4011_v6 = vpop.f32.mrf.mxu0  ;;  %v3376_v39 = vrot.slane %v3375_v29, 4  ;;  %v3391_v25 = vsel %vm5162_vm2, %v3386_v9, %v3390_v51  ;;  %v3860_v27 = vrot.slane %v6244_v41, 5  ;;  %v4986_v51 = vld [vmem:[%s5150_s26 + $0x9c] sm:$0xff] }
 0x20d   : > { %v3609_v2 = vpop.f32.mrf.mxu3  ;;  %4805 = vmatmul.msk.bf16.gmra.mxu2 %vm658_vm3, %v4985_v47  ;;  %v2662_v3 = vpop.f32.mrf.mxu1  ;;  %v2582_v47 = vpack.c.b16 %v2562_v15, %v2561_v23  ;;  %v3859_v49 = vrot.slane %v3857_v56, 4  ;;  %v3393_v29 = vshrl.u32 %v4847_v24, 16  ;;  %v2510_v36 = vrot.slane %v5064_v52, 5 }
 0x20e   : > { %v3685_v4 = vadd.f32 %v3609_v2, %v3027_v13  ;;  %v2735_v50 = vadd.f32 %v2662_v3, %v5678_v46  ;;  %v3935_v13 = vpack.c.b16 %v3914_v55, %v3913_v40  ;;  %v4908_v46 = vrot.slane %v4892_v20, 9 }
 0x20f   : > { %v3381_v59 = vsel %vm5162_vm2, %v3376_v39, %v6238_v54  ;;  %v3402_v40 = vshll.u32 %v6269_v5, 16  ;;  %v3406_v55 = vshrl.u32 %v6269_v5, 16  ;;  %v3514_v41 = vunpack.c.l.b16 %v3391_v25 }
 0x210   : > { %v4087_v63 = vadd.f32 %v4011_v6, %v3685_v4  ;;  %v2954_v14 = vpop.f32.mrf.mxu2  ;;  %v3858_v3 = vsel %vm5345_vm6, %v4908_v46, %v3857_v56  ;;  %v3395_v9 = vrot.slane %v3393_v29, 4  ;;  %v3398_v23 = vrot.slane %v3396_v8, 5  ;;  %v6288_v46 = vld [vmem:[%s5150_s26 + $0xb0] sm:$0x1] }
 0x211   : > { %v3028_v7 = vadd.f32 %v2954_v14, %v2734_v1  ;;  %v5065_v14 = vld [vmem:[%s5150_s26 + $0xa4] sm:$0x1]  ;;  %v3408_v56 = vrot.slane %v3406_v55, 4  ;;  %v3412_v52 = vshll.u32 %v6288_v46, 16 }
 0x212   : > { %v4118_v37 = vadd.f32 %v4117_v42, %v4087_v63  ;;  %v4156_v38 = vmul.f32 %v4087_v63, %v4087_v63  ;;  %4875 = vmatmul.msk.bf16.gmra.mxu3 %vm658_vm3, %v3533_v53  ;;  %v4651_v53 = vld [vmem:[%s5150_s26 + $0x9c] sm:$0xe]  ;;  %v2512_v63 = vrot.slane %v2510_v36, 4  ;;  %v3399_v8 = vor.u32 %v3398_v23, %v3395_v9  ;;  %v4893_v23 = vld [vmem:[%s5150_s26 + $0xa8] sm:$0xe] }
 0x213   : > { %v4667_v20 = vrot.slane %v4651_v53, 9  ;;  %v3414_v9 = vrot.slane %v3412_v52, 5 }
 0x214   : > { %v4187_v1 = vadd.f32 %v4186_v26, %v4156_v38  ;;  %v4014_v42 = vpop.f32.mrf.mxu0  ;;  %v3513_v26 = vunpack.c.l.b16 %v3381_v59 }
 0x215   : > { %v3612_v34 = vpop.f32.mrf.mxu3  ;;  %v2665_v6 = vpop.f32.mrf.mxu1 }
 0x216   : > { %v3686_v2 = vadd.f32 %v3612_v34, %v3028_v7  ;;  %v2736_v54 = vadd.f32 %v2665_v6, %v5690_v21  ;;  %v3861_v21 = vsel %vm5345_vm6, %v3859_v49, %v3860_v27  ;;  %v2513_v7 = vrot.slane %v5065_v14, 5 }
 0x217   : > { %4929 = vmatmul.msk.bf16.gmra.mxu0 %vm658_vm3, %v3935_v13  ;;  %v6285_v13 = vrot.slane %v3402_v40, 5  ;;  %v3534_v25 = vpack.c.b16 %v3514_v41, %v3513_v26  ;;  %v4850_v26 = vld [vmem:[%s5150_s26 + $0xb4] sm:$0xf]  ;;  %v6300_v41 = vld [vmem:[%s5150_s26 + $0xb8] sm:$0xf] }
 0x218   : > { %v4088_v4 = vadd.f32 %v4014_v42, %v3686_v2  ;;  %v2956_v39 = vpop.f32.mrf.mxu2  ;;  %4688 = vmatmul.msk.bf16.gmra.mxu1 %vm658_vm3, %v2582_v47  ;;  %v3915_v42 = vunpack.c.l.b16 %v3858_v3  ;;  %v2514_v29 = vsel %vm5345_vm6, %v2512_v63, %v2513_v7  ;;  %v3430_v63 = vshrl.u32 %v6300_v41, 16 }
 0x219   : > { %v3029_v15 = vadd.f32 %v2956_v39, %v2735_v50  ;;  %v3916_v50 = vunpack.c.l.b16 %v3861_v21  ;;  %v3409_v6 = vor.u32 %v3408_v56, %v6285_v13  ;;  %v2564_v55 = vunpack.c.l.b16 %v2514_v29 }
 0x21a   : > { %v4119_v24 = vadd.f32 %v4118_v37, %v4088_v4  ;;  %v4157_v38 = vmul.f32 %v4088_v4, %v4088_v4  ;;  %v2511_v37 = vsel %vm5345_vm6, %v4667_v20, %v2510_v36  ;;  %v3400_v4 = vrot.slane %v3399_v8, 4 }
 0x21b   : > { %v2563_v40 = vunpack.c.l.b16 %v2511_v37  ;;  %v3936_v36 = vpack.c.b16 %v3916_v50, %v3915_v42  ;;  %v3426_v20 = vshll.u32 %v6300_v41, 16  ;;  %v5066_v42 = vld [vmem:[%s5150_s26 + $0xac] sm:$0xf]  ;;  %v4652_v37 = vld [vmem:[%s5150_s26 + $0xa8] sm:$0xe] }
 0x21c   : > { %v4188_v59 = vadd.f32 %v4187_v1, %v4157_v38  ;;  %v4016_v47 = vpop.f32.mrf.mxu0 }
 0x21d   : > { %v3614_v49 = vpop.f32.mrf.mxu3  ;;  %4806 = vmatmul.msk.bf16.gmra.mxu2 %vm658_vm3, %v4986_v51  ;;  %v2667_v27 = vpop.f32.mrf.mxu1  ;;  %v3420_v51 = vshll.u32 %v4850_v26, 16  ;;  %v2583_v38 = vpack.c.b16 %v2564_v55, %v2563_v40  ;;  %v6316_v8 = vrot.slane %v3426_v20, 5  ;;  %v4987_v40 = vld [vmem:[%s5150_s26 + $0xa8] sm:$0xff]  ;;  %v4668_v55 = vrot.slane %v4652_v37, 9 }
 0x21e   : > { %v3687_v34 = vadd.f32 %v3614_v49, %v3029_v15  ;;  %v2737_v1 = vadd.f32 %v2667_v27, %v5703_v35  ;;  %v3410_v35 = vrot.slane %v3409_v6, 4  ;;  %v3417_v15 = vshrl.u32 %v4850_v26, 16 }
 0x21f   : > { %v3405_v27 = vsel %vm5162_vm2, %v3400_v4, %v6285_v13  ;;  %v3422_v29 = vrot.slane %v3420_v51, 5  ;;  %v6321_v13 = vld [vmem:[%s5150_s26 + $0xbc] sm:$0x1] }
 0x220   : > { %v4089_v2 = vadd.f32 %v4016_v47, %v3687_v34  ;;  %v2959_v53 = vpop.f32.mrf.mxu2  ;;  %v4909_v47 = vrot.slane %v4893_v23, 9  ;;  %v3432_v34 = vrot.slane %v3430_v63, 4 }
 0x221   : > { %v3030_v3 = vadd.f32 %v2959_v53, %v2736_v54  ;;  %v3864_v54 = vrot.slane %v6269_v5, 5  ;;  %v3419_v5 = vrot.slane %v3417_v15, 4 }
 0x222   : > { %v4120_v39 = vadd.f32 %v4119_v24, %v4089_v2  ;;  %v4158_v21 = vmul.f32 %v4089_v2, %v4089_v2  ;;  %4876 = vmatmul.msk.bf16.gmra.mxu3 %vm658_vm3, %v3534_v25  ;;  %v2517_v25 = vrot.slane %v5066_v42, 5  ;;  %v3867_v2 = vrot.slane %v6288_v46, 5 }
 0x223   : > { %v3865_v23 = vsel %vm5345_vm6, %v4909_v47, %v3864_v54  ;;  %v3423_v15 = vor.u32 %v3422_v29, %v3419_v5  ;;  %v3433_v51 = vor.u32 %v3432_v34, %v6316_v8  ;;  %v3436_v46 = vshll.u32 %v6321_v13, 16 }
 0x224   : > { %v4189_v14 = vadd.f32 %v4188_v59, %v4158_v21  ;;  %v4019_v7 = vpop.f32.mrf.mxu0  ;;  %v3415_v59 = vsel %vm5162_vm2, %v3410_v35, %v3414_v9  ;;  %v2519_v26 = vrot.slane %v2517_v25, 4  ;;  %v3515_v35 = vunpack.c.l.b16 %v3405_v27 }
 0x225   : > { %v3617_v24 = vpop.f32.mrf.mxu3  ;;  %v2670_v56 = vpop.f32.mrf.mxu1  ;;  %v3516_v9 = vunpack.c.l.b16 %v3415_v59  ;;  %v3917_v47 = vunpack.c.l.b16 %v3865_v23  ;;  %v3434_v27 = vrot.slane %v3433_v51, 4  ;;  %v3438_v59 = vrot.slane %v3436_v46, 5  ;;  %v5068_v23 = vld [vmem:[%s5150_s26 + $0xb8] sm:$0xf]  ;;  %v4653_v46 = vld [vmem:[%s5150_s26 + $0xb4] sm:$0xe] }
 0x226   : > { %v3688_v49 = vadd.f32 %v3617_v24, %v3030_v3  ;;  %v2738_v50 = vadd.f32 %v2670_v56, %v5717_v18  ;;  %v3866_v18 = vrot.slane %v3864_v54, 4  ;;  %v5067_v3 = vld [vmem:[%s5150_s26 + $0xb0] sm:$0x1] }
 0x227   : > { %4930 = vmatmul.msk.bf16.gmra.mxu0 %vm658_vm3, %v3936_v36  ;;  %v2520_v36 = vrot.slane %v5067_v3, 5  ;;  %v3535_v56 = vpack.c.b16 %v3516_v9, %v3515_v35 }
 0x228   : > { %v4090_v6 = vadd.f32 %v4019_v7, %v3688_v49  ;;  %v2961_v52 = vpop.f32.mrf.mxu2  ;;  %4689 = vmatmul.msk.bf16.gmra.mxu1 %vm658_vm3, %v2583_v38  ;;  %v2518_v38 = vsel %vm5345_vm6, %v4668_v55, %v2517_v25  ;;  %v3424_v49 = vrot.slane %v3423_v15, 4  ;;  %v4853_v25 = vld [vmem:[%s5150_s26 + $0xc0] sm:$0xf]  ;;  %v6346_v55 = vld [vmem:[%s5150_s26 + $0xc4] sm:$0xf]  ;;  %v2524_v15 = vrot.slane %v5068_v23, 5 }
 0x229   : > { %v3031_v53 = vadd.f32 %v2961_v52, %v2737_v1  ;;  %v3868_v1 = vsel %vm5345_vm6, %v3866_v18, %v3867_v2  ;;  %v2521_v54 = vsel %vm5345_vm6, %v2519_v26, %v2520_v36  ;;  %v2565_v29 = vunpack.c.l.b16 %v2518_v38  ;;  %v4894_v36 = vld [vmem:[%s5150_s26 + $0xb4] sm:$0xe] }
 0x22a   : > { %v4121_v4 = vadd.f32 %v4120_v39, %v4090_v6  ;;  %v4159_v21 = vmul.f32 %v4090_v6, %v4090_v6  ;;  %v3918_v42 = vunpack.c.l.b16 %v3868_v1  ;;  %v2566_v34 = vunpack.c.l.b16 %v2521_v54 }
 0x22c   : > { %v4190_v20 = vadd.f32 %v4189_v14, %v4159_v21  ;;  %v4021_v63 = vpop.f32.mrf.mxu0  ;;  %v3937_v2 = vpack.c.b16 %v3918_v42, %v3917_v47  ;;  %v2584_v3 = vpack.c.b16 %v2566_v34, %v2565_v29  ;;  %v3444_v21 = vshll.u32 %v4853_v25, 16  ;;  %v4988_v42 = vld [vmem:[%s5150_s26 + $0xb4] sm:$0xff] }
 0x22d   : > { %v3619_v7 = vpop.f32.mrf.mxu3  ;;  %4807 = vmatmul.msk.bf16.gmra.mxu2 %vm658_vm3, %v4987_v40  ;;  %v2672_v39 = vpop.f32.mrf.mxu1  ;;  %v3871_v40 = vrot.slane %v6300_v41, 5  ;;  %v3454_v41 = vshrl.u32 %v6346_v55, 16 }
 0x22e   : > { %v3689_v24 = vadd.f32 %v3619_v7, %v3031_v53  ;;  %v2739_v14 = vadd.f32 %v2672_v39, %v5730_v43  ;;  %v3429_v43 = vsel %vm5162_vm2, %v3424_v49, %v6316_v8  ;;  %v3439_v53 = vsel %vm5162_vm2, %v3434_v27, %v3438_v59  ;;  %v5069_v59 = vld [vmem:[%s5150_s26 + $0xbc] sm:$0x1] }
 0x22f   : > { %v3518_v1 = vunpack.c.l.b16 %v3439_v53  ;;  %v4910_v7 = vrot.slane %v4894_v36, 9  ;;  %v3873_v39 = vrot.slane %v3871_v40, 4  ;;  %v4669_v49 = vrot.slane %v4653_v46, 9 }
 0x230   : > { %v4091_v37 = vadd.f32 %v4021_v63, %v3689_v24  ;;  %v2964_v5 = vpop.f32.mrf.mxu2  ;;  %v3450_v63 = vshll.u32 %v6346_v55, 16  ;;  %v2526_v27 = vrot.slane %v2524_v15, 4 }
 0x231   : > { %v3032_v6 = vadd.f32 %v2964_v5, %v2738_v50 }
 0x232   : > { %v4122_v52 = vadd.f32 %v4121_v4, %v4091_v37  ;;  %v4160_v18 = vmul.f32 %v4091_v37, %v4091_v37  ;;  %4877 = vmatmul.msk.bf16.gmra.mxu3 %vm658_vm3, %v3535_v56  ;;  %v3441_v4 = vshrl.u32 %v4853_v25, 16  ;;  %v3446_v56 = vrot.slane %v3444_v21, 5  ;;  %v6360_v25 = vld [vmem:[%s5150_s26 + $0xc8] sm:$0x1] }
 0x233   : > { %v2527_v37 = vrot.slane %v5069_v59, 5  ;;  %v3452_v34 = vrot.slane %v3450_v63, 5 }
 0x234   : > { %v4191_v50 = vadd.f32 %v4190_v20, %v4160_v18  ;;  %v4024_v26 = vpop.f32.mrf.mxu0  ;;  %v3517_v20 = vunpack.c.l.b16 %v3429_v43  ;;  %v3443_v24 = vrot.slane %v3441_v4, 4  ;;  %v3872_v43 = vsel %vm5345_vm6, %v4910_v7, %v3871_v40  ;;  %v6463_v4 = vld [vmem:[#allocation2_spill] sm:$0xff] }
 0x235   : > { %v3622_v35 = vpop.f32.mrf.mxu3  ;;  %v2675_v9 = vpop.f32.mrf.mxu1  ;;  %v3460_v40 = vshll.u32 %v6360_v25, 16 }
 0x236   : > { %v3690_v51 = vadd.f32 %v3622_v35, %v3032_v6  ;;  %v2740_v8 = vadd.f32 %v2675_v9, %v5746_v30  ;;  %v3874_v30 = vrot.slane %v6321_v13, 5  ;;  %v3456_v6 = vrot.slane %v3454_v41, 4 }
 0x237   : > { %4931 = vmatmul.msk.bf16.gmra.mxu0 %vm658_vm3, %v3937_v2  ;;  %v3536_v53 = vpack.c.b16 %v3518_v1, %v3517_v20  ;;  %v3447_v36 = vor.u32 %v3446_v56, %v3443_v24  ;;  %v3919_v9 = vunpack.c.l.b16 %v3872_v43 }
 0x238   : > { %v4092_v38 = vadd.f32 %v4024_v26, %v3690_v51  ;;  %v2966_v54 = vpop.f32.mrf.mxu2  ;;  %4690 = vmatmul.msk.bf16.gmra.mxu1 %vm658_vm3, %v2584_v3  ;;  %v3875_v13 = vsel %vm5345_vm6, %v3873_v39, %v3874_v30  ;;  %v2528_v3 = vsel %vm5345_vm6, %v2526_v27, %v2527_v37  ;;  %v3457_v35 = vor.u32 %v3456_v6, %v3452_v34  ;;  %v4895_v30 = vld [vmem:[%s5150_s26 + $0xc0] sm:$0xe]  ;;  %v6378_v27 = vld [vmem:[%s5150_s26 + $0xd0] sm:$0xf] }
 0x239   : > { %v3033_v47 = vadd.f32 %v2966_v54, %v2739_v14  ;;  %v3920_v23 = vunpack.c.l.b16 %v3875_v13  ;;  %v2568_v41 = vunpack.c.l.b16 %v2528_v3  ;;  %v3448_v20 = vrot.slane %v3447_v36, 4  ;;  %v4654_v13 = vld [vmem:[%s5150_s26 + $0xc0] sm:$0xe] }
 0x23a   : > { %v4123_v5 = vadd.f32 %v4122_v52, %v4092_v38  ;;  %v4161_v29 = vmul.f32 %v4092_v38, %v4092_v38  ;;  %v2525_v52 = vsel %vm5345_vm6, %v4669_v49, %v2524_v15  ;;  %v3458_v39 = vrot.slane %v3457_v35, 4  ;;  %v4856_v49 = vld [vmem:[%s5150_s26 + $0xcc] sm:$0xf] }
 0x23b   : > { %v2567_v63 = vunpack.c.l.b16 %v2525_v52  ;;  %v3462_v38 = vrot.slane %v3460_v40, 5  ;;  %v3938_v54 = vpack.c.b16 %v3920_v23, %v3919_v9  ;;  %v3453_v37 = vsel %vm5162_vm2, %v3448_v20, %v3452_v34  ;;  %v5071_v9 = vld [vmem:[%s5150_s26 + $0xc8] sm:$0x1] }
 0x23c   : > { %v4192_v18 = vadd.f32 %v4191_v50, %v4161_v29  ;;  %v4026_v2 = vpop.f32.mrf.mxu0  ;;  %v4911_v43 = vrot.slane %v4895_v30, 9  ;;  %v3478_v34 = vshrl.u32 %v6378_v27, 16  ;;  %v3881_v36 = vrot.slane %v6360_v25, 5 }
 0x23d   : > { %v3624_v14 = vpop.f32.mrf.mxu3  ;;  %4808 = vmatmul.msk.bf16.gmra.mxu2 %vm658_vm3, %v4988_v42  ;;  %v2677_v26 = vpop.f32.mrf.mxu1  ;;  %v3878_v42 = vrot.slane %v6346_v55, 5  ;;  %v3465_v55 = vshrl.u32 %v4856_v49, 16  ;;  %v4670_v35 = vrot.slane %v4654_v13, 9  ;;  %v2534_v23 = vrot.slane %v5071_v9, 5 }
 0x23e   : > { %v3691_v50 = vadd.f32 %v3624_v14, %v3033_v47  ;;  %v2741_v21 = vadd.f32 %v2677_v26, %v6463_v4  ;;  %v2585_v47 = vpack.c.b16 %v2568_v41, %v2567_v63  ;;  %v3468_v14 = vshll.u32 %v4856_v49, 16  ;;  %v4989_v4 = vld [vmem:[%s5150_s26 + $0xc0] sm:$0xff] }
 0x23f   : > { %v3880_v3 = vrot.slane %v3878_v42, 4  ;;  %v3879_v41 = vsel %vm5345_vm6, %v4911_v43, %v3878_v42 }
 0x240   : > { %v4093_v51 = vadd.f32 %v4026_v2, %v3691_v50  ;;  %v2969_v46 = vpop.f32.mrf.mxu2  ;;  %v3470_v20 = vrot.slane %v3468_v14, 5 }
 0x241   : > { %v3034_v15 = vadd.f32 %v2969_v46, %v2740_v8  ;;  %v3882_v25 = vsel %vm5345_vm6, %v3880_v3, %v3881_v36 }
 0x242   : > { %v4124_v1 = vadd.f32 %v4123_v5, %v4093_v51  ;;  %v4162_v7 = vmul.f32 %v4093_v51, %v4093_v51  ;;  %4878 = vmatmul.msk.bf16.gmra.mxu3 %vm658_vm3, %v3536_v53  ;;  %v5070_v5 = vld [vmem:[%s5150_s26 + $0xc4] sm:$0xf]  ;;  %v3474_v53 = vshll.u32 %v6378_v27, 16 }
 0x243   : > { %v2531_v29 = vrot.slane %v5070_v5, 5 }
 0x244   : > { %v4193_v24 = vadd.f32 %v4192_v18, %v4162_v7  ;;  %v4029_v56 = vpop.f32.mrf.mxu0  ;;  %v3463_v18 = vsel %vm5162_vm2, %v3458_v39, %v3462_v38  ;;  %v3476_v7 = vrot.slane %v3474_v53, 5  ;;  %v3480_v39 = vrot.slane %v3478_v34, 4 }
 0x245   : > { %v3627_v8 = vpop.f32.mrf.mxu3  ;;  %v2680_v59 = vpop.f32.mrf.mxu1  ;;  %v2533_v40 = vrot.slane %v2531_v29, 4  ;;  %v3520_v63 = vunpack.c.l.b16 %v3463_v18 }
 0x246   : > { %v3692_v6 = vadd.f32 %v3627_v8, %v3034_v15  ;;  %v2742_v2 = vadd.f32 %v2680_v59, %v5782_v44  ;;  %v3519_v44 = vunpack.c.l.b16 %v3453_v37  ;;  %v3467_v15 = vrot.slane %v3465_v55, 4 }
 0x247   : > { %4932 = vmatmul.msk.bf16.gmra.mxu0 %vm658_vm3, %v3938_v54  ;;  %v3921_v8 = vunpack.c.l.b16 %v3879_v41  ;;  %v3922_v59 = vunpack.c.l.b16 %v3882_v25  ;;  %v3481_v5 = vor.u32 %v3480_v39, %v3476_v7  ;;  %v4990_v39 = vld [vmem:[%s5150_s26 + $0xcc] sm:$0xff] }
 0x248   : > { %v4094_v26 = vadd.f32 %v4029_v56, %v3692_v6  ;;  %v2971_v52 = vpop.f32.mrf.mxu2  ;;  %4691 = vmatmul.msk.bf16.gmra.mxu1 %vm658_vm3, %v2585_v47  ;;  %v2535_v47 = vsel %vm5345_vm6, %v2533_v40, %v2534_v23  ;;  %v3537_v49 = vpack.c.b16 %v3520_v63, %v3519_v44  ;;  %v3471_v37 = vor.u32 %v3470_v20, %v3467_v15  ;;  %v4896_v40 = vld [vmem:[%s5150_s26 + $0xcc] sm:$0xe] }
 0x249   : > { %v3035_v50 = vadd.f32 %v2971_v52, %v2741_v21  ;;  %v4858_v21 = vld [vmem:[%s5150_s26 + $0xd4] sm:$0x1]  ;;  %v2570_v55 = vunpack.c.l.b16 %v2535_v47  ;;  %v3939_v34 = vpack.c.b16 %v3922_v59, %v3921_v8  ;;  %v3482_v52 = vrot.slane %v3481_v5, 4 }
 0x24a   : > { %v4125_v51 = vadd.f32 %v4124_v1, %v4094_v26  ;;  %v4163_v46 = vmul.f32 %v4094_v26, %v4094_v26  ;;  %v2532_v1 = vsel %vm5345_vm6, %v4670_v35, %v2531_v29  ;;  %v3484_v6 = vshll.u32 %v4858_v21, 16 }
 0x24b   : > { %v2569_v13 = vunpack.c.l.b16 %v2532_v1  ;;  %v3472_v26 = vrot.slane %v3471_v37, 4  ;;  %v3888_v15 = vrot.slane %v4858_v21, 5 }
 0x24c   : > { %v4194_v38 = vadd.f32 %v4193_v24, %v4163_v46  ;;  %v4031_v54 = vpop.f32.mrf.mxu0  ;;  %v3486_v44 = vrot.slane %v3484_v6, 5 }
 0x24d   : > { %v3629_v30 = vpop.f32.mrf.mxu3  ;;  %4809 = vmatmul.msk.bf16.gmra.mxu2 %vm658_vm3, %v4989_v4  ;;  %v2682_v56 = vpop.f32.mrf.mxu1  ;;  %v2586_v36 = vpack.c.b16 %v2570_v55, %v2569_v13  ;;  %v3477_v23 = vsel %vm5162_vm2, %v3472_v26, %v3476_v7 }
 0x24e   : > { %v3693_v42 = vadd.f32 %v3629_v30, %v3035_v50  ;;  %v2743_v24 = vadd.f32 %v2682_v56, %v5802_v16  ;;  %v3885_v50 = vrot.slane %v6378_v27, 5  ;;  %v4912_v27 = vrot.slane %v4896_v40, 9 }
 0x250   : > { %v4095_v18 = vadd.f32 %v4031_v54, %v3693_v42  ;;  %v2974_v43 = vpop.f32.mrf.mxu2  ;;  %v3887_v41 = vrot.slane %v3885_v50, 4  ;;  %v3886_v7 = vsel %vm5345_vm6, %v4912_v27, %v3885_v50 }
 0x251   : > { %v3036_v14 = vadd.f32 %v2974_v43, %v2742_v2 }
 0x252   : > { %v4126_v53 = vadd.f32 %v4125_v51, %v4095_v18  ;;  %v4164_v29 = vmul.f32 %v4095_v18, %v4095_v18  ;;  %4879 = vmatmul.msk.bf16.gmra.mxu3 %vm658_vm3, %v3537_v49  ;;  %v3487_v51 = vsel %vm5162_vm2, %v3482_v52, %v3486_v44  ;;  %v3889_v31 = vsel %vm5345_vm6, %v3887_v41, %v3888_v15  ;;  %v6464_v49 = vld [vmem:[#allocation3_spill] sm:$0xff] }
 0x253   : > { %v3522_v25 = vunpack.c.l.b16 %v3487_v51  ;;  %v3924_v59 = vunpack.c.l.b16 %v3889_v31 }
 0x254   : > { %v4195_v3 = vadd.f32 %v4194_v38, %v4164_v29  ;;  %v4034_v16 = vpop.f32.mrf.mxu0 }
 0x255   : > { %v3632_v4 = vpop.f32.mrf.mxu3  ;;  %v2685_v35 = vpop.f32.mrf.mxu1 }
 0x256   : > { %v3694_v9 = vadd.f32 %v3632_v4, %v3036_v14  ;;  %v2744_v2 = vadd.f32 %v2685_v35, %v5821_v17  ;;  %v3521_v17 = vunpack.c.l.b16 %v3477_v23 }
 0x257   : > { %4933 = vmatmul.msk.bf16.gmra.mxu0 %vm658_vm3, %v3939_v34 }
 0x258   : > { %v4096_v46 = vadd.f32 %v4034_v16, %v3694_v9  ;;  %v2976_v63 = vpop.f32.mrf.mxu2  ;;  %4692 = vmatmul.msk.bf16.gmra.mxu1 %vm658_vm3, %v2586_v36  ;;  %v3538_v21 = vpack.c.b16 %v3522_v25, %v3521_v17 }
 0x259   : > { %v3037_v20 = vadd.f32 %v2976_v63, %v2743_v24  ;;  %v3923_v24 = vunpack.c.l.b16 %v3886_v7 }
 0x25a   : > { %v4127_v38 = vadd.f32 %v4126_v53, %v4096_v46  ;;  %v4165_v54 = vmul.f32 %v4096_v46, %v4096_v46 }
 0x25b   : > { %v3940_v13 = vpack.c.b16 %v3924_v59, %v3923_v24 }
 0x25c   : > { %v4196_v30 = vadd.f32 %v4195_v3, %v4165_v54  ;;  %v4036_v56 = vpop.f32.mrf.mxu0 }
 0x25d   : > { %v3634_v1 = vpop.f32.mrf.mxu3  ;;  %4810 = vmatmul.msk.bf16.gmra.mxu2 %vm658_vm3, %v4990_v39  ;;  %v2687_v47 = vpop.f32.mrf.mxu1 }
 0x25e   : > { %v3695_v42 = vadd.f32 %v3634_v1, %v3037_v20  ;;  %v2745_v8 = vadd.f32 %v2687_v47, %v6464_v49 }
 0x260   : > { %v4097_v37 = vadd.f32 %v4036_v56, %v3695_v42  ;;  %v2979_v5 = vpop.f32.mrf.mxu2 }
 0x261   : > { %v3038_v6 = vadd.f32 %v2979_v5, %v2744_v2 }
 0x262   : > { %v4128_v18 = vadd.f32 %v4127_v38, %v4097_v37  ;;  %v4166_v43 = vmul.f32 %v4097_v37, %v4097_v37  ;;  %4880 = vmatmul.msk.bf16.gmra.mxu3 %vm658_vm3, %v3538_v21 }
 0x264   : > { %v4197_v19 = vadd.f32 %v4196_v30, %v4166_v43  ;;  %v4039_v55 = vpop.f32.mrf.mxu0 }
 0x265   : > { %v3637_v14 = vpop.f32.mrf.mxu3  ;;  %v2690_v53 = vpop.f32.mrf.mxu1 }
 0x266   : > { %v3696_v29 = vadd.f32 %v3637_v14, %v3038_v6  ;;  %v2746_v34 = vadd.f32 %v2690_v53, %v5864_v61 }
 0x267   : > { %4934 = vmatmul.msk.bf16.gmra.mxu0 %vm658_vm3, %v3940_v13 }
 0x268   : > { %v4098_v26 = vadd.f32 %v4039_v55, %v3696_v29  ;;  %v2981_v52 = vpop.f32.mrf.mxu2 }
 0x269   : > { %v3039_v44 = vadd.f32 %v2981_v52, %v2745_v8 }
 0x26a   : > { %v4129_v3 = vadd.f32 %v4128_v18, %v4098_v26  ;;  %v4167_v16 = vmul.f32 %v4098_v26, %v4098_v26 }
 0x26c   : > { %v4198_v36 = vadd.f32 %v4197_v19, %v4167_v16  ;;  %v4041_v50 = vpop.f32.mrf.mxu0 }
 0x26d   : > { %v3639_v4 = vpop.f32.mrf.mxu3  ;;  %v2692_v35 = vpop.f32.mrf.mxu1 }
 0x26e   : > { %v3697_v40 = vadd.f32 %v3639_v4, %v3039_v44  ;;  %v2747_v9 = vadd.f32 %v2692_v35, %v5888_v11 }
 0x270   : > { %v4099_v2 = vadd.f32 %v4041_v50, %v3697_v40  ;;  %v2984_v23 = vpop.f32.mrf.mxu2 }
 0x271   : > { %v3040_v51 = vadd.f32 %v2984_v23, %v2746_v34 }
 0x272   : > { %v4130_v46 = vadd.f32 %v4129_v3, %v4099_v2  ;;  %v4168_v63 = vmul.f32 %v4099_v2, %v4099_v2 }
 0x274   : > { %v4199_v61 = vadd.f32 %v4198_v36, %v4168_v63  ;;  %v4044_v27 = vpop.f32.mrf.mxu0 }
 0x275   : > { %v3642_v41 = vpop.f32.mrf.mxu3  ;;  %v2695_v15 = vpop.f32.mrf.mxu1 }
 0x276   : > { %v3698_v20 = vadd.f32 %v3642_v41, %v3040_v51  ;;  %v2748_v39 = vadd.f32 %v2695_v15, %v5907_v10 }
 0x278   : > { %v4100_v38 = vadd.f32 %v4044_v27, %v3698_v20  ;;  %v2986_v54 = vpop.f32.mrf.mxu2 }
 0x279   : > { %v3041_v17 = vadd.f32 %v2986_v54, %v2747_v9 }
 0x27a   : > { %v4131_v25 = vadd.f32 %v4130_v46, %v4100_v38  ;;  %v4169_v30 = vmul.f32 %v4100_v38, %v4100_v38 }
 0x27c   : > { %v4200_v56 = vadd.f32 %v4199_v61, %v4169_v30  ;;  %v4046_v7 = vpop.f32.mrf.mxu0 }
 0x27d   : > { %v3644_v11 = vpop.f32.mrf.mxu3  ;;  %v2697_v31 = vpop.f32.mrf.mxu1 }
 0x27e   : > { %v3699_v1 = vadd.f32 %v3644_v11, %v3041_v17  ;;  %v2749_v47 = vadd.f32 %v2697_v31, %v5931_v45 }
 0x280   : > { %v4101_v42 = vadd.f32 %v4046_v7, %v3699_v1  ;;  %v2989_v21 = vpop.f32.mrf.mxu2 }
 0x281   : > { %v3042_v49 = vadd.f32 %v2989_v21, %v2748_v39 }
 0x282   : > { %v4132_v8 = vadd.f32 %v4131_v25, %v4101_v42  ;;  %v4170_v24 = vmul.f32 %v4101_v42, %v4101_v42 }
 0x284   : > { %v4201_v59 = vadd.f32 %v4200_v56, %v4170_v24  ;;  %v4049_v37 = vpop.f32.mrf.mxu0 }
 0x285   : > { %v3647_v10 = vpop.f32.mrf.mxu3  ;;  %v2700_v5 = vpop.f32.mrf.mxu1 }
 0x286   : > { %v3700_v6 = vadd.f32 %v3647_v10, %v3042_v49  ;;  %v2750_v18 = vadd.f32 %v2700_v5, %v5950_v48 }
 0x288   : > { %v4102_v43 = vadd.f32 %v4049_v37, %v3700_v6  ;;  %v2991_v13 = vpop.f32.mrf.mxu2 }
 0x289   : > { %v3043_v19 = vadd.f32 %v2991_v13, %v2749_v47 }
 0x28a   : > { %v4133_v55 = vadd.f32 %v4132_v8, %v4102_v43  ;;  %v4171_v14 = vmul.f32 %v4102_v43, %v4102_v43 }
 0x28c   : > { %v4202_v53 = vadd.f32 %v4201_v59, %v4171_v14  ;;  %v4051_v29 = vpop.f32.mrf.mxu0 }
 0x28d   : > { %v3649_v45 = vpop.f32.mrf.mxu3  ;;  %v2702_v34 = vpop.f32.mrf.mxu1 }
 0x28e   : > { %v3701_v26 = vadd.f32 %v3649_v45, %v3043_v19  ;;  %v2751_v2 = vadd.f32 %v2702_v34, %v5974_v33 }
 0x290   : > { %v4103_v52 = vadd.f32 %v4051_v29, %v3701_v26  ;;  %v2994_v44 = vpop.f32.mrf.mxu2 }
 0x291   : > { %v3044_v3 = vadd.f32 %v2994_v44, %v2750_v18 }
 0x292   : > { %v4134_v16 = vadd.f32 %v4133_v55, %v4103_v52  ;;  %v4172_v36 = vmul.f32 %v4103_v52, %v4103_v52 }
 0x294   : > { %v4203_v50 = vadd.f32 %v4202_v53, %v4172_v36  ;;  %v4054_v4 = vpop.f32.mrf.mxu0 }
 0x295   : > { %v3652_v35 = vpop.f32.mrf.mxu3  ;;  %v2705_v40 = vpop.f32.mrf.mxu1 }
 0x296   : > { %v3702_v48 = vadd.f32 %v3652_v35, %v3044_v3  ;;  %v2752_v38 = vadd.f32 %v2705_v40, %v5993_v0 }
 0x298   : > { %v4104_v9 = vadd.f32 %v4054_v4, %v3702_v48  ;;  %v2996_v23 = vpop.f32.mrf.mxu2 }
 0x299   : > { %v3045_v63 = vadd.f32 %v2996_v23, %v2751_v2 }
 0x29a   : > { %v4135_v51 = vadd.f32 %v4134_v16, %v4104_v9  ;;  %v4173_v46 = vmul.f32 %v4104_v9, %v4104_v9 }
 0x29c   : > { %v4204_v61 = vadd.f32 %v4203_v50, %v4173_v46  ;;  %v4056_v27 = vpop.f32.mrf.mxu0 }
 0x29d   : > { %v3654_v41 = vpop.f32.mrf.mxu3  ;;  %v2707_v15 = vpop.f32.mrf.mxu1 }
 0x29e   : > { %v3703_v20 = vadd.f32 %v3654_v41, %v3045_v63  ;;  %v2753_v47 = vadd.f32 %v2707_v15, %v6017_v22 }
 0x2a0   : > { %v4105_v39 = vadd.f32 %v4056_v27, %v3703_v20  ;;  %v2999_v54 = vpop.f32.mrf.mxu2 }
 0x2a1   : > { %v3046_v30 = vadd.f32 %v2999_v54, %v2752_v38 }
 0x2a2   : > { %v4136_v17 = vadd.f32 %v4135_v51, %v4105_v39  ;;  %v4174_v25 = vmul.f32 %v4105_v39, %v4105_v39 }
 0x2a4   : > { %v4205_v56 = vadd.f32 %v4204_v61, %v4174_v25  ;;  %v4059_v7 = vpop.f32.mrf.mxu0 }
 0x2a5   : > { %v3657_v11 = vpop.f32.mrf.mxu3  ;;  %v2710_v33 = vpop.f32.mrf.mxu1 }
 0x2a6   : > { %v3704_v31 = vadd.f32 %v3657_v11, %v3046_v30  ;;  %v2754_v6 = vadd.f32 %v2710_v33, %v6036_v58 }
 0x2a8   : > { %v4106_v1 = vadd.f32 %v4059_v7, %v3704_v31  ;;  %v3001_v42 = vpop.f32.mrf.mxu2 }
 0x2a9   : > { %v3047_v8 = vadd.f32 %v3001_v42, %v2753_v47 }
 0x2aa   : > { %v4137_v21 = vadd.f32 %v4136_v17, %v4106_v1  ;;  %v4175_v49 = vmul.f32 %v4106_v1, %v4106_v1 }
 0x2ac   : > { %v4206_v24 = vadd.f32 %v4205_v56, %v4175_v49  ;;  %v4061_v59 = vpop.f32.mrf.mxu0 }
 0x2ad   : > { %v3659_v37 = vpop.f32.mrf.mxu3  ;;  %v2712_v0 = vpop.f32.mrf.mxu1 }
 0x2ae   : > { %v3705_v10 = vadd.f32 %v3659_v37, %v3047_v8  ;;  %v2755_v34 = vadd.f32 %v2712_v0, %v6060_v32 }
 0x2b0   : > { %v4107_v5 = vadd.f32 %v4061_v59, %v3705_v10  ;;  %v3004_v18 = vpop.f32.mrf.mxu2 }
 0x2b1   : > { %v3048_v19 = vadd.f32 %v3004_v18, %v2754_v6 }
 0x2b2   : > { %v4138_v43 = vadd.f32 %v4137_v21, %v4107_v5  ;;  %v4176_v13 = vmul.f32 %v4107_v5, %v4107_v5 }
 0x2b4   : > { %v4207_v55 = vadd.f32 %v4206_v24, %v4176_v13  ;;  %v4064_v14 = vpop.f32.mrf.mxu0 }
 0x2b5   : > { %v3662_v53 = vpop.f32.mrf.mxu3  ;;  %v2715_v22 = vpop.f32.mrf.mxu1 }
 0x2b6   : > { %v3706_v29 = vadd.f32 %v3662_v53, %v3048_v19  ;;  %v2756_v40 = vadd.f32 %v2715_v22, %v6079_v60 }
 0x2b8   : > { %v4108_v45 = vadd.f32 %v4064_v14, %v3706_v29  ;;  %v3006_v26 = vpop.f32.mrf.mxu2 }
 0x2b9   : > { %v3049_v3 = vadd.f32 %v3006_v26, %v2755_v34 }
 0x2ba   : > { %v4139_v52 = vadd.f32 %v4138_v43, %v4108_v45  ;;  %v4177_v44 = vmul.f32 %v4108_v45, %v4108_v45 }
 0x2bc   : > { %v4208_v16 = vadd.f32 %v4207_v55, %v4177_v44  ;;  %v4066_v36 = vpop.f32.mrf.mxu0 }
 0x2bd   : > { %v3664_v50 = vpop.f32.mrf.mxu3  ;;  %v2717_v58 = vpop.f32.mrf.mxu1 }
 0x2be   : > { %v3707_v4 = vadd.f32 %v3664_v50, %v3049_v3  ;;  %v2757_v41 = vadd.f32 %v2717_v58, %v6103_v57 }
 0x2c0   : > { %v4109_v35 = vadd.f32 %v4066_v36, %v3707_v4  ;;  %v3009_v48 = vpop.f32.mrf.mxu2 }
 0x2c1   : > { %v3050_v23 = vadd.f32 %v3009_v48, %v2756_v40 }
 0x2c2   : > { %v4140_v9 = vadd.f32 %v4139_v52, %v4109_v35  ;;  %v4178_v2 = vmul.f32 %v4109_v35, %v4109_v35  ;;  %v6465_v52 = vld [vmem:[#allocation4_spill] sm:$0xff] }
 0x2c4   : > { %v4209_v51 = vadd.f32 %v4208_v16, %v4178_v2  ;;  %v4069_v46 = vpop.f32.mrf.mxu0 }
 0x2c5   : > { %v3667_v63 = vpop.f32.mrf.mxu3  ;;  %v2720_v61 = vpop.f32.mrf.mxu1 }
 0x2c6   : > { %v3708_v32 = vadd.f32 %v3667_v63, %v3050_v23  ;;  %v2758_v56 = vadd.f32 %v2720_v61, %v6120_v12 }
 0x2c8   : > { %v4110_v27 = vadd.f32 %v4069_v46, %v3708_v32  ;;  %v3011_v15 = vpop.f32.mrf.mxu2 }
 0x2c9   : > { %v3051_v38 = vadd.f32 %v3011_v15, %v2757_v41 }
 0x2ca   : > { %v4141_v20 = vadd.f32 %v4140_v9, %v4110_v27  ;;  %v4179_v39 = vmul.f32 %v4110_v27, %v4110_v27 }
 0x2cc   : > { %v4210_v54 = vadd.f32 %v4209_v51, %v4179_v39  ;;  %v4071_v17 = vpop.f32.mrf.mxu0 }
 0x2cd   : > { %v3669_v25 = vpop.f32.mrf.mxu3  ;;  %v2722_v11 = vpop.f32.mrf.mxu1 }
 0x2ce   : > { %v3709_v60 = vadd.f32 %v3669_v25, %v3051_v38  ;;  %v2759_v8 = vadd.f32 %v2722_v11, %v6143_v62 }
 0x2d0   : > { %v4111_v30 = vadd.f32 %v4071_v17, %v3709_v60  ;;  %v3014_v7 = vpop.f32.mrf.mxu2 }
 0x2d1   : > { %v3052_v1 = vadd.f32 %v3014_v7, %v2758_v56 }
 0x2d2   : > { %v4142_v33 = vadd.f32 %v4141_v20, %v4111_v30  ;;  %v4180_v31 = vmul.f32 %v4111_v30, %v4111_v30 }
 0x2d4   : > { %v4211_v47 = vadd.f32 %v4210_v54, %v4180_v31  ;;  %v4074_v42 = vpop.f32.mrf.mxu0 }
 0x2d5   : > { %v3672_v21 = vpop.f32.mrf.mxu3  ;;  %v2725_v10 = vpop.f32.mrf.mxu1 }
 0x2d6   : > { %v3710_v57 = vadd.f32 %v3672_v21, %v3052_v1  ;;  %v2760_v13 = vadd.f32 %v2725_v10, %v6162_v28 }
 0x2d8   : > { %v4112_v49 = vadd.f32 %v4074_v42, %v3710_v57  ;;  %v3016_v24 = vpop.f32.mrf.mxu2 }
 0x2d9   : > { %v3053_v0 = vadd.f32 %v3016_v24, %v2759_v8 }
 0x2da   : > { %v4143_v59 = vadd.f32 %v4142_v33, %v4112_v49  ;;  %v4181_v37 = vmul.f32 %v4112_v49, %v4112_v49 }
 0x2dc   : > { %v4212_v5 = vadd.f32 %v4211_v47, %v4181_v37  ;;  %v4076_v6 = vpop.f32.mrf.mxu0 }
 0x2dd   : > { %v3674_v12 = vpop.f32.mrf.mxu3  ;;  %v2727_v29 = vpop.f32.mrf.mxu1 }
 0x2de   : > { %v3711_v18 = vadd.f32 %v3674_v12, %v3053_v0  ;;  %v2761_v44 = vadd.f32 %v2727_v29, %v6465_v52 }
 0x2e0   : > { %v4113_v43 = vadd.f32 %v4076_v6, %v3711_v18  ;;  %v3019_v19 = vpop.f32.mrf.mxu2 }
 0x2e1   : > { %v3054_v53 = vadd.f32 %v3019_v19, %v2760_v13 }
 0x2e2   : > { %v4144_v55 = vadd.f32 %v4143_v59, %v4113_v43  ;;  %v4182_v14 = vmul.f32 %v4113_v43, %v4113_v43 }
 0x2e4   : > { %v4213_v22 = vadd.f32 %v4212_v5, %v4182_v14  ;;  %v4079_v45 = vpop.f32.mrf.mxu0 }
 0x2e5   : > { %v3677_v62 = vpop.f32.mrf.mxu3 }
 0x2e6   : > { %v3712_v34 = vadd.f32 %v3677_v62, %v3054_v53 }
 0x2e8   : > { %v4114_v26 = vadd.f32 %v4079_v45, %v3712_v34  ;;  %v3021_v3 = vpop.f32.mrf.mxu2 }
 0x2e9   : > { %v3055_v50 = vadd.f32 %v3021_v3, %v2761_v44 }
 0x2ea   : > { %v4145_v16 = vadd.f32 %v4144_v55, %v4114_v26  ;;  %v4183_v36 = vmul.f32 %v4114_v26, %v4114_v26 }
 0x2ec   : > { %v4214_v58 = vadd.f32 %v4213_v22, %v4183_v36  ;;  %v4081_v35 = vpop.f32.mrf.mxu0 }
 0x2ed   : > { %v3679_v4 = vpop.f32.mrf.mxu3 }
 0x2ee   : > { %v3713_v28 = vadd.f32 %v3679_v4, %v3055_v50 }
 0x2f0   : > { %v4115_v40 = vadd.f32 %v4081_v35, %v3713_v28 }
 0x2f2   : > { %v4146_v48 = vadd.f32 %v4145_v16, %v4115_v40  ;;  %v4184_v9 = vmul.f32 %v4115_v40, %v4115_v40 }
 0x2f4   : > { %v4147_v2 = vrot.slane %v4146_v48, 4  ;;  %v4215_v23 = vadd.f32 %v4214_v58, %v4184_v9 }
 0x2f6   : > { %v4148_v51 = vadd.f32 %v4147_v2, %v4146_v48  ;;  %v4216_v46 = vrot.slane %v4215_v23, 4 }
 0x2f8   : > { %v4149_v63 = vrot.slane %v4148_v51, 2  ;;  %v4217_v32 = vadd.f32 %v4216_v46, %v4215_v23 }
 0x2fa   : > { %v4150_v61 = vadd.f32 %v4149_v63, %v4148_v51  ;;  %v4218_v27 = vrot.slane %v4217_v32, 2 }
 0x2fc   : > { %v4151_v41 = vrot.slane %v4150_v61, 1  ;;  %v4219_v15 = vadd.f32 %v4218_v27, %v4217_v32 }
 0x2fe   : > { %v4220_v20 = vrot.slane %v4219_v15, 1  ;;  %v4152_v39 = vadd.f32 %v4151_v41, %v4150_v61 }
 0x300   : > { %v4221_v38 = vadd.f32 %v4220_v20, %v4219_v15 }
 0x302   : > { %v4223_v54 = vsel %vm4222_vm7, %v4152_v39, %v4221_v38 }
 0x303   : > { %4224 = vst [vmem:[%s157_s14] sm:$0x3] %v4223_v54 }
 0x304 PF: > { %s12_s11 = sadd.s32 1, %s5094_s11   ;;  %s6466_s9 = smov %s5090_s10 }
 0x305   : > { %p9_p5 = scmp.ge.s32.totalorder %s12_s11, 4   ;;  %s6467_s10 = smov %s6469_s12 }
 0x307   :  { %11 = sbr.rel (!%p9_p5) target bundleno = 2 (0x2), region = 69 }

</bundles_post_ra>
